<compile_context>
chip_gen: v7x
topology: tpu7x:2x2x1
jax: 0.10.0
libtpu: 0.0.40
codegen_flags: <defaults>
</compile_context>

<pallas_src>
import functools

import jax
import jax.numpy as jnp
from jax.experimental import pallas as pl
from jax.experimental.pallas import tpu as pltpu


MASK_CH = 16 * 16 * 9      # 2304, mask head output channels
HID2 = 256                 # hidden width of both heads' first conv
FLOW_TAPS_PAD = 16         # 9 flow-head taps padded to a sublane-friendly 16 rows


def _round_up(x, m):
    return (x + m - 1) // m * m


def _choose_ts(HW, N, ts_max=512, min_steps=4):
    """Spatial (lane) tile: multiple of 128, or the full H*W extent when 128-tiling is impossible.

    Shrunk (in steps of 128) until the (N, spatial) grid has >= min_steps steps when the shape
    allows, so v7x's two TensorCores each get >= 2 pipelined steps.  Capped at ts_max (mem-bound
    kernels reach ~85% of HBM roofline around 512-wide tiles)."""
    if HW <= 256 and HW % 128 != 0:
        return HW                                   # full-extent block (lane rule: full dim ok)
    ts = min(ts_max, max(128, (min(ts_max, HW) // 128) * 128))
    while ts > 128 and N * pl.cdiv(HW, ts) < min_steps:
        ts -= 128
    return ts


# ----------------------------------------------------------------------------
# Pallas kernel: fused mask head + flow head (shared layer 1), transposed layout
# ----------------------------------------------------------------------------
def _fused_heads_kernel(patches_ref, w1_ref, b1_ref, mw2_ref, mb2_ref, fw2_ref,
                        mask_ref, flow_ref):
    # Shared layer 1, transposed: (512, K1p) @ (K1p, ts) -> (512, ts), f32 accumulation on MXU.
    h = jnp.dot(w1_ref[...], patches_ref[...], preferred_element_type=jnp.float32)
    h = jnp.maximum(h + b1_ref[...], 0.0)
    hm = h[:HID2, :].astype(mw2_ref.dtype)        # (256, ts) mask-head activation
    hf = h[HID2:, :].astype(fw2_ref.dtype)        # (256, ts) flow-head activation

    # Mask head layer 2 (1x1 conv); 0.25 scale already folded into mw2/mb2.  bf16 store,
    # already in NCHW layout (channels on sublanes, pixels on lanes).
    m = jnp.dot(mw2_ref[...], hm, preferred_element_type=jnp.float32)
    mask_ref[...] = (m + mb2_ref[...]).astype(mask_ref.dtype)

    # Flow head conv2: per-tap channel contraction (taps on sublanes: 9 real + 7 zero rows).
    # Spatial tap-sum + bias are applied in the wrapper (needs a 1-pixel halo).
    flow_ref[...] = jnp.dot(fw2_ref[...], hf,
                            preferred_element_type=jnp.float32).astype(flow_ref.dtype)


def fused_heads(patches_T, params, *, ts_max=512, mask_dtype=jnp.bfloat16):
    N, K1p, HW = patches_T.shape
    ts = _choose_ts(HW, N, ts_max)
    grid = (N, pl.cdiv(HW, ts))

    w1T, b1 = params["w1T"], params["b1"]
    mw2T, mb2 = params["mask_w2T"], params["mask_b2"]
    fw2T = params["flow_w2T"]

    flops = 2 * N * HW * (K1p * 2 * HID2 + HID2 * MASK_CH + HID2 * FLOW_TAPS_PAD)
    bytes_accessed = (patches_T.size * 2
                      + (w1T.size + mw2T.size + fw2T.size) * 2
                      + (b1.size + mb2.size) * 4
                      + N * MASK_CH * HW * 2            # bf16 mask writeback
                      + N * FLOW_TAPS_PAD * HW * 4)     # f32 flow taps

    mask_ncs, flow_taps = pl.pallas_call(
        _fused_heads_kernel,
        out_shape=(jax.ShapeDtypeStruct((N, MASK_CH, HW), mask_dtype),
                   jax.ShapeDtypeStruct((N, FLOW_TAPS_PAD, HW), jnp.float32)),
        grid_spec=pltpu.PrefetchScalarGridSpec(
            num_scalar_prefetch=0,
            grid=grid,
            in_specs=[
                pl.BlockSpec((None, K1p, ts), lambda n, s: (n, 0, s)),     # patch tile (K1p, ts)
                pl.BlockSpec((2 * HID2, K1p), lambda n, s: (0, 0)),        # fused layer-1 weight^T
                pl.BlockSpec((2 * HID2, 1), lambda n, s: (0, 0)),          # fused layer-1 bias col
                pl.BlockSpec((MASK_CH, HID2), lambda n, s: (0, 0)),        # mask 1x1 weight^T *0.25
                pl.BlockSpec((MASK_CH, 1), lambda n, s: (0, 0)),           # mask bias col *0.25
                pl.BlockSpec((FLOW_TAPS_PAD, HID2), lambda n, s: (0, 0)),  # flow conv2 tap rows
            ],
            out_specs=[
                pl.BlockSpec((None, MASK_CH, ts), lambda n, s: (n, 0, s)),
                pl.BlockSpec((None, FLOW_TAPS_PAD, ts), lambda n, s: (n, 0, s)),
            ],
        ),
        compiler_params=pltpu.CompilerParams(
            dimension_semantics=("parallel", "parallel"),
            vmem_limit_bytes=48 * 1024 * 1024,
        ),
        cost_estimate=pl.CostEstimate(
            flops=flops, transcendentals=0, bytes_accessed=bytes_accessed),
    )(patches_T, w1T, b1, mw2T, mb2, fw2T)

    return mask_ncs, flow_taps


# ----------------------------------------------------------------------------
# Glue: transposed im2col for 3x3 / pad=1 convolutions (taps-major rows, pixels as lanes)
# ----------------------------------------------------------------------------
def im2col_3x3_T(x_nchw, K1p):
    N, C, H, W = x_nchw.shape
    xp = jnp.pad(x_nchw, ((0, 0), (0, 0), (1, 1), (1, 1)))
    cols = [xp[:, :, dy:dy + H, dx:dx + W] for dy in range(3) for dx in range(3)]
    if K1p > 9 * C:
        cols.append(jnp.zeros((N, K1p - 9 * C, H, W), x_nchw.dtype))
    return jnp.concatenate(cols, axis=1).reshape(N, K1p, H * W)


# ----------------------------------------------------------------------------
# MUpdateBlock forward
# ----------------------------------------------------------------------------
def mupdate_block_forward(imgf_nchw, params, *, ts_max=512, mask_dtype=jnp.bfloat16):
    x = imgf_nchw.astype(jnp.bfloat16)        # NCHW consumed directly; no input layout transpose
    N, C, H, W = x.shape
    K1p = params["w1T"].shape[1]

    # TODO(synk): at real RAFT sizes, replace this HBM im2col (9x blow-up of x) with 9 in-kernel
    # shifted dots over halo'd row-band tiles of x (pl.Element / manual-DMA halo blocks).
    patches_T = im2col_3x3_T(x, K1p)          # (N, K1p, H*W) bf16

    mask_ncs, flow_taps = fused_heads(patches_T, params, ts_max=ts_max, mask_dtype=mask_dtype)

    # Mask head: kernel already wrote (N, 2304, H*W) in NCHW layout -> free reshape, no transpose.
    mask = mask_ncs.reshape(N, MASK_CH, H, W)

    # Flow head conv2 spatial sum: 9 shifted adds of the per-tap channel contractions (+ bias).
    taps = flow_taps[:, :9, :].astype(jnp.float32).reshape(N, 9, H, W)
    tpad = jnp.pad(taps, ((0, 0), (0, 0), (1, 1), (1, 1)))
    acc = jnp.zeros((N, H, W), jnp.float32)
    for t, (dy, dx) in enumerate([(dy, dx) for dy in range(3) for dx in range(3)]):
        acc = acc + tpad[:, t, dy:dy + H, dx:dx + W]
    dflow = (acc + params["flow_b2"])[:, None, :, :]    # (N, 1, H, W)

    return mask, dflow


# ----------------------------------------------------------------------------
# Pure-JAX reference (lax.conv, f32) for correctness check
# ----------------------------------------------------------------------------
def _conv_ref(x_nhwc, w_hwio, b, padding):
    y = jax.lax.conv_general_dilated(
        x_nhwc, w_hwio, window_strides=(1, 1), padding=padding,
        dimension_numbers=("NHWC", "HWIO", "NHWC"),
    )
    return y + b


def mupdate_block_ref(imgf_nchw, hwio):
    x = jnp.transpose(imgf_nchw, (0, 2, 3, 1))
    hm = jnp.maximum(_conv_ref(x, hwio["mask_w1"], hwio["mask_b1"], "SAME"), 0.0)
    mask = 0.25 * _conv_ref(hm, hwio["mask_w2"], hwio["mask_b2"], "SAME")
    hf = jnp.maximum(_conv_ref(x, hwio["flow_w1"], hwio["flow_b1"], "SAME"), 0.0)
    dflow = _conv_ref(hf, hwio["flow_w2"], hwio["flow_b2"], "SAME")
    return mask.transpose(0, 3, 1, 2), dflow.transpose(0, 3, 1, 2)


# ----------------------------------------------------------------------------
# Deterministic parameter init (HWIO) + packing into the transposed kernel layout
# ----------------------------------------------------------------------------
def init_params(key, hidden_dim):
    ks = jax.random.split(key, 8)
    s = 0.05
    hwio = {
        # flow_head.conv1: hidden -> 256, 3x3
        "flow_w1": s * jax.random.normal(ks[0], (3, 3, hidden_dim, HID2), jnp.float32),
        "flow_b1": s * jax.random.normal(ks[1], (HID2,), jnp.float32),
        # flow_head.conv2: 256 -> 1, 3x3
        "flow_w2": s * jax.random.normal(ks[2], (3, 3, HID2, 1), jnp.float32),
        "flow_b2": s * jax.random.normal(ks[3], (1,), jnp.float32),
        # mask[0]: hidden -> 256, 3x3
        "mask_w1": s * jax.random.normal(ks[4], (3, 3, hidden_dim, HID2), jnp.float32),
        "mask_b1": s * jax.random.normal(ks[5], (HID2,), jnp.float32),
        # mask[2]: 256 -> 16*16*9 = 2304, 1x1
        "mask_w2": s * jax.random.normal(ks[6], (1, 1, HID2, MASK_CH), jnp.float32),
        "mask_b2": s * jax.random.normal(ks[7], (MASK_CH,), jnp.float32),
    }
    return pack_params(hwio), hwio


def pack_params(hwio):
    C = hwio["mask_w1"].shape[2]
    K1 = 9 * C
    K1p = _round_up(K1, 128)     # lane-align the contraction dim (matters on v5e's 128-wide MXU)

    # Fused layer-1 weight^T [mask | flow] -> (512, K1p) bf16, zero-padded lanes; bias as column.
    w1_cat = jnp.concatenate(
        [hwio["mask_w1"].reshape(K1, HID2), hwio["flow_w1"].reshape(K1, HID2)], axis=1)
    w1T = jnp.pad(w1_cat.T, ((0, 0), (0, K1p - K1))).astype(jnp.bfloat16)
    b1 = jnp.concatenate([hwio["mask_b1"], hwio["flow_b1"]]).reshape(2 * HID2, 1).astype(jnp.float32)

    # Mask layer-2 (1x1 conv) transposed, with the module's 0.25 folded in (exact: power of two).
    mask_w2T = (0.25 * hwio["mask_w2"].reshape(HID2, MASK_CH).T).astype(jnp.bfloat16)   # (2304, 256)
    mask_b2 = (0.25 * hwio["mask_b2"]).reshape(MASK_CH, 1).astype(jnp.float32)

    # Flow conv2 per-tap rows: flow_w2T[t, c] = w2[dy, dx, c, 0], t = dy*3 + dx; pad 9 -> 16 rows.
    fw2_rows = hwio["flow_w2"][..., 0].reshape(9, HID2)
    flow_w2T = jnp.pad(fw2_rows, ((0, FLOW_TAPS_PAD - 9), (0, 0))).astype(jnp.bfloat16)

    return {
        "w1T": w1T,
        "b1": b1,
        "mask_w2T": mask_w2T,
        "mask_b2": mask_b2,
        "flow_w2T": flow_w2T,
        "flow_b2": hwio["flow_b2"][0].astype(jnp.float32),
    }


if __name__ == "__main__":
    key = jax.random.PRNGKey(0)
    k_in, k_par = jax.random.split(key)

    # Small shapes: batch=2, hidden_dim=32, spatial=8x8 (NCHW input, as in PyTorch).
    N, C, H, W = 2, 32, 8, 8
    imgf = jax.random.normal(k_in, (N, C, H, W), jnp.float32)

    params, hwio = init_params(k_par, hidden_dim=C)

    fwd = jax.jit(functools.partial(mupdate_block_forward, ts_max=512))
    mask, dflow = fwd(imgf, params)
    mask = jax.block_until_ready(mask)
    dflow = jax.block_until_ready(dflow)

    assert mask.shape == (N, MASK_CH, H, W)
    assert dflow.shape == (N, 1, H, W)

    # Correctness check vs. pure-JAX f32 conv reference (bf16 MXU operands + bf16 mask store,
    # f32 accumulation; hence the slightly looser tolerance).
    mask_ref, dflow_ref = mupdate_block_ref(imgf, hwio)
    assert jnp.allclose(mask.astype(jnp.float32), mask_ref, rtol=3e-2, atol=3e-2)
    assert jnp.allclose(dflow, dflow_ref, rtol=3e-2, atol=3e-2)

    print("KERNEL_OK")
</pallas_src>

<mosaic_0001>
module attributes {stable_mosaic.version = 11 : i64} {
  func.func @_fused_heads_kernel(%arg0: i32, %arg1: i32, %arg2: memref<1x384x64xbf16, #tpu.memory_space<vmem>>, %arg3: memref<512x384xbf16, #tpu.memory_space<vmem>>, %arg4: memref<512x1xf32, #tpu.memory_space<vmem>>, %arg5: memref<2304x256xbf16, #tpu.memory_space<vmem>>, %arg6: memref<2304x1xf32, #tpu.memory_space<vmem>>, %arg7: memref<16x256xbf16, #tpu.memory_space<vmem>>, %arg8: memref<1x2304x64xbf16, #tpu.memory_space<vmem>>, %arg9: memref<1x16x64xf32, #tpu.memory_space<vmem>>) attributes {dimension_semantics = [#tpu.dimension_semantics<parallel>, #tpu.dimension_semantics<parallel>], iteration_bounds = array<i64: 2, 1>, scalar_prefetch = 0 : i64, scratch_operands = 0 : i64, tpu.core_type = #tpu.core_type<tc>, window_params = [{transform_indices = @transform_0, window_bounds = array<i64: 1, 384, 64>}, {pipeline_mode = #tpu.pipeline_mode<synchronous>, transform_indices = @transform_1, window_bounds = array<i64: 512, 384>}, {pipeline_mode = #tpu.pipeline_mode<synchronous>, transform_indices = @transform_2, window_bounds = array<i64: 512, 1>}, {pipeline_mode = #tpu.pipeline_mode<synchronous>, transform_indices = @transform_3, window_bounds = array<i64: 2304, 256>}, {pipeline_mode = #tpu.pipeline_mode<synchronous>, transform_indices = @transform_4, window_bounds = array<i64: 2304, 1>}, {pipeline_mode = #tpu.pipeline_mode<synchronous>, transform_indices = @transform_5, window_bounds = array<i64: 16, 256>}, {transform_indices = @transform_6, window_bounds = array<i64: 1, 2304, 64>}, {transform_indices = @transform_7, window_bounds = array<i64: 1, 16, 64>}]} {
    %c0 = arith.constant 0 : index
    %c0_0 = arith.constant 0 : index
    %0 = vector.load %arg3[%c0, %c0_0] : memref<512x384xbf16, #tpu.memory_space<vmem>>, vector<512x384xbf16>
    %c0_1 = arith.constant 0 : index
    %c0_2 = arith.constant 0 : index
    %c0_3 = arith.constant 0 : index
    %1 = vector.load %arg2[%c0_1, %c0_2, %c0_3] : memref<1x384x64xbf16, #tpu.memory_space<vmem>>, vector<1x384x64xbf16>
    %2 = vector.shape_cast %1 : vector<1x384x64xbf16> to vector<384x64xbf16>
    %cst = arith.constant dense<0.000000e+00> : vector<512x64xf32>
    %3 = tpu.matmul %0, %2, %cst {dimension_numbers = #tpu.dot_dimension_numbers<[1], [0], [0], [1], [0, 0, 1, 1], [], []>} : vector<512x384xbf16>, vector<384x64xbf16>, vector<512x64xf32> -> vector<512x64xf32>
    %c0_4 = arith.constant 0 : index
    %c0_5 = arith.constant 0 : index
    %4 = vector.load %arg4[%c0_4, %c0_5] : memref<512x1xf32, #tpu.memory_space<vmem>>, vector<512x1xf32>
    %5 = vector.broadcast %4 : vector<512x1xf32> to vector<512x64xf32>
    %6 = arith.addf %3, %5 : vector<512x64xf32>
    %cst_6 = arith.constant 0.000000e+00 : f32
    %7 = vector.broadcast %cst_6 : f32 to vector<512x64xf32>
    %8 = arith.maximumf %6, %7 : vector<512x64xf32>
    %9 = vector.extract_strided_slice %8 {offsets = [0, 0], sizes = [256, 64], strides = [1, 1]} : vector<512x64xf32> to vector<256x64xf32>
    %10 = arith.truncf %9 : vector<256x64xf32> to vector<256x64xbf16>
    %11 = vector.extract_strided_slice %8 {offsets = [256, 0], sizes = [256, 64], strides = [1, 1]} : vector<512x64xf32> to vector<256x64xf32>
    %12 = arith.truncf %11 : vector<256x64xf32> to vector<256x64xbf16>
    %c0_7 = arith.constant 0 : index
    %c0_8 = arith.constant 0 : index
    %13 = vector.load %arg5[%c0_7, %c0_8] : memref<2304x256xbf16, #tpu.memory_space<vmem>>, vector<2304x256xbf16>
    %cst_9 = arith.constant dense<0.000000e+00> : vector<2304x64xf32>
    %14 = tpu.matmul %13, %10, %cst_9 {dimension_numbers = #tpu.dot_dimension_numbers<[1], [0], [0], [1], [0, 0, 1, 1], [], []>} : vector<2304x256xbf16>, vector<256x64xbf16>, vector<2304x64xf32> -> vector<2304x64xf32>
    %c0_10 = arith.constant 0 : index
    %c0_11 = arith.constant 0 : index
    %15 = vector.load %arg6[%c0_10, %c0_11] : memref<2304x1xf32, #tpu.memory_space<vmem>>, vector<2304x1xf32>
    %16 = vector.broadcast %15 : vector<2304x1xf32> to vector<2304x64xf32>
    %17 = arith.addf %14, %16 : vector<2304x64xf32>
    %18 = arith.truncf %17 : vector<2304x64xf32> to vector<2304x64xbf16>
    %c0_12 = arith.constant 0 : index
    %c0_13 = arith.constant 0 : index
    %c0_14 = arith.constant 0 : index
    %19 = vector.load %arg8[%c0_12, %c0_13, %c0_14] : memref<1x2304x64xbf16, #tpu.memory_space<vmem>>, vector<1x2304x64xbf16>
    %20 = vector.shape_cast %19 : vector<1x2304x64xbf16> to vector<2304x64xbf16>
    %21 = vector.shape_cast %18 : vector<2304x64xbf16> to vector<1x2304x64xbf16>
    tpu.vector_store %arg8[%c0_12, %c0_13, %c0_14], %21 {strides = array<i32>} : memref<1x2304x64xbf16, #tpu.memory_space<vmem>>, vector<1x2304x64xbf16>,
    %c0_15 = arith.constant 0 : index
    %c0_16 = arith.constant 0 : index
    %22 = vector.load %arg7[%c0_15, %c0_16] : memref<16x256xbf16, #tpu.memory_space<vmem>>, vector<16x256xbf16>
    %cst_17 = arith.constant dense<0.000000e+00> : vector<16x64xf32>
    %23 = tpu.matmul %22, %12, %cst_17 {dimension_numbers = #tpu.dot_dimension_numbers<[1], [0], [0], [1], [0, 0, 1, 1], [], []>} : vector<16x256xbf16>, vector<256x64xbf16>, vector<16x64xf32> -> vector<16x64xf32>
    %c0_18 = arith.constant 0 : index
    %c0_19 = arith.constant 0 : index
    %c0_20 = arith.constant 0 : index
    %24 = vector.load %arg9[%c0_18, %c0_19, %c0_20] : memref<1x16x64xf32, #tpu.memory_space<vmem>>, vector<1x16x64xf32>
    %25 = vector.shape_cast %24 : vector<1x16x64xf32> to vector<16x64xf32>
    %26 = vector.shape_cast %23 : vector<16x64xf32> to vector<1x16x64xf32>
    tpu.vector_store %arg9[%c0_18, %c0_19, %c0_20], %26 {strides = array<i32>} : memref<1x16x64xf32, #tpu.memory_space<vmem>>, vector<1x16x64xf32>,
    return
  }
  func.func @transform_0(%arg0: i32, %arg1: i32) -> (i32, i32, i32) {
    %c0_i32 = arith.constant 0 : i32
    %c0_i32_0 = arith.constant 0 : i32
    return %arg0, %c0_i32, %arg1 : i32, i32, i32
  }
  func.func @transform_1(%arg0: i32, %arg1: i32) -> (i32, i32) {
    %c0_i32 = arith.constant 0 : i32
    %c0_i32_0 = arith.constant 0 : i32
    %c0_i32_1 = arith.constant 0 : i32
    return %c0_i32, %c0_i32_0 : i32, i32
  }
  func.func @transform_2(%arg0: i32, %arg1: i32) -> (i32, i32) {
    %c0_i32 = arith.constant 0 : i32
    %c0_i32_0 = arith.constant 0 : i32
    %c0_i32_1 = arith.constant 0 : i32
    return %c0_i32, %c0_i32_0 : i32, i32
  }
  func.func @transform_3(%arg0: i32, %arg1: i32) -> (i32, i32) {
    %c0_i32 = arith.constant 0 : i32
    %c0_i32_0 = arith.constant 0 : i32
    %c0_i32_1 = arith.constant 0 : i32
    return %c0_i32, %c0_i32_0 : i32, i32
  }
  func.func @transform_4(%arg0: i32, %arg1: i32) -> (i32, i32) {
    %c0_i32 = arith.constant 0 : i32
    %c0_i32_0 = arith.constant 0 : i32
    %c0_i32_1 = arith.constant 0 : i32
    return %c0_i32, %c0_i32_0 : i32, i32
  }
  func.func @transform_5(%arg0: i32, %arg1: i32) -> (i32, i32) {
    %c0_i32 = arith.constant 0 : i32
    %c0_i32_0 = arith.constant 0 : i32
    %c0_i32_1 = arith.constant 0 : i32
    return %c0_i32, %c0_i32_0 : i32, i32
  }
  func.func @transform_6(%arg0: i32, %arg1: i32) -> (i32, i32, i32) {
    %c0_i32 = arith.constant 0 : i32
    %c0_i32_0 = arith.constant 0 : i32
    return %arg0, %c0_i32, %arg1 : i32, i32, i32
  }
  func.func @transform_7(%arg0: i32, %arg1: i32) -> (i32, i32, i32) {
    %c0_i32 = arith.constant 0 : i32
    %c0_i32_0 = arith.constant 0 : i32
    return %arg0, %c0_i32, %arg1 : i32, i32, i32
  }
}

</mosaic_0001>

<bundles_post_ra>
// kernel: mupdate_block_forward.1
= control target key start
LH: loop header
LB: loop body
LE: loop exit
PB: predicated region body
PF: predicated region fallthrough
CT: control target
= control target key end

     0   :  { %s10343_s24 = smov 0   ;;  %s10345_s25 = smov 0   ;;  %s14227_s0 = inlined_call_operand.vmem [shape: bf16[2,384,64], index: 0, kind: input, shape index: {}]   ;;  %s14228_s1 = inlined_call_operand.vmem [shape: bf16[512,384], index: 1, kind: input, shape index: {}]   ;;  %s14229_s2 = inlined_call_operand.vmem [shape: f32[512,1], index: 2, kind: input, shape index: {}]   ;;  %s14230_s3 = inlined_call_operand.vmem [shape: bf16[2304,256], index: 3, kind: input, shape index: {}]   ;;  %s14231_s4 = inlined_call_operand.vmem [shape: f32[2304,1], index: 4, kind: input, shape index: {}]   ;;  %s14232_s5 = inlined_call_operand.vmem [shape: bf16[16,256], index: 5, kind: input, shape index: {}]   ;;  %s14233_s6 = inlined_call_operand.vmem [shape: bf16[2,2304,64], index: 6, kind: output, shape index: {0}]   ;;  %s14234_s7 = inlined_call_operand.vmem [shape: f32[2,16,64], index: 7, kind: output, shape index: {1}]  }
   0x1   :  { %s10347_s26 = smov 0  }
   0x2 LB: > { %s30_s27 = sadd.s32 1, %s10296_s25  ;;  %p8494_p0 = scmp.ge.s32.totalorder %s10300_s26, 1  ;;  %s10300_s26 = sphi %s10347_s26, %s18_s26   ;;  %s10296_s25 = sphi %s10345_s25, %s14547_s25   ;;  %s10292_s24 = sphi %s10343_s24, %s14546_s24  }
   0x3   : > { %p32_p1 = scmp.ge.s32.totalorder %s30_s27, 2  ;;  %p261_p2 = scmp.lt.s32.totalorder %s10300_s26, 3 }
   0x5   : > { %s14549_s27 = smov (%p32_p1, %s30_s27), 0  ;;  %p262_p3 = pnand %p8494_p0, %p261_p2 }
   0x7   : > { %265 = sbr.rel (%p262_p3) target bundleno = 1305 (0x519), region = 44 }
   0xe   : > { %v510_v0 = vld [vmem:[%s14229_s2 + $0x10] sm:$0xff]  ;;  %v508_v1 = vld [vmem:[%s14229_s2] sm:$0xff]  ;;  %p307_p4 = scmp.lt.s32.totalorder %s10292_s24, 1  ;;  %v14235_v2 = vmov 0   ;;  %v511_v3 = vld [vmem:[%s14229_s2 + $0x18] sm:$0xff]  ;;  %vm8015_vm0 = vcmask 519168  }
   0xf   : > { %9690 = vset.pattern.permute.xlu1 %v14235_v2  ;;  %9689 = vset.pattern.permute.xlu0 %v14235_v2  ;;  %v509_v4 = vld [vmem:[%s14229_s2 + $0x8] sm:$0xff]  ;;  %v512_v6 = vld [vmem:[%s14229_s2 + $0x20] sm:$0xff]  ;;  %v515_v9 = vld [vmem:[%s14229_s2 + $0x38] sm:$0xff]  ;;  %vm8357_vm1 = vcmask 523264  }
  0x10   : > { %584 = vperm.xlu1 %9690, %v510_v0   ;;  %574 = vperm.xlu0 %9689, %v508_v1   ;;  %s14551_s24 = smov (!%p307_p4, %s10292_s24), 1  ;;  %v513_v5 = vld [vmem:[%s14229_s2 + $0x28] sm:$0xff]  ;;  %v514_v10 = vld [vmem:[%s14229_s2 + $0x30] sm:$0xff]  ;;  %v516_v13 = vld [vmem:[%s14229_s2 + $0x40] sm:$0xff] }
  0x11   : > { %1548 = vmatprep.subr.bf16.mxu0 %v14235_v2  ;;  %s9662_s13 = smul.u32 192, %s14551_s24  ;;  %v517_v11 = vld [vmem:[%s14229_s2 + $0x48] sm:$0xff]  ;;  %v519_v16 = vld [vmem:[%s14229_s2 + $0x58] sm:$0xff]  ;;  %v518_v18 = vld [vmem:[%s14229_s2 + $0x50] sm:$0xff]  ;;  %s9199_s14 = sshll.u32 %s14551_s24, 4 }
  0x12   : > { %v521_v21 = vld [vmem:[%s14229_s2 + $0x68] sm:$0xff]  ;;  %v520_v22 = vld [vmem:[%s14229_s2 + $0x60] sm:$0xff]  ;;  %v523_v25 = vld [vmem:[%s14229_s2 + $0x78] sm:$0xff]  ;;  %s9663_s11 = smul.u32 1152, %s14551_s24  ;;  %s330_s17 = scalar_lea.vmem %s14234_s7, %s9199_s14 }
  0x13   : > { %s10388_s20 = scalar_lea.vmem %s14227_s0, %s9662_s13  ;;  %v522_v26 = vld [vmem:[%s14229_s2 + $0x70] sm:$0xff]  ;;  %v525_v29 = vld [vmem:[%s14229_s2 + $0x88] sm:$0xff]  ;;  %v524_v30 = vld [vmem:[%s14229_s2 + $0x80] sm:$0xff] }
  0x14   : > { %589 = vperm.xlu1 %9690, %v511_v3   ;;  %579 = vperm.xlu0 %9689, %v509_v4   ;;  %v9691_v7 = vld [vmem:[%s10388_s20] sm:$0xff]   ;;  %v9692_v8 = vld [vmem:[%s10388_s20 + $0x8] sm:$0xff]   ;;  %v9693_v12 = vld [vmem:[%s10388_s20 + $0x10] sm:$0xff]   ;;  %s12776_s23 = scalar_lea.vmem %s14233_s6, %s9663_s11 }
  0x15   : > { %1549 = vmatpush1.bf16.msra.mxu0 %v9691_v7  ;;  %v9699_v14 = vld [vmem:[%s10388_s20 + $0x80] sm:$0xff]   ;;  %v9694_v15 = vld [vmem:[%s10388_s20 + $0x18] sm:$0xff]   ;;  %v9701_v17 = vld [vmem:[%s10388_s20 + $0x88] sm:$0xff]  }
  0x16   : > { %1550 = vmatprep.subr.bf16.mxu0 %v14235_v2  ;;  %9550 = vmatprep.subr.bf16.mxu1 %v9699_v14  ;;  %v9703_v19 = vld [vmem:[%s10388_s20 + $0x90] sm:$0xff]   ;;  %v9695_v20 = vld [vmem:[%s10388_s20 + $0x20] sm:$0xff]   ;;  %v9705_v23 = vld [vmem:[%s10388_s20 + $0x98] sm:$0xff]  }
  0x17   : > { %9551 = vmatpush3.bf16.msra.mxu1 %v9699_v14  ;;  %v9696_v24 = vld [vmem:[%s10388_s20 + $0x28] sm:$0xff]   ;;  %v9707_v27 = vld [vmem:[%s10388_s20 + $0xa0] sm:$0xff]   ;;  %v9697_v28 = vld [vmem:[%s10388_s20 + $0x30] sm:$0xff]  }
  0x18   : > { %599 = vperm.xlu1 %9690, %v513_v5   ;;  %594 = vperm.xlu0 %9689, %v512_v6   ;;  %v9709_v31 = vld [vmem:[%s10388_s20 + $0xa8] sm:$0xff]   ;;  %v9698_v32 = vld [vmem:[%s10388_s20 + $0x38] sm:$0xff]   ;;  %v526_v34 = vld [vmem:[%s14229_s2 + $0x90] sm:$0xff] }
  0x19   : > { %1551 = vmatpush1.bf16.msra.mxu0 %v9692_v8  ;;  %9552 = vmatprep.subr.bf16.mxu1 %v9701_v17  ;;  %v527_v33 = vld [vmem:[%s14229_s2 + $0x98] sm:$0xff]  ;;  %v9711_v35 = vld [vmem:[%s10388_s20 + $0xb0] sm:$0xff]   ;;  %v9700_v37 = vld [vmem:[%s10388_s20 + $0x40] sm:$0xff]  }
  0x1a   : > { %1552 = vmatprep.subr.bf16.mxu0 %v14235_v2  ;;  %v9715_v36 = vld [vmem:[%s14228_s1 + $0x8] ss:$12 sps:$4 sm:$0xff]   ;;  %v528_v39 = vld [vmem:[%s14229_s2 + $0xa0] sm:$0xff]  ;;  %v9713_v41 = vld [vmem:[%s10388_s20 + $0xb8] sm:$0xff]  }
  0x1b   : > { %9553 = vmatpush3.bf16.msra.mxu1 %v9701_v17  ;;  %v529_v38 = vld [vmem:[%s14229_s2 + $0xa8] sm:$0xff]  ;;  %v9719_v40 = vld [vmem:[%s14228_s1 + $0x4] ss:$12 sps:$4 sm:$0xff]   ;;  %9566 = vmatprep.mubr.bf16.mxu1 %v9715_v36  ;;  %v531_v43 = vld [vmem:[%s14229_s2 + $0xb8] sm:$0xff] }
  0x1c   : > { %609 = vperm.xlu1 %9690, %v515_v9   ;;  %604 = vperm.xlu0 %9689, %v514_v10   ;;  %v9702_v42 = vld [vmem:[%s10388_s20 + $0x48] sm:$0xff]   ;;  %v530_v44 = vld [vmem:[%s14229_s2 + $0xb0] sm:$0xff]  ;;  %v532_v47 = vld [vmem:[%s14229_s2 + $0xc0] sm:$0xff] }
  0x1d   : > { %1553 = vmatpush1.bf16.msra.mxu0 %v9693_v12  ;;  %9554 = vmatprep.subr.bf16.mxu1 %v9703_v19  ;;  %v9704_v45 = vld [vmem:[%s10388_s20 + $0x50] sm:$0xff]   ;;  %v533_v46 = vld [vmem:[%s14229_s2 + $0xc8] sm:$0xff]  ;;  %v9723_v49 = vld [vmem:[%s14228_s1 + $0x38] ss:$12 sps:$4 sm:$0xff]  }
  0x1e   : > { %1554 = vmatprep.subr.bf16.mxu0 %v14235_v2  ;;  %1580 = vmatprep.mubr.bf16.mxu0 %v9719_v40  ;;  %v9716_v48 = vld [vmem:[%s14228_s1 + $0x20] ss:$12 sps:$4 sm:$0xff]   ;;  %v9706_v50 = vld [vmem:[%s10388_s20 + $0x58] sm:$0xff]   ;;  %v534_v52 = vld [vmem:[%s14229_s2 + $0xd0] sm:$0xff] }
  0x1f   : > { %9555 = vmatpush3.bf16.msra.mxu1 %v9703_v19  ;;  %v535_v51 = vld [vmem:[%s14229_s2 + $0xd8] sm:$0xff]  ;;  %v9708_v53 = vld [vmem:[%s10388_s20 + $0x60] sm:$0xff]   ;;  %v537_v54 = vld [vmem:[%s14229_s2 + $0xe8] sm:$0xff] }
  0x20   : > { %619 = vperm.xlu1 %9690, %v517_v11   ;;  %614 = vperm.xlu0 %9689, %v516_v13   ;;  %v536_v55 = vld [vmem:[%s14229_s2 + $0xe0] sm:$0xff]  ;;  %v9724_v56 = vld [vmem:[%s14228_s1 + $0x50] ss:$12 sps:$4 sm:$0xff]   ;;  %v9731_v57 = vld [vmem:[%s14228_s1 + $0x68] ss:$12 sps:$4 sm:$0xff]  }
  0x21   : > { %1555 = vmatpush1.bf16.msra.mxu0 %v9694_v15  ;;  %9556 = vmatprep.subr.bf16.mxu1 %v9705_v23  ;;  %v9710_v58 = vld [vmem:[%s10388_s20 + $0x68] sm:$0xff]   ;;  %v539_v59 = vld [vmem:[%s14229_s2 + $0xf8] sm:$0xff]  ;;  %v538_v60 = vld [vmem:[%s14229_s2 + $0xf0] sm:$0xff] }
  0x22   : > { %1556 = vmatprep.subr.bf16.mxu0 %v14235_v2  ;;  %v9712_v61 = vld [vmem:[%s10388_s20 + $0x70] sm:$0xff]   ;;  %v541_v62 = vld [vmem:[%s14229_s2 + $0x108] sm:$0xff]  ;;  %v540_v63 = vld [vmem:[%s14229_s2 + $0x100] sm:$0xff] }
  0x23   : > { %9557 = vmatpush3.bf16.msra.mxu1 %v9705_v23  ;;  %v9732_v0 = vld [vmem:[%s14228_s1 + $0x80] ss:$12 sps:$4 sm:$0xff]   ;;  %v9739_v1 = vld [vmem:[%s14228_s1 + $0x98] ss:$12 sps:$4 sm:$0xff]   ;;  %v542_v5 = vld [vmem:[%s14229_s2 + $0x110] sm:$0xff] }
  0x24   : > { %629 = vperm.xlu1 %9690, %v519_v16   ;;  %624 = vperm.xlu0 %9689, %v518_v18   ;;  %v9714_v3 = vld [vmem:[%s10388_s20 + $0x78] sm:$0xff]   ;;  %v9717_v6 = vld [vmem:[%s14228_s1] ss:$12 sps:$4 sm:$0xff]   ;;  %v9747_v11 = vld [vmem:[%s14228_s1 + $0xc8] ss:$12 sps:$4 sm:$0xff]  }
  0x25   : > { %1557 = vmatpush1.bf16.msra.mxu0 %v9695_v20  ;;  %9558 = vmatprep.subr.bf16.mxu1 %v9707_v27  ;;  %v543_v4 = vld [vmem:[%s14229_s2 + $0x118] sm:$0xff]  ;;  %v545_v8 = vld [vmem:[%s14229_s2 + $0x128] sm:$0xff]  ;;  %v544_v9 = vld [vmem:[%s14229_s2 + $0x120] sm:$0xff] }
  0x26   : > { %1558 = vmatprep.subr.bf16.mxu0 %v14235_v2  ;;  %v9720_v7 = vld [vmem:[%s14228_s1 + $0x1c] ss:$12 sps:$4 sm:$0xff]   ;;  %v546_v13 = vld [vmem:[%s14229_s2 + $0x130] sm:$0xff]  ;;  %v9722_v14 = vld [vmem:[%s14228_s1 + $0x18] ss:$12 sps:$4 sm:$0xff]  }
  0x27   : > { %9559 = vmatpush3.bf16.msra.mxu1 %v9707_v27  ;;  %v9740_v10 = vld [vmem:[%s14228_s1 + $0xb0] ss:$12 sps:$4 sm:$0xff]   ;;  %v9725_v15 = vld [vmem:[%s14228_s1 + $0x34] ss:$12 sps:$4 sm:$0xff]   ;;  %v549_v16 = vld [vmem:[%s14229_s2 + $0x148] sm:$0xff] }
  0x28   : > { %639 = vperm.xlu1 %9690, %v521_v21   ;;  %634 = vperm.xlu0 %9689, %v520_v22   ;;  %v547_v12 = vld [vmem:[%s14229_s2 + $0x138] sm:$0xff]  ;;  %v548_v17 = vld [vmem:[%s14229_s2 + $0x140] sm:$0xff]  ;;  %v550_v21 = vld [vmem:[%s14229_s2 + $0x150] sm:$0xff] }
  0x29   : > { %1559 = vmatpush1.bf16.msra.mxu0 %v9696_v24  ;;  %9560 = vmatprep.subr.bf16.mxu1 %v9709_v31  ;;  %v9748_v18 = vld [vmem:[%s14228_s1 + $0xe0] ss:$12 sps:$4 sm:$0xff]   ;;  %v9755_v19 = vld [vmem:[%s14228_s1 + $0xf8] ss:$12 sps:$4 sm:$0xff]   ;;  %v9727_v22 = vld [vmem:[%s14228_s1 + $0x30] ss:$12 sps:$4 sm:$0xff]  }
  0x2a   : > { %1560 = vmatprep.subr.bf16.mxu0 %v14235_v2  ;;  %v551_v20 = vld [vmem:[%s14229_s2 + $0x158] sm:$0xff]  ;;  %v553_v24 = vld [vmem:[%s14229_s2 + $0x168] sm:$0xff] }
  0x2b   : > { %9561 = vmatpush3.bf16.msra.mxu1 %v9709_v31  ;;  %v9728_v23 = vld [vmem:[%s14228_s1 + $0x4c] ss:$12 sps:$4 sm:$0xff]   ;;  %v9763_v27 = vld [vmem:[%s14228_s1 + $0x128] ss:$12 sps:$4 sm:$0xff]   ;;  %v9733_v31 = vld [vmem:[%s14228_s1 + $0x64] ss:$12 sps:$4 sm:$0xff]  }
  0x2c   : > { %649 = vperm.xlu1 %9690, %v523_v25   ;;  %644 = vperm.xlu0 %9689, %v522_v26   ;;  %v552_v25 = vld [vmem:[%s14229_s2 + $0x160] sm:$0xff]  ;;  %v9756_v26 = vld [vmem:[%s14228_s1 + $0x110] ss:$12 sps:$4 sm:$0xff]  }
  0x2d   : > { %1561 = vmatpush1.bf16.msra.mxu0 %v9697_v28  ;;  %9562 = vmatprep.subr.bf16.mxu1 %v9711_v35  ;;  %v555_v28 = vld [vmem:[%s14229_s2 + $0x178] sm:$0xff] }
  0x2e   : > { %1562 = vmatprep.subr.bf16.mxu0 %v14235_v2  ;;  %v559_v36 = vld [vmem:[%s14229_s2 + $0x198] sm:$0xff] }
  0x2f   : > { %9563 = vmatpush3.bf16.msra.mxu1 %v9711_v35  ;;  %v9771_v35 = vld [vmem:[%s14228_s1 + $0x158] ss:$12 sps:$4 sm:$0xff]   ;;  %v9736_v40 = vld [vmem:[%s14228_s1 + $0x7c] ss:$12 sps:$4 sm:$0xff]  }
  0x30   : > { %659 = vperm.xlu1 %9690, %v525_v29   ;;  %654 = vperm.xlu0 %9689, %v524_v30   ;;  %v554_v29 = vld [vmem:[%s14229_s2 + $0x170] sm:$0xff] }
  0x31   : > { %1563 = vmatpush1.bf16.msra.mxu0 %v9698_v32  ;;  %9564 = vmatprep.subr.bf16.mxu1 %v9713_v41  ;;  %v9730_v30 = vld [vmem:[%s14228_s1 + $0x48] ss:$12 sps:$4 sm:$0xff]  }
  0x32   : > { %1564 = vmatprep.subr.bf16.mxu0 %v14235_v2  ;;  %v557_v32 = vld [vmem:[%s14229_s2 + $0x188] sm:$0xff] }
  0x33   : > { %9565 = vmatpush3.bf16.msra.mxu1 %v9713_v41  ;;  %v560_v41 = vld [vmem:[%s14229_s2 + $0x1a0] sm:$0xff] }
  0x34   : > { %669 = vperm.xlu1 %9690, %v527_v33   ;;  %664 = vperm.xlu0 %9689, %v526_v34   ;;  %v556_v33 = vld [vmem:[%s14229_s2 + $0x180] sm:$0xff] }
  0x35   : > { %1565 = vmatpush1.bf16.msra.mxu0 %v9700_v37  ;;  %9630 = vmatprep.subr.bf16.mxu1 %v14235_v2  ;;  %v9764_v34 = vld [vmem:[%s14228_s1 + $0x140] ss:$12 sps:$4 sm:$0xff]   ;;  %v558_v37 = vld [vmem:[%s14229_s2 + $0x190] sm:$0xff] }
  0x36   : > { %1566 = vmatprep.subr.bf16.mxu0 %v14235_v2  ;;  %9567 = vmatmul.mubr.bf16.vlgmr.msra.gmra.mrb[0].mxu1 %v9716_v48  ;;  %v565_v48 = vld [vmem:[%s14229_s2 + $0x1c8] sm:$0xff] }
  0x37   : > { %9570 = vmatprep.mubr.bf16.mxu1 %v9723_v49  ;;  %v564_v49 = vld [vmem:[%s14229_s2 + $0x1c0] sm:$0xff] }
  0x38   : > { %679 = vperm.xlu1 %9690, %v529_v38   ;;  %674 = vperm.xlu0 %9689, %v528_v39   ;;  %v9735_v38 = vld [vmem:[%s14228_s1 + $0x60] ss:$12 sps:$4 sm:$0xff]  }
  0x39   : > { %1567 = vmatpush1.bf16.msra.mxu0 %v9702_v42  ;;  %v561_v39 = vld [vmem:[%s14229_s2 + $0x1a8] sm:$0xff]  ;;  %v9772_v42 = vld [vmem:[%s14228_s1 + $0x170] ss:$12 sps:$4 sm:$0xff]  }
  0x3a   : > { %1568 = vmatprep.subr.bf16.mxu0 %v14235_v2 }
  0x3c   : > { %689 = vperm.xlu1 %9690, %v531_v43   ;;  %684 = vperm.xlu0 %9689, %v530_v44   ;;  %v9782_v43 = vld [vmem:[%s14228_s1 + $0x188] ss:$12 sps:$4 sm:$0xff]   ;;  %v563_v44 = vld [vmem:[%s14229_s2 + $0x1b8] sm:$0xff] }
  0x3d   : > { %1569 = vmatpush1.bf16.msra.mxu0 %v9704_v45  ;;  %v562_v45 = vld [vmem:[%s14229_s2 + $0x1b0] sm:$0xff] }
  0x3e   : > { %1570 = vmatprep.subr.bf16.mxu0 %v14235_v2  ;;  %9571 = vmatmul.mubr.bf16.gmra.mrb[4].mxu1 %v9724_v56  ;;  %v9744_v56 = vld [vmem:[%s14228_s1 + $0xac] ss:$12 sps:$4 sm:$0xff]  }
  0x3f   : > { %9574 = vmatprep.mubr.bf16.mxu1 %v9731_v57  ;;  %v568_v57 = vld [vmem:[%s14229_s2 + $0x1e0] sm:$0xff] }
  0x40   : > { %699 = vperm.xlu1 %9690, %v533_v46   ;;  %694 = vperm.xlu0 %9689, %v532_v47   ;;  %v9738_v46 = vld [vmem:[%s14228_s1 + $0x78] ss:$12 sps:$4 sm:$0xff]   ;;  %v9741_v47 = vld [vmem:[%s14228_s1 + $0x94] ss:$12 sps:$4 sm:$0xff]  }
  0x41   : > { %1571 = vmatpush1.bf16.msra.mxu0 %v9706_v50  ;;  %v9783_v50 = vld [vmem:[%s14228_s1 + $0x1a0] ss:$12 sps:$4 sm:$0xff]  }
  0x42   : > { %1572 = vmatprep.subr.bf16.mxu0 %v14235_v2 }
  0x44   : > { %709 = vperm.xlu1 %9690, %v535_v51   ;;  %704 = vperm.xlu0 %9689, %v534_v52   ;;  %v9790_v51 = vld [vmem:[%s14228_s1 + $0x1b8] ss:$12 sps:$4 sm:$0xff]  }
  0x45   : > { %1573 = vmatpush1.bf16.msra.mxu0 %v9708_v53  ;;  %v567_v52 = vld [vmem:[%s14229_s2 + $0x1d8] sm:$0xff]  ;;  %v566_v53 = vld [vmem:[%s14229_s2 + $0x1d0] sm:$0xff] }
  0x46   : > { %1574 = vmatprep.subr.bf16.mxu0 %v14235_v2  ;;  %9575 = vmatmul.mubr.bf16.gmra.mrb[8].mxu1 %v9732_v0  ;;  %v2510_v0 = vld [vmem:[%s14231_s4] sm:$0xff] }
  0x47   : > { %9578 = vmatprep.mubr.bf16.mxu1 %v9739_v1  ;;  %v9749_v1 = vld [vmem:[%s14228_s1 + $0xc4] ss:$12 sps:$4 sm:$0xff]  }
  0x48   : > { %719 = vperm.xlu1 %9690, %v537_v54   ;;  %714 = vperm.xlu0 %9689, %v536_v55   ;;  %v9743_v54 = vld [vmem:[%s14228_s1 + $0x90] ss:$12 sps:$4 sm:$0xff]   ;;  %v569_v55 = vld [vmem:[%s14229_s2 + $0x1e8] sm:$0xff] }
  0x49   : > { %1575 = vmatpush1.bf16.msra.mxu0 %v9710_v58  ;;  %v9791_v58 = vld [vmem:[%s14228_s1 + $0x1d0] ss:$12 sps:$4 sm:$0xff]  }
  0x4a   : > { %1576 = vmatprep.subr.bf16.mxu0 %v14235_v2 }
  0x4c   : > { %729 = vperm.xlu1 %9690, %v539_v59   ;;  %724 = vperm.xlu0 %9689, %v538_v60   ;;  %v9798_v59 = vld [vmem:[%s14228_s1 + $0x1e8] ss:$12 sps:$4 sm:$0xff]   ;;  %v571_v60 = vld [vmem:[%s14229_s2 + $0x1f8] sm:$0xff] }
  0x4d   : > { %1577 = vmatpush1.bf16.msra.mxu0 %v9712_v61  ;;  %v570_v61 = vld [vmem:[%s14229_s2 + $0x1f0] sm:$0xff] }
  0x4e   : > { %1578 = vmatprep.subr.bf16.mxu0 %v14235_v2  ;;  %9579 = vmatmul.mubr.bf16.gmra.mrb[12].mxu1 %v9740_v10 }
  0x4f   : > { %9582 = vmatprep.mubr.bf16.mxu1 %v9747_v11 }
  0x50   : > { %739 = vperm.xlu1 %9690, %v541_v62   ;;  %734 = vperm.xlu0 %9689, %v540_v63   ;;  %v9746_v62 = vld [vmem:[%s14228_s1 + $0xa8] ss:$12 sps:$4 sm:$0xff]  }
  0x51   : > { %1579 = vmatpush1.bf16.msra.mxu0 %v9714_v3  ;;  %v2511_v63 = vld [vmem:[%s14231_s4 + $0x8] sm:$0xff] }
  0x52   : > { %5678 = vmatprep.subr.bf16.mxu0 %v14235_v2  ;;  %v9799_v3 = vld [vmem:[%s14228_s1 + $0x200] ss:$12 sps:$4 sm:$0xff]  }
  0x54   : > { %749 = vperm.xlu1 %9690, %v543_v4   ;;  %744 = vperm.xlu0 %9689, %v542_v5   ;;  %v9806_v4 = vld [vmem:[%s14228_s1 + $0x218] ss:$12 sps:$4 sm:$0xff]  }
  0x55   : > { %1581 = vmatmul.mubr.bf16.vlgmr.msra.gmra.mrb[0].mxu0 %v9717_v6 }
  0x56   : > { %1588 = vmatprep.mubr.bf16.mxu0 %v9720_v7  ;;  %9583 = vmatmul.mubr.bf16.gmra.mrb[16].mxu1 %v9748_v18  ;;  %v2513_v7 = vld [vmem:[%s14231_s4 + $0x18] sm:$0xff] }
  0x57   : > { %9586 = vmatprep.mubr.bf16.mxu1 %v9755_v19  ;;  %v2517_v19 = vld [vmem:[%s14231_s4 + $0x38] sm:$0xff] }
  0x58   : > { %759 = vperm.xlu1 %9690, %v545_v8   ;;  %754 = vperm.xlu0 %9689, %v544_v9   ;;  %v2512_v8 = vld [vmem:[%s14231_s4 + $0x10] sm:$0xff]  ;;  %v9751_v9 = vld [vmem:[%s14228_s1 + $0xc0] ss:$12 sps:$4 sm:$0xff]  }
  0x5c   : > { %769 = vperm.xlu1 %9690, %v547_v12   ;;  %764 = vperm.xlu0 %9689, %v546_v13   ;;  %v2515_v12 = vld [vmem:[%s14231_s4 + $0x28] sm:$0xff] }
  0x5d   : > { %1589 = vmatmul.mubr.bf16.gmra.mrb[4].mxu0 %v9722_v14  ;;  %v9752_v13 = vld [vmem:[%s14228_s1 + $0xdc] ss:$12 sps:$4 sm:$0xff]   ;;  %v2514_v14 = vld [vmem:[%s14231_s4 + $0x20] sm:$0xff] }
  0x5e   : > { %1596 = vmatprep.mubr.bf16.mxu0 %v9725_v15  ;;  %9587 = vmatmul.mubr.bf16.gmra.mrb[20].mxu1 %v9756_v26  ;;  %v9807_v15 = vld [vmem:[%s14228_s1 + $0x230] ss:$12 sps:$4 sm:$0xff]   ;;  %v9757_v26 = vld [vmem:[%s14228_s1 + $0xf4] ss:$12 sps:$4 sm:$0xff]  }
  0x5f   : > { %9590 = vmatprep.mubr.bf16.mxu1 %v9763_v27  ;;  %v9815_v27 = vld [vmem:[%s14228_s1 + $0x260] ss:$12 sps:$4 sm:$0xff]  }
  0x60   : > { %779 = vperm.xlu1 %9690, %v549_v16   ;;  %774 = vperm.xlu0 %9689, %v548_v17   ;;  %v9814_v16 = vld [vmem:[%s14228_s1 + $0x248] ss:$12 sps:$4 sm:$0xff]  }
  0x64   : > { %789 = vperm.xlu1 %9690, %v551_v20   ;;  %784 = vperm.xlu0 %9689, %v550_v21   ;;  %v2516_v20 = vld [vmem:[%s14231_s4 + $0x30] sm:$0xff]  ;;  %v9754_v21 = vld [vmem:[%s14228_s1 + $0xd8] ss:$12 sps:$4 sm:$0xff]  }
  0x65   : > { %1597 = vmatmul.mubr.bf16.gmra.mrb[8].mxu0 %v9727_v22 }
  0x66   : > { %1604 = vmatprep.mubr.bf16.mxu0 %v9728_v23  ;;  %9591 = vmatmul.mubr.bf16.gmra.mrb[24].mxu1 %v9764_v34 }
  0x67   : > { %9594 = vmatprep.mubr.bf16.mxu1 %v9771_v35  ;;  %v2523_v35 = vld [vmem:[%s14231_s4 + $0x68] sm:$0xff] }
  0x68   : > { %799 = vperm.xlu1 %9690, %v553_v24   ;;  %794 = vperm.xlu0 %9689, %v552_v25   ;;  %v2519_v24 = vld [vmem:[%s14231_s4 + $0x48] sm:$0xff]  ;;  %v2518_v25 = vld [vmem:[%s14231_s4 + $0x40] sm:$0xff] }
  0x6c   : > { %809 = vperm.xlu1 %9690, %v555_v28   ;;  %804 = vperm.xlu0 %9689, %v554_v29  }
  0x6d   : > { %1605 = vmatmul.mubr.bf16.gmra.mrb[12].mxu0 %v9730_v30  ;;  %v2521_v30 = vld [vmem:[%s14231_s4 + $0x58] sm:$0xff] }
  0x6e   : > { %1612 = vmatprep.mubr.bf16.mxu0 %v9733_v31  ;;  %9595 = vmatmul.mubr.bf16.gmra.mrb[28].mxu1 %v9772_v42  ;;  %v2520_v31 = vld [vmem:[%s14231_s4 + $0x50] sm:$0xff]  ;;  %v2525_v42 = vld [vmem:[%s14231_s4 + $0x78] sm:$0xff] }
  0x6f   : > { %9598 = vmatprep.mubr.bf16.mxu1 %v9782_v43  ;;  %v2524_v43 = vld [vmem:[%s14231_s4 + $0x70] sm:$0xff] }
  0x70   : > { %819 = vperm.xlu1 %9690, %v557_v32   ;;  %814 = vperm.xlu0 %9689, %v556_v33   ;;  %v9759_v32 = vld [vmem:[%s14228_s1 + $0xf0] ss:$12 sps:$4 sm:$0xff]  }
  0x74   : > { %829 = vperm.xlu1 %9690, %v559_v36   ;;  %824 = vperm.xlu0 %9689, %v558_v37   ;;  %v9760_v36 = vld [vmem:[%s14228_s1 + $0x10c] ss:$12 sps:$4 sm:$0xff]   ;;  %v2522_v37 = vld [vmem:[%s14231_s4 + $0x60] sm:$0xff] }
  0x75   : > { %1613 = vmatmul.mubr.bf16.gmra.mrb[16].mxu0 %v9735_v38  ;;  %v9822_v38 = vld [vmem:[%s14228_s1 + $0x278] ss:$12 sps:$4 sm:$0xff]  }
  0x76   : > { %1620 = vmatprep.mubr.bf16.mxu0 %v9736_v40  ;;  %9599 = vmatmul.mubr.bf16.gmra.mrb[32].mxu1 %v9783_v50 }
  0x77   : > { %9602 = vmatprep.mubr.bf16.mxu1 %v9790_v51 }
  0x78   : > { %839 = vperm.xlu1 %9690, %v561_v39   ;;  %834 = vperm.xlu0 %9689, %v560_v41   ;;  %v9823_v39 = vld [vmem:[%s14228_s1 + $0x290] ss:$12 sps:$4 sm:$0xff]  }
  0x7c   : > { %849 = vperm.xlu1 %9690, %v563_v44   ;;  %844 = vperm.xlu0 %9689, %v562_v45   ;;  %v9762_v44 = vld [vmem:[%s14228_s1 + $0x108] ss:$12 sps:$4 sm:$0xff]  }
  0x7d   : > { %1621 = vmatmul.mubr.bf16.gmra.mrb[20].mxu0 %v9738_v46 }
  0x7e   : > { %1628 = vmatprep.mubr.bf16.mxu0 %v9741_v47  ;;  %9603 = vmatmul.mubr.bf16.gmra.mrb[36].mxu1 %v9791_v58  ;;  %v9765_v47 = vld [vmem:[%s14228_s1 + $0x124] ss:$12 sps:$4 sm:$0xff]   ;;  %v2531_v58 = vld [vmem:[%s14231_s4 + $0xa8] sm:$0xff] }
  0x7f   : > { %9606 = vmatprep.mubr.bf16.mxu1 %v9798_v59  ;;  %v2530_v59 = vld [vmem:[%s14231_s4 + $0xa0] sm:$0xff] }
  0x80   : > { %859 = vperm.xlu1 %9690, %v565_v48   ;;  %854 = vperm.xlu0 %9689, %v564_v49   ;;  %v2527_v48 = vld [vmem:[%s14231_s4 + $0x88] sm:$0xff]  ;;  %v2526_v49 = vld [vmem:[%s14231_s4 + $0x80] sm:$0xff] }
  0x84   : > { %869 = vperm.xlu1 %9690, %v567_v52   ;;  %864 = vperm.xlu0 %9689, %v566_v53   ;;  %v2529_v52 = vld [vmem:[%s14231_s4 + $0x98] sm:$0xff]  ;;  %v2528_v53 = vld [vmem:[%s14231_s4 + $0x90] sm:$0xff] }
  0x85   : > { %1629 = vmatmul.mubr.bf16.gmra.mrb[24].mxu0 %v9743_v54  ;;  %v9767_v54 = vld [vmem:[%s14228_s1 + $0x120] ss:$12 sps:$4 sm:$0xff]  }
  0x86   : > { %1636 = vmatprep.mubr.bf16.mxu0 %v9744_v56  ;;  %9607 = vmatmul.mubr.bf16.gmra.mrb[40].mxu1 %v9799_v3  ;;  %v9770_v3 = vld [vmem:[%s14228_s1 + $0x138] ss:$12 sps:$4 sm:$0xff]  }
  0x87   : > { %9610 = vmatprep.mubr.bf16.mxu1 %v9806_v4  ;;  %v9773_v4 = vld [vmem:[%s14228_s1 + $0x154] ss:$12 sps:$4 sm:$0xff]  }
  0x88   : > { %879 = vperm.xlu1 %9690, %v569_v55   ;;  %874 = vperm.xlu0 %9689, %v568_v57   ;;  %v9768_v55 = vld [vmem:[%s14228_s1 + $0x13c] ss:$12 sps:$4 sm:$0xff]  }
  0x8c   : > { %889 = vperm.xlu1 %9690, %v571_v60   ;;  %884 = vperm.xlu0 %9689, %v570_v61   ;;  %v9830_v60 = vld [vmem:[%s14228_s1 + $0x2a8] ss:$12 sps:$4 sm:$0xff]   ;;  %v9831_v61 = vld [vmem:[%s14228_s1 + $0x2c0] ss:$12 sps:$4 sm:$0xff]  }
  0x8d   : > { %1637 = vmatmul.mubr.bf16.gmra.mrb[28].mxu0 %v9746_v62 }
  0x8e   : > { %1644 = vmatprep.mubr.bf16.mxu0 %v9749_v1  ;;  %9611 = vmatmul.mubr.bf16.gmra.mrb[44].mxu1 %v9807_v15  ;;  %v2532_v1 = vld [vmem:[%s14231_s4 + $0xb0] sm:$0xff]  ;;  %v2537_v15 = vld [vmem:[%s14231_s4 + $0xd8] sm:$0xff] }
  0x8f   : > { %v10731_v5 = vpop.permute.xlu1 %584  ;;  %v10733_v6 = vpop.permute.xlu0 %574  ;;  %9614 = vmatprep.mubr.bf16.mxu1 %v9814_v16  ;;  %v2536_v16 = vld [vmem:[%s14231_s4 + $0xd0] sm:$0xff] }
  0x90   : > { %2805 = vperm.xlu1 %9690, %v2511_v63   ;;  %2800 = vperm.xlu0 %9689, %v2510_v0   ;;  %v2533_v0 = vld [vmem:[%s14231_s4 + $0xb8] sm:$0xff] }
  0x93   : > { %v10744_v10 = vpop.permute.xlu1 %589  ;;  %v10746_v11 = vpop.permute.xlu0 %579 }
  0x94   : > { %2815 = vperm.xlu1 %9690, %v2513_v7   ;;  %2810 = vperm.xlu0 %9689, %v2512_v8  }
  0x95   : > { %1645 = vmatmul.mubr.bf16.gmra.mrb[32].mxu0 %v9751_v9  ;;  %v2535_v9 = vld [vmem:[%s14231_s4 + $0xc8] sm:$0xff] }
  0x96   : > { %1652 = vmatprep.mubr.bf16.mxu0 %v9752_v13  ;;  %9615 = vmatmul.mubr.bf16.gmra.mrb[48].mxu1 %v9815_v27  ;;  %v9838_v27 = vld [vmem:[%s14228_s1 + $0x2d8] ss:$12 sps:$4 sm:$0xff]  }
  0x97   : > { %v10763_v17 = vpop.permute.xlu1 %599  ;;  %v10765_v18 = vpop.permute.xlu0 %594  ;;  %9618 = vmatprep.mubr.bf16.mxu1 %v9822_v38  ;;  %v9779_v38 = vld [vmem:[%s14228_s1 + $0x184] ss:$12 sps:$4 sm:$0xff]  }
  0x98   : > { %2825 = vperm.xlu1 %9690, %v2515_v12   ;;  %2820 = vperm.xlu0 %9689, %v2514_v14   ;;  %v2534_v12 = vld [vmem:[%s14231_s4 + $0xc0] sm:$0xff] }
  0x9b   : > { %v10776_v22 = vpop.permute.xlu1 %609  ;;  %v10778_v23 = vpop.permute.xlu0 %604 }
  0x9c   : > { %2835 = vperm.xlu1 %9690, %v2517_v19   ;;  %2830 = vperm.xlu0 %9689, %v2516_v20   ;;  %v9775_v19 = vld [vmem:[%s14228_s1 + $0x150] ss:$12 sps:$4 sm:$0xff]   ;;  %v9776_v20 = vld [vmem:[%s14228_s1 + $0x16c] ss:$12 sps:$4 sm:$0xff]  }
  0x9d   : > { %1653 = vmatmul.mubr.bf16.gmra.mrb[36].mxu0 %v9754_v21 }
  0x9e   : > { %1660 = vmatprep.mubr.bf16.mxu0 %v9757_v26  ;;  %9619 = vmatmul.mubr.bf16.gmra.mrb[52].mxu1 %v9823_v39  ;;  %v2538_v26 = vld [vmem:[%s14231_s4 + $0xe0] sm:$0xff] }
  0x9f   : > { %v10792_v28 = vpop.permute.xlu1 %619  ;;  %v10794_v29 = vpop.permute.xlu0 %614  ;;  %9622 = vmatprep.mubr.bf16.mxu1 %v9830_v60  ;;  %v2546_v60 = vld [vmem:[%s14231_s4 + $0x120] sm:$0xff] }
  0xa0   : > { %2845 = vperm.xlu1 %9690, %v2519_v24   ;;  %2840 = vperm.xlu0 %9689, %v2518_v25   ;;  %v2539_v25 = vld [vmem:[%s14231_s4 + $0xe8] sm:$0xff] }
  0xa3   : > { %v10805_v33 = vpop.permute.xlu1 %629  ;;  %v10807_v34 = vpop.permute.xlu0 %624 }
  0xa4   : > { %2855 = vperm.xlu1 %9690, %v2521_v30   ;;  %2850 = vperm.xlu0 %9689, %v2520_v31   ;;  %v9839_v30 = vld [vmem:[%s14228_s1 + $0x2f0] ss:$12 sps:$4 sm:$0xff]  }
  0xa5   : > { %1661 = vmatmul.mubr.bf16.gmra.mrb[40].mxu0 %v9759_v32 }
  0xa6   : > { %1668 = vmatprep.mubr.bf16.mxu0 %v9760_v36  ;;  %9623 = vmatmul.mubr.bf16.gmra.mrb[56].mxu1 %v9831_v61  ;;  %v2540_v36 = vld [vmem:[%s14231_s4 + $0xf0] sm:$0xff] }
  0xa7   : > { %v10824_v40 = vpop.permute.xlu1 %639  ;;  %v10826_v41 = vpop.permute.xlu0 %634  ;;  %9626 = vmatprep.mubr.bf16.mxu1 %v9838_v27  ;;  %v2552_v27 = vld [vmem:[%s14231_s4 + $0x150] sm:$0xff] }
  0xa8   : > { %2865 = vperm.xlu1 %9690, %v2523_v35   ;;  %2860 = vperm.xlu0 %9689, %v2522_v37   ;;  %v2541_v35 = vld [vmem:[%s14231_s4 + $0xf8] sm:$0xff]  ;;  %v9778_v37 = vld [vmem:[%s14228_s1 + $0x168] ss:$12 sps:$4 sm:$0xff]  }
  0xab   : > { %v10837_v45 = vpop.permute.xlu1 %649  ;;  %v10839_v46 = vpop.permute.xlu0 %644 }
  0xac   : > { %2875 = vperm.xlu1 %9690, %v2525_v42   ;;  %2870 = vperm.xlu0 %9689, %v2524_v43   ;;  %v2543_v43 = vld [vmem:[%s14231_s4 + $0x108] sm:$0xff] }
  0xad   : > { %1669 = vmatmul.mubr.bf16.gmra.mrb[44].mxu0 %v9762_v44  ;;  %v2542_v44 = vld [vmem:[%s14231_s4 + $0x100] sm:$0xff] }
  0xae   : > { %1676 = vmatprep.mubr.bf16.mxu0 %v9765_v47  ;;  %9627 = vmatmul.mubr.bf16.gmra.mrb[60].mxu1 %v9839_v30  ;;  %v9789_v30 = vld [vmem:[%s14228_s1 + $0x1b0] ss:$12 sps:$4 sm:$0xff]  }
  0xaf   : > { %v10850_v50 = vpop.permute.xlu1 %659  ;;  %v10852_v51 = vpop.permute.xlu0 %654 }
  0xb0   : > { %2885 = vperm.xlu1 %9690, %v2527_v48   ;;  %2880 = vperm.xlu0 %9689, %v2526_v49   ;;  %v2545_v49 = vld [vmem:[%s14231_s4 + $0x118] sm:$0xff] }
  0xb3   : > { %v10866_v56 = vpop.permute.xlu1 %669  ;;  %v10868_v57 = vpop.permute.xlu0 %664 }
  0xb4   : > { %2895 = vperm.xlu1 %9690, %v2529_v52   ;;  %2890 = vperm.xlu0 %9689, %v2528_v53   ;;  %v2544_v52 = vld [vmem:[%s14231_s4 + $0x110] sm:$0xff]  ;;  %v9781_v53 = vld [vmem:[%s14228_s1 + $0x180] ss:$12 sps:$4 sm:$0xff]  }
  0xb5   : > { %1677 = vmatmul.mubr.bf16.gmra.mrb[48].mxu0 %v9767_v54  ;;  %v9784_v54 = vld [vmem:[%s14228_s1 + $0x19c] ss:$12 sps:$4 sm:$0xff]  }
  0xb6   : > { %1684 = vmatprep.mubr.bf16.mxu0 %v9768_v55 }
  0xb7   : > { %v10882_v62 = vpop.permute.xlu1 %679  ;;  %v10884_v63 = vpop.permute.xlu0 %674 }
  0xb8   : > { %2905 = vperm.xlu1 %9690, %v2531_v58   ;;  %2900 = vperm.xlu0 %9689, %v2530_v59   ;;  %v2547_v59 = vld [vmem:[%s14231_s4 + $0x128] sm:$0xff] }
  0xbb   : > { %v10898_v7 = vpop.permute.xlu1 %689  ;;  %v10900_v8 = vpop.permute.xlu0 %684 }
  0xbc   : > { %2915 = vperm.xlu1 %9690, %v2533_v0   ;;  %2910 = vperm.xlu0 %9689, %v2532_v1   ;;  %v2549_v1 = vld [vmem:[%s14231_s4 + $0x138] sm:$0xff] }
  0xbd   : > { %1685 = vmatmul.mubr.bf16.gmra.mrb[52].mxu0 %v9770_v3  ;;  %v2548_v3 = vld [vmem:[%s14231_s4 + $0x130] sm:$0xff] }
  0xbe   : > { %1692 = vmatprep.mubr.bf16.mxu0 %v9773_v4  ;;  %v9786_v4 = vld [vmem:[%s14228_s1 + $0x198] ss:$12 sps:$4 sm:$0xff]  }
  0xbf   : > { %v10908_v13 = vpop.permute.xlu1 %699  ;;  %v10910_v14 = vpop.permute.xlu0 %694 }
  0xc0   : > { %2925 = vperm.xlu1 %9690, %v2535_v9   ;;  %2920 = vperm.xlu0 %9689, %v2534_v12   ;;  %v9787_v9 = vld [vmem:[%s14228_s1 + $0x1b4] ss:$12 sps:$4 sm:$0xff]  }
  0xc3   : > { %v10924_v21 = vpop.permute.xlu1 %709  ;;  %v10926_v24 = vpop.permute.xlu0 %704 }
  0xc4   : > { %2935 = vperm.xlu1 %9690, %v2537_v15   ;;  %2930 = vperm.xlu0 %9689, %v2536_v16   ;;  %v2551_v16 = vld [vmem:[%s14231_s4 + $0x148] sm:$0xff] }
  0xc5   : > { %1693 = vmatmul.mubr.bf16.gmra.mrb[56].mxu0 %v9775_v19  ;;  %v2550_v19 = vld [vmem:[%s14231_s4 + $0x140] sm:$0xff] }
  0xc6   : > { %1700 = vmatprep.mubr.bf16.mxu0 %v9776_v20 }
  0xc7   : > { %v10940_v31 = vpop.permute.xlu1 %719  ;;  %v10942_v32 = vpop.permute.xlu0 %714 }
  0xc8   : > { %2945 = vperm.xlu1 %9690, %v2539_v25   ;;  %2940 = vperm.xlu0 %9689, %v2538_v26   ;;  %v2553_v26 = vld [vmem:[%s14231_s4 + $0x158] sm:$0xff] }
  0xcb   : > { %v10956_v39 = vpop.permute.xlu1 %729  ;;  %v10958_v42 = vpop.permute.xlu0 %724 }
  0xcc   : > { %2955 = vperm.xlu1 %9690, %v2541_v35   ;;  %2950 = vperm.xlu0 %9689, %v2540_v36   ;;  %v9792_v35 = vld [vmem:[%s14228_s1 + $0x1cc] ss:$12 sps:$4 sm:$0xff]  }
  0xcd   : > { %1701 = vmatmul.mubr.bf16.gmra.mrb[60].mxu0 %v9778_v37 }
  0xce   : > { %1708 = vmatprep.mubr.bf16.mxu0 %v9779_v38  ;;  %v2555_v38 = vld [vmem:[%s14231_s4 + $0x168] sm:$0xff] }
  0xcf   : > { %v10966_v47 = vpop.permute.xlu1 %739  ;;  %v10968_v48 = vpop.permute.xlu0 %734 }
  0xd0   : > { %2965 = vperm.xlu1 %9690, %v2543_v43   ;;  %2960 = vperm.xlu0 %9689, %v2542_v44   ;;  %v2554_v43 = vld [vmem:[%s14231_s4 + $0x160] sm:$0xff] }
  0xd3   : > { %v10982_v55 = vpop.permute.xlu1 %749  ;;  %v10984_v58 = vpop.permute.xlu0 %744 }
  0xd4   : > { %2975 = vperm.xlu1 %9690, %v2545_v49   ;;  %2970 = vperm.xlu0 %9689, %v2544_v52   ;;  %v2557_v52 = vld [vmem:[%s14231_s4 + $0x178] sm:$0xff] }
  0xd5   : > { %1709 = vmatmul.mubr.bf16.gmra.mrb[64].mxu0 %v9781_v53  ;;  %v2556_v53 = vld [vmem:[%s14231_s4 + $0x170] sm:$0xff] }
  0xd6   : > { %1716 = vmatprep.mubr.bf16.mxu0 %v9784_v54  ;;  %v9794_v54 = vld [vmem:[%s14228_s1 + $0x1c8] ss:$12 sps:$4 sm:$0xff]  }
  0xd7   : > { %v10992_v61 = vpop.permute.xlu1 %759  ;;  %v10994_v0 = vpop.permute.xlu0 %754 }
  0xd8   : > { %14237 = vst [vmem:[#allocation2_spill] sm:$0xff] %v10992_v61  ;;  %14238 = vst [vmem:[#allocation3_spill] sm:$0xff] %v10994_v0  ;;  %2985 = vperm.xlu1 %9690, %v2547_v59   ;;  %2980 = vperm.xlu0 %9689, %v2546_v60   ;;  %v9795_v59 = vld [vmem:[%s14228_s1 + $0x1e4] ss:$12 sps:$4 sm:$0xff]  }
  0xdb   : > { %v11008_v12 = vpop.permute.xlu1 %769  ;;  %v11010_v15 = vpop.permute.xlu0 %764 }
  0xdc   : > { %14239 = vst [vmem:[#allocation4_spill] sm:$0xff] %v11008_v12  ;;  %14240 = vst [vmem:[#allocation5_spill] sm:$0xff] %v11010_v15  ;;  %2995 = vperm.xlu1 %9690, %v2549_v1   ;;  %2990 = vperm.xlu0 %9689, %v2548_v3   ;;  %v2559_v3 = vld [vmem:[%s14231_s4 + $0x188] sm:$0xff] }
  0xdd   : > { %1717 = vmatmul.mubr.bf16.gmra.mrb[68].mxu0 %v9786_v4  ;;  %v2558_v4 = vld [vmem:[%s14231_s4 + $0x180] sm:$0xff] }
  0xde   : > { %1724 = vmatprep.mubr.bf16.mxu0 %v9787_v9 }
  0xdf   : > { %v11018_v20 = vpop.permute.xlu1 %779  ;;  %v11020_v25 = vpop.permute.xlu0 %774 }
  0xe0   : > { %14241 = vst [vmem:[#allocation6_spill] sm:$0xff] %v11018_v20  ;;  %14242 = vst [vmem:[#allocation7_spill] sm:$0xff] %v11020_v25  ;;  %3005 = vperm.xlu1 %9690, %v2551_v16   ;;  %3000 = vperm.xlu0 %9689, %v2550_v19   ;;  %v2561_v19 = vld [vmem:[%s14231_s4 + $0x198] sm:$0xff] }
  0xe3   : > { %v11034_v36 = vpop.permute.xlu1 %789  ;;  %v11036_v37 = vpop.permute.xlu0 %784 }
  0xe4   : > { %14243 = vst [vmem:[#allocation8_spill] sm:$0xff] %v11034_v36  ;;  %14244 = vst [vmem:[#allocation9_spill] sm:$0xff] %v11036_v37  ;;  %3015 = vperm.xlu1 %9690, %v2553_v26   ;;  %3010 = vperm.xlu0 %9689, %v2552_v27   ;;  %v2560_v26 = vld [vmem:[%s14231_s4 + $0x190] sm:$0xff]  ;;  %v9797_v27 = vld [vmem:[%s14228_s1 + $0x1e0] ss:$12 sps:$4 sm:$0xff]  }
  0xe5   : > { %1725 = vmatmul.mubr.bf16.gmra.mrb[72].mxu0 %v9789_v30  ;;  %v9800_v30 = vld [vmem:[%s14228_s1 + $0x1fc] ss:$12 sps:$4 sm:$0xff]  }
  0xe6   : > { %1732 = vmatprep.mubr.bf16.mxu0 %v9792_v35 }
  0xe7   : > { %v11044_v44 = vpop.permute.xlu1 %799  ;;  %v11046_v49 = vpop.permute.xlu0 %794 }
  0xe8   : > { %14245 = vst [vmem:[#allocation10_spill] sm:$0xff] %v11044_v44  ;;  %14246 = vst [vmem:[#allocation11_spill] sm:$0xff] %v11046_v49  ;;  %3025 = vperm.xlu1 %9690, %v2555_v38   ;;  %3020 = vperm.xlu0 %9689, %v2554_v43   ;;  %v2563_v43 = vld [vmem:[%s14231_s4 + $0x1a8] sm:$0xff]  ;;  %v2589_v49 = vld [vmem:[%s14231_s4 + $0x278] sm:$0xff] }
  0xeb   : > { %v11060_v60 = vpop.permute.xlu1 %809  ;;  %v11062_v1 = vpop.permute.xlu0 %804 }
  0xec   : > { %14247 = vst [vmem:[#allocation12_spill] sm:$0xff] %v11060_v60  ;;  %14248 = vst [vmem:[#allocation13_spill] sm:$0xff] %v11062_v1  ;;  %3035 = vperm.xlu1 %9690, %v2557_v52   ;;  %3030 = vperm.xlu0 %9689, %v2556_v53   ;;  %v2562_v52 = vld [vmem:[%s14231_s4 + $0x1a0] sm:$0xff] }
  0xed   : > { %1733 = vmatmul.mubr.bf16.gmra.mrb[76].mxu0 %v9794_v54  ;;  %v2586_v60 = vld [vmem:[%s14231_s4 + $0x260] sm:$0xff] }
  0xee   : > { %1740 = vmatprep.mubr.bf16.mxu0 %v9795_v59  ;;  %v2565_v59 = vld [vmem:[%s14231_s4 + $0x1b8] sm:$0xff] }
  0xef   : > { %v11070_v9 = vpop.permute.xlu1 %819  ;;  %v11072_v16 = vpop.permute.xlu0 %814 }
  0xf0   : > { %14249 = vst [vmem:[#allocation14_spill] sm:$0xff] %v11070_v9  ;;  %14250 = vst [vmem:[#allocation15_spill] sm:$0xff] %v11072_v16  ;;  %3045 = vperm.xlu1 %9690, %v2559_v3   ;;  %3040 = vperm.xlu0 %9689, %v2558_v4   ;;  %v2564_v3 = vld [vmem:[%s14231_s4 + $0x1b0] sm:$0xff]  ;;  %v9802_v4 = vld [vmem:[%s14228_s1 + $0x1f8] ss:$12 sps:$4 sm:$0xff]  }
  0xf1   : > { %v2584_v16 = vld [vmem:[%s14231_s4 + $0x250] sm:$0xff] }
  0xf3   : > { %v11086_v35 = vpop.permute.xlu1 %829  ;;  %v11088_v38 = vpop.permute.xlu0 %824 }
  0xf4   : > { %14251 = vst [vmem:[#allocation16_spill] sm:$0xff] %v11086_v35  ;;  %14252 = vst [vmem:[#allocation17_spill] sm:$0xff] %v11088_v38  ;;  %3055 = vperm.xlu1 %9690, %v2561_v19   ;;  %3050 = vperm.xlu0 %9689, %v2560_v26   ;;  %v9803_v19 = vld [vmem:[%s14228_s1 + $0x214] ss:$12 sps:$4 sm:$0xff]  }
  0xf5   : > { %1741 = vmatmul.mubr.bf16.gmra.mrb[80].mxu0 %v9797_v27  ;;  %v2582_v35 = vld [vmem:[%s14231_s4 + $0x240] sm:$0xff] }
  0xf6   : > { %1748 = vmatprep.mubr.bf16.mxu0 %v9800_v30  ;;  %v2567_v30 = vld [vmem:[%s14231_s4 + $0x1c8] sm:$0xff] }
  0xf7   : > { %v11096_v53 = vpop.permute.xlu1 %839  ;;  %v11098_v54 = vpop.permute.xlu0 %834 }
  0xf8   : > { %14253 = vst [vmem:[#allocation18_spill] sm:$0xff] %v11096_v53  ;;  %14254 = vst [vmem:[#allocation19_spill] sm:$0xff] %v11098_v54  ;;  %3065 = vperm.xlu1 %9690, %v2563_v43   ;;  %3060 = vperm.xlu0 %9689, %v2562_v52   ;;  %v2566_v43 = vld [vmem:[%s14231_s4 + $0x1c0] sm:$0xff]  ;;  %v2580_v54 = vld [vmem:[%s14231_s4 + $0x230] sm:$0xff] }
  0xfb   : > { %v11112_v26 = vpop.permute.xlu1 %849  ;;  %v11114_v27 = vpop.permute.xlu0 %844 }
  0xfc   : > { %14255 = vst [vmem:[#allocation20_spill] sm:$0xff] %v11112_v26  ;;  %14256 = vst [vmem:[#allocation21_spill] sm:$0xff] %v11114_v27  ;;  %3075 = vperm.xlu1 %9690, %v2565_v59   ;;  %3070 = vperm.xlu0 %9689, %v2564_v3   ;;  %v2569_v26 = vld [vmem:[%s14231_s4 + $0x1d8] sm:$0xff]  ;;  %v2568_v59 = vld [vmem:[%s14231_s4 + $0x1d0] sm:$0xff] }
  0xfd   : > { %1749 = vmatmul.mubr.bf16.gmra.mrb[84].mxu0 %v9802_v4  ;;  %v9805_v3 = vld [vmem:[%s14228_s1 + $0x210] ss:$12 sps:$4 sm:$0xff]   ;;  %v9808_v4 = vld [vmem:[%s14228_s1 + $0x22c] ss:$12 sps:$4 sm:$0xff]  }
  0xfe   : > { %1756 = vmatprep.mubr.bf16.mxu0 %v9803_v19  ;;  %v2571_v19 = vld [vmem:[%s14231_s4 + $0x1e8] sm:$0xff] }
  0xff   : > { %v11122_v52 = vpop.permute.xlu1 %859  ;;  %v11124_v2 = vpop.permute.xlu0 %854 }
 0x100   : > { %14257 = vst [vmem:[#allocation22_spill] sm:$0xff] %v11122_v52  ;;  %14258 = vst [vmem:[#allocation23_spill] sm:$0xff] %v11124_v2  ;;  %3085 = vperm.xlu1 %9690, %v2567_v30   ;;  %3080 = vperm.xlu0 %9689, %v2566_v43   ;;  %v2570_v30 = vld [vmem:[%s14231_s4 + $0x1e0] sm:$0xff] }
 0x103   : > { %v11138_v52 = vpop.permute.xlu1 %869  ;;  %v11140_v2 = vpop.permute.xlu0 %864 }
 0x104   : > { %14259 = vst [vmem:[#allocation24_spill] sm:$0xff] %v11138_v52  ;;  %14260 = vst [vmem:[#allocation25_spill] sm:$0xff] %v11140_v2  ;;  %3095 = vperm.xlu1 %9690, %v2569_v26   ;;  %3090 = vperm.xlu0 %9689, %v2568_v59   ;;  %v2573_v52 = vld [vmem:[%s14231_s4 + $0x1f8] sm:$0xff]  ;;  %v2572_v26 = vld [vmem:[%s14231_s4 + $0x1f0] sm:$0xff] }
 0x105   : > { %1757 = vmatmul.mubr.bf16.gmra.mrb[88].mxu0 %v9805_v3  ;;  %v9810_v59 = vld [vmem:[%s14228_s1 + $0x228] ss:$12 sps:$4 sm:$0xff]   ;;  %v9811_v3 = vld [vmem:[%s14228_s1 + $0x244] ss:$12 sps:$4 sm:$0xff]  }
 0x106   : > { %1764 = vmatprep.mubr.bf16.mxu0 %v9808_v4  ;;  %v2575_v4 = vld [vmem:[%s14231_s4 + $0x208] sm:$0xff] }
 0x107   : > { %v11148_v43 = vpop.permute.xlu1 %879  ;;  %v11150_v27 = vpop.permute.xlu0 %874 }
 0x108   : > { %14261 = vst [vmem:[#allocation26_spill] sm:$0xff] %v11148_v43  ;;  %14262 = vst [vmem:[#allocation27_spill] sm:$0xff] %v11150_v27  ;;  %3105 = vperm.xlu1 %9690, %v2571_v19   ;;  %3100 = vperm.xlu0 %9689, %v2570_v30   ;;  %v2574_v19 = vld [vmem:[%s14231_s4 + $0x200] sm:$0xff] }
 0x10b   : > { %v11164_v43 = vpop.permute.xlu1 %889  ;;  %v11166_v27 = vpop.permute.xlu0 %884 }
 0x10c   : > { %14263 = vst [vmem:[#allocation28_spill] sm:$0xff] %v11164_v43  ;;  %14264 = vst [vmem:[#allocation29_spill] sm:$0xff] %v11166_v27  ;;  %3115 = vperm.xlu1 %9690, %v2573_v52   ;;  %3110 = vperm.xlu0 %9689, %v2572_v26   ;;  %v2577_v52 = vld [vmem:[%s14231_s4 + $0x218] sm:$0xff]  ;;  %v2576_v26 = vld [vmem:[%s14231_s4 + $0x210] sm:$0xff] }
 0x10d   : > { %1765 = vmatmul.mubr.bf16.gmra.mrb[92].mxu0 %v9810_v59  ;;  %v9813_v43 = vld [vmem:[%s14228_s1 + $0x240] ss:$12 sps:$4 sm:$0xff]  }
 0x10e   : > { %1772 = vmatprep.mubr.bf16.mxu0 %v9811_v3  ;;  %v9816_v3 = vld [vmem:[%s14228_s1 + $0x25c] ss:$12 sps:$4 sm:$0xff]  }
 0x10f   : > { %v11174_v30 = vpop.permute.xlu1 %2805  ;;  %v11176_v2 = vpop.permute.xlu0 %2800 }
 0x110   : > { %14265 = vst [vmem:[#allocation30_spill] sm:$0xff] %v11174_v30  ;;  %14266 = vst [vmem:[#allocation31_spill] sm:$0xff] %v11176_v2  ;;  %3125 = vperm.xlu1 %9690, %v2575_v4   ;;  %3120 = vperm.xlu0 %9689, %v2574_v19   ;;  %v11194_v4 = vpop.f32.mrb[0].mxu1  ;;  %v2579_v19 = vld [vmem:[%s14231_s4 + $0x228] sm:$0xff]  ;;  %v2578_v2 = vld [vmem:[%s14231_s4 + $0x220] sm:$0xff] }
 0x111   : > { %v1871_v27 = vpop.f32.mrb[1].mxu1 }
 0x113   : > { %v11187_v59 = vpop.permute.xlu1 %2815  ;;  %v11189_v30 = vpop.permute.xlu0 %2810 }
 0x114   : > { %14267 = vst [vmem:[#allocation32_spill] sm:$0xff] %v11187_v59  ;;  %14268 = vst [vmem:[#allocation33_spill] sm:$0xff] %v11189_v30  ;;  %3135 = vperm.xlu1 %9690, %v2577_v52   ;;  %3130 = vperm.xlu0 %9689, %v2576_v26   ;;  %v11202_v59 = vpop.f32.mrb[2].mxu1  ;;  %v2581_v26 = vld [vmem:[%s14231_s4 + $0x238] sm:$0xff] }
 0x115   : > { %1773 = vmatmul.mubr.bf16.gmra.mrb[96].mxu0 %v9813_v43  ;;  %v11208_v52 = vpop.f32.mrb[3].mxu1  ;;  %v9818_v43 = vld [vmem:[%s14228_s1 + $0x258] ss:$12 sps:$4 sm:$0xff]  }
 0x116   : > { %1780 = vmatprep.mubr.bf16.mxu0 %v9816_v3  ;;  %v11226_v3 = vpop.f32.mrb[4].mxu1 }
 0x117   : > { %v11204_v30 = vpop.permute.xlu1 %2825  ;;  %v11206_v53 = vpop.permute.xlu0 %2820 }
 0x118   : > { %14269 = vst [vmem:[#allocation34_spill] sm:$0xff] %v11204_v30  ;;  %14270 = vst [vmem:[#allocation35_spill] sm:$0xff] %v11206_v53  ;;  %3145 = vperm.xlu1 %9690, %v2579_v19   ;;  %3140 = vperm.xlu0 %9689, %v2578_v2   ;;  %v9819_v2 = vld [vmem:[%s14228_s1 + $0x274] ss:$12 sps:$4 sm:$0xff]   ;;  %v2583_v19 = vld [vmem:[%s14231_s4 + $0x248] sm:$0xff]  ;;  %v11234_v38 = vpop.f32.mrb[5].mxu1 }
 0x11b   : > { %v11219_v30 = vpop.permute.xlu1 %2835  ;;  %v11221_v53 = vpop.permute.xlu0 %2830 }
 0x11c   : > { %14271 = vst [vmem:[#allocation36_spill] sm:$0xff] %v11219_v30  ;;  %14272 = vst [vmem:[#allocation37_spill] sm:$0xff] %v11221_v53  ;;  %3155 = vperm.xlu1 %9690, %v2581_v26   ;;  %3150 = vperm.xlu0 %9689, %v2580_v54   ;;  %v11236_v30 = vpop.f32.mrb[6].mxu1  ;;  %v2585_v26 = vld [vmem:[%s14231_s4 + $0x258] sm:$0xff] }
 0x11d   : > { %1781 = vmatmul.mubr.bf16.gmra.mrb[100].mxu0 %v9818_v43  ;;  %v11242_v54 = vpop.f32.mrb[7].mxu1  ;;  %v9821_v43 = vld [vmem:[%s14228_s1 + $0x270] ss:$12 sps:$4 sm:$0xff]  }
 0x11e   : > { %1788 = vmatprep.mubr.bf16.mxu0 %v9819_v2  ;;  %v11260_v2 = vpop.f32.mrb[8].mxu1 }
 0x11f   : > { %v11238_v53 = vpop.permute.xlu1 %2845  ;;  %v11240_v9 = vpop.permute.xlu0 %2840 }
 0x120   : > { %14273 = vst [vmem:[#allocation38_spill] sm:$0xff] %v11238_v53  ;;  %14274 = vst [vmem:[#allocation39_spill] sm:$0xff] %v11240_v9  ;;  %3165 = vperm.xlu1 %9690, %v2583_v19   ;;  %3160 = vperm.xlu0 %9689, %v2582_v35   ;;  %v9824_v35 = vld [vmem:[%s14228_s1 + $0x28c] ss:$12 sps:$4 sm:$0xff]   ;;  %v11268_v1 = vpop.f32.mrb[9].mxu1 }
 0x121   : > { %v2587_v19 = vld [vmem:[%s14231_s4 + $0x268] sm:$0xff] }
 0x123   : > { %v11253_v53 = vpop.permute.xlu1 %2855  ;;  %v11255_v9 = vpop.permute.xlu0 %2850 }
 0x124   : > { %14275 = vst [vmem:[#allocation40_spill] sm:$0xff] %v11253_v53  ;;  %14276 = vst [vmem:[#allocation41_spill] sm:$0xff] %v11255_v9  ;;  %3175 = vperm.xlu1 %9690, %v2585_v26   ;;  %3170 = vperm.xlu0 %9689, %v2584_v16   ;;  %v11270_v53 = vpop.f32.mrb[10].mxu1 }
 0x125   : > { %1789 = vmatmul.mubr.bf16.gmra.mrb[104].mxu0 %v9821_v43  ;;  %v11276_v16 = vpop.f32.mrb[11].mxu1  ;;  %v2588_v43 = vld [vmem:[%s14231_s4 + $0x270] sm:$0xff] }
 0x126   : > { %1796 = vmatprep.mubr.bf16.mxu0 %v9824_v35  ;;  %v9826_v35 = vld [vmem:[%s14228_s1 + $0x288] ss:$12 sps:$4 sm:$0xff]   ;;  %v11295_v25 = vpop.f32.mrb[12].mxu1 }
 0x127   : > { %v11272_v9 = vpop.permute.xlu1 %2865  ;;  %v11274_v44 = vpop.permute.xlu0 %2860 }
 0x128   : > { %14277 = vst [vmem:[#allocation42_spill] sm:$0xff] %v11272_v9  ;;  %14278 = vst [vmem:[#allocation43_spill] sm:$0xff] %v11274_v44  ;;  %3185 = vperm.xlu1 %9690, %v2587_v19   ;;  %3180 = vperm.xlu0 %9689, %v2586_v60   ;;  %v1582_v26 = vpop.f32.mrb[0].mxu0  ;;  %v9827_v9 = vld [vmem:[%s14228_s1 + $0x2a4] ss:$12 sps:$4 sm:$0xff]  }
 0x129   : > { %v1583_v36 = vadd.f32 %v1582_v26, %v10733_v6  ;;  %v1584_v37 = vpop.f32.mrb[1].mxu0  ;;  %v2591_v26 = vld [vmem:[%s14231_s4 + $0x288] sm:$0xff] }
 0x12a   : > { %v1585_v20 = vpop.f32.mrb[2].mxu0 }
 0x12b   : > { %v11288_v19 = vpop.permute.xlu1 %2875  ;;  %v11290_v60 = vpop.permute.xlu0 %2870  ;;  %v1872_v44 = vadd.f32 %v1871_v27, %v1583_v36  ;;  %v1586_v6 = vadd.f32 %v1585_v20, %v10746_v11  ;;  %v9848_v36 = vld [vmem:[%s14230_s3 + $0x3d4] ss:$8 sps:$4 sm:$0xff]  }
 0x12c   : > { %14279 = vst [vmem:[#allocation44_spill] sm:$0xff] %v11288_v19  ;;  %14280 = vst [vmem:[#allocation45_spill] sm:$0xff] %v11290_v60  ;;  %3195 = vperm.xlu1 %9690, %v2589_v49   ;;  %3190 = vperm.xlu0 %9689, %v2588_v43   ;;  %v1587_v37 = vpop.f32.mrb[3].mxu0  ;;  %v2590_v19 = vld [vmem:[%s14231_s4 + $0x280] sm:$0xff]  ;;  %v11304_v60 = vpop.f32.mrb[13].mxu1 }
 0x12d   : > { %1797 = vmatmul.mubr.bf16.gmra.mrb[108].mxu0 %v9826_v35  ;;  %v11309_v49 = vpop.f32.mrb[14].mxu1  ;;  %v1875_v11 = vadd.f32 %v11208_v52, %v1586_v6  ;;  %6198 = vmatprep.mubr.bf16.mxu1 %v9848_v36  ;;  %v2126_v37 = vmax.f32 %v1872_v44, 0.0  ;;  %v2593_v35 = vld [vmem:[%s14231_s4 + $0x298] sm:$0xff]  ;;  %v2592_v52 = vld [vmem:[%s14231_s4 + $0x290] sm:$0xff] }
 0x12e   : > { %1804 = vmatprep.mubr.bf16.mxu0 %v9827_v9  ;;  %v11316_v43 = vpop.f32.mrb[15].mxu1  ;;  %v9829_v9 = vld [vmem:[%s14228_s1 + $0x2a0] ss:$12 sps:$4 sm:$0xff]   ;;  %v9832_v36 = vld [vmem:[%s14228_s1 + $0x2bc] ss:$12 sps:$4 sm:$0xff]  }
 0x12f   : > { %v11312_v20 = vpop.permute.xlu1 %2885  ;;  %v11314_v27 = vpop.permute.xlu0 %2880  ;;  %v2127_v12 = vmax.f32 %v1875_v11, 0.0 }
 0x130   : > { %14281 = vst [vmem:[#allocation46_spill] sm:$0xff] %v11312_v20  ;;  %14282 = vst [vmem:[#allocation47_spill] sm:$0xff] %v11314_v27  ;;  %3205 = vperm.xlu1 %9690, %v2591_v26   ;;  %3200 = vperm.xlu0 %9689, %v2590_v19   ;;  %v1590_v15 = vpop.f32.mrb[4].mxu0 }
 0x131   : > { %v1591_v6 = vadd.f32 %v1590_v15, %v10731_v5  ;;  %v1592_v20 = vpop.f32.mrb[5].mxu0  ;;  %v2190_v26 = vpack.c.bf16 %v2127_v12, %v2126_v37  ;;  %v11336_v5 = vpop.f32.mrb[16].mxu1  ;;  %v2595_v12 = vld [vmem:[%s14231_s4 + $0x2a8] sm:$0xff]  ;;  %v2594_v37 = vld [vmem:[%s14231_s4 + $0x2a0] sm:$0xff] }
 0x132   : > { %v1593_v27 = vpop.f32.mrb[6].mxu0 }
 0x133   : > { %v11328_v19 = vpop.permute.xlu1 %2895  ;;  %v11330_v44 = vpop.permute.xlu0 %2890  ;;  %v1880_v11 = vadd.f32 %v11194_v4, %v1591_v6  ;;  %v1594_v15 = vadd.f32 %v1593_v27, %v10744_v10  ;;  %5679 = vmatpush1.bf16.msra.mxu0 %v2190_v26  ;;  %9646 = vmatpush1.bf16.msra.mxu1 %v2190_v26  ;;  %v14285_v4 = vmov 0  }
 0x134   : > { %14283 = vst [vmem:[#allocation48_spill] sm:$0xff] %v11328_v19  ;;  %14284 = vst [vmem:[#allocation49_spill] sm:$0xff] %v11330_v44  ;;  %3215 = vperm.xlu1 %9690, %v2593_v35   ;;  %3210 = vperm.xlu0 %9689, %v2592_v52   ;;  %v1595_v20 = vpop.f32.mrb[7].mxu0  ;;  %v11345_v19 = vpop.f32.mrb[17].mxu1  ;;  %v2597_v44 = vld [vmem:[%s14231_s4 + $0x2b8] sm:$0xff] }
 0x135   : > { %1805 = vmatmul.mubr.bf16.gmra.mrb[112].mxu0 %v9829_v9  ;;  %5680 = vmatprep.subr.bf16.mxu0 %v14285_v4  ;;  %v11348_v35 = vpop.f32.mrb[18].mxu1  ;;  %v1883_v10 = vadd.f32 %v11202_v59, %v1594_v15  ;;  %v2128_v26 = vmax.f32 %v1880_v11, 0.0  ;;  %v2596_v59 = vld [vmem:[%s14231_s4 + $0x2b0] sm:$0xff] }
 0x136   : > { %9631 = vmatprep.subr.bf16.mxu1 %v14285_v4  ;;  %1812 = vmatprep.mubr.bf16.mxu0 %v9832_v36  ;;  %v11356_v6 = vpop.f32.mrb[19].mxu1  ;;  %v9834_v36 = vld [vmem:[%s14228_s1 + $0x2b8] ss:$12 sps:$4 sm:$0xff]  }
 0x137   : > { %v11351_v27 = vpop.permute.xlu1 %2905  ;;  %v11353_v52 = vpop.permute.xlu0 %2900  ;;  %v2129_v20 = vmax.f32 %v1883_v10, 0.0  ;;  %v9835_v10 = vld [vmem:[%s14228_s1 + $0x2d4] ss:$12 sps:$4 sm:$0xff]  }
 0x138   : > { %14286 = vst [vmem:[#allocation50_spill] sm:$0xff] %v11351_v27  ;;  %14287 = vst [vmem:[#allocation51_spill] sm:$0xff] %v11353_v52  ;;  %3225 = vperm.xlu1 %9690, %v2595_v12   ;;  %3220 = vperm.xlu0 %9689, %v2594_v37   ;;  %v1598_v9 = vpop.f32.mrb[8].mxu0 }
 0x139   : > { %v1599_v15 = vadd.f32 %v1598_v9, %v10765_v18  ;;  %v1600_v27 = vpop.f32.mrb[9].mxu0  ;;  %v2191_v37 = vpack.c.bf16 %v2129_v20, %v2128_v26  ;;  %v11376_v18 = vpop.f32.mrb[20].mxu1  ;;  %v2599_v26 = vld [vmem:[%s14231_s4 + $0x2c8] sm:$0xff]  ;;  %v2598_v20 = vld [vmem:[%s14231_s4 + $0x2c0] sm:$0xff] }
 0x13a   : > { %v1601_v61 = vpop.f32.mrb[10].mxu0 }
 0x13b   : > { %v11368_v12 = vpop.permute.xlu1 %2915  ;;  %v11370_v11 = vpop.permute.xlu0 %2910  ;;  %v1888_v52 = vadd.f32 %v11234_v38, %v1599_v15  ;;  %v1602_v27 = vadd.f32 %v1601_v61, %v10763_v17  ;;  %5681 = vmatpush1.bf16.msra.mxu0 %v2191_v37  ;;  %9647 = vmatpush1.bf16.msra.mxu1 %v2191_v37 }
 0x13c   : > { %14288 = vst [vmem:[#allocation52_spill] sm:$0xff] %v11368_v12  ;;  %14289 = vst [vmem:[#allocation53_spill] sm:$0xff] %v11370_v11  ;;  %3235 = vperm.xlu1 %9690, %v2597_v44   ;;  %3230 = vperm.xlu0 %9689, %v2596_v59   ;;  %v1603_v9 = vpop.f32.mrb[11].mxu0  ;;  %v11385_v12 = vpop.f32.mrb[21].mxu1 }
 0x13d   : > { %1813 = vmatmul.mubr.bf16.gmra.mrb[116].mxu0 %v9834_v36  ;;  %5682 = vmatprep.subr.bf16.mxu0 %v14285_v4  ;;  %v11388_v38 = vpop.f32.mrb[22].mxu1  ;;  %v1891_v17 = vadd.f32 %v11242_v54, %v1602_v27  ;;  %v2130_v15 = vmax.f32 %v1888_v52, 0.0  ;;  %v2601_v9 = vld [vmem:[%s14231_s4 + $0x2d8] sm:$0xff]  ;;  %v2600_v54 = vld [vmem:[%s14231_s4 + $0x2d0] sm:$0xff] }
 0x13e   : > { %9632 = vmatprep.subr.bf16.mxu1 %v14285_v4  ;;  %1820 = vmatprep.mubr.bf16.mxu0 %v9835_v10  ;;  %v11396_v59 = vpop.f32.mrb[23].mxu1  ;;  %v9837_v10 = vld [vmem:[%s14228_s1 + $0x2d0] ss:$12 sps:$4 sm:$0xff]  }
 0x13f   : > { %v11391_v61 = vpop.permute.xlu1 %2925  ;;  %v11393_v44 = vpop.permute.xlu0 %2920  ;;  %v2131_v37 = vmax.f32 %v1891_v17, 0.0  ;;  %v9840_v17 = vld [vmem:[%s14228_s1 + $0x2ec] ss:$12 sps:$4 sm:$0xff]  }
 0x140   : > { %14290 = vst [vmem:[#allocation54_spill] sm:$0xff] %v11391_v61  ;;  %14291 = vst [vmem:[#allocation55_spill] sm:$0xff] %v11393_v44  ;;  %3245 = vperm.xlu1 %9690, %v2599_v26   ;;  %3240 = vperm.xlu0 %9689, %v2598_v20   ;;  %v1606_v36 = vpop.f32.mrb[12].mxu0 }
 0x141   : > { %v1607_v27 = vadd.f32 %v1606_v36, %v10778_v23  ;;  %v1608_v61 = vpop.f32.mrb[13].mxu0  ;;  %v2192_v20 = vpack.c.bf16 %v2131_v37, %v2130_v15  ;;  %v11416_v23 = vpop.f32.mrb[24].mxu1  ;;  %v2603_v15 = vld [vmem:[%s14231_s4 + $0x2e8] sm:$0xff]  ;;  %v2602_v37 = vld [vmem:[%s14231_s4 + $0x2e0] sm:$0xff] }
 0x142   : > { %v1609_v11 = vpop.f32.mrb[14].mxu0 }
 0x143   : > { %v11408_v26 = vpop.permute.xlu1 %2935  ;;  %v11410_v52 = vpop.permute.xlu0 %2930  ;;  %v1896_v44 = vadd.f32 %v11226_v3, %v1607_v27  ;;  %v1610_v61 = vadd.f32 %v1609_v11, %v10776_v22  ;;  %5683 = vmatpush1.bf16.msra.mxu0 %v2192_v20  ;;  %9648 = vmatpush1.bf16.msra.mxu1 %v2192_v20 }
 0x144   : > { %14292 = vst [vmem:[#allocation56_spill] sm:$0xff] %v11408_v26  ;;  %14293 = vst [vmem:[#allocation57_spill] sm:$0xff] %v11410_v52  ;;  %3255 = vperm.xlu1 %9690, %v2601_v9   ;;  %3250 = vperm.xlu0 %9689, %v2600_v54   ;;  %v1611_v36 = vpop.f32.mrb[15].mxu0  ;;  %v11425_v26 = vpop.f32.mrb[25].mxu1 }
 0x145   : > { %1821 = vmatmul.mubr.bf16.gmra.mrb[120].mxu0 %v9837_v10  ;;  %5684 = vmatprep.subr.bf16.mxu0 %v14285_v4  ;;  %v11428_v3 = vpop.f32.mrb[26].mxu1  ;;  %v1899_v22 = vadd.f32 %v11236_v30, %v1610_v61  ;;  %v2132_v27 = vmax.f32 %v1896_v44, 0.0  ;;  %v2605_v36 = vld [vmem:[%s14231_s4 + $0x2f8] sm:$0xff]  ;;  %v2604_v30 = vld [vmem:[%s14231_s4 + $0x2f0] sm:$0xff] }
 0x146   : > { %9633 = vmatprep.subr.bf16.mxu1 %v14285_v4  ;;  %1828 = vmatprep.mubr.bf16.mxu0 %v9840_v17  ;;  %v11436_v54 = vpop.f32.mrb[27].mxu1  ;;  %v9842_v17 = vld [vmem:[%s14228_s1 + $0x2e8] ss:$12 sps:$4 sm:$0xff]  }
 0x147   : > { %v11431_v11 = vpop.permute.xlu1 %2945  ;;  %v11433_v9 = vpop.permute.xlu0 %2940  ;;  %v2133_v20 = vmax.f32 %v1899_v22, 0.0  ;;  %v9845_v22 = vld [vmem:[%s14230_s3 + $0x4] ss:$8 sps:$4 sm:$0xff]  }
 0x148   : > { %14294 = vst [vmem:[#allocation58_spill] sm:$0xff] %v11431_v11  ;;  %14295 = vst [vmem:[#allocation59_spill] sm:$0xff] %v11433_v9  ;;  %3265 = vperm.xlu1 %9690, %v2603_v15   ;;  %3260 = vperm.xlu0 %9689, %v2602_v37   ;;  %v1614_v10 = vpop.f32.mrb[16].mxu0 }
 0x149   : > { %v1615_v61 = vadd.f32 %v1614_v10, %v10794_v29  ;;  %v1616_v11 = vpop.f32.mrb[17].mxu0  ;;  %v2193_v37 = vpack.c.bf16 %v2133_v20, %v2132_v27  ;;  %v11456_v29 = vpop.f32.mrb[28].mxu1  ;;  %v2607_v27 = vld [vmem:[%s14231_s4 + $0x308] sm:$0xff]  ;;  %v2606_v20 = vld [vmem:[%s14231_s4 + $0x300] sm:$0xff] }
 0x14a   : > { %v1617_v52 = vpop.f32.mrb[18].mxu0 }
 0x14b   : > { %v11448_v15 = vpop.permute.xlu1 %2955  ;;  %v11450_v44 = vpop.permute.xlu0 %2950  ;;  %v1904_v9 = vadd.f32 %v11268_v1, %v1615_v61  ;;  %v1618_v11 = vadd.f32 %v1617_v52, %v10792_v28  ;;  %5685 = vmatpush1.bf16.msra.mxu0 %v2193_v37  ;;  %9649 = vmatpush1.bf16.msra.mxu1 %v2193_v37 }
 0x14c   : > { %14296 = vst [vmem:[#allocation60_spill] sm:$0xff] %v11448_v15  ;;  %14297 = vst [vmem:[#allocation61_spill] sm:$0xff] %v11450_v44  ;;  %3275 = vperm.xlu1 %9690, %v2605_v36   ;;  %3270 = vperm.xlu0 %9689, %v2604_v30   ;;  %v1619_v10 = vpop.f32.mrb[19].mxu0  ;;  %v11465_v15 = vpop.f32.mrb[29].mxu1 }
 0x14d   : > { %1829 = vmatmul.mubr.bf16.gmra.mrb[124].mxu0 %v9842_v17  ;;  %5686 = vmatprep.subr.bf16.mxu0 %v14285_v4  ;;  %v11468_v1 = vpop.f32.mrb[30].mxu1  ;;  %v1907_v28 = vadd.f32 %v11276_v16, %v1618_v11  ;;  %v2134_v61 = vmax.f32 %v1904_v9, 0.0  ;;  %v2609_v10 = vld [vmem:[%s14231_s4 + $0x318] sm:$0xff]  ;;  %v2608_v16 = vld [vmem:[%s14231_s4 + $0x310] sm:$0xff] }
 0x14e   : > { %9634 = vmatprep.subr.bf16.mxu1 %v14285_v4  ;;  %5710 = vmatprep.mubr.bf16.mxu0 %v9845_v22  ;;  %v11476_v30 = vpop.f32.mrb[31].mxu1 }
 0x14f   : > { %v11471_v52 = vpop.permute.xlu1 %2965  ;;  %v11473_v36 = vpop.permute.xlu0 %2960  ;;  %v2135_v37 = vmax.f32 %v1907_v28, 0.0 }
 0x150   : > { %14298 = vst [vmem:[#allocation62_spill] sm:$0xff] %v11471_v52  ;;  %14299 = vst [vmem:[#allocation63_spill] sm:$0xff] %v11473_v36  ;;  %3285 = vperm.xlu1 %9690, %v2607_v27   ;;  %3280 = vperm.xlu0 %9689, %v2606_v20   ;;  %v1622_v17 = vpop.f32.mrb[20].mxu0  ;;  %v11490_v28 = vpop.f32.mrb[32].mxu1 }
 0x151   : > { %v1623_v11 = vadd.f32 %v1622_v17, %v10807_v34  ;;  %v1624_v52 = vpop.f32.mrb[21].mxu0  ;;  %v2194_v27 = vpack.c.bf16 %v2135_v37, %v2134_v61  ;;  %v2611_v34 = vld [vmem:[%s14231_s4 + $0x328] sm:$0xff]  ;;  %v11499_v61 = vpop.f32.mrb[33].mxu1 }
 0x152   : > { %v1625_v20 = vpop.f32.mrb[22].mxu0  ;;  %v2610_v52 = vld [vmem:[%s14231_s4 + $0x320] sm:$0xff] }
 0x153   : > { %v11485_v36 = vpop.permute.xlu1 %2975  ;;  %v11487_v22 = vpop.permute.xlu0 %2970  ;;  %v1912_v9 = vadd.f32 %v11260_v2, %v1623_v11  ;;  %v1626_v44 = vadd.f32 %v1625_v20, %v10805_v33  ;;  %5687 = vmatpush1.bf16.msra.mxu0 %v2194_v27  ;;  %9650 = vmatpush1.bf16.msra.mxu1 %v2194_v27  ;;  %v2613_v27 = vld [vmem:[%s14231_s4 + $0x338] sm:$0xff]  ;;  %v2612_v20 = vld [vmem:[%s14231_s4 + $0x330] sm:$0xff] }
 0x154   : > { %14300 = vst [vmem:[#allocation64_spill] sm:$0xff] %v11485_v36  ;;  %14301 = vst [vmem:[#allocation65_spill] sm:$0xff] %v11487_v22  ;;  %3295 = vperm.xlu1 %9690, %v2609_v10   ;;  %3290 = vperm.xlu0 %9689, %v2608_v16   ;;  %v1627_v0 = vpop.f32.mrb[23].mxu0  ;;  %v11503_v2 = vpop.f32.mrb[34].mxu1 }
 0x155   : > { %5688 = vmatprep.subr.bf16.mxu0 %v14285_v4  ;;  %9635 = vmatprep.subr.bf16.mxu1 %v14285_v4  ;;  %v1915_v33 = vadd.f32 %v11270_v53, %v1626_v44  ;;  %v11510_v17 = vpop.f32.mrb[35].mxu1  ;;  %v2136_v10 = vmax.f32 %v1912_v9, 0.0 }
 0x157   : > { %v11506_v0 = vpop.permute.xlu1 %2985  ;;  %v11508_v37 = vpop.permute.xlu0 %2980  ;;  %v2137_v16 = vmax.f32 %v1915_v33, 0.0 }
 0x158   : > { %14302 = vst [vmem:[#allocation66_spill] sm:$0xff] %v11506_v0  ;;  %14303 = vst [vmem:[#allocation67_spill] sm:$0xff] %v11508_v37  ;;  %3305 = vperm.xlu1 %9690, %v2611_v34   ;;  %3300 = vperm.xlu0 %9689, %v2610_v52   ;;  %v1630_v11 = vpop.f32.mrb[24].mxu0  ;;  %v11524_v37 = vpop.f32.mrb[36].mxu1 }
 0x159   : > { %v1631_v53 = vadd.f32 %v1630_v11, %v10826_v41  ;;  %v1632_v44 = vpop.f32.mrb[25].mxu0  ;;  %v2195_v52 = vpack.c.bf16 %v2137_v16, %v2136_v10  ;;  %v2615_v41 = vld [vmem:[%s14231_s4 + $0x348] sm:$0xff]  ;;  %v2614_v10 = vld [vmem:[%s14231_s4 + $0x340] sm:$0xff]  ;;  %v11533_v16 = vpop.f32.mrb[37].mxu1 }
 0x15a   : > { %v1633_v33 = vpop.f32.mrb[26].mxu0 }
 0x15b   : > { %v11519_v0 = vpop.permute.xlu1 %2995  ;;  %v11521_v34 = vpop.permute.xlu0 %2990  ;;  %v1920_v9 = vadd.f32 %v11304_v60, %v1631_v53  ;;  %v1634_v36 = vadd.f32 %v1633_v33, %v10824_v40  ;;  %5689 = vmatpush1.bf16.msra.mxu0 %v2195_v52  ;;  %9651 = vmatpush1.bf16.msra.mxu1 %v2195_v52  ;;  %v2617_v52 = vld [vmem:[%s14231_s4 + $0x358] sm:$0xff]  ;;  %v2616_v33 = vld [vmem:[%s14231_s4 + $0x350] sm:$0xff] }
 0x15c   : > { %14304 = vst [vmem:[#allocation68_spill] sm:$0xff] %v11519_v0  ;;  %14305 = vst [vmem:[#allocation69_spill] sm:$0xff] %v11521_v34  ;;  %3315 = vperm.xlu1 %9690, %v2613_v27   ;;  %3310 = vperm.xlu0 %9689, %v2612_v20   ;;  %v1635_v22 = vpop.f32.mrb[27].mxu0  ;;  %v11537_v60 = vpop.f32.mrb[38].mxu1 }
 0x15d   : > { %5690 = vmatprep.subr.bf16.mxu0 %v14285_v4  ;;  %9636 = vmatprep.subr.bf16.mxu1 %v14285_v4  ;;  %v1923_v40 = vadd.f32 %v11316_v43, %v1634_v36  ;;  %v11544_v27 = vpop.f32.mrb[39].mxu1  ;;  %v2138_v20 = vmax.f32 %v1920_v9, 0.0 }
 0x15f   : > { %v11540_v22 = vpop.permute.xlu1 %3005  ;;  %v11542_v11 = vpop.permute.xlu0 %3000  ;;  %v2139_v53 = vmax.f32 %v1923_v40, 0.0 }
 0x160   : > { %14306 = vst [vmem:[#allocation70_spill] sm:$0xff] %v11540_v22  ;;  %14307 = vst [vmem:[#allocation71_spill] sm:$0xff] %v11542_v11  ;;  %3325 = vperm.xlu1 %9690, %v2615_v41   ;;  %3320 = vperm.xlu0 %9689, %v2614_v10   ;;  %v1638_v44 = vpop.f32.mrb[28].mxu0  ;;  %v11558_v11 = vpop.f32.mrb[40].mxu1 }
 0x161   : > { %v1639_v43 = vadd.f32 %v1638_v44, %v10839_v46  ;;  %v1640_v36 = vpop.f32.mrb[29].mxu0  ;;  %v2196_v10 = vpack.c.bf16 %v2139_v53, %v2138_v20  ;;  %v2619_v46 = vld [vmem:[%s14231_s4 + $0x368] sm:$0xff]  ;;  %v2618_v20 = vld [vmem:[%s14231_s4 + $0x360] sm:$0xff]  ;;  %v11567_v53 = vpop.f32.mrb[41].mxu1 }
 0x162   : > { %v1641_v40 = vpop.f32.mrb[30].mxu0 }
 0x163   : > { %v11553_v22 = vpop.permute.xlu1 %3015  ;;  %v11555_v41 = vpop.permute.xlu0 %3010  ;;  %v1928_v9 = vadd.f32 %v11295_v25, %v1639_v43  ;;  %v1642_v0 = vadd.f32 %v1641_v40, %v10837_v45  ;;  %5691 = vmatpush1.bf16.msra.mxu0 %v2196_v10  ;;  %9652 = vmatpush1.bf16.msra.mxu1 %v2196_v10  ;;  %v2621_v10 = vld [vmem:[%s14231_s4 + $0x378] sm:$0xff]  ;;  %v2620_v40 = vld [vmem:[%s14231_s4 + $0x370] sm:$0xff] }
 0x164   : > { %14308 = vst [vmem:[#allocation72_spill] sm:$0xff] %v11553_v22  ;;  %14309 = vst [vmem:[#allocation73_spill] sm:$0xff] %v11555_v41  ;;  %3335 = vperm.xlu1 %9690, %v2617_v52   ;;  %3330 = vperm.xlu0 %9689, %v2616_v33   ;;  %v1643_v34 = vpop.f32.mrb[31].mxu0  ;;  %v11571_v25 = vpop.f32.mrb[42].mxu1 }
 0x165   : > { %5692 = vmatprep.subr.bf16.mxu0 %v14285_v4  ;;  %9637 = vmatprep.subr.bf16.mxu1 %v14285_v4  ;;  %v1931_v45 = vadd.f32 %v11309_v49, %v1642_v0  ;;  %v11578_v52 = vpop.f32.mrb[43].mxu1  ;;  %v2140_v33 = vmax.f32 %v1928_v9, 0.0 }
 0x167   : > { %v11574_v34 = vpop.permute.xlu1 %3025  ;;  %v11576_v44 = vpop.permute.xlu0 %3020  ;;  %v2141_v43 = vmax.f32 %v1931_v45, 0.0 }
 0x168   : > { %14310 = vst [vmem:[#allocation74_spill] sm:$0xff] %v11574_v34  ;;  %14311 = vst [vmem:[#allocation75_spill] sm:$0xff] %v11576_v44  ;;  %3345 = vperm.xlu1 %9690, %v2619_v46   ;;  %3340 = vperm.xlu0 %9689, %v2618_v20   ;;  %v1646_v36 = vpop.f32.mrb[32].mxu0  ;;  %v11592_v44 = vpop.f32.mrb[44].mxu1 }
 0x169   : > { %v1647_v49 = vadd.f32 %v1646_v36, %v10852_v51  ;;  %v1648_v0 = vpop.f32.mrb[33].mxu0  ;;  %v2197_v20 = vpack.c.bf16 %v2141_v43, %v2140_v33  ;;  %v2623_v51 = vld [vmem:[%s14231_s4 + $0x388] sm:$0xff]  ;;  %v2622_v33 = vld [vmem:[%s14231_s4 + $0x380] sm:$0xff]  ;;  %v11601_v43 = vpop.f32.mrb[45].mxu1 }
 0x16a   : > { %v1649_v45 = vpop.f32.mrb[34].mxu0 }
 0x16b   : > { %v11587_v34 = vpop.permute.xlu1 %3035  ;;  %v11589_v46 = vpop.permute.xlu0 %3030  ;;  %v1936_v9 = vadd.f32 %v11345_v19, %v1647_v49  ;;  %v1650_v22 = vadd.f32 %v1649_v45, %v10850_v50  ;;  %5693 = vmatpush1.bf16.msra.mxu0 %v2197_v20  ;;  %9653 = vmatpush1.bf16.msra.mxu1 %v2197_v20  ;;  %v2625_v20 = vld [vmem:[%s14231_s4 + $0x398] sm:$0xff]  ;;  %v2624_v45 = vld [vmem:[%s14231_s4 + $0x390] sm:$0xff] }
 0x16c   : > { %14312 = vst [vmem:[#allocation76_spill] sm:$0xff] %v11587_v34  ;;  %14313 = vst [vmem:[#allocation77_spill] sm:$0xff] %v11589_v46  ;;  %3355 = vperm.xlu1 %9690, %v2621_v10   ;;  %3350 = vperm.xlu0 %9689, %v2620_v40   ;;  %v1651_v41 = vpop.f32.mrb[35].mxu0  ;;  %v11605_v19 = vpop.f32.mrb[46].mxu1 }
 0x16d   : > { %5694 = vmatprep.subr.bf16.mxu0 %v14285_v4  ;;  %9638 = vmatprep.subr.bf16.mxu1 %v14285_v4  ;;  %v1939_v50 = vadd.f32 %v11356_v6, %v1650_v22  ;;  %v11612_v10 = vpop.f32.mrb[47].mxu1  ;;  %v2142_v40 = vmax.f32 %v1936_v9, 0.0 }
 0x16f   : > { %v11608_v41 = vpop.permute.xlu1 %3045  ;;  %v11610_v36 = vpop.permute.xlu0 %3040  ;;  %v2143_v49 = vmax.f32 %v1939_v50, 0.0 }
 0x170   : > { %14314 = vst [vmem:[#allocation78_spill] sm:$0xff] %v11608_v41  ;;  %14315 = vst [vmem:[#allocation79_spill] sm:$0xff] %v11610_v36  ;;  %3365 = vperm.xlu1 %9690, %v2623_v51   ;;  %3360 = vperm.xlu0 %9689, %v2622_v33   ;;  %v1654_v0 = vpop.f32.mrb[36].mxu0  ;;  %v11626_v36 = vpop.f32.mrb[48].mxu1 }
 0x171   : > { %v1655_v6 = vadd.f32 %v1654_v0, %v10868_v57  ;;  %v1656_v22 = vpop.f32.mrb[37].mxu0  ;;  %v2198_v33 = vpack.c.bf16 %v2143_v49, %v2142_v40  ;;  %v2627_v57 = vld [vmem:[%s14231_s4 + $0x3a8] sm:$0xff]  ;;  %v2626_v40 = vld [vmem:[%s14231_s4 + $0x3a0] sm:$0xff]  ;;  %v11635_v49 = vpop.f32.mrb[49].mxu1 }
 0x172   : > { %v1657_v50 = vpop.f32.mrb[38].mxu0 }
 0x173   : > { %v11621_v41 = vpop.permute.xlu1 %3055  ;;  %v11623_v51 = vpop.permute.xlu0 %3050  ;;  %v1944_v9 = vadd.f32 %v11336_v5, %v1655_v6  ;;  %v1658_v34 = vadd.f32 %v1657_v50, %v10866_v56  ;;  %5695 = vmatpush1.bf16.msra.mxu0 %v2198_v33  ;;  %9654 = vmatpush1.bf16.msra.mxu1 %v2198_v33  ;;  %v2629_v33 = vld [vmem:[%s14231_s4 + $0x3b8] sm:$0xff]  ;;  %v2628_v50 = vld [vmem:[%s14231_s4 + $0x3b0] sm:$0xff] }
 0x174   : > { %14316 = vst [vmem:[#allocation80_spill] sm:$0xff] %v11621_v41  ;;  %14317 = vst [vmem:[#allocation81_spill] sm:$0xff] %v11623_v51  ;;  %3375 = vperm.xlu1 %9690, %v2625_v20   ;;  %3370 = vperm.xlu0 %9689, %v2624_v45   ;;  %v1659_v46 = vpop.f32.mrb[39].mxu0  ;;  %v11639_v5 = vpop.f32.mrb[50].mxu1 }
 0x175   : > { %5696 = vmatprep.subr.bf16.mxu0 %v14285_v4  ;;  %9639 = vmatprep.subr.bf16.mxu1 %v14285_v4  ;;  %v1947_v56 = vadd.f32 %v11348_v35, %v1658_v34  ;;  %v11646_v20 = vpop.f32.mrb[51].mxu1  ;;  %v2144_v45 = vmax.f32 %v1944_v9, 0.0 }
 0x177   : > { %v11642_v46 = vpop.permute.xlu1 %3065  ;;  %v11644_v0 = vpop.permute.xlu0 %3060  ;;  %v2145_v6 = vmax.f32 %v1947_v56, 0.0 }
 0x178   : > { %14318 = vst [vmem:[#allocation82_spill] sm:$0xff] %v11642_v46  ;;  %14319 = vst [vmem:[#allocation83_spill] sm:$0xff] %v11644_v0  ;;  %3385 = vperm.xlu1 %9690, %v2627_v57   ;;  %3380 = vperm.xlu0 %9689, %v2626_v40   ;;  %v1662_v22 = vpop.f32.mrb[40].mxu0  ;;  %v11660_v0 = vpop.f32.mrb[52].mxu1 }
 0x179   : > { %v1663_v35 = vadd.f32 %v1662_v22, %v10884_v63  ;;  %v1664_v34 = vpop.f32.mrb[41].mxu0  ;;  %v2199_v40 = vpack.c.bf16 %v2145_v6, %v2144_v45  ;;  %v2631_v63 = vld [vmem:[%s14231_s4 + $0x3c8] sm:$0xff]  ;;  %v2630_v45 = vld [vmem:[%s14231_s4 + $0x3c0] sm:$0xff]  ;;  %v11669_v6 = vpop.f32.mrb[53].mxu1 }
 0x17a   : > { %v1665_v56 = vpop.f32.mrb[42].mxu0 }
 0x17b   : > { %v11655_v46 = vpop.permute.xlu1 %3075  ;;  %v11657_v57 = vpop.permute.xlu0 %3070  ;;  %v1952_v9 = vadd.f32 %v11385_v12, %v1663_v35  ;;  %v1666_v41 = vadd.f32 %v1665_v56, %v10882_v62  ;;  %5697 = vmatpush1.bf16.msra.mxu0 %v2199_v40  ;;  %9655 = vmatpush1.bf16.msra.mxu1 %v2199_v40  ;;  %v2633_v40 = vld [vmem:[%s14231_s4 + $0x3d8] sm:$0xff]  ;;  %v2632_v56 = vld [vmem:[%s14231_s4 + $0x3d0] sm:$0xff] }
 0x17c   : > { %14320 = vst [vmem:[#allocation84_spill] sm:$0xff] %v11655_v46  ;;  %14321 = vst [vmem:[#allocation85_spill] sm:$0xff] %v11657_v57  ;;  %3395 = vperm.xlu1 %9690, %v2629_v33   ;;  %3390 = vperm.xlu0 %9689, %v2628_v50   ;;  %v1667_v51 = vpop.f32.mrb[43].mxu0  ;;  %v11673_v12 = vpop.f32.mrb[54].mxu1 }
 0x17d   : > { %5698 = vmatprep.subr.bf16.mxu0 %v14285_v4  ;;  %9640 = vmatprep.subr.bf16.mxu1 %v14285_v4  ;;  %v1955_v62 = vadd.f32 %v11396_v59, %v1666_v41  ;;  %v11680_v33 = vpop.f32.mrb[55].mxu1  ;;  %v2146_v50 = vmax.f32 %v1952_v9, 0.0 }
 0x17f   : > { %v11676_v51 = vpop.permute.xlu1 %3085  ;;  %v11678_v22 = vpop.permute.xlu0 %3080  ;;  %v2147_v35 = vmax.f32 %v1955_v62, 0.0 }
 0x180   : > { %14322 = vst [vmem:[#allocation86_spill] sm:$0xff] %v11676_v51  ;;  %14323 = vst [vmem:[#allocation87_spill] sm:$0xff] %v11678_v22  ;;  %3405 = vperm.xlu1 %9690, %v2631_v63   ;;  %3400 = vperm.xlu0 %9689, %v2630_v45   ;;  %v1670_v34 = vpop.f32.mrb[44].mxu0 }
 0x181   : > { %v1671_v59 = vadd.f32 %v1670_v34, %v10900_v8  ;;  %v1672_v41 = vpop.f32.mrb[45].mxu0  ;;  %v2200_v45 = vpack.c.bf16 %v2147_v35, %v2146_v50  ;;  %v2635_v8 = vld [vmem:[%s14231_s4 + $0x3e8] sm:$0xff]  ;;  %v2634_v34 = vld [vmem:[%s14231_s4 + $0x3e0] sm:$0xff] }
 0x182   : > { %v1673_v62 = vpop.f32.mrb[46].mxu0 }
 0x183   : > { %v11689_v51 = vpop.permute.xlu1 %3095  ;;  %v11691_v63 = vpop.permute.xlu0 %3090  ;;  %v1960_v9 = vadd.f32 %v11376_v18, %v1671_v59  ;;  %v1674_v22 = vadd.f32 %v1673_v62, %v10898_v7  ;;  %5699 = vmatpush1.bf16.msra.mxu0 %v2200_v45  ;;  %9656 = vmatpush1.bf16.msra.mxu1 %v2200_v45  ;;  %v2636_v59 = vld [vmem:[%s14231_s4 + $0x3f0] sm:$0xff] }
 0x184   : > { %14324 = vst [vmem:[#allocation88_spill] sm:$0xff] %v11689_v51  ;;  %14325 = vst [vmem:[#allocation89_spill] sm:$0xff] %v11691_v63  ;;  %3415 = vperm.xlu1 %9690, %v2633_v40   ;;  %3410 = vperm.xlu0 %9689, %v2632_v56   ;;  %v1675_v46 = vpop.f32.mrb[47].mxu0  ;;  %v2637_v56 = vld [vmem:[%s14231_s4 + $0x3f8] sm:$0xff]  ;;  %v2762_v51 = vld [vmem:[%s14231_s4 + $0x7e0] sm:$0xff] }
 0x185   : > { %5700 = vmatprep.subr.bf16.mxu0 %v14285_v4  ;;  %9641 = vmatprep.subr.bf16.mxu1 %v14285_v4  ;;  %v1963_v18 = vadd.f32 %v11388_v38, %v1674_v22  ;;  %v2148_v46 = vmax.f32 %v1960_v9, 0.0 }
 0x187   : > { %v11704_v50 = vpop.permute.xlu1 %3105  ;;  %v11706_v7 = vpop.permute.xlu0 %3100  ;;  %v2149_v35 = vmax.f32 %v1963_v18, 0.0 }
 0x188   : > { %14326 = vst [vmem:[#allocation90_spill] sm:$0xff] %v11704_v50  ;;  %14327 = vst [vmem:[#allocation91_spill] sm:$0xff] %v11706_v7  ;;  %3425 = vperm.xlu1 %9690, %v2635_v8   ;;  %3420 = vperm.xlu0 %9689, %v2634_v34   ;;  %v1678_v40 = vpop.f32.mrb[48].mxu0  ;;  %v11720_v34 = vpop.f32.mrb[56].mxu1 }
 0x189   : > { %v1679_v41 = vadd.f32 %v1678_v40, %v10910_v14  ;;  %v1680_v38 = vpop.f32.mrb[49].mxu0  ;;  %v2201_v62 = vpack.c.bf16 %v2149_v35, %v2148_v46  ;;  %v2639_v14 = vld [vmem:[%s14231_s4 + $0x408] sm:$0xff]  ;;  %v2638_v46 = vld [vmem:[%s14231_s4 + $0x400] sm:$0xff]  ;;  %v11729_v35 = vpop.f32.mrb[57].mxu1 }
 0x18a   : > { %v1681_v8 = vpop.f32.mrb[50].mxu0 }
 0x18b   : > { %v11715_v22 = vpop.permute.xlu1 %3115  ;;  %v11717_v45 = vpop.permute.xlu0 %3110  ;;  %v1968_v9 = vadd.f32 %v11425_v26, %v1679_v41  ;;  %v1682_v18 = vadd.f32 %v1681_v8, %v10908_v13  ;;  %5701 = vmatpush1.bf16.msra.mxu0 %v2201_v62  ;;  %9657 = vmatpush1.bf16.msra.mxu1 %v2201_v62  ;;  %v2641_v62 = vld [vmem:[%s14231_s4 + $0x418] sm:$0xff]  ;;  %v2640_v8 = vld [vmem:[%s14231_s4 + $0x410] sm:$0xff] }
 0x18c   : > { %14328 = vst [vmem:[#allocation92_spill] sm:$0xff] %v11715_v22  ;;  %14329 = vst [vmem:[#allocation93_spill] sm:$0xff] %v11717_v45  ;;  %3435 = vperm.xlu1 %9690, %v2637_v56   ;;  %3430 = vperm.xlu0 %9689, %v2636_v59   ;;  %v1683_v50 = vpop.f32.mrb[51].mxu0  ;;  %v11733_v26 = vpop.f32.mrb[58].mxu1 }
 0x18d   : > { %5702 = vmatprep.subr.bf16.mxu0 %v14285_v4  ;;  %9642 = vmatprep.subr.bf16.mxu1 %v14285_v4  ;;  %v1971_v13 = vadd.f32 %v11436_v54, %v1682_v18  ;;  %v11740_v56 = vpop.f32.mrb[59].mxu1  ;;  %v2150_v59 = vmax.f32 %v1968_v9, 0.0 }
 0x18f   : > { %v11736_v50 = vpop.permute.xlu1 %3125  ;;  %v11738_v40 = vpop.permute.xlu0 %3120  ;;  %v2151_v41 = vmax.f32 %v1971_v13, 0.0 }
 0x190   : > { %14330 = vst [vmem:[#allocation94_spill] sm:$0xff] %v11736_v50  ;;  %14331 = vst [vmem:[#allocation95_spill] sm:$0xff] %v11738_v40  ;;  %3445 = vperm.xlu1 %9690, %v2639_v14   ;;  %3440 = vperm.xlu0 %9689, %v2638_v46   ;;  %v1686_v38 = vpop.f32.mrb[52].mxu0 }
 0x191   : > { %v1687_v54 = vadd.f32 %v1686_v38, %v10926_v24  ;;  %v1688_v18 = vpop.f32.mrb[53].mxu0  ;;  %v2202_v46 = vpack.c.bf16 %v2151_v41, %v2150_v59  ;;  %v2643_v24 = vld [vmem:[%s14231_s4 + $0x428] sm:$0xff]  ;;  %v2642_v38 = vld [vmem:[%s14231_s4 + $0x420] sm:$0xff] }
 0x192   : > { %v1689_v13 = vpop.f32.mrb[54].mxu0 }
 0x193   : > { %v11749_v50 = vpop.permute.xlu1 %3135  ;;  %v11751_v14 = vpop.permute.xlu0 %3130  ;;  %v1976_v9 = vadd.f32 %v11416_v23, %v1687_v54  ;;  %v1690_v40 = vadd.f32 %v1689_v13, %v10924_v21  ;;  %5703 = vmatpush1.bf16.msra.mxu0 %v2202_v46  ;;  %9658 = vmatpush1.bf16.msra.mxu1 %v2202_v46  ;;  %v2644_v54 = vld [vmem:[%s14231_s4 + $0x430] sm:$0xff] }
 0x194   : > { %14332 = vst [vmem:[#allocation96_spill] sm:$0xff] %v11749_v50  ;;  %14333 = vst [vmem:[#allocation97_spill] sm:$0xff] %v11751_v14  ;;  %3455 = vperm.xlu1 %9690, %v2641_v62   ;;  %3450 = vperm.xlu0 %9689, %v2640_v8   ;;  %v1691_v22 = vpop.f32.mrb[55].mxu0  ;;  %v2645_v8 = vld [vmem:[%s14231_s4 + $0x438] sm:$0xff] }
 0x195   : > { %5704 = vmatprep.subr.bf16.mxu0 %v14285_v4  ;;  %9643 = vmatprep.subr.bf16.mxu1 %v14285_v4  ;;  %v1979_v23 = vadd.f32 %v11428_v3, %v1690_v40  ;;  %v2152_v22 = vmax.f32 %v1976_v9, 0.0 }
 0x197   : > { %v11764_v59 = vpop.permute.xlu1 %3145  ;;  %v11766_v21 = vpop.permute.xlu0 %3140  ;;  %v2153_v41 = vmax.f32 %v1979_v23, 0.0 }
 0x198   : > { %14334 = vst [vmem:[#allocation98_spill] sm:$0xff] %v11764_v59  ;;  %14335 = vst [vmem:[#allocation99_spill] sm:$0xff] %v11766_v21  ;;  %3465 = vperm.xlu1 %9690, %v2643_v24   ;;  %3460 = vperm.xlu0 %9689, %v2642_v38   ;;  %v1694_v62 = vpop.f32.mrb[56].mxu0  ;;  %v11780_v38 = vpop.f32.mrb[60].mxu1 }
 0x199   : > { %v1695_v18 = vadd.f32 %v1694_v62, %v10942_v32  ;;  %v1696_v3 = vpop.f32.mrb[57].mxu0  ;;  %v2203_v13 = vpack.c.bf16 %v2153_v41, %v2152_v22  ;;  %v2647_v32 = vld [vmem:[%s14231_s4 + $0x448] sm:$0xff]  ;;  %v2646_v22 = vld [vmem:[%s14231_s4 + $0x440] sm:$0xff]  ;;  %v11789_v41 = vpop.f32.mrb[61].mxu1 }
 0x19a   : > { %v1697_v24 = vpop.f32.mrb[58].mxu0 }
 0x19b   : > { %v11775_v40 = vpop.permute.xlu1 %3155  ;;  %v11777_v46 = vpop.permute.xlu0 %3150  ;;  %v1984_v9 = vadd.f32 %v11465_v15, %v1695_v18  ;;  %v1698_v23 = vadd.f32 %v1697_v24, %v10940_v31  ;;  %5705 = vmatpush1.bf16.msra.mxu0 %v2203_v13  ;;  %9659 = vmatpush1.bf16.msra.mxu1 %v2203_v13  ;;  %v2649_v13 = vld [vmem:[%s14231_s4 + $0x458] sm:$0xff]  ;;  %v2648_v24 = vld [vmem:[%s14231_s4 + $0x450] sm:$0xff] }
 0x19c   : > { %14336 = vst [vmem:[#allocation100_spill] sm:$0xff] %v11775_v40  ;;  %14337 = vst [vmem:[#allocation101_spill] sm:$0xff] %v11777_v46  ;;  %3475 = vperm.xlu1 %9690, %v2645_v8   ;;  %3470 = vperm.xlu0 %9689, %v2644_v54   ;;  %v1699_v59 = vpop.f32.mrb[59].mxu0  ;;  %v11793_v15 = vpop.f32.mrb[62].mxu1  ;;  %v2760_v46 = vld [vmem:[%s14231_s4 + $0x7d0] sm:$0xff] }
 0x19d   : > { %5706 = vmatprep.subr.bf16.mxu0 %v14285_v4  ;;  %9644 = vmatprep.subr.bf16.mxu1 %v14285_v4  ;;  %v1987_v31 = vadd.f32 %v11476_v30, %v1698_v23  ;;  %v11800_v8 = vpop.f32.mrb[63].mxu1  ;;  %v2154_v54 = vmax.f32 %v1984_v9, 0.0 }
 0x19f   : > { %v11796_v59 = vpop.permute.xlu1 %3165  ;;  %v11798_v62 = vpop.permute.xlu0 %3160  ;;  %v2155_v18 = vmax.f32 %v1987_v31, 0.0 }
 0x1a0   : > { %14338 = vst [vmem:[#allocation102_spill] sm:$0xff] %v11796_v59  ;;  %14339 = vst [vmem:[#allocation103_spill] sm:$0xff] %v11798_v62  ;;  %3485 = vperm.xlu1 %9690, %v2647_v32   ;;  %3480 = vperm.xlu0 %9689, %v2646_v22   ;;  %v1702_v3 = vpop.f32.mrb[60].mxu0 }
 0x1a1   : > { %v1703_v30 = vadd.f32 %v1702_v3, %v10958_v42  ;;  %v1704_v23 = vpop.f32.mrb[61].mxu0  ;;  %v2204_v22 = vpack.c.bf16 %v2155_v18, %v2154_v54  ;;  %v2651_v42 = vld [vmem:[%s14231_s4 + $0x468] sm:$0xff]  ;;  %v2650_v3 = vld [vmem:[%s14231_s4 + $0x460] sm:$0xff] }
 0x1a2   : > { %v1705_v31 = vpop.f32.mrb[62].mxu0 }
 0x1a3   : > { %v11809_v59 = vpop.permute.xlu1 %3175  ;;  %v11811_v32 = vpop.permute.xlu0 %3170  ;;  %v1992_v9 = vadd.f32 %v11456_v29, %v1703_v30  ;;  %v1706_v62 = vadd.f32 %v1705_v31, %v10956_v39  ;;  %5707 = vmatpush1.bf16.msra.mxu0 %v2204_v22  ;;  %9660 = vmatpush1.bf16.msra.mxu1 %v2204_v22  ;;  %v2652_v30 = vld [vmem:[%s14231_s4 + $0x470] sm:$0xff] }
 0x1a4   : > { %14340 = vst [vmem:[#allocation104_spill] sm:$0xff] %v11809_v59  ;;  %14341 = vst [vmem:[#allocation105_spill] sm:$0xff] %v11811_v32  ;;  %3495 = vperm.xlu1 %9690, %v2649_v13   ;;  %3490 = vperm.xlu0 %9689, %v2648_v24   ;;  %v1707_v40 = vpop.f32.mrb[63].mxu0  ;;  %v2653_v24 = vld [vmem:[%s14231_s4 + $0x478] sm:$0xff]  ;;  %v2756_v59 = vld [vmem:[%s14231_s4 + $0x7b0] sm:$0xff] }
 0x1a5   : > { %5708 = vmatprep.subr.bf16.mxu0 %v14285_v4  ;;  %9645 = vmatprep.subr.bf16.mxu1 %v14285_v4  ;;  %v1995_v29 = vadd.f32 %v11468_v1, %v1706_v62  ;;  %v2156_v40 = vmax.f32 %v1992_v9, 0.0  ;;  %v2761_v32 = vld [vmem:[%s14231_s4 + $0x7d8] sm:$0xff] }
 0x1a7   : > { %v11824_v54 = vpop.permute.xlu1 %3185  ;;  %v11826_v39 = vpop.permute.xlu0 %3180  ;;  %v2157_v18 = vmax.f32 %v1995_v29, 0.0  ;;  %v2655_v29 = vld [vmem:[%s14231_s4 + $0x488] sm:$0xff] }
 0x1a8   : > { %14342 = vst [vmem:[#allocation106_spill] sm:$0xff] %v11824_v54  ;;  %14343 = vst [vmem:[#allocation107_spill] sm:$0xff] %v11826_v39  ;;  %3505 = vperm.xlu1 %9690, %v2651_v42   ;;  %3500 = vperm.xlu0 %9689, %v2650_v3   ;;  %v1710_v13 = vpop.f32.mrb[64].mxu0  ;;  %v9843_v42 = vld [vmem:[%s14230_s3] ss:$8 sps:$4 sm:$0xff]   ;;  %v2752_v54 = vld [vmem:[%s14231_s4 + $0x790] sm:$0xff] }
 0x1a9   : > { %v1711_v4 = vadd.f32 %v1710_v13, %v10968_v48  ;;  %v1712_v1 = vpop.f32.mrb[65].mxu0  ;;  %v2205_v22 = vpack.c.bf16 %v2157_v18, %v2156_v40  ;;  %v9846_v48 = vld [vmem:[%s14230_s3 + $0x3d0] ss:$8 sps:$4 sm:$0xff]   ;;  %v9849_v18 = vld [vmem:[%s14230_s3 + $0x14] ss:$8 sps:$4 sm:$0xff]  }
 0x1aa   : > { %v1713_v9 = vpop.f32.mrb[66].mxu0  ;;  %v2757_v39 = vld [vmem:[%s14231_s4 + $0x7b8] sm:$0xff] }
 0x1ab   : > { %v11835_v62 = vpop.permute.xlu1 %3195  ;;  %v11837_v23 = vpop.permute.xlu0 %3190  ;;  %v2000_v31 = vadd.f32 %v11499_v61, %v1711_v4  ;;  %v1714_v3 = vadd.f32 %v1713_v9, %v10966_v47  ;;  %5709 = vmatpush1.bf16.msra.mxu0 %v2205_v22  ;;  %9661 = vmatpush1.bf16.msra.mxu1 %v2205_v22  ;;  %v2654_v61 = vld [vmem:[%s14231_s4 + $0x480] sm:$0xff]  ;;  %v2657_v9 = vld [vmem:[%s14231_s4 + $0x498] sm:$0xff] }
 0x1ac   : > { %14344 = vst [vmem:[#allocation108_spill] sm:$0xff] %v11835_v62  ;;  %14345 = vst [vmem:[#allocation109_spill] sm:$0xff] %v11837_v23  ;;  %3515 = vperm.xlu1 %9690, %v2653_v24   ;;  %3510 = vperm.xlu0 %9689, %v2652_v30   ;;  %v1715_v40 = vpop.f32.mrb[67].mxu0  ;;  %v9851_v47 = vld [vmem:[%s14230_s3 + $0x3e4] ss:$8 sps:$4 sm:$0xff]   ;;  %v2753_v23 = vld [vmem:[%s14231_s4 + $0x798] sm:$0xff] }
 0x1ad   : > { %v2003_v13 = vadd.f32 %v11510_v17, %v1714_v3  ;;  %v2158_v4 = vmax.f32 %v2000_v31, 0.0  ;;  %v2656_v40 = vld [vmem:[%s14231_s4 + $0x490] sm:$0xff] }
 0x1ae   : > { %5711 = vmatmul.mubr.bf16.vlgmr.msra.gmra.mrb[128].mxu0 %v9843_v42  ;;  %6199 = vmatmul.mubr.bf16.vlgmr.msra.gmra.mrb[64].mxu1 %v9846_v48 }
 0x1af   : > { %v11860_v24 = vpop.permute.xlu1 %3205  ;;  %v11862_v30 = vpop.permute.xlu0 %3200  ;;  %v2159_v1 = vmax.f32 %v2003_v13, 0.0  ;;  %5718 = vmatprep.mubr.bf16.mxu0 %v9849_v18  ;;  %6206 = vmatprep.mubr.bf16.mxu1 %v9851_v47  ;;  %v9853_v13 = vld [vmem:[%s14230_s3 + $0x10] ss:$8 sps:$4 sm:$0xff]   ;;  %v2659_v18 = vld [vmem:[%s14231_s4 + $0x4a8] sm:$0xff]  ;;  %v2658_v47 = vld [vmem:[%s14231_s4 + $0x4a0] sm:$0xff] }
 0x1b0   : > { %14346 = vst [vmem:[#allocation110_spill] sm:$0xff] %v11860_v24  ;;  %14347 = vst [vmem:[#allocation111_spill] sm:$0xff] %v11862_v30  ;;  %3525 = vperm.xlu1 %9690, %v2655_v29   ;;  %3520 = vperm.xlu0 %9689, %v2654_v61   ;;  %v1718_v22 = vpop.f32.mrb[68].mxu0  ;;  %v2748_v24 = vld [vmem:[%s14231_s4 + $0x770] sm:$0xff] }
 0x1b1   : > { %v1719_v17 = vadd.f32 %v1718_v22, %v10984_v58  ;;  %v1720_v3 = vpop.f32.mrb[69].mxu0  ;;  %v11871_v29 = vpack.c.bf16 %v2159_v1, %v2158_v4  ;;  %v9855_v1 = vld [vmem:[%s14230_s3 + $0x24] ss:$8 sps:$4 sm:$0xff]  }
 0x1b2   : > { %v1721_v61 = vpop.f32.mrb[70].mxu0 }
 0x1b3   : > { %v11873_v31 = vpop.permute.xlu1 %3215  ;;  %v11875_v42 = vpop.permute.xlu0 %3210  ;;  %v2008_v48 = vadd.f32 %v11490_v28, %v1719_v17  ;;  %v1722_v58 = vadd.f32 %v1721_v61, %v10982_v55  ;;  %v9854_v28 = vld [vmem:[%s14230_s3 + $0x3e0] ss:$8 sps:$4 sm:$0xff]   ;;  %v9857_v55 = vld [vmem:[%s14230_s3 + $0x3f4] ss:$8 sps:$4 sm:$0xff]  }
 0x1b4   : > { %14348 = vst [vmem:[#allocation112_spill] sm:$0xff] %v11873_v31  ;;  %14349 = vst [vmem:[#allocation113_spill] sm:$0xff] %v11875_v42  ;;  %3535 = vperm.xlu1 %9690, %v2657_v9   ;;  %3530 = vperm.xlu0 %9689, %v2656_v40   ;;  %v1723_v4 = vpop.f32.mrb[71].mxu0  ;;  %v2660_v31 = vld [vmem:[%s14231_s4 + $0x4b0] sm:$0xff]  ;;  %v2747_v42 = vld [vmem:[%s14231_s4 + $0x768] sm:$0xff] }
 0x1b5   : > { %v2011_v22 = vadd.f32 %v11503_v2, %v1722_v58  ;;  %v2160_v17 = vmax.f32 %v2008_v48, 0.0  ;;  %v2661_v4 = vld [vmem:[%s14231_s4 + $0x4b8] sm:$0xff]  ;;  %v14352_v2 = vld [vmem:[#allocation3_spill] sm:$0xff] }
 0x1b6   : > { %5719 = vmatmul.mubr.bf16.gmra.mrb[132].mxu0 %v9853_v13  ;;  %6207 = vmatmul.mubr.bf16.gmra.mrb[68].mxu1 %v9854_v28 }
 0x1b7   : > { %v11898_v9 = vpop.permute.xlu1 %3225  ;;  %v11900_v40 = vpop.permute.xlu0 %3220  ;;  %v2161_v3 = vmax.f32 %v2011_v22, 0.0  ;;  %5726 = vmatprep.mubr.bf16.mxu0 %v9855_v1  ;;  %6214 = vmatprep.mubr.bf16.mxu1 %v9857_v55  ;;  %v9859_v22 = vld [vmem:[%s14230_s3 + $0x20] ss:$8 sps:$4 sm:$0xff]  }
 0x1b8   : > { %14350 = vst [vmem:[#allocation114_spill] sm:$0xff] %v11898_v9  ;;  %14351 = vst [vmem:[#allocation115_spill] sm:$0xff] %v11900_v40  ;;  %3545 = vperm.xlu1 %9690, %v2659_v18   ;;  %3540 = vperm.xlu0 %9689, %v2658_v47   ;;  %v1726_v61 = vpop.f32.mrb[72].mxu0  ;;  %v14355_v40 = vld [vmem:[#allocation2_spill] sm:$0xff]  ;;  %v2663_v1 = vld [vmem:[%s14231_s4 + $0x4c8] sm:$0xff] }
 0x1b9   : > { %v1727_v58 = vadd.f32 %v1726_v61, %v14352_v2  ;;  %v1728_v9 = vpop.f32.mrb[73].mxu0  ;;  %v11913_v13 = vpack.c.bf16 %v2161_v3, %v2160_v17  ;;  %v2662_v55 = vld [vmem:[%s14231_s4 + $0x4c0] sm:$0xff] }
 0x1ba   : > { %v1729_v47 = vpop.f32.mrb[74].mxu0 }
 0x1bb   : > { %v11909_v18 = vpop.permute.xlu1 %3235  ;;  %v11911_v48 = vpop.permute.xlu0 %3230  ;;  %v2016_v28 = vadd.f32 %v11533_v16, %v1727_v58  ;;  %v1730_v61 = vadd.f32 %v1729_v47, %v14355_v40  ;;  %v9861_v16 = vld [vmem:[%s14230_s3 + $0x34] ss:$8 sps:$4 sm:$0xff]   ;;  %v9863_v40 = vld [vmem:[%s14230_s3 + $0x404] ss:$8 sps:$4 sm:$0xff]  }
 0x1bc   : > { %14353 = vst [vmem:[#allocation3_spill] sm:$0xff] %v11909_v18  ;;  %14354 = vst [vmem:[#allocation116_spill] sm:$0xff] %v11911_v48  ;;  %3555 = vperm.xlu1 %9690, %v2661_v4   ;;  %3550 = vperm.xlu0 %9689, %v2660_v31   ;;  %v9860_v31 = vld [vmem:[%s14230_s3 + $0x3f0] ss:$8 sps:$4 sm:$0xff]   ;;  %v1731_v9 = vpop.f32.mrb[75].mxu0 }
 0x1bd   : > { %v2019_v17 = vadd.f32 %v11544_v27, %v1730_v61  ;;  %v2162_v2 = vmax.f32 %v2016_v28, 0.0  ;;  %v2665_v9 = vld [vmem:[%s14231_s4 + $0x4d8] sm:$0xff]  ;;  %v2664_v18 = vld [vmem:[%s14231_s4 + $0x4d0] sm:$0xff] }
 0x1be   : > { %5727 = vmatmul.mubr.bf16.gmra.mrb[136].mxu0 %v9859_v22  ;;  %6215 = vmatmul.mubr.bf16.gmra.mrb[72].mxu1 %v9860_v31  ;;  %v14358_v27 = vld [vmem:[#allocation5_spill] sm:$0xff]  ;;  %v2744_v48 = vld [vmem:[%s14231_s4 + $0x750] sm:$0xff] }
 0x1bf   : > { %v11936_v3 = vpop.permute.xlu1 %3245  ;;  %v11938_v4 = vpop.permute.xlu0 %3240  ;;  %v2163_v58 = vmax.f32 %v2019_v17, 0.0  ;;  %5734 = vmatprep.mubr.bf16.mxu0 %v9861_v16  ;;  %6222 = vmatprep.mubr.bf16.mxu1 %v9863_v40  ;;  %v9865_v17 = vld [vmem:[%s14230_s3 + $0x30] ss:$8 sps:$4 sm:$0xff]   ;;  %v2667_v16 = vld [vmem:[%s14231_s4 + $0x4e8] sm:$0xff]  ;;  %v2666_v40 = vld [vmem:[%s14231_s4 + $0x4e0] sm:$0xff] }
 0x1c0   : > { %14356 = vst [vmem:[#allocation2_spill] sm:$0xff] %v11936_v3  ;;  %14357 = vst [vmem:[#allocation117_spill] sm:$0xff] %v11938_v4  ;;  %3565 = vperm.xlu1 %9690, %v2663_v1   ;;  %3560 = vperm.xlu0 %9689, %v2662_v55   ;;  %v1734_v47 = vpop.f32.mrb[76].mxu0  ;;  %v14361_v4 = vld [vmem:[#allocation4_spill] sm:$0xff] }
 0x1c1   : > { %v1735_v61 = vadd.f32 %v1734_v47, %v14358_v27  ;;  %v1736_v3 = vpop.f32.mrb[77].mxu0  ;;  %v11947_v1 = vpack.c.bf16 %v2163_v58, %v2162_v2 }
 0x1c2   : > { %v1737_v31 = vpop.f32.mrb[78].mxu0  ;;  %v9867_v3 = vld [vmem:[%s14230_s3 + $0x44] ss:$8 sps:$4 sm:$0xff]  }
 0x1c3   : > { %v11949_v28 = vpop.permute.xlu1 %3255  ;;  %v11951_v22 = vpop.permute.xlu0 %3250  ;;  %v2024_v55 = vadd.f32 %v11524_v37, %v1735_v61  ;;  %v1738_v47 = vadd.f32 %v1737_v31, %v14361_v4  ;;  %v9866_v37 = vld [vmem:[%s14230_s3 + $0x400] ss:$8 sps:$4 sm:$0xff]   ;;  %v9869_v4 = vld [vmem:[%s14230_s3 + $0x414] ss:$8 sps:$4 sm:$0xff]  }
 0x1c4   : > { %14359 = vst [vmem:[#allocation5_spill] sm:$0xff] %v11949_v28  ;;  %14360 = vst [vmem:[#allocation118_spill] sm:$0xff] %v11951_v22  ;;  %3575 = vperm.xlu1 %9690, %v2665_v9   ;;  %3570 = vperm.xlu0 %9689, %v2664_v18   ;;  %v1739_v18 = vpop.f32.mrb[79].mxu0  ;;  %v2668_v28 = vld [vmem:[%s14231_s4 + $0x4f0] sm:$0xff]  ;;  %v2745_v22 = vld [vmem:[%s14231_s4 + $0x758] sm:$0xff] }
 0x1c5   : > { %v2027_v2 = vadd.f32 %v11537_v60, %v1738_v47  ;;  %v2164_v27 = vmax.f32 %v2024_v55, 0.0  ;;  %v2669_v18 = vld [vmem:[%s14231_s4 + $0x4f8] sm:$0xff]  ;;  %v14364_v60 = vld [vmem:[#allocation7_spill] sm:$0xff] }
 0x1c6   : > { %5735 = vmatmul.mubr.bf16.gmra.mrb[140].mxu0 %v9865_v17  ;;  %6223 = vmatmul.mubr.bf16.gmra.mrb[76].mxu1 %v9866_v37 }
 0x1c7   : > { %v11974_v58 = vpop.permute.xlu1 %3265  ;;  %v11976_v9 = vpop.permute.xlu0 %3260  ;;  %v2165_v61 = vmax.f32 %v2027_v2, 0.0  ;;  %5742 = vmatprep.mubr.bf16.mxu0 %v9867_v3  ;;  %6230 = vmatprep.mubr.bf16.mxu1 %v9869_v4  ;;  %v9871_v2 = vld [vmem:[%s14230_s3 + $0x40] ss:$8 sps:$4 sm:$0xff]  }
 0x1c8   : > { %14362 = vst [vmem:[#allocation4_spill] sm:$0xff] %v11974_v58  ;;  %14363 = vst [vmem:[#allocation119_spill] sm:$0xff] %v11976_v9  ;;  %3585 = vperm.xlu1 %9690, %v2667_v16   ;;  %3580 = vperm.xlu0 %9689, %v2666_v40   ;;  %v1742_v31 = vpop.f32.mrb[80].mxu0  ;;  %v14367_v9 = vld [vmem:[#allocation6_spill] sm:$0xff]  ;;  %v2671_v3 = vld [vmem:[%s14231_s4 + $0x508] sm:$0xff] }
 0x1c9   : > { %v1743_v47 = vadd.f32 %v1742_v31, %v14364_v60  ;;  %v1744_v58 = vpop.f32.mrb[81].mxu0  ;;  %v11989_v17 = vpack.c.bf16 %v2165_v61, %v2164_v27  ;;  %v2670_v4 = vld [vmem:[%s14231_s4 + $0x500] sm:$0xff] }
 0x1ca   : > { %v1745_v40 = vpop.f32.mrb[82].mxu0 }
 0x1cb   : > { %v11985_v16 = vpop.permute.xlu1 %3275  ;;  %v11987_v55 = vpop.permute.xlu0 %3270  ;;  %v2032_v37 = vadd.f32 %v11567_v53, %v1743_v47  ;;  %v1746_v31 = vadd.f32 %v1745_v40, %v14367_v9  ;;  %v9873_v53 = vld [vmem:[%s14230_s3 + $0x54] ss:$8 sps:$4 sm:$0xff]   ;;  %v9875_v9 = vld [vmem:[%s14230_s3 + $0x424] ss:$8 sps:$4 sm:$0xff]  }
 0x1cc   : > { %14365 = vst [vmem:[#allocation7_spill] sm:$0xff] %v11985_v16  ;;  %14366 = vst [vmem:[#allocation120_spill] sm:$0xff] %v11987_v55  ;;  %3595 = vperm.xlu1 %9690, %v2669_v18   ;;  %3590 = vperm.xlu0 %9689, %v2668_v28   ;;  %v9872_v28 = vld [vmem:[%s14230_s3 + $0x410] ss:$8 sps:$4 sm:$0xff]   ;;  %v1747_v58 = vpop.f32.mrb[83].mxu0 }
 0x1cd   : > { %v2035_v27 = vadd.f32 %v11578_v52, %v1746_v31  ;;  %v2166_v60 = vmax.f32 %v2032_v37, 0.0  ;;  %v2673_v58 = vld [vmem:[%s14231_s4 + $0x518] sm:$0xff]  ;;  %v2672_v16 = vld [vmem:[%s14231_s4 + $0x510] sm:$0xff] }
 0x1ce   : > { %5743 = vmatmul.mubr.bf16.gmra.mrb[144].mxu0 %v9871_v2  ;;  %6231 = vmatmul.mubr.bf16.gmra.mrb[80].mxu1 %v9872_v28  ;;  %v14370_v52 = vld [vmem:[#allocation9_spill] sm:$0xff]  ;;  %v2740_v55 = vld [vmem:[%s14231_s4 + $0x730] sm:$0xff] }
 0x1cf   : > { %v12012_v61 = vpop.permute.xlu1 %3285  ;;  %v12014_v18 = vpop.permute.xlu0 %3280  ;;  %v2167_v47 = vmax.f32 %v2035_v27, 0.0  ;;  %5750 = vmatprep.mubr.bf16.mxu0 %v9873_v53  ;;  %6238 = vmatprep.mubr.bf16.mxu1 %v9875_v9  ;;  %v9877_v27 = vld [vmem:[%s14230_s3 + $0x50] ss:$8 sps:$4 sm:$0xff]   ;;  %v2675_v53 = vld [vmem:[%s14231_s4 + $0x528] sm:$0xff]  ;;  %v2674_v9 = vld [vmem:[%s14231_s4 + $0x520] sm:$0xff] }
 0x1d0   : > { %14368 = vst [vmem:[#allocation6_spill] sm:$0xff] %v12012_v61  ;;  %14369 = vst [vmem:[#allocation121_spill] sm:$0xff] %v12014_v18  ;;  %3605 = vperm.xlu1 %9690, %v2671_v3   ;;  %3600 = vperm.xlu0 %9689, %v2670_v4   ;;  %v1750_v40 = vpop.f32.mrb[84].mxu0  ;;  %v14373_v18 = vld [vmem:[#allocation8_spill] sm:$0xff] }
 0x1d1   : > { %v1751_v31 = vadd.f32 %v1750_v40, %v14370_v52  ;;  %v1752_v61 = vpop.f32.mrb[85].mxu0  ;;  %v12023_v3 = vpack.c.bf16 %v2167_v47, %v2166_v60 }
 0x1d2   : > { %v1753_v28 = vpop.f32.mrb[86].mxu0  ;;  %v9879_v61 = vld [vmem:[%s14230_s3 + $0x64] ss:$8 sps:$4 sm:$0xff]  }
 0x1d3   : > { %v12025_v37 = vpop.permute.xlu1 %3295  ;;  %v12027_v2 = vpop.permute.xlu0 %3290  ;;  %v2040_v4 = vadd.f32 %v11558_v11, %v1751_v31  ;;  %v1754_v40 = vadd.f32 %v1753_v28, %v14373_v18  ;;  %v9878_v11 = vld [vmem:[%s14230_s3 + $0x420] ss:$8 sps:$4 sm:$0xff]   ;;  %v9881_v18 = vld [vmem:[%s14230_s3 + $0x434] ss:$8 sps:$4 sm:$0xff]  }
 0x1d4   : > { %14371 = vst [vmem:[#allocation9_spill] sm:$0xff] %v12025_v37  ;;  %14372 = vst [vmem:[#allocation122_spill] sm:$0xff] %v12027_v2  ;;  %3615 = vperm.xlu1 %9690, %v2673_v58   ;;  %3610 = vperm.xlu0 %9689, %v2672_v16   ;;  %v1755_v16 = vpop.f32.mrb[87].mxu0  ;;  %v2676_v37 = vld [vmem:[%s14231_s4 + $0x530] sm:$0xff]  ;;  %v2741_v2 = vld [vmem:[%s14231_s4 + $0x738] sm:$0xff] }
 0x1d5   : > { %v2043_v60 = vadd.f32 %v11571_v25, %v1754_v40  ;;  %v2168_v52 = vmax.f32 %v2040_v4, 0.0  ;;  %v2677_v16 = vld [vmem:[%s14231_s4 + $0x538] sm:$0xff]  ;;  %v14376_v25 = vld [vmem:[#allocation11_spill] sm:$0xff] }
 0x1d6   : > { %5751 = vmatmul.mubr.bf16.gmra.mrb[148].mxu0 %v9877_v27  ;;  %6239 = vmatmul.mubr.bf16.gmra.mrb[84].mxu1 %v9878_v11 }
 0x1d7   : > { %v12050_v47 = vpop.permute.xlu1 %3305  ;;  %v12052_v58 = vpop.permute.xlu0 %3300  ;;  %v2169_v31 = vmax.f32 %v2043_v60, 0.0  ;;  %5758 = vmatprep.mubr.bf16.mxu0 %v9879_v61  ;;  %6246 = vmatprep.mubr.bf16.mxu1 %v9881_v18  ;;  %v9883_v60 = vld [vmem:[%s14230_s3 + $0x60] ss:$8 sps:$4 sm:$0xff]  }
 0x1d8   : > { %14374 = vst [vmem:[#allocation8_spill] sm:$0xff] %v12050_v47  ;;  %14375 = vst [vmem:[#allocation123_spill] sm:$0xff] %v12052_v58  ;;  %3625 = vperm.xlu1 %9690, %v2675_v53   ;;  %3620 = vperm.xlu0 %9689, %v2674_v9   ;;  %v1758_v28 = vpop.f32.mrb[88].mxu0  ;;  %v14379_v58 = vld [vmem:[#allocation10_spill] sm:$0xff]  ;;  %v2679_v61 = vld [vmem:[%s14231_s4 + $0x548] sm:$0xff] }
 0x1d9   : > { %v1759_v40 = vadd.f32 %v1758_v28, %v14376_v25  ;;  %v1760_v47 = vpop.f32.mrb[89].mxu0  ;;  %v12065_v27 = vpack.c.bf16 %v2169_v31, %v2168_v52  ;;  %v2678_v18 = vld [vmem:[%s14231_s4 + $0x540] sm:$0xff] }
 0x1da   : > { %v1761_v9 = vpop.f32.mrb[90].mxu0 }
 0x1db   : > { %v12061_v53 = vpop.permute.xlu1 %3315  ;;  %v12063_v4 = vpop.permute.xlu0 %3310  ;;  %v2048_v11 = vadd.f32 %v11601_v43, %v1759_v40  ;;  %v1762_v28 = vadd.f32 %v1761_v9, %v14379_v58  ;;  %v9885_v43 = vld [vmem:[%s14230_s3 + $0x74] ss:$8 sps:$4 sm:$0xff]   ;;  %v9887_v58 = vld [vmem:[%s14230_s3 + $0x444] ss:$8 sps:$4 sm:$0xff]  }
 0x1dc   : > { %14377 = vst [vmem:[#allocation11_spill] sm:$0xff] %v12061_v53  ;;  %14378 = vst [vmem:[#allocation124_spill] sm:$0xff] %v12063_v4  ;;  %3635 = vperm.xlu1 %9690, %v2677_v16   ;;  %3630 = vperm.xlu0 %9689, %v2676_v37   ;;  %v9884_v37 = vld [vmem:[%s14230_s3 + $0x430] ss:$8 sps:$4 sm:$0xff]   ;;  %v1763_v47 = vpop.f32.mrb[91].mxu0 }
 0x1dd   : > { %v2051_v52 = vadd.f32 %v11612_v10, %v1762_v28  ;;  %v2170_v25 = vmax.f32 %v2048_v11, 0.0  ;;  %v2681_v47 = vld [vmem:[%s14231_s4 + $0x558] sm:$0xff]  ;;  %v2680_v53 = vld [vmem:[%s14231_s4 + $0x550] sm:$0xff] }
 0x1de   : > { %5759 = vmatmul.mubr.bf16.gmra.mrb[152].mxu0 %v9883_v60  ;;  %6247 = vmatmul.mubr.bf16.gmra.mrb[88].mxu1 %v9884_v37  ;;  %v14382_v10 = vld [vmem:[#allocation13_spill] sm:$0xff] }
 0x1df   : > { %v12088_v31 = vpop.permute.xlu1 %3325  ;;  %v12090_v16 = vpop.permute.xlu0 %3320  ;;  %v2171_v40 = vmax.f32 %v2051_v52, 0.0  ;;  %5766 = vmatprep.mubr.bf16.mxu0 %v9885_v43  ;;  %6254 = vmatprep.mubr.bf16.mxu1 %v9887_v58  ;;  %v9889_v52 = vld [vmem:[%s14230_s3 + $0x70] ss:$8 sps:$4 sm:$0xff]   ;;  %v2683_v43 = vld [vmem:[%s14231_s4 + $0x568] sm:$0xff]  ;;  %v2682_v58 = vld [vmem:[%s14231_s4 + $0x560] sm:$0xff] }
 0x1e0   : > { %14380 = vst [vmem:[#allocation10_spill] sm:$0xff] %v12088_v31  ;;  %14381 = vst [vmem:[#allocation125_spill] sm:$0xff] %v12090_v16  ;;  %3645 = vperm.xlu1 %9690, %v2679_v61   ;;  %3640 = vperm.xlu0 %9689, %v2678_v18   ;;  %v1766_v9 = vpop.f32.mrb[92].mxu0  ;;  %v14385_v16 = vld [vmem:[#allocation12_spill] sm:$0xff] }
 0x1e1   : > { %v1767_v28 = vadd.f32 %v1766_v9, %v14382_v10  ;;  %v1768_v31 = vpop.f32.mrb[93].mxu0  ;;  %v12099_v61 = vpack.c.bf16 %v2171_v40, %v2170_v25 }
 0x1e2   : > { %v1769_v37 = vpop.f32.mrb[94].mxu0  ;;  %v9891_v31 = vld [vmem:[%s14230_s3 + $0x84] ss:$8 sps:$4 sm:$0xff]  }
 0x1e3   : > { %v12101_v11 = vpop.permute.xlu1 %3335  ;;  %v12103_v60 = vpop.permute.xlu0 %3330  ;;  %v2056_v18 = vadd.f32 %v11592_v44, %v1767_v28  ;;  %v1770_v9 = vadd.f32 %v1769_v37, %v14385_v16  ;;  %v9890_v44 = vld [vmem:[%s14230_s3 + $0x440] ss:$8 sps:$4 sm:$0xff]   ;;  %v9893_v16 = vld [vmem:[%s14230_s3 + $0x454] ss:$8 sps:$4 sm:$0xff]  }
 0x1e4   : > { %14383 = vst [vmem:[#allocation13_spill] sm:$0xff] %v12101_v11  ;;  %14384 = vst [vmem:[#allocation126_spill] sm:$0xff] %v12103_v60  ;;  %3655 = vperm.xlu1 %9690, %v2681_v47   ;;  %3650 = vperm.xlu0 %9689, %v2680_v53   ;;  %v1771_v53 = vpop.f32.mrb[95].mxu0  ;;  %v2684_v11 = vld [vmem:[%s14231_s4 + $0x570] sm:$0xff] }
 0x1e5   : > { %v2059_v25 = vadd.f32 %v11605_v19, %v1770_v9  ;;  %v2172_v10 = vmax.f32 %v2056_v18, 0.0  ;;  %v2685_v53 = vld [vmem:[%s14231_s4 + $0x578] sm:$0xff]  ;;  %v14388_v19 = vld [vmem:[#allocation15_spill] sm:$0xff] }
 0x1e6   : > { %5767 = vmatmul.mubr.bf16.gmra.mrb[156].mxu0 %v9889_v52  ;;  %6255 = vmatmul.mubr.bf16.gmra.mrb[92].mxu1 %v9890_v44 }
 0x1e7   : > { %v12126_v40 = vpop.permute.xlu1 %3345  ;;  %v12128_v47 = vpop.permute.xlu0 %3340  ;;  %v2173_v28 = vmax.f32 %v2059_v25, 0.0  ;;  %5774 = vmatprep.mubr.bf16.mxu0 %v9891_v31  ;;  %6262 = vmatprep.mubr.bf16.mxu1 %v9893_v16  ;;  %v9895_v25 = vld [vmem:[%s14230_s3 + $0x80] ss:$8 sps:$4 sm:$0xff]  }
 0x1e8   : > { %14386 = vst [vmem:[#allocation12_spill] sm:$0xff] %v12126_v40  ;;  %14387 = vst [vmem:[#allocation127_spill] sm:$0xff] %v12128_v47  ;;  %3665 = vperm.xlu1 %9690, %v2683_v43   ;;  %3660 = vperm.xlu0 %9689, %v2682_v58   ;;  %v1774_v37 = vpop.f32.mrb[96].mxu0  ;;  %v14391_v47 = vld [vmem:[#allocation14_spill] sm:$0xff]  ;;  %v2687_v31 = vld [vmem:[%s14231_s4 + $0x588] sm:$0xff] }
 0x1e9   : > { %v1775_v9 = vadd.f32 %v1774_v37, %v14388_v19  ;;  %v1776_v40 = vpop.f32.mrb[97].mxu0  ;;  %v12141_v52 = vpack.c.bf16 %v2173_v28, %v2172_v10  ;;  %v2686_v16 = vld [vmem:[%s14231_s4 + $0x580] sm:$0xff] }
 0x1ea   : > { %v1777_v58 = vpop.f32.mrb[98].mxu0 }
 0x1eb   : > { %v12137_v43 = vpop.permute.xlu1 %3355  ;;  %v12139_v18 = vpop.permute.xlu0 %3350  ;;  %v2064_v44 = vadd.f32 %v11635_v49, %v1775_v9  ;;  %v1778_v37 = vadd.f32 %v1777_v58, %v14391_v47  ;;  %v9897_v49 = vld [vmem:[%s14230_s3 + $0x94] ss:$8 sps:$4 sm:$0xff]   ;;  %v9899_v47 = vld [vmem:[%s14230_s3 + $0x464] ss:$8 sps:$4 sm:$0xff]  }
 0x1ec   : > { %14389 = vst [vmem:[#allocation15_spill] sm:$0xff] %v12137_v43  ;;  %14390 = vst [vmem:[#allocation128_spill] sm:$0xff] %v12139_v18  ;;  %3675 = vperm.xlu1 %9690, %v2685_v53   ;;  %3670 = vperm.xlu0 %9689, %v2684_v11   ;;  %v9896_v11 = vld [vmem:[%s14230_s3 + $0x450] ss:$8 sps:$4 sm:$0xff]   ;;  %v1779_v40 = vpop.f32.mrb[99].mxu0 }
 0x1ed   : > { %v2067_v10 = vadd.f32 %v11646_v20, %v1778_v37  ;;  %v2174_v19 = vmax.f32 %v2064_v44, 0.0  ;;  %v2689_v40 = vld [vmem:[%s14231_s4 + $0x598] sm:$0xff]  ;;  %v2688_v43 = vld [vmem:[%s14231_s4 + $0x590] sm:$0xff] }
 0x1ee   : > { %5775 = vmatmul.mubr.bf16.gmra.mrb[160].mxu0 %v9895_v25  ;;  %6263 = vmatmul.mubr.bf16.gmra.mrb[96].mxu1 %v9896_v11  ;;  %v14394_v20 = vld [vmem:[#allocation17_spill] sm:$0xff] }
 0x1ef   : > { %v12164_v28 = vpop.permute.xlu1 %3365  ;;  %v12166_v53 = vpop.permute.xlu0 %3360  ;;  %v2175_v9 = vmax.f32 %v2067_v10, 0.0  ;;  %5782 = vmatprep.mubr.bf16.mxu0 %v9897_v49  ;;  %6270 = vmatprep.mubr.bf16.mxu1 %v9899_v47  ;;  %v2691_v10 = vld [vmem:[%s14231_s4 + $0x5a8] sm:$0xff]  ;;  %v2690_v49 = vld [vmem:[%s14231_s4 + $0x5a0] sm:$0xff]  ;;  %v9901_v47 = vld [vmem:[%s14230_s3 + $0x90] ss:$8 sps:$4 sm:$0xff]  }
 0x1f0   : > { %14392 = vst [vmem:[#allocation14_spill] sm:$0xff] %v12164_v28  ;;  %14393 = vst [vmem:[#allocation129_spill] sm:$0xff] %v12166_v53  ;;  %3685 = vperm.xlu1 %9690, %v2687_v31   ;;  %3680 = vperm.xlu0 %9689, %v2686_v16   ;;  %v1782_v58 = vpop.f32.mrb[100].mxu0  ;;  %v14397_v53 = vld [vmem:[#allocation16_spill] sm:$0xff] }
 0x1f1   : > { %v1783_v37 = vadd.f32 %v1782_v58, %v14394_v20  ;;  %v1784_v28 = vpop.f32.mrb[101].mxu0  ;;  %v2214_v25 = vpack.c.bf16 %v2175_v9, %v2174_v19  ;;  %v2692_v20 = vld [vmem:[%s14231_s4 + $0x5b0] sm:$0xff] }
 0x1f2   : > { %v1785_v11 = vpop.f32.mrb[102].mxu0  ;;  %v9903_v28 = vld [vmem:[%s14230_s3 + $0xa4] ss:$8 sps:$4 sm:$0xff]  }
 0x1f3   : > { %v12175_v31 = vpop.permute.xlu1 %3375  ;;  %v12177_v44 = vpop.permute.xlu0 %3370  ;;  %v2072_v16 = vadd.f32 %v11626_v36, %v1783_v37  ;;  %v1786_v18 = vadd.f32 %v1785_v11, %v14397_v53  ;;  %9528 = vmatprep.subr.bf16.mxu0 %v2214_v25  ;;  %v9902_v36 = vld [vmem:[%s14230_s3 + $0x460] ss:$8 sps:$4 sm:$0xff]   ;;  %v9905_v53 = vld [vmem:[%s14230_s3 + $0x474] ss:$8 sps:$4 sm:$0xff]  }
 0x1f4   : > { %14395 = vst [vmem:[#allocation17_spill] sm:$0xff] %v12175_v31  ;;  %14396 = vst [vmem:[#allocation130_spill] sm:$0xff] %v12177_v44  ;;  %3695 = vperm.xlu1 %9690, %v2689_v40   ;;  %3690 = vperm.xlu0 %9689, %v2688_v43   ;;  %v1787_v43 = vpop.f32.mrb[103].mxu0  ;;  %v2735_v31 = vld [vmem:[%s14231_s4 + $0x708] sm:$0xff]  ;;  %v2736_v44 = vld [vmem:[%s14231_s4 + $0x710] sm:$0xff] }
 0x1f5   : > { %9529 = vmatpush3.bf16.msra.mxu0 %v11871_v29  ;;  %v2075_v19 = vadd.f32 %v11639_v5, %v1786_v18  ;;  %v2693_v29 = vld [vmem:[%s14231_s4 + $0x5b8] sm:$0xff]  ;;  %v2176_v37 = vmax.f32 %v2072_v16, 0.0  ;;  %v14400_v5 = vld [vmem:[#allocation19_spill] sm:$0xff] }
 0x1f6   : > { %5783 = vmatmul.mubr.bf16.gmra.mrb[164].mxu0 %v9901_v47  ;;  %6271 = vmatmul.mubr.bf16.gmra.mrb[100].mxu1 %v9902_v36  ;;  %v9907_v16 = vld [vmem:[%s14230_s3 + $0xa0] ss:$8 sps:$4 sm:$0xff]  }
 0x1f7   : > { %v12201_v9 = vpop.permute.xlu1 %3385  ;;  %v12203_v58 = vpop.permute.xlu0 %3380  ;;  %v2177_v25 = vmax.f32 %v2075_v19, 0.0  ;;  %5790 = vmatprep.mubr.bf16.mxu0 %v9903_v28  ;;  %6278 = vmatprep.mubr.bf16.mxu1 %v9905_v53  ;;  %v14403_v19 = vld [vmem:[#allocation18_spill] sm:$0xff]  ;;  %v2695_v28 = vld [vmem:[%s14231_s4 + $0x5c8] sm:$0xff] }
 0x1f8   : > { %14398 = vst [vmem:[#allocation16_spill] sm:$0xff] %v12201_v9  ;;  %14399 = vst [vmem:[#allocation131_spill] sm:$0xff] %v12203_v58  ;;  %3705 = vperm.xlu1 %9690, %v2691_v10   ;;  %3700 = vperm.xlu0 %9689, %v2690_v49   ;;  %v1790_v40 = vpop.f32.mrb[104].mxu0  ;;  %v2694_v53 = vld [vmem:[%s14231_s4 + $0x5c0] sm:$0xff] }
 0x1f9   : > { %v1791_v18 = vadd.f32 %v1790_v40, %v14400_v5  ;;  %v1792_v11 = vpop.f32.mrb[105].mxu0  ;;  %v2215_v47 = vpack.c.bf16 %v2177_v25, %v2176_v37  ;;  %v9908_v40 = vld [vmem:[%s14230_s3 + $0x470] ss:$8 sps:$4 sm:$0xff]  }
 0x1fa   : > { %v1793_v36 = vpop.f32.mrb[106].mxu0 }
 0x1fb   : > { %v12212_v10 = vpop.permute.xlu1 %3395  ;;  %v12214_v49 = vpop.permute.xlu0 %3390  ;;  %v2080_v43 = vadd.f32 %v11669_v6, %v1791_v18  ;;  %v1794_v9 = vadd.f32 %v1793_v36, %v14403_v19  ;;  %9530 = vmatprep.subr.bf16.mxu0 %v2215_v47  ;;  %v2697_v47 = vld [vmem:[%s14231_s4 + $0x5d8] sm:$0xff]  ;;  %v2696_v36 = vld [vmem:[%s14231_s4 + $0x5d0] sm:$0xff] }
 0x1fc   : > { %14401 = vst [vmem:[#allocation19_spill] sm:$0xff] %v12212_v10  ;;  %14402 = vst [vmem:[#allocation132_spill] sm:$0xff] %v12214_v49  ;;  %3715 = vperm.xlu1 %9690, %v2693_v29   ;;  %3710 = vperm.xlu0 %9689, %v2692_v20   ;;  %v1795_v6 = vpop.f32.mrb[107].mxu0  ;;  %v9909_v29 = vld [vmem:[%s14230_s3 + $0xb4] ss:$8 sps:$4 sm:$0xff]  }
 0x1fd   : > { %9531 = vmatpush3.bf16.msra.mxu0 %v11913_v13  ;;  %v9911_v20 = vld [vmem:[%s14230_s3 + $0x484] ss:$8 sps:$4 sm:$0xff]   ;;  %v2083_v37 = vadd.f32 %v11680_v33, %v1794_v9  ;;  %v2178_v18 = vmax.f32 %v2080_v43, 0.0  ;;  %v14406_v33 = vld [vmem:[#allocation21_spill] sm:$0xff] }
 0x1fe   : > { %5791 = vmatmul.mubr.bf16.gmra.mrb[168].mxu0 %v9907_v16  ;;  %6279 = vmatmul.mubr.bf16.gmra.mrb[104].mxu1 %v9908_v40  ;;  %v2699_v6 = vld [vmem:[%s14231_s4 + $0x5e8] sm:$0xff] }
 0x1ff   : > { %v12238_v25 = vpop.permute.xlu1 %3405  ;;  %v12240_v5 = vpop.permute.xlu0 %3400  ;;  %v2179_v11 = vmax.f32 %v2083_v37, 0.0  ;;  %5798 = vmatprep.mubr.bf16.mxu0 %v9909_v29  ;;  %6286 = vmatprep.mubr.bf16.mxu1 %v9911_v20  ;;  %v14407_v37 = vld [vmem:[#allocation20_spill] sm:$0xff]  ;;  %v2698_v29 = vld [vmem:[%s14231_s4 + $0x5e0] sm:$0xff] }
 0x200   : > { %14404 = vst [vmem:[#allocation18_spill] sm:$0xff] %v12238_v25  ;;  %14405 = vst [vmem:[#allocation133_spill] sm:$0xff] %v12240_v5  ;;  %3725 = vperm.xlu1 %9690, %v2695_v28   ;;  %3720 = vperm.xlu0 %9689, %v2694_v53   ;;  %v1798_v13 = vpop.f32.mrb[108].mxu0  ;;  %v9913_v20 = vld [vmem:[%s14230_s3 + $0xb0] ss:$8 sps:$4 sm:$0xff]  }
 0x201   : > { %v1799_v9 = vadd.f32 %v1798_v13, %v14406_v33  ;;  %v1800_v19 = vpop.f32.mrb[109].mxu0  ;;  %v2216_v16 = vpack.c.bf16 %v2179_v11, %v2178_v18  ;;  %v9915_v11 = vld [vmem:[%s14230_s3 + $0xc4] ss:$8 sps:$4 sm:$0xff]   ;;  %v9917_v13 = vld [vmem:[%s14230_s3 + $0x494] ss:$8 sps:$4 sm:$0xff]  }
 0x202   : > { %v1801_v40 = vpop.f32.mrb[110].mxu0  ;;  %v2700_v19 = vld [vmem:[%s14231_s4 + $0x5f0] sm:$0xff] }
 0x203   : > { %v12249_v28 = vpop.permute.xlu1 %3415  ;;  %v12251_v43 = vpop.permute.xlu0 %3410  ;;  %v2088_v53 = vadd.f32 %v11660_v0, %v1799_v9  ;;  %v1802_v25 = vadd.f32 %v1801_v40, %v14407_v37  ;;  %9532 = vmatprep.subr.bf16.mxu0 %v2216_v16  ;;  %v9914_v0 = vld [vmem:[%s14230_s3 + $0x480] ss:$8 sps:$4 sm:$0xff]  }
 0x204   : > { %3735 = vperm.xlu1 %9690, %v2697_v47   ;;  %3730 = vperm.xlu0 %9689, %v2696_v36   ;;  %v1803_v18 = vpop.f32.mrb[111].mxu0 }
 0x205   : > { %9533 = vmatpush3.bf16.msra.mxu0 %v11947_v1  ;;  %v2091_v47 = vadd.f32 %v11673_v12, %v1802_v25  ;;  %v2701_v1 = vld [vmem:[%s14231_s4 + $0x5f8] sm:$0xff]  ;;  %v2180_v16 = vmax.f32 %v2088_v53, 0.0  ;;  %v14408_v12 = vld [vmem:[#allocation23_spill] sm:$0xff] }
 0x206   : > { %5799 = vmatmul.mubr.bf16.gmra.mrb[172].mxu0 %v9913_v20  ;;  %6287 = vmatmul.mubr.bf16.gmra.mrb[108].mxu1 %v9914_v0  ;;  %v9919_v53 = vld [vmem:[%s14230_s3 + $0xc0] ss:$8 sps:$4 sm:$0xff]  }
 0x207   : > { %v12275_v36 = vpop.permute.xlu1 %3425  ;;  %v12277_v33 = vpop.permute.xlu0 %3420  ;;  %v2181_v40 = vmax.f32 %v2091_v47, 0.0  ;;  %5806 = vmatprep.mubr.bf16.mxu0 %v9915_v11  ;;  %6294 = vmatprep.mubr.bf16.mxu1 %v9917_v13  ;;  %v14409_v47 = vld [vmem:[#allocation22_spill] sm:$0xff]  ;;  %v2703_v11 = vld [vmem:[%s14231_s4 + $0x608] sm:$0xff] }
 0x208   : > { %3745 = vperm.xlu1 %9690, %v2699_v6   ;;  %3740 = vperm.xlu0 %9689, %v2698_v29   ;;  %v1806_v9 = vpop.f32.mrb[112].mxu0  ;;  %v2702_v13 = vld [vmem:[%s14231_s4 + $0x600] sm:$0xff] }
 0x209   : > { %v1807_v25 = vadd.f32 %v1806_v9, %v14408_v12  ;;  %v1808_v37 = vpop.f32.mrb[113].mxu0  ;;  %v2217_v20 = vpack.c.bf16 %v2181_v40, %v2180_v16  ;;  %v9920_v9 = vld [vmem:[%s14230_s3 + $0x490] ss:$8 sps:$4 sm:$0xff]  }
 0x20a   : > { %v1809_v0 = vpop.f32.mrb[114].mxu0 }
 0x20b   : > { %v12286_v6 = vpop.permute.xlu1 %3435  ;;  %v12288_v29 = vpop.permute.xlu0 %3430  ;;  %v2096_v18 = vadd.f32 %v11729_v35, %v1807_v25  ;;  %v1810_v5 = vadd.f32 %v1809_v0, %v14409_v47  ;;  %9534 = vmatprep.subr.bf16.mxu0 %v2217_v20  ;;  %v2705_v20 = vld [vmem:[%s14231_s4 + $0x618] sm:$0xff]  ;;  %v2704_v0 = vld [vmem:[%s14231_s4 + $0x610] sm:$0xff] }
 0x20c   : > { %3755 = vperm.xlu1 %9690, %v2701_v1   ;;  %3750 = vperm.xlu0 %9689, %v2700_v19   ;;  %v1811_v35 = vpop.f32.mrb[115].mxu0  ;;  %v9921_v1 = vld [vmem:[%s14230_s3 + $0xd4] ss:$8 sps:$4 sm:$0xff]   ;;  %v9923_v19 = vld [vmem:[%s14230_s3 + $0x4a4] ss:$8 sps:$4 sm:$0xff]  }
 0x20d   : > { %9535 = vmatpush3.bf16.msra.mxu0 %v11989_v17  ;;  %v2099_v16 = vadd.f32 %v11740_v56, %v1810_v5  ;;  %v2182_v25 = vmax.f32 %v2096_v18, 0.0  ;;  %v14410_v56 = vld [vmem:[#allocation25_spill] sm:$0xff]  ;;  %v2707_v35 = vld [vmem:[%s14231_s4 + $0x628] sm:$0xff] }
 0x20e   : > { %5807 = vmatmul.mubr.bf16.gmra.mrb[176].mxu0 %v9919_v53  ;;  %6295 = vmatmul.mubr.bf16.gmra.mrb[112].mxu1 %v9920_v9 }
 0x20f   : > { %v12312_v40 = vpop.permute.xlu1 %3445  ;;  %v12314_v12 = vpop.permute.xlu0 %3440  ;;  %v2183_v37 = vmax.f32 %v2099_v16, 0.0  ;;  %5814 = vmatprep.mubr.bf16.mxu0 %v9921_v1  ;;  %6302 = vmatprep.mubr.bf16.mxu1 %v9923_v19  ;;  %v14411_v16 = vld [vmem:[#allocation24_spill] sm:$0xff]  ;;  %v2706_v1 = vld [vmem:[%s14231_s4 + $0x620] sm:$0xff] }
 0x210   : > { %3765 = vperm.xlu1 %9690, %v2703_v11   ;;  %3760 = vperm.xlu0 %9689, %v2702_v13   ;;  %v1814_v17 = vpop.f32.mrb[116].mxu0  ;;  %v9925_v19 = vld [vmem:[%s14230_s3 + $0xd0] ss:$8 sps:$4 sm:$0xff]  }
 0x211   : > { %v1815_v5 = vadd.f32 %v1814_v17, %v14410_v56  ;;  %v1816_v47 = vpop.f32.mrb[117].mxu0  ;;  %v2218_v53 = vpack.c.bf16 %v2183_v37, %v2182_v25  ;;  %v9927_v37 = vld [vmem:[%s14230_s3 + $0xe4] ss:$8 sps:$4 sm:$0xff]   ;;  %v9929_v17 = vld [vmem:[%s14230_s3 + $0x4b4] ss:$8 sps:$4 sm:$0xff]  }
 0x212   : > { %v1817_v9 = vpop.f32.mrb[118].mxu0  ;;  %v2708_v47 = vld [vmem:[%s14231_s4 + $0x630] sm:$0xff] }
 0x213   : > { %v12323_v11 = vpop.permute.xlu1 %3455  ;;  %v12325_v18 = vpop.permute.xlu0 %3450  ;;  %v2104_v13 = vadd.f32 %v11720_v34, %v1815_v5  ;;  %v1818_v10 = vadd.f32 %v1817_v9, %v14411_v16  ;;  %9536 = vmatprep.subr.bf16.mxu0 %v2218_v53  ;;  %v9926_v34 = vld [vmem:[%s14230_s3 + $0x4a0] ss:$8 sps:$4 sm:$0xff]  }
 0x214   : > { %3775 = vperm.xlu1 %9690, %v2705_v20   ;;  %3770 = vperm.xlu0 %9689, %v2704_v0   ;;  %v1819_v25 = vpop.f32.mrb[119].mxu0 }
 0x215   : > { %9537 = vmatpush3.bf16.msra.mxu0 %v12023_v3  ;;  %v2107_v20 = vadd.f32 %v11733_v26, %v1818_v10  ;;  %v2709_v3 = vld [vmem:[%s14231_s4 + $0x638] sm:$0xff]  ;;  %v2184_v53 = vmax.f32 %v2104_v13, 0.0  ;;  %v14412_v26 = vld [vmem:[#allocation27_spill] sm:$0xff] }
 0x216   : > { %5815 = vmatmul.mubr.bf16.gmra.mrb[180].mxu0 %v9925_v19  ;;  %6303 = vmatmul.mubr.bf16.gmra.mrb[116].mxu1 %v9926_v34  ;;  %v9931_v13 = vld [vmem:[%s14230_s3 + $0xe0] ss:$8 sps:$4 sm:$0xff]  }
 0x217   : > { %v12349_v0 = vpop.permute.xlu1 %3465  ;;  %v12351_v56 = vpop.permute.xlu0 %3460  ;;  %v2185_v9 = vmax.f32 %v2107_v20, 0.0  ;;  %5822 = vmatprep.mubr.bf16.mxu0 %v9927_v37  ;;  %6310 = vmatprep.mubr.bf16.mxu1 %v9929_v17  ;;  %v14413_v20 = vld [vmem:[#allocation26_spill] sm:$0xff]  ;;  %v2711_v37 = vld [vmem:[%s14231_s4 + $0x648] sm:$0xff] }
 0x218   : > { %3785 = vperm.xlu1 %9690, %v2707_v35   ;;  %3780 = vperm.xlu0 %9689, %v2706_v1   ;;  %v1822_v5 = vpop.f32.mrb[120].mxu0  ;;  %v2710_v17 = vld [vmem:[%s14231_s4 + $0x640] sm:$0xff] }
 0x219   : > { %v1823_v10 = vadd.f32 %v1822_v5, %v14412_v26  ;;  %v1824_v16 = vpop.f32.mrb[121].mxu0  ;;  %v2219_v19 = vpack.c.bf16 %v2185_v9, %v2184_v53  ;;  %v9932_v5 = vld [vmem:[%s14230_s3 + $0x4b0] ss:$8 sps:$4 sm:$0xff]  }
 0x21a   : > { %v1825_v34 = vpop.f32.mrb[122].mxu0 }
 0x21b   : > { %v12360_v35 = vpop.permute.xlu1 %3475  ;;  %v12362_v1 = vpop.permute.xlu0 %3470  ;;  %v2112_v25 = vadd.f32 %v11789_v41, %v1823_v10  ;;  %v1826_v49 = vadd.f32 %v1825_v34, %v14413_v20  ;;  %9538 = vmatprep.subr.bf16.mxu0 %v2219_v19  ;;  %v2713_v19 = vld [vmem:[%s14231_s4 + $0x658] sm:$0xff]  ;;  %v2712_v34 = vld [vmem:[%s14231_s4 + $0x650] sm:$0xff] }
 0x21c   : > { %3795 = vperm.xlu1 %9690, %v2709_v3   ;;  %3790 = vperm.xlu0 %9689, %v2708_v47   ;;  %v1827_v41 = vpop.f32.mrb[123].mxu0  ;;  %v9933_v3 = vld [vmem:[%s14230_s3 + $0xf4] ss:$8 sps:$4 sm:$0xff]   ;;  %v9935_v47 = vld [vmem:[%s14230_s3 + $0x4c4] ss:$8 sps:$4 sm:$0xff]  }
 0x21d   : > { %9539 = vmatpush3.bf16.msra.mxu0 %v12065_v27  ;;  %v2115_v53 = vadd.f32 %v11800_v8, %v1826_v49  ;;  %v2186_v10 = vmax.f32 %v2112_v25, 0.0  ;;  %v14414_v8 = vld [vmem:[#allocation29_spill] sm:$0xff] }
 0x21e   : > { %5823 = vmatmul.mubr.bf16.gmra.mrb[184].mxu0 %v9931_v13  ;;  %6311 = vmatmul.mubr.bf16.gmra.mrb[120].mxu1 %v9932_v5  ;;  %v9937_v41 = vld [vmem:[%s14230_s3 + $0xf0] ss:$8 sps:$4 sm:$0xff]  }
 0x21f   : > { %v12386_v9 = vpop.permute.xlu1 %3485  ;;  %v12388_v26 = vpop.permute.xlu0 %3480  ;;  %v2187_v16 = vmax.f32 %v2115_v53, 0.0  ;;  %5830 = vmatprep.mubr.bf16.mxu0 %v9933_v3  ;;  %6318 = vmatprep.mubr.bf16.mxu1 %v9935_v47  ;;  %v14415_v53 = vld [vmem:[#allocation28_spill] sm:$0xff]  ;;  %v2715_v3 = vld [vmem:[%s14231_s4 + $0x668] sm:$0xff]  ;;  %v2714_v47 = vld [vmem:[%s14231_s4 + $0x660] sm:$0xff] }
 0x220   : > { %3805 = vperm.xlu1 %9690, %v2711_v37   ;;  %3800 = vperm.xlu0 %9689, %v2710_v17   ;;  %v1830_v27 = vpop.f32.mrb[124].mxu0 }
 0x221   : > { %v1831_v49 = vadd.f32 %v1830_v27, %v14414_v8  ;;  %v1832_v20 = vpop.f32.mrb[125].mxu0  ;;  %v2220_v13 = vpack.c.bf16 %v2187_v16, %v2186_v10  ;;  %v9939_v16 = vld [vmem:[%s14230_s3 + $0x104] ss:$8 sps:$4 sm:$0xff]   ;;  %v9941_v27 = vld [vmem:[%s14230_s3 + $0x4d4] ss:$8 sps:$4 sm:$0xff]  }
 0x222   : > { %v1833_v5 = vpop.f32.mrb[126].mxu0 }
 0x223   : > { %v12397_v37 = vpop.permute.xlu1 %3495  ;;  %v12399_v25 = vpop.permute.xlu0 %3490  ;;  %v2120_v17 = vadd.f32 %v11780_v38, %v1831_v49  ;;  %v1834_v58 = vadd.f32 %v1833_v5, %v14415_v53  ;;  %9540 = vmatprep.subr.bf16.mxu0 %v2220_v13  ;;  %v9938_v38 = vld [vmem:[%s14230_s3 + $0x4c0] ss:$8 sps:$4 sm:$0xff]   ;;  %v2716_v13 = vld [vmem:[%s14231_s4 + $0x670] sm:$0xff] }
 0x224   : > { %3815 = vperm.xlu1 %9690, %v2713_v19   ;;  %3810 = vperm.xlu0 %9689, %v2712_v34   ;;  %v1835_v10 = vpop.f32.mrb[127].mxu0  ;;  %v9943_v5 = vld [vmem:[%s14230_s3 + $0x100] ss:$8 sps:$4 sm:$0xff]   ;;  %v9945_v53 = vld [vmem:[%s14230_s3 + $0x114] ss:$8 sps:$4 sm:$0xff]  }
 0x225   : > { %9541 = vmatpush3.bf16.msra.mxu0 %v12099_v61  ;;  %v2123_v19 = vadd.f32 %v11793_v15, %v1834_v58  ;;  %v2188_v34 = vmax.f32 %v2120_v17, 0.0  ;;  %v2717_v61 = vld [vmem:[%s14231_s4 + $0x678] sm:$0xff]  ;;  %v2719_v58 = vld [vmem:[%s14231_s4 + $0x688] sm:$0xff]  ;;  %v2718_v17 = vld [vmem:[%s14231_s4 + $0x680] sm:$0xff] }
 0x226   : > { %5831 = vmatmul.mubr.bf16.gmra.mrb[188].mxu0 %v9937_v41  ;;  %6319 = vmatmul.mubr.bf16.gmra.mrb[124].mxu1 %v9938_v38  ;;  %v9944_v41 = vld [vmem:[%s14230_s3 + $0x4d0] ss:$8 sps:$4 sm:$0xff]  }
 0x227   : > { %v2189_v8 = vmax.f32 %v2123_v19, 0.0  ;;  %v12423_v49 = vpop.permute.xlu1 %3505  ;;  %v12425_v20 = vpop.permute.xlu0 %3500  ;;  %5838 = vmatprep.mubr.bf16.mxu0 %v9939_v16  ;;  %6326 = vmatprep.mubr.bf16.mxu1 %v9941_v27  ;;  %v2720_v10 = vld [vmem:[%s14231_s4 + $0x690] sm:$0xff]  ;;  %v2723_v16 = vld [vmem:[%s14231_s4 + $0x6a8] sm:$0xff] }
 0x228   : > { %3825 = vperm.xlu1 %9690, %v2715_v3   ;;  %3820 = vperm.xlu0 %9689, %v2714_v47   ;;  %v9947_v3 = vld [vmem:[%s14230_s3 + $0x4e4] ss:$8 sps:$4 sm:$0xff]  }
 0x229   : > { %v2221_v15 = vpack.c.bf16 %v2189_v8, %v2188_v34  ;;  %v2722_v34 = vld [vmem:[%s14231_s4 + $0x6a0] sm:$0xff]  ;;  %v9949_v8 = vld [vmem:[%s14230_s3 + $0x110] ss:$8 sps:$4 sm:$0xff]  }
 0x22b   : > { %9542 = vmatprep.subr.bf16.mxu0 %v2221_v15  ;;  %v12452_v47 = vpop.permute.xlu1 %3515  ;;  %v12454_v38 = vpop.permute.xlu0 %3510  ;;  %v9953_v15 = vld [vmem:[%s14230_s3 + $0x4f4] ss:$8 sps:$4 sm:$0xff]  }
 0x22c   : > { %3835 = vperm.xlu1 %9690, %v2717_v61   ;;  %3830 = vperm.xlu0 %9689, %v2716_v13   ;;  %v9950_v61 = vld [vmem:[%s14230_s3 + $0x4e0] ss:$8 sps:$4 sm:$0xff]   ;;  %v9951_v13 = vld [vmem:[%s14230_s3 + $0x124] ss:$8 sps:$4 sm:$0xff]  }
 0x22d   : > { %9543 = vmatpush3.bf16.msra.mxu0 %v12141_v52  ;;  %v2721_v52 = vld [vmem:[%s14231_s4 + $0x698] sm:$0xff] }
 0x22e   : > { %5839 = vmatmul.mubr.bf16.gmra.mrb[192].mxu0 %v9943_v5  ;;  %6327 = vmatmul.mubr.bf16.gmra.mrb[128].mxu1 %v9944_v41 }
 0x22f   : > { %5846 = vmatprep.mubr.bf16.mxu0 %v9945_v53  ;;  %6334 = vmatprep.mubr.bf16.mxu1 %v9947_v3  ;;  %v12465_v27 = vpop.permute.xlu1 %3525  ;;  %v12467_v19 = vpop.permute.xlu0 %3520  ;;  %v2727_v53 = vld [vmem:[%s14231_s4 + $0x6c8] sm:$0xff]  ;;  %v2726_v3 = vld [vmem:[%s14231_s4 + $0x6c0] sm:$0xff] }
 0x230   : > { %3845 = vperm.xlu1 %9690, %v2719_v58   ;;  %3840 = vperm.xlu0 %9689, %v2718_v17   ;;  %v2725_v58 = vld [vmem:[%s14231_s4 + $0x6b8] sm:$0xff]  ;;  %v2724_v17 = vld [vmem:[%s14231_s4 + $0x6b0] sm:$0xff] }
 0x233   : > { %v12490_v5 = vpop.permute.xlu1 %3535  ;;  %v12492_v41 = vpop.permute.xlu0 %3530 }
 0x234   : > { %3855 = vperm.xlu1 %9690, %v2721_v52   ;;  %3850 = vperm.xlu0 %9689, %v2720_v10   ;;  %v9955_v52 = vld [vmem:[%s14230_s3 + $0x120] ss:$8 sps:$4 sm:$0xff]   ;;  %v9956_v10 = vld [vmem:[%s14230_s3 + $0x4f0] ss:$8 sps:$4 sm:$0xff]  }
 0x236   : > { %5847 = vmatmul.mubr.bf16.gmra.mrb[196].mxu0 %v9949_v8  ;;  %6335 = vmatmul.mubr.bf16.gmra.mrb[132].mxu1 %v9950_v61 }
 0x237   : > { %5854 = vmatprep.mubr.bf16.mxu0 %v9951_v13  ;;  %6342 = vmatprep.mubr.bf16.mxu1 %v9953_v15  ;;  %v12512_v8 = vpop.permute.xlu1 %3545  ;;  %v12514_v61 = vpop.permute.xlu0 %3540  ;;  %v2729_v13 = vld [vmem:[%s14231_s4 + $0x6d8] sm:$0xff]  ;;  %v2728_v15 = vld [vmem:[%s14231_s4 + $0x6d0] sm:$0xff] }
 0x238   : > { %3865 = vperm.xlu1 %9690, %v2723_v16   ;;  %3860 = vperm.xlu0 %9689, %v2722_v34   ;;  %v9957_v16 = vld [vmem:[%s14230_s3 + $0x134] ss:$8 sps:$4 sm:$0xff]   ;;  %v9959_v34 = vld [vmem:[%s14230_s3 + $0x504] ss:$8 sps:$4 sm:$0xff]  }
 0x23c   : > { %3875 = vperm.xlu1 %9690, %v2725_v58   ;;  %3870 = vperm.xlu0 %9689, %v2724_v17   ;;  %v2731_v58 = vld [vmem:[%s14231_s4 + $0x6e8] sm:$0xff]  ;;  %v2730_v17 = vld [vmem:[%s14231_s4 + $0x6e0] sm:$0xff] }
 0x23e   : > { %5855 = vmatmul.mubr.bf16.gmra.mrb[200].mxu0 %v9955_v52  ;;  %6343 = vmatmul.mubr.bf16.gmra.mrb[136].mxu1 %v9956_v10  ;;  %v9963_v52 = vld [vmem:[%s14230_s3 + $0x144] ss:$8 sps:$4 sm:$0xff]   ;;  %v9965_v10 = vld [vmem:[%s14230_s3 + $0x514] ss:$8 sps:$4 sm:$0xff]  }
 0x23f   : > { %5862 = vmatprep.mubr.bf16.mxu0 %v9957_v16  ;;  %6350 = vmatprep.mubr.bf16.mxu1 %v9959_v34  ;;  %v12540_v16 = vpop.permute.xlu1 %3555  ;;  %v12542_v34 = vpop.permute.xlu0 %3550 }
 0x240   : > { %3885 = vperm.xlu1 %9690, %v2727_v53   ;;  %3880 = vperm.xlu0 %9689, %v2726_v3   ;;  %v9961_v53 = vld [vmem:[%s14230_s3 + $0x130] ss:$8 sps:$4 sm:$0xff]   ;;  %v9962_v3 = vld [vmem:[%s14230_s3 + $0x500] ss:$8 sps:$4 sm:$0xff]  }
 0x244   : > { %3895 = vperm.xlu1 %9690, %v2729_v13   ;;  %3890 = vperm.xlu0 %9689, %v2728_v15   ;;  %v2733_v13 = vld [vmem:[%s14231_s4 + $0x6f8] sm:$0xff]  ;;  %v2732_v15 = vld [vmem:[%s14231_s4 + $0x6f0] sm:$0xff] }
 0x246   : > { %5863 = vmatmul.mubr.bf16.gmra.mrb[204].mxu0 %v9961_v53  ;;  %6351 = vmatmul.mubr.bf16.gmra.mrb[140].mxu1 %v9962_v3  ;;  %v2734_v53 = vld [vmem:[%s14231_s4 + $0x700] sm:$0xff] }
 0x247   : > { %5870 = vmatprep.mubr.bf16.mxu0 %v9963_v52  ;;  %6358 = vmatprep.mubr.bf16.mxu1 %v9965_v10  ;;  %v9967_v3 = vld [vmem:[%s14230_s3 + $0x140] ss:$8 sps:$4 sm:$0xff]   ;;  %v9968_v52 = vld [vmem:[%s14230_s3 + $0x510] ss:$8 sps:$4 sm:$0xff]   ;;  %v9969_v10 = vld [vmem:[%s14230_s3 + $0x154] ss:$8 sps:$4 sm:$0xff]  }
 0x248   : > { %3905 = vperm.xlu1 %9690, %v2731_v58   ;;  %3900 = vperm.xlu0 %9689, %v2730_v17   ;;  %v12553_v58 = vpop.permute.xlu1 %3565  ;;  %v12555_v17 = vpop.permute.xlu0 %3560 }
 0x24c   : > { %3915 = vperm.xlu1 %9690, %v2733_v13   ;;  %3910 = vperm.xlu0 %9689, %v2732_v15   ;;  %v9971_v13 = vld [vmem:[%s14230_s3 + $0x524] ss:$8 sps:$4 sm:$0xff]   ;;  %v2737_v15 = vld [vmem:[%s14231_s4 + $0x718] sm:$0xff]  ;;  %v12578_v60 = vpop.permute.xlu1 %3575  ;;  %v12580_v4 = vpop.permute.xlu0 %3570 }
 0x24e   : > { %5871 = vmatmul.mubr.bf16.gmra.mrb[208].mxu0 %v9967_v3  ;;  %6359 = vmatmul.mubr.bf16.gmra.mrb[144].mxu1 %v9968_v52  ;;  %v9973_v3 = vld [vmem:[%s14230_s3 + $0x150] ss:$8 sps:$4 sm:$0xff]   ;;  %v9974_v52 = vld [vmem:[%s14230_s3 + $0x520] ss:$8 sps:$4 sm:$0xff]  }
 0x24f   : > { %5878 = vmatprep.mubr.bf16.mxu0 %v9969_v10  ;;  %6366 = vmatprep.mubr.bf16.mxu1 %v9971_v13  ;;  %v9977_v10 = vld [vmem:[%s14230_s3 + $0x534] ss:$8 sps:$4 sm:$0xff]  }
 0x250   : > { %3925 = vperm.xlu1 %9690, %v2735_v31   ;;  %3920 = vperm.xlu0 %9689, %v2734_v53   ;;  %v2739_v31 = vld [vmem:[%s14231_s4 + $0x728] sm:$0xff]  ;;  %v2738_v53 = vld [vmem:[%s14231_s4 + $0x720] sm:$0xff]  ;;  %v12600_v13 = vpop.permute.xlu1 %3585 }
 0x254   : > { %3935 = vperm.xlu1 %9690, %v2737_v15   ;;  %3930 = vperm.xlu0 %9689, %v2736_v44   ;;  %v9975_v44 = vld [vmem:[%s14230_s3 + $0x164] ss:$8 sps:$4 sm:$0xff]   ;;  %v12602_v15 = vpop.permute.xlu0 %3580 }
 0x256   : > { %5879 = vmatmul.mubr.bf16.gmra.mrb[212].mxu0 %v9973_v3  ;;  %6367 = vmatmul.mubr.bf16.gmra.mrb[148].mxu1 %v9974_v52  ;;  %v9979_v3 = vld [vmem:[%s14230_s3 + $0x160] ss:$8 sps:$4 sm:$0xff]   ;;  %v9980_v52 = vld [vmem:[%s14230_s3 + $0x530] ss:$8 sps:$4 sm:$0xff]  }
 0x257   : > { %5886 = vmatprep.mubr.bf16.mxu0 %v9975_v44  ;;  %6374 = vmatprep.mubr.bf16.mxu1 %v9977_v10  ;;  %v12628_v44 = vpop.permute.xlu1 %3595 }
 0x258   : > { %3945 = vperm.xlu1 %9690, %v2739_v31   ;;  %3940 = vperm.xlu0 %9689, %v2738_v53   ;;  %v2743_v31 = vld [vmem:[%s14231_s4 + $0x748] sm:$0xff]  ;;  %v2742_v53 = vld [vmem:[%s14231_s4 + $0x740] sm:$0xff]  ;;  %v12630_v10 = vpop.permute.xlu0 %3590 }
 0x25c   : > { %3955 = vperm.xlu1 %9690, %v2741_v2   ;;  %3950 = vperm.xlu0 %9689, %v2740_v55   ;;  %v9981_v55 = vld [vmem:[%s14230_s3 + $0x174] ss:$8 sps:$4 sm:$0xff]   ;;  %v9983_v2 = vld [vmem:[%s14230_s3 + $0x544] ss:$8 sps:$4 sm:$0xff]  }
 0x25e   : > { %5887 = vmatmul.mubr.bf16.gmra.mrb[216].mxu0 %v9979_v3  ;;  %6375 = vmatmul.mubr.bf16.gmra.mrb[152].mxu1 %v9980_v52  ;;  %v2746_v3 = vld [vmem:[%s14231_s4 + $0x760] sm:$0xff]  ;;  %v9985_v52 = vld [vmem:[%s14230_s3 + $0x170] ss:$8 sps:$4 sm:$0xff]  }
 0x25f   : > { %5894 = vmatprep.mubr.bf16.mxu0 %v9981_v55  ;;  %6382 = vmatprep.mubr.bf16.mxu1 %v9983_v2  ;;  %v9989_v55 = vld [vmem:[%s14230_s3 + $0x554] ss:$8 sps:$4 sm:$0xff]  }
 0x260   : > { %3965 = vperm.xlu1 %9690, %v2743_v31   ;;  %3960 = vperm.xlu0 %9689, %v2742_v53   ;;  %v12641_v31 = vpop.permute.xlu1 %3605  ;;  %v12643_v53 = vpop.permute.xlu0 %3600  ;;  %v2749_v2 = vld [vmem:[%s14231_s4 + $0x778] sm:$0xff] }
 0x264   : > { %3975 = vperm.xlu1 %9690, %v2745_v22   ;;  %3970 = vperm.xlu0 %9689, %v2744_v48   ;;  %v9986_v48 = vld [vmem:[%s14230_s3 + $0x540] ss:$8 sps:$4 sm:$0xff]   ;;  %v9987_v22 = vld [vmem:[%s14230_s3 + $0x184] ss:$8 sps:$4 sm:$0xff]   ;;  %v12666_v30 = vpop.permute.xlu1 %3615  ;;  %v12668_v62 = vpop.permute.xlu0 %3610 }
 0x266   : > { %5895 = vmatmul.mubr.bf16.gmra.mrb[220].mxu0 %v9985_v52  ;;  %6383 = vmatmul.mubr.bf16.gmra.mrb[156].mxu1 %v9986_v48  ;;  %v9991_v52 = vld [vmem:[%s14230_s3 + $0x180] ss:$8 sps:$4 sm:$0xff]   ;;  %v9992_v48 = vld [vmem:[%s14230_s3 + $0x550] ss:$8 sps:$4 sm:$0xff]  }
 0x267   : > { %5902 = vmatprep.mubr.bf16.mxu0 %v9987_v22  ;;  %6390 = vmatprep.mubr.bf16.mxu1 %v9989_v55  ;;  %v9995_v22 = vld [vmem:[%s14230_s3 + $0x564] ss:$8 sps:$4 sm:$0xff]  }
 0x268   : > { %3985 = vperm.xlu1 %9690, %v2747_v42   ;;  %3980 = vperm.xlu0 %9689, %v2746_v3   ;;  %v2751_v42 = vld [vmem:[%s14231_s4 + $0x788] sm:$0xff]  ;;  %v2750_v3 = vld [vmem:[%s14231_s4 + $0x780] sm:$0xff]  ;;  %v12688_v55 = vpop.permute.xlu1 %3625 }
 0x26c   : > { %3995 = vperm.xlu1 %9690, %v2749_v2   ;;  %3990 = vperm.xlu0 %9689, %v2748_v24   ;;  %v9993_v24 = vld [vmem:[%s14230_s3 + $0x194] ss:$8 sps:$4 sm:$0xff]   ;;  %v12690_v2 = vpop.permute.xlu0 %3620 }
 0x26e   : > { %5903 = vmatmul.mubr.bf16.gmra.mrb[224].mxu0 %v9991_v52  ;;  %6391 = vmatmul.mubr.bf16.gmra.mrb[160].mxu1 %v9992_v48  ;;  %v9997_v52 = vld [vmem:[%s14230_s3 + $0x190] ss:$8 sps:$4 sm:$0xff]   ;;  %v9998_v48 = vld [vmem:[%s14230_s3 + $0x560] ss:$8 sps:$4 sm:$0xff]  }
 0x26f   : > { %5910 = vmatprep.mubr.bf16.mxu0 %v9993_v24  ;;  %6398 = vmatprep.mubr.bf16.mxu1 %v9995_v22  ;;  %v12716_v24 = vpop.permute.xlu1 %3635 }
 0x270   : > { %4005 = vperm.xlu1 %9690, %v2751_v42   ;;  %4000 = vperm.xlu0 %9689, %v2750_v3   ;;  %v2755_v42 = vld [vmem:[%s14231_s4 + $0x7a8] sm:$0xff]  ;;  %v2754_v3 = vld [vmem:[%s14231_s4 + $0x7a0] sm:$0xff]  ;;  %v12718_v22 = vpop.permute.xlu0 %3630 }
 0x274   : > { %4015 = vperm.xlu1 %9690, %v2753_v23   ;;  %4010 = vperm.xlu0 %9689, %v2752_v54   ;;  %v9999_v54 = vld [vmem:[%s14230_s3 + $0x1a4] ss:$8 sps:$4 sm:$0xff]   ;;  %v10001_v23 = vld [vmem:[%s14230_s3 + $0x574] ss:$8 sps:$4 sm:$0xff]  }
 0x276   : > { %5911 = vmatmul.mubr.bf16.gmra.mrb[228].mxu0 %v9997_v52  ;;  %6399 = vmatmul.mubr.bf16.gmra.mrb[164].mxu1 %v9998_v48  ;;  %v12731_v52 = vpop.permute.xlu0 %3640  ;;  %v2758_v48 = vld [vmem:[%s14231_s4 + $0x7c0] sm:$0xff] }
 0x277   : > { %5918 = vmatprep.mubr.bf16.mxu0 %v9999_v54  ;;  %6406 = vmatprep.mubr.bf16.mxu1 %v10001_v23  ;;  %14417 = vst [vmem:[#allocation20_spill] sm:$0xff] %v12731_v52  ;;  %v10003_v54 = vld [vmem:[%s14230_s3 + $0x1a0] ss:$8 sps:$4 sm:$0xff]   ;;  %v10007_v23 = vld [vmem:[%s14230_s3 + $0x584] ss:$8 sps:$4 sm:$0xff]  }
 0x278   : > { %4025 = vperm.xlu1 %9690, %v2755_v42   ;;  %4020 = vperm.xlu0 %9689, %v2754_v3   ;;  %v2759_v42 = vld [vmem:[%s14231_s4 + $0x7c8] sm:$0xff]  ;;  %v12729_v3 = vpop.permute.xlu1 %3645 }
 0x279   : > { %14416 = vst [vmem:[#allocation21_spill] sm:$0xff] %v12729_v3 }
 0x27a   : > { %v12757_v50 = vpop.permute.xlu0 %3650 }
 0x27b   : > { %14419 = vst [vmem:[#allocation22_spill] sm:$0xff] %v12757_v50 }
 0x27c   : > { %4035 = vperm.xlu1 %9690, %v2757_v39   ;;  %4030 = vperm.xlu0 %9689, %v2756_v59   ;;  %v10004_v59 = vld [vmem:[%s14230_s3 + $0x570] ss:$8 sps:$4 sm:$0xff]   ;;  %v10005_v39 = vld [vmem:[%s14230_s3 + $0x1b4] ss:$8 sps:$4 sm:$0xff]   ;;  %v12755_v21 = vpop.permute.xlu1 %3655 }
 0x27d   : > { %14418 = vst [vmem:[#allocation23_spill] sm:$0xff] %v12755_v21 }
 0x27e   : > { %5919 = vmatmul.mubr.bf16.gmra.mrb[232].mxu0 %v10003_v54  ;;  %6407 = vmatmul.mubr.bf16.gmra.mrb[168].mxu1 %v10004_v59  ;;  %v14420_v54 = vld [vmem:[#allocation31_spill] sm:$0xff] }
 0x27f   : > { %5926 = vmatprep.mubr.bf16.mxu0 %v10005_v39  ;;  %6414 = vmatprep.mubr.bf16.mxu1 %v10007_v23  ;;  %v2763_v23 = vld [vmem:[%s14231_s4 + $0x7e8] sm:$0xff] }
 0x280   : > { %4045 = vperm.xlu1 %9690, %v2759_v42   ;;  %4040 = vperm.xlu0 %9689, %v2758_v48   ;;  %v10009_v48 = vld [vmem:[%s14230_s3 + $0x1b0] ss:$8 sps:$4 sm:$0xff]  }
 0x281   : > { %v5712_v14 = vpop.f32.mrb[128].mxu0  ;;  %v6200_v42 = vpop.f32.mrb[64].mxu1 }
 0x282   : > { %v5713_v59 = vadd.f32 %v5712_v14, %v14420_v54  ;;  %v6201_v45 = vadd.f32 %v6200_v42, %v12251_v43  ;;  %v5714_v7 = vpop.f32.mrb[129].mxu0  ;;  %v6202_v39 = vpop.f32.mrb[65].mxu1  ;;  %v10013_v43 = vld [vmem:[%s14230_s3 + $0x594] ss:$8 sps:$4 sm:$0xff]  }
 0x283   : > { %v5715_v7 = vpop.f32.mrb[130].mxu0  ;;  %v6203_v14 = vpop.f32.mrb[66].mxu1  ;;  %v14421_v39 = vld [vmem:[#allocation30_spill] sm:$0xff] }
 0x284   : > { %4055 = vperm.xlu1 %9690, %v2761_v32   ;;  %4050 = vperm.xlu0 %9689, %v2760_v46   ;;  %v10010_v46 = vld [vmem:[%s14230_s3 + $0x580] ss:$8 sps:$4 sm:$0xff]   ;;  %v10011_v32 = vld [vmem:[%s14230_s3 + $0x1c4] ss:$8 sps:$4 sm:$0xff]   ;;  %v9200_v42 = vpack.c.bf16 %v5713_v59, %v5713_v59  ;;  %v9322_v54 = vpack.c.bf16 %v6201_v45, %v6201_v45  ;;  %v5716_v63 = vadd.f32 %v5715_v7, %v14421_v39  ;;  %v6205_v21 = vpop.f32.mrb[67].mxu1  ;;  %v5717_v50 = vpop.f32.mrb[131].mxu0 }
 0x285   : > { %v6204_v57 = vadd.f32 %v6203_v14, %v12249_v28  ;;  %v2765_v45 = vld [vmem:[%s14231_s4 + $0x7f8] sm:$0xff]  ;;  %v2764_v28 = vld [vmem:[%s14231_s4 + $0x7f0] sm:$0xff]  ;;  %v12798_v50 = vpop.permute.xlu0 %3660  ;;  %v10015_v21 = vld [vmem:[%s14230_s3 + $0x1c0] ss:$8 sps:$4 sm:$0xff]  }
 0x286   : > { %8016 = vst.msk [vmem:[%s12776_s23] sm:$0xf] %vm8015_vm0, %v9200_v42  ;;  %8138 = vst.msk [vmem:[%s12776_s23 + $0x1e8] sm:$0xf] %vm8015_vm0, %v9322_v54  ;;  %v9201_v3 = vpack.c.bf16 %v5716_v63, %v5716_v63  ;;  %5927 = vmatmul.mubr.bf16.gmra.mrb[236].mxu0 %v10009_v48  ;;  %6415 = vmatmul.mubr.bf16.gmra.mrb[172].mxu1 %v10010_v46  ;;  %v14422_v48 = vld [vmem:[#allocation33_spill] sm:$0xff] }
 0x287   : > { %v9323_v52 = vpack.c.bf16 %v6204_v57, %v6204_v57  ;;  %5934 = vmatprep.mubr.bf16.mxu0 %v10011_v32  ;;  %6422 = vmatprep.mubr.bf16.mxu1 %v10013_v43  ;;  %v10016_v14 = vld [vmem:[%s14230_s3 + $0x590] ss:$8 sps:$4 sm:$0xff]   ;;  %v10019_v42 = vld [vmem:[%s14230_s3 + $0x5a4] ss:$8 sps:$4 sm:$0xff]  }
 0x288   : > { %4065 = vperm.xlu1 %9690, %v2763_v23   ;;  %4060 = vperm.xlu0 %9689, %v2762_v51   ;;  %v12796_v51 = vpop.permute.xlu1 %3665  ;;  %8017 = vst.msk [vmem:[%s12776_s23 + $0x4] sm:$0xf] %vm8015_vm0, %v9201_v3  ;;  %v2767_v3 = vld [vmem:[%s14231_s4 + $0x808] sm:$0xff] }
 0x289   : > { %8139 = vst.msk [vmem:[%s12776_s23 + $0x1ec] sm:$0xf] %vm8015_vm0, %v9323_v52  ;;  %v5720_v57 = vpop.f32.mrb[132].mxu0  ;;  %v6208_v63 = vpop.f32.mrb[68].mxu1  ;;  %v2766_v52 = vld [vmem:[%s14231_s4 + $0x800] sm:$0xff] }
 0x28a   : > { %v5721_v59 = vadd.f32 %v5720_v57, %v14422_v48  ;;  %v6209_v23 = vadd.f32 %v6208_v63, %v12277_v33  ;;  %v5722_v46 = vpop.f32.mrb[133].mxu0  ;;  %v6210_v7 = vpop.f32.mrb[69].mxu1  ;;  %v10017_v33 = vld [vmem:[%s14230_s3 + $0x1d4] ss:$8 sps:$4 sm:$0xff]  }
 0x28b   : > { %v5723_v32 = vpop.f32.mrb[134].mxu0  ;;  %v6211_v43 = vpop.f32.mrb[70].mxu1 }
 0x28c   : > { %4075 = vperm.xlu1 %9690, %v2765_v45   ;;  %4070 = vperm.xlu0 %9689, %v2764_v28   ;;  %v9202_v54 = vpack.c.bf16 %v5721_v59, %v5721_v59  ;;  %v9324_v39 = vpack.c.bf16 %v6209_v23, %v6209_v23  ;;  %v14423_v45 = vld [vmem:[#allocation32_spill] sm:$0xff]  ;;  %v6212_v57 = vadd.f32 %v6211_v43, %v12275_v36  ;;  %v6213_v63 = vpop.f32.mrb[71].mxu1  ;;  %v5725_v48 = vpop.f32.mrb[135].mxu0  ;;  %v2769_v59 = vld [vmem:[%s14231_s4 + $0x818] sm:$0xff] }
 0x28d   : > { %v5724_v28 = vadd.f32 %v5723_v32, %v14423_v45  ;;  %v2768_v36 = vld [vmem:[%s14231_s4 + $0x810] sm:$0xff]  ;;  %v12836_v23 = vpop.permute.xlu1 %3675  ;;  %v14424_v32 = vld [vmem:[#allocation35_spill] sm:$0xff]  ;;  %v2770_v45 = vld [vmem:[%s14231_s4 + $0x820] sm:$0xff] }
 0x28e   : > { %8018 = vst.msk [vmem:[%s12776_s23 + $0x8] sm:$0xf] %vm8015_vm0, %v9202_v54  ;;  %8140 = vst.msk [vmem:[%s12776_s23 + $0x1f0] sm:$0xf] %vm8015_vm0, %v9324_v39  ;;  %v9325_v7 = vpack.c.bf16 %v6212_v57, %v6212_v57  ;;  %5935 = vmatmul.mubr.bf16.gmra.mrb[240].mxu0 %v10015_v21  ;;  %6423 = vmatmul.mubr.bf16.gmra.mrb[176].mxu1 %v10016_v14  ;;  %v10021_v14 = vld [vmem:[%s14230_s3 + $0x1d0] ss:$8 sps:$4 sm:$0xff]  }
 0x28f   : > { %v9203_v46 = vpack.c.bf16 %v5724_v28, %v5724_v28  ;;  %5942 = vmatprep.mubr.bf16.mxu0 %v10017_v33  ;;  %6430 = vmatprep.mubr.bf16.mxu1 %v10019_v42  ;;  %v2771_v39 = vld [vmem:[%s14231_s4 + $0x828] sm:$0xff]  ;;  %v10025_v48 = vld [vmem:[%s14230_s3 + $0x5b4] ss:$8 sps:$4 sm:$0xff]  }
 0x290   : > { %4085 = vperm.xlu1 %9690, %v2767_v3   ;;  %4080 = vperm.xlu0 %9689, %v2766_v52   ;;  %v12838_v3 = vpop.permute.xlu0 %3670  ;;  %8141 = vst.msk [vmem:[%s12776_s23 + $0x1f4] sm:$0xf] %vm8015_vm0, %v9325_v7  ;;  %v10022_v28 = vld [vmem:[%s14230_s3 + $0x5a0] ss:$8 sps:$4 sm:$0xff]  }
 0x291   : > { %8019 = vst.msk [vmem:[%s12776_s23 + $0xc] sm:$0xf] %vm8015_vm0, %v9203_v46  ;;  %v5728_v21 = vpop.f32.mrb[136].mxu0  ;;  %v6216_v52 = vpop.f32.mrb[72].mxu1 }
 0x292   : > { %v5729_v43 = vadd.f32 %v5728_v21, %v14424_v32  ;;  %v6217_v33 = vadd.f32 %v6216_v52, %v12288_v29  ;;  %v5730_v42 = vpop.f32.mrb[137].mxu0  ;;  %v6218_v54 = vpop.f32.mrb[73].mxu1  ;;  %v10023_v29 = vld [vmem:[%s14230_s3 + $0x1e4] ss:$8 sps:$4 sm:$0xff]  }
 0x293   : > { %v5731_v57 = vpop.f32.mrb[138].mxu0  ;;  %v6219_v63 = vpop.f32.mrb[74].mxu1 }
 0x294   : > { %4095 = vperm.xlu1 %9690, %v2769_v59   ;;  %4090 = vperm.xlu0 %9689, %v2768_v36   ;;  %v9204_v46 = vpack.c.bf16 %v5729_v43, %v5729_v43  ;;  %v9326_v7 = vpack.c.bf16 %v6217_v33, %v6217_v33  ;;  %v14425_v59 = vld [vmem:[#allocation34_spill] sm:$0xff]  ;;  %v6220_v21 = vadd.f32 %v6219_v63, %v12286_v6  ;;  %v6221_v52 = vpop.f32.mrb[75].mxu1  ;;  %v5733_v32 = vpop.f32.mrb[139].mxu0  ;;  %v2773_v43 = vld [vmem:[%s14231_s4 + $0x838] sm:$0xff]  ;;  %v2772_v6 = vld [vmem:[%s14231_s4 + $0x830] sm:$0xff] }
 0x295   : > { %v5732_v36 = vadd.f32 %v5731_v57, %v14425_v59  ;;  %v12876_v33 = vpop.permute.xlu1 %3685  ;;  %v14426_v57 = vld [vmem:[#allocation37_spill] sm:$0xff]  ;;  %v2774_v59 = vld [vmem:[%s14231_s4 + $0x840] sm:$0xff] }
 0x296   : > { %8020 = vst.msk [vmem:[%s12776_s23 + $0x10] sm:$0xf] %vm8015_vm0, %v9204_v46  ;;  %8142 = vst.msk [vmem:[%s12776_s23 + $0x1f8] sm:$0xf] %vm8015_vm0, %v9326_v7  ;;  %v9327_v54 = vpack.c.bf16 %v6220_v21, %v6220_v21  ;;  %5943 = vmatmul.mubr.bf16.gmra.mrb[244].mxu0 %v10021_v14  ;;  %6431 = vmatmul.mubr.bf16.gmra.mrb[180].mxu1 %v10022_v28  ;;  %v10027_v28 = vld [vmem:[%s14230_s3 + $0x1e0] ss:$8 sps:$4 sm:$0xff]  }
 0x297   : > { %v9205_v42 = vpack.c.bf16 %v5732_v36, %v5732_v36  ;;  %5950 = vmatprep.mubr.bf16.mxu0 %v10023_v29  ;;  %6438 = vmatprep.mubr.bf16.mxu1 %v10025_v48  ;;  %v2775_v7 = vld [vmem:[%s14231_s4 + $0x848] sm:$0xff]  ;;  %v10028_v36 = vld [vmem:[%s14230_s3 + $0x5b0] ss:$8 sps:$4 sm:$0xff]  }
 0x298   : > { %4105 = vperm.xlu1 %9690, %v2771_v39   ;;  %4100 = vperm.xlu0 %9689, %v2770_v45   ;;  %v12878_v39 = vpop.permute.xlu0 %3680  ;;  %8143 = vst.msk [vmem:[%s12776_s23 + $0x1fc] sm:$0xf] %vm8015_vm0, %v9327_v54  ;;  %v10031_v32 = vld [vmem:[%s14230_s3 + $0x5c4] ss:$8 sps:$4 sm:$0xff]  }
 0x299   : > { %8021 = vst.msk [vmem:[%s12776_s23 + $0x14] sm:$0xf] %vm8015_vm0, %v9205_v42  ;;  %v5736_v14 = vpop.f32.mrb[140].mxu0  ;;  %v6224_v45 = vpop.f32.mrb[76].mxu1 }
 0x29a   : > { %v5737_v63 = vadd.f32 %v5736_v14, %v14426_v57  ;;  %v6225_v29 = vadd.f32 %v6224_v45, %v12314_v12  ;;  %v5738_v48 = vpop.f32.mrb[141].mxu0  ;;  %v6226_v46 = vpop.f32.mrb[77].mxu1  ;;  %v10029_v12 = vld [vmem:[%s14230_s3 + $0x1f4] ss:$8 sps:$4 sm:$0xff]  }
 0x29b   : > { %v5739_v21 = vpop.f32.mrb[142].mxu0  ;;  %v6227_v52 = vpop.f32.mrb[78].mxu1 }
 0x29c   : > { %4115 = vperm.xlu1 %9690, %v2773_v43   ;;  %4110 = vperm.xlu0 %9689, %v2772_v6   ;;  %v9206_v42 = vpack.c.bf16 %v5737_v63, %v5737_v63  ;;  %v9328_v54 = vpack.c.bf16 %v6225_v29, %v6225_v29  ;;  %v14427_v43 = vld [vmem:[#allocation36_spill] sm:$0xff]  ;;  %v6228_v14 = vadd.f32 %v6227_v52, %v12312_v40  ;;  %v6229_v45 = vpop.f32.mrb[79].mxu1  ;;  %v5741_v57 = vpop.f32.mrb[143].mxu0  ;;  %v2777_v63 = vld [vmem:[%s14231_s4 + $0x858] sm:$0xff] }
 0x29d   : > { %v5740_v6 = vadd.f32 %v5739_v21, %v14427_v43  ;;  %v2776_v40 = vld [vmem:[%s14231_s4 + $0x850] sm:$0xff]  ;;  %v12916_v29 = vpop.permute.xlu1 %3695  ;;  %v14428_v21 = vld [vmem:[#allocation39_spill] sm:$0xff]  ;;  %v2778_v43 = vld [vmem:[%s14231_s4 + $0x860] sm:$0xff] }
 0x29e   : > { %8022 = vst.msk [vmem:[%s12776_s23 + $0x18] sm:$0xf] %vm8015_vm0, %v9206_v42  ;;  %8144 = vst.msk [vmem:[%s12776_s23 + $0x200] sm:$0xf] %vm8015_vm0, %v9328_v54  ;;  %v9329_v46 = vpack.c.bf16 %v6228_v14, %v6228_v14  ;;  %5951 = vmatmul.mubr.bf16.gmra.mrb[248].mxu0 %v10027_v28  ;;  %6439 = vmatmul.mubr.bf16.gmra.mrb[184].mxu1 %v10028_v36  ;;  %v10033_v36 = vld [vmem:[%s14230_s3 + $0x1f0] ss:$8 sps:$4 sm:$0xff]  }
 0x29f   : > { %v9207_v48 = vpack.c.bf16 %v5740_v6, %v5740_v6  ;;  %5958 = vmatprep.mubr.bf16.mxu0 %v10029_v12  ;;  %6446 = vmatprep.mubr.bf16.mxu1 %v10031_v32  ;;  %v2779_v54 = vld [vmem:[%s14231_s4 + $0x868] sm:$0xff]  ;;  %v10038_v57 = vld [vmem:[%s14230_s3 + $0x5d4] ss:$8 sps:$4 sm:$0xff]  }
 0x2a0   : > { %4125 = vperm.xlu1 %9690, %v2775_v7   ;;  %4120 = vperm.xlu0 %9689, %v2774_v59   ;;  %v12918_v7 = vpop.permute.xlu0 %3690  ;;  %8145 = vst.msk [vmem:[%s12776_s23 + $0x204] sm:$0xf] %vm8015_vm0, %v9329_v46  ;;  %v10034_v6 = vld [vmem:[%s14230_s3 + $0x5c0] ss:$8 sps:$4 sm:$0xff]  }
 0x2a1   : > { %8023 = vst.msk [vmem:[%s12776_s23 + $0x1c] sm:$0xf] %vm8015_vm0, %v9207_v48  ;;  %v5744_v28 = vpop.f32.mrb[144].mxu0  ;;  %v6232_v59 = vpop.f32.mrb[80].mxu1 }
 0x2a2   : > { %v5745_v52 = vadd.f32 %v5744_v28, %v14428_v21  ;;  %v6233_v12 = vadd.f32 %v6232_v59, %v12325_v18  ;;  %v5746_v32 = vpop.f32.mrb[145].mxu0  ;;  %v6234_v42 = vpop.f32.mrb[81].mxu1  ;;  %v10037_v18 = vld [vmem:[%s14230_s3 + $0x204] ss:$8 sps:$4 sm:$0xff]  }
 0x2a3   : > { %v5747_v14 = vpop.f32.mrb[146].mxu0  ;;  %v6235_v45 = vpop.f32.mrb[82].mxu1 }
 0x2a4   : > { %4135 = vperm.xlu1 %9690, %v2777_v63   ;;  %4130 = vperm.xlu0 %9689, %v2776_v40   ;;  %v9208_v48 = vpack.c.bf16 %v5745_v52, %v5745_v52  ;;  %v9330_v46 = vpack.c.bf16 %v6233_v12, %v6233_v12  ;;  %v14429_v63 = vld [vmem:[#allocation38_spill] sm:$0xff]  ;;  %v6236_v28 = vadd.f32 %v6235_v45, %v12323_v11  ;;  %v6237_v59 = vpop.f32.mrb[83].mxu1  ;;  %v5749_v21 = vpop.f32.mrb[147].mxu0  ;;  %v2781_v52 = vld [vmem:[%s14231_s4 + $0x878] sm:$0xff]  ;;  %v2780_v11 = vld [vmem:[%s14231_s4 + $0x870] sm:$0xff] }
 0x2a5   : > { %v5748_v40 = vadd.f32 %v5747_v14, %v14429_v63  ;;  %v12956_v12 = vpop.permute.xlu1 %3705  ;;  %v14430_v14 = vld [vmem:[#allocation41_spill] sm:$0xff]  ;;  %v2782_v63 = vld [vmem:[%s14231_s4 + $0x880] sm:$0xff] }
 0x2a6   : > { %8024 = vst.msk [vmem:[%s12776_s23 + $0x20] sm:$0xf] %vm8015_vm0, %v9208_v48  ;;  %8146 = vst.msk [vmem:[%s12776_s23 + $0x208] sm:$0xf] %vm8015_vm0, %v9330_v46  ;;  %v9331_v42 = vpack.c.bf16 %v6236_v28, %v6236_v28  ;;  %5959 = vmatmul.mubr.bf16.gmra.mrb[252].mxu0 %v10033_v36  ;;  %6447 = vmatmul.mubr.bf16.gmra.mrb[188].mxu1 %v10034_v6  ;;  %v10035_v6 = vld [vmem:[%s14230_s3 + $0x200] ss:$8 sps:$4 sm:$0xff]  }
 0x2a7   : > { %v9209_v32 = vpack.c.bf16 %v5748_v40, %v5748_v40  ;;  %5966 = vmatprep.mubr.bf16.mxu0 %v10037_v18  ;;  %6454 = vmatprep.mubr.bf16.mxu1 %v10038_v57  ;;  %v2783_v46 = vld [vmem:[%s14231_s4 + $0x888] sm:$0xff]  ;;  %v10040_v40 = vld [vmem:[%s14230_s3 + $0x5d0] ss:$8 sps:$4 sm:$0xff]  }
 0x2a8   : > { %4145 = vperm.xlu1 %9690, %v2779_v54   ;;  %4140 = vperm.xlu0 %9689, %v2778_v43   ;;  %v12958_v54 = vpop.permute.xlu0 %3700  ;;  %8147 = vst.msk [vmem:[%s12776_s23 + $0x20c] sm:$0xf] %vm8015_vm0, %v9331_v42  ;;  %v10044_v21 = vld [vmem:[%s14230_s3 + $0x5e4] ss:$8 sps:$4 sm:$0xff]  }
 0x2a9   : > { %8025 = vst.msk [vmem:[%s12776_s23 + $0x24] sm:$0xf] %vm8015_vm0, %v9209_v32  ;;  %v5752_v36 = vpop.f32.mrb[148].mxu0  ;;  %v6240_v43 = vpop.f32.mrb[84].mxu1 }
 0x2aa   : > { %v5753_v45 = vadd.f32 %v5752_v36, %v14430_v14  ;;  %v6241_v18 = vadd.f32 %v6240_v43, %v12351_v56  ;;  %v5754_v57 = vpop.f32.mrb[149].mxu0  ;;  %v6242_v48 = vpop.f32.mrb[85].mxu1  ;;  %v10043_v56 = vld [vmem:[%s14230_s3 + $0x214] ss:$8 sps:$4 sm:$0xff]  }
 0x2ab   : > { %v5755_v28 = vpop.f32.mrb[150].mxu0  ;;  %v6243_v59 = vpop.f32.mrb[86].mxu1 }
 0x2ac   : > { %4155 = vperm.xlu1 %9690, %v2781_v52   ;;  %4150 = vperm.xlu0 %9689, %v2780_v11   ;;  %v9210_v32 = vpack.c.bf16 %v5753_v45, %v5753_v45  ;;  %v9332_v42 = vpack.c.bf16 %v6241_v18, %v6241_v18  ;;  %v14431_v52 = vld [vmem:[#allocation40_spill] sm:$0xff]  ;;  %v6244_v36 = vadd.f32 %v6243_v59, %v12349_v0  ;;  %v6245_v43 = vpop.f32.mrb[87].mxu1  ;;  %v5757_v14 = vpop.f32.mrb[151].mxu0  ;;  %v2785_v45 = vld [vmem:[%s14231_s4 + $0x898] sm:$0xff] }
 0x2ad   : > { %v5756_v11 = vadd.f32 %v5755_v28, %v14431_v52  ;;  %v2784_v0 = vld [vmem:[%s14231_s4 + $0x890] sm:$0xff]  ;;  %v12996_v18 = vpop.permute.xlu1 %3715  ;;  %v14432_v28 = vld [vmem:[#allocation43_spill] sm:$0xff]  ;;  %v2786_v52 = vld [vmem:[%s14231_s4 + $0x8a0] sm:$0xff] }
 0x2ae   : > { %8026 = vst.msk [vmem:[%s12776_s23 + $0x28] sm:$0xf] %vm8015_vm0, %v9210_v32  ;;  %8148 = vst.msk [vmem:[%s12776_s23 + $0x210] sm:$0xf] %vm8015_vm0, %v9332_v42  ;;  %v9333_v48 = vpack.c.bf16 %v6244_v36, %v6244_v36  ;;  %5967 = vmatmul.mubr.bf16.gmra.mrb[0].mxu0 %v10035_v6  ;;  %6455 = vmatmul.mubr.bf16.gmra.mrb[192].mxu1 %v10040_v40  ;;  %v10041_v40 = vld [vmem:[%s14230_s3 + $0x210] ss:$8 sps:$4 sm:$0xff]  }
 0x2af   : > { %v9211_v57 = vpack.c.bf16 %v5756_v11, %v5756_v11  ;;  %5974 = vmatprep.mubr.bf16.mxu0 %v10043_v56  ;;  %6462 = vmatprep.mubr.bf16.mxu1 %v10044_v21  ;;  %v2787_v42 = vld [vmem:[%s14231_s4 + $0x8a8] sm:$0xff]  ;;  %v10050_v14 = vld [vmem:[%s14230_s3 + $0x5f4] ss:$8 sps:$4 sm:$0xff]  }
 0x2b0   : > { %4165 = vperm.xlu1 %9690, %v2783_v46   ;;  %4160 = vperm.xlu0 %9689, %v2782_v63   ;;  %v12998_v46 = vpop.permute.xlu0 %3710  ;;  %8149 = vst.msk [vmem:[%s12776_s23 + $0x214] sm:$0xf] %vm8015_vm0, %v9333_v48  ;;  %v10046_v11 = vld [vmem:[%s14230_s3 + $0x5e0] ss:$8 sps:$4 sm:$0xff]  }
 0x2b1   : > { %8027 = vst.msk [vmem:[%s12776_s23 + $0x2c] sm:$0xf] %vm8015_vm0, %v9211_v57  ;;  %v5760_v6 = vpop.f32.mrb[152].mxu0  ;;  %v6248_v63 = vpop.f32.mrb[88].mxu1 }
 0x2b2   : > { %v5761_v59 = vadd.f32 %v5760_v6, %v14432_v28  ;;  %v6249_v56 = vadd.f32 %v6248_v63, %v12362_v1  ;;  %v5762_v21 = vpop.f32.mrb[153].mxu0  ;;  %v6250_v32 = vpop.f32.mrb[89].mxu1  ;;  %v10049_v1 = vld [vmem:[%s14230_s3 + $0x224] ss:$8 sps:$4 sm:$0xff]  }
 0x2b3   : > { %v5763_v36 = vpop.f32.mrb[154].mxu0  ;;  %v6251_v43 = vpop.f32.mrb[90].mxu1 }
 0x2b4   : > { %4175 = vperm.xlu1 %9690, %v2785_v45   ;;  %4170 = vperm.xlu0 %9689, %v2784_v0   ;;  %v9212_v57 = vpack.c.bf16 %v5761_v59, %v5761_v59  ;;  %v9334_v48 = vpack.c.bf16 %v6249_v56, %v6249_v56  ;;  %v14433_v45 = vld [vmem:[#allocation42_spill] sm:$0xff]  ;;  %v6252_v6 = vadd.f32 %v6251_v43, %v12360_v35  ;;  %v6253_v63 = vpop.f32.mrb[91].mxu1  ;;  %v5765_v28 = vpop.f32.mrb[155].mxu0  ;;  %v2789_v59 = vld [vmem:[%s14231_s4 + $0x8b8] sm:$0xff]  ;;  %v2788_v35 = vld [vmem:[%s14231_s4 + $0x8b0] sm:$0xff] }
 0x2b5   : > { %v5764_v0 = vadd.f32 %v5763_v36, %v14433_v45  ;;  %v13036_v56 = vpop.permute.xlu1 %3725  ;;  %v14434_v36 = vld [vmem:[#allocation45_spill] sm:$0xff]  ;;  %v2790_v45 = vld [vmem:[%s14231_s4 + $0x8c0] sm:$0xff] }
 0x2b6   : > { %8028 = vst.msk [vmem:[%s12776_s23 + $0x30] sm:$0xf] %vm8015_vm0, %v9212_v57  ;;  %8150 = vst.msk [vmem:[%s12776_s23 + $0x218] sm:$0xf] %vm8015_vm0, %v9334_v48  ;;  %v9335_v32 = vpack.c.bf16 %v6252_v6, %v6252_v6  ;;  %5975 = vmatmul.mubr.bf16.gmra.mrb[4].mxu0 %v10041_v40  ;;  %6463 = vmatmul.mubr.bf16.gmra.mrb[196].mxu1 %v10046_v11  ;;  %v10047_v11 = vld [vmem:[%s14230_s3 + $0x220] ss:$8 sps:$4 sm:$0xff]  }
 0x2b7   : > { %v9213_v21 = vpack.c.bf16 %v5764_v0, %v5764_v0  ;;  %5982 = vmatprep.mubr.bf16.mxu0 %v10049_v1  ;;  %6470 = vmatprep.mubr.bf16.mxu1 %v10050_v14  ;;  %v2791_v48 = vld [vmem:[%s14231_s4 + $0x8c8] sm:$0xff]  ;;  %v10052_v0 = vld [vmem:[%s14230_s3 + $0x5f0] ss:$8 sps:$4 sm:$0xff]  }
 0x2b8   : > { %4185 = vperm.xlu1 %9690, %v2787_v42   ;;  %4180 = vperm.xlu0 %9689, %v2786_v52   ;;  %v13038_v42 = vpop.permute.xlu0 %3720  ;;  %8151 = vst.msk [vmem:[%s12776_s23 + $0x21c] sm:$0xf] %vm8015_vm0, %v9335_v32  ;;  %v10056_v28 = vld [vmem:[%s14230_s3 + $0x604] ss:$8 sps:$4 sm:$0xff]  }
 0x2b9   : > { %8029 = vst.msk [vmem:[%s12776_s23 + $0x34] sm:$0xf] %vm8015_vm0, %v9213_v21  ;;  %v5768_v40 = vpop.f32.mrb[156].mxu0  ;;  %v6256_v52 = vpop.f32.mrb[92].mxu1 }
 0x2ba   : > { %v5769_v43 = vadd.f32 %v5768_v40, %v14434_v36  ;;  %v6257_v1 = vadd.f32 %v6256_v52, %v12388_v26  ;;  %v5770_v14 = vpop.f32.mrb[157].mxu0  ;;  %v6258_v57 = vpop.f32.mrb[93].mxu1  ;;  %v10055_v26 = vld [vmem:[%s14230_s3 + $0x234] ss:$8 sps:$4 sm:$0xff]  }
 0x2bb   : > { %v5771_v6 = vpop.f32.mrb[158].mxu0  ;;  %v6259_v63 = vpop.f32.mrb[94].mxu1 }
 0x2bc   : > { %4195 = vperm.xlu1 %9690, %v2789_v59   ;;  %4190 = vperm.xlu0 %9689, %v2788_v35   ;;  %v9214_v21 = vpack.c.bf16 %v5769_v43, %v5769_v43  ;;  %v9336_v32 = vpack.c.bf16 %v6257_v1, %v6257_v1  ;;  %v14435_v59 = vld [vmem:[#allocation44_spill] sm:$0xff]  ;;  %v6260_v40 = vadd.f32 %v6259_v63, %v12386_v9  ;;  %v6261_v52 = vpop.f32.mrb[95].mxu1  ;;  %v5773_v36 = vpop.f32.mrb[159].mxu0  ;;  %v2793_v43 = vld [vmem:[%s14231_s4 + $0x8d8] sm:$0xff] }
 0x2bd   : > { %v5772_v35 = vadd.f32 %v5771_v6, %v14435_v59  ;;  %v2792_v9 = vld [vmem:[%s14231_s4 + $0x8d0] sm:$0xff]  ;;  %v13076_v1 = vpop.permute.xlu1 %3735  ;;  %v14436_v6 = vld [vmem:[#allocation47_spill] sm:$0xff]  ;;  %v2794_v59 = vld [vmem:[%s14231_s4 + $0x8e0] sm:$0xff] }
 0x2be   : > { %8030 = vst.msk [vmem:[%s12776_s23 + $0x38] sm:$0xf] %vm8015_vm0, %v9214_v21  ;;  %8152 = vst.msk [vmem:[%s12776_s23 + $0x220] sm:$0xf] %vm8015_vm0, %v9336_v32  ;;  %v9337_v57 = vpack.c.bf16 %v6260_v40, %v6260_v40  ;;  %5983 = vmatmul.mubr.bf16.gmra.mrb[8].mxu0 %v10047_v11  ;;  %6471 = vmatmul.mubr.bf16.gmra.mrb[200].mxu1 %v10052_v0  ;;  %v10053_v0 = vld [vmem:[%s14230_s3 + $0x230] ss:$8 sps:$4 sm:$0xff]  }
 0x2bf   : > { %v9215_v14 = vpack.c.bf16 %v5772_v35, %v5772_v35  ;;  %5990 = vmatprep.mubr.bf16.mxu0 %v10055_v26  ;;  %6478 = vmatprep.mubr.bf16.mxu1 %v10056_v28  ;;  %v2795_v32 = vld [vmem:[%s14231_s4 + $0x8e8] sm:$0xff]  ;;  %v10062_v36 = vld [vmem:[%s14230_s3 + $0x614] ss:$8 sps:$4 sm:$0xff]  }
 0x2c0   : > { %4205 = vperm.xlu1 %9690, %v2791_v48   ;;  %4200 = vperm.xlu0 %9689, %v2790_v45   ;;  %v13078_v48 = vpop.permute.xlu0 %3730  ;;  %8153 = vst.msk [vmem:[%s12776_s23 + $0x224] sm:$0xf] %vm8015_vm0, %v9337_v57  ;;  %v10058_v35 = vld [vmem:[%s14230_s3 + $0x600] ss:$8 sps:$4 sm:$0xff]  }
 0x2c1   : > { %8031 = vst.msk [vmem:[%s12776_s23 + $0x3c] sm:$0xf] %vm8015_vm0, %v9215_v14  ;;  %v5776_v11 = vpop.f32.mrb[160].mxu0  ;;  %v6264_v45 = vpop.f32.mrb[96].mxu1 }
 0x2c2   : > { %v5777_v63 = vadd.f32 %v5776_v11, %v14436_v6  ;;  %v6265_v26 = vadd.f32 %v6264_v45, %v12399_v25  ;;  %v5778_v28 = vpop.f32.mrb[161].mxu0  ;;  %v6266_v21 = vpop.f32.mrb[97].mxu1  ;;  %v10061_v25 = vld [vmem:[%s14230_s3 + $0x244] ss:$8 sps:$4 sm:$0xff]  }
 0x2c3   : > { %v5779_v40 = vpop.f32.mrb[162].mxu0  ;;  %v6267_v52 = vpop.f32.mrb[98].mxu1 }
 0x2c4   : > { %4215 = vperm.xlu1 %9690, %v2793_v43   ;;  %4210 = vperm.xlu0 %9689, %v2792_v9   ;;  %v9216_v14 = vpack.c.bf16 %v5777_v63, %v5777_v63  ;;  %v9338_v57 = vpack.c.bf16 %v6265_v26, %v6265_v26  ;;  %v14437_v43 = vld [vmem:[#allocation46_spill] sm:$0xff]  ;;  %v6268_v11 = vadd.f32 %v6267_v52, %v12397_v37  ;;  %v6269_v45 = vpop.f32.mrb[99].mxu1  ;;  %v5781_v6 = vpop.f32.mrb[163].mxu0  ;;  %v2797_v63 = vld [vmem:[%s14231_s4 + $0x8f8] sm:$0xff]  ;;  %v2796_v37 = vld [vmem:[%s14231_s4 + $0x8f0] sm:$0xff] }
 0x2c5   : > { %v5780_v9 = vadd.f32 %v5779_v40, %v14437_v43  ;;  %v13116_v26 = vpop.permute.xlu1 %3745 }
 0x2c6   : > { %8032 = vst.msk [vmem:[%s12776_s23 + $0x40] sm:$0xf] %vm8015_vm0, %v9216_v14  ;;  %8154 = vst.msk [vmem:[%s12776_s23 + $0x228] sm:$0xf] %vm8015_vm0, %v9338_v57  ;;  %v9339_v21 = vpack.c.bf16 %v6268_v11, %v6268_v11  ;;  %5991 = vmatmul.mubr.bf16.gmra.mrb[12].mxu0 %v10053_v0  ;;  %6479 = vmatmul.mubr.bf16.gmra.mrb[204].mxu1 %v10058_v35  ;;  %v14438_v35 = vld [vmem:[#allocation49_spill] sm:$0xff] }
 0x2c7   : > { %v9217_v28 = vpack.c.bf16 %v5780_v9, %v5780_v9  ;;  %5998 = vmatprep.mubr.bf16.mxu0 %v10061_v25  ;;  %6486 = vmatprep.mubr.bf16.mxu1 %v10062_v36  ;;  %v10059_v14 = vld [vmem:[%s14230_s3 + $0x240] ss:$8 sps:$4 sm:$0xff]   ;;  %v10064_v57 = vld [vmem:[%s14230_s3 + $0x610] ss:$8 sps:$4 sm:$0xff]   ;;  %v10067_v11 = vld [vmem:[%s14230_s3 + $0x254] ss:$8 sps:$4 sm:$0xff]  }
 0x2c8   : > { %4225 = vperm.xlu1 %9690, %v2795_v32   ;;  %4220 = vperm.xlu0 %9689, %v2794_v59   ;;  %v13118_v32 = vpop.permute.xlu0 %3740  ;;  %8155 = vst.msk [vmem:[%s12776_s23 + $0x22c] sm:$0xf] %vm8015_vm0, %v9339_v21 }
 0x2c9   : > { %8033 = vst.msk [vmem:[%s12776_s23 + $0x44] sm:$0xf] %vm8015_vm0, %v9217_v28  ;;  %v5784_v0 = vpop.f32.mrb[164].mxu0  ;;  %v6272_v59 = vpop.f32.mrb[100].mxu1  ;;  %v14439_v28 = vld [vmem:[#allocation48_spill] sm:$0xff] }
 0x2ca   : > { %v5785_v40 = vadd.f32 %v5784_v0, %v14438_v35  ;;  %v6273_v52 = vadd.f32 %v6272_v59, %v12425_v20  ;;  %v5786_v25 = vpop.f32.mrb[165].mxu0  ;;  %v6274_v36 = vpop.f32.mrb[101].mxu1  ;;  %v10068_v20 = vld [vmem:[%s14230_s3 + $0x624] ss:$8 sps:$4 sm:$0xff]  }
 0x2cb   : > { %v5787_v43 = vpop.f32.mrb[166].mxu0  ;;  %v6275_v9 = vpop.f32.mrb[102].mxu1  ;;  %v14440_v25 = vld [vmem:[#allocation51_spill] sm:$0xff] }
 0x2cc   : > { %4235 = vperm.xlu1 %9690, %v2797_v63   ;;  %4230 = vperm.xlu0 %9689, %v2796_v37   ;;  %v9218_v45 = vpack.c.bf16 %v5785_v40, %v5785_v40  ;;  %v9340_v6 = vpack.c.bf16 %v6273_v52, %v6273_v52  ;;  %v5788_v21 = vadd.f32 %v5787_v43, %v14439_v28  ;;  %v6277_v37 = vpop.f32.mrb[103].mxu1  ;;  %v5789_v0 = vpop.f32.mrb[167].mxu0 }
 0x2cd   : > { %v6276_v63 = vadd.f32 %v6275_v9, %v12423_v49 }
 0x2ce   : > { %8034 = vst.msk [vmem:[%s12776_s23 + $0x48] sm:$0xf] %vm8015_vm0, %v9218_v45  ;;  %8156 = vst.msk [vmem:[%s12776_s23 + $0x230] sm:$0xf] %vm8015_vm0, %v9340_v6  ;;  %v9219_v59 = vpack.c.bf16 %v5788_v21, %v5788_v21  ;;  %5999 = vmatmul.mubr.bf16.gmra.mrb[16].mxu0 %v10059_v14  ;;  %6487 = vmatmul.mubr.bf16.gmra.mrb[208].mxu1 %v10064_v57  ;;  %v10065_v14 = vld [vmem:[%s14230_s3 + $0x250] ss:$8 sps:$4 sm:$0xff]  }
 0x2cf   : > { %v9341_v35 = vpack.c.bf16 %v6276_v63, %v6276_v63  ;;  %6006 = vmatprep.mubr.bf16.mxu0 %v10067_v11  ;;  %6494 = vmatprep.mubr.bf16.mxu1 %v10068_v20  ;;  %v10070_v57 = vld [vmem:[%s14230_s3 + $0x620] ss:$8 sps:$4 sm:$0xff]   ;;  %v10073_v45 = vld [vmem:[%s14230_s3 + $0x264] ss:$8 sps:$4 sm:$0xff]  }
 0x2d0   : > { %8035 = vst.msk [vmem:[%s12776_s23 + $0x4c] sm:$0xf] %vm8015_vm0, %v9219_v59  ;;  %v14441_v21 = vld [vmem:[#allocation50_spill] sm:$0xff] }
 0x2d1   : > { %8157 = vst.msk [vmem:[%s12776_s23 + $0x234] sm:$0xf] %vm8015_vm0, %v9341_v35  ;;  %v5792_v40 = vpop.f32.mrb[168].mxu0  ;;  %v6280_v52 = vpop.f32.mrb[104].mxu1 }
 0x2d2   : > { %v5793_v49 = vadd.f32 %v5792_v40, %v14440_v25  ;;  %v6281_v36 = vadd.f32 %v6280_v52, %v12454_v38  ;;  %v5794_v43 = vpop.f32.mrb[169].mxu0  ;;  %v6282_v9 = vpop.f32.mrb[105].mxu1  ;;  %v10074_v38 = vld [vmem:[%s14230_s3 + $0x634] ss:$8 sps:$4 sm:$0xff]  }
 0x2d3   : > { %v5795_v11 = vpop.f32.mrb[170].mxu0  ;;  %v6283_v20 = vpop.f32.mrb[106].mxu1 }
 0x2d4   : > { %v9220_v6 = vpack.c.bf16 %v5793_v49, %v5793_v49  ;;  %v9342_v28 = vpack.c.bf16 %v6281_v36, %v6281_v36  ;;  %v5796_v63 = vadd.f32 %v5795_v11, %v14441_v21  ;;  %v6284_v37 = vadd.f32 %v6283_v20, %v12452_v47  ;;  %v6285_v0 = vpop.f32.mrb[107].mxu1  ;;  %v5797_v59 = vpop.f32.mrb[171].mxu0  ;;  %v14442_v49 = vld [vmem:[#allocation53_spill] sm:$0xff] }
 0x2d6   : > { %8036 = vst.msk [vmem:[%s12776_s23 + $0x50] sm:$0xf] %vm8015_vm0, %v9220_v6  ;;  %8158 = vst.msk [vmem:[%s12776_s23 + $0x238] sm:$0xf] %vm8015_vm0, %v9342_v28  ;;  %v9221_v35 = vpack.c.bf16 %v5796_v63, %v5796_v63  ;;  %v9343_v40 = vpack.c.bf16 %v6284_v37, %v6284_v37  ;;  %6007 = vmatmul.mubr.bf16.gmra.mrb[20].mxu0 %v10065_v14  ;;  %6495 = vmatmul.mubr.bf16.gmra.mrb[212].mxu1 %v10070_v57  ;;  %v10071_v14 = vld [vmem:[%s14230_s3 + $0x260] ss:$8 sps:$4 sm:$0xff]  }
 0x2d7   : > { %6014 = vmatprep.mubr.bf16.mxu0 %v10073_v45  ;;  %6502 = vmatprep.mubr.bf16.mxu1 %v10074_v38  ;;  %v10076_v57 = vld [vmem:[%s14230_s3 + $0x630] ss:$8 sps:$4 sm:$0xff]   ;;  %v10079_v45 = vld [vmem:[%s14230_s3 + $0x274] ss:$8 sps:$4 sm:$0xff]  }
 0x2d8   : > { %8037 = vst.msk [vmem:[%s12776_s23 + $0x54] sm:$0xf] %vm8015_vm0, %v9221_v35  ;;  %8159 = vst.msk [vmem:[%s12776_s23 + $0x23c] sm:$0xf] %vm8015_vm0, %v9343_v40  ;;  %v14443_v28 = vld [vmem:[#allocation52_spill] sm:$0xff] }
 0x2d9   : > { %v5800_v52 = vpop.f32.mrb[172].mxu0  ;;  %v6288_v25 = vpop.f32.mrb[108].mxu1 }
 0x2da   : > { %v5801_v47 = vadd.f32 %v5800_v52, %v14442_v49  ;;  %v6289_v36 = vadd.f32 %v6288_v25, %v12467_v19  ;;  %v5802_v43 = vpop.f32.mrb[173].mxu0  ;;  %v6290_v9 = vpop.f32.mrb[109].mxu1  ;;  %v10080_v19 = vld [vmem:[%s14230_s3 + $0x644] ss:$8 sps:$4 sm:$0xff]  }
 0x2db   : > { %v5803_v11 = vpop.f32.mrb[174].mxu0  ;;  %v6291_v20 = vpop.f32.mrb[110].mxu1  ;;  %v14444_v25 = vld [vmem:[#allocation55_spill] sm:$0xff]  ;;  %v10077_v43 = vld [vmem:[%s14230_s3 + $0x270] ss:$8 sps:$4 sm:$0xff]  }
 0x2dc   : > { %v9222_v38 = vpack.c.bf16 %v5801_v47, %v5801_v47  ;;  %v9344_v6 = vpack.c.bf16 %v6289_v36, %v6289_v36  ;;  %v5804_v21 = vadd.f32 %v5803_v11, %v14443_v28  ;;  %v6292_v63 = vadd.f32 %v6291_v20, %v12465_v27  ;;  %v6293_v37 = vpop.f32.mrb[111].mxu1  ;;  %v5805_v0 = vpop.f32.mrb[175].mxu0  ;;  %v10082_v9 = vld [vmem:[%s14230_s3 + $0x640] ss:$8 sps:$4 sm:$0xff]   ;;  %v10085_v11 = vld [vmem:[%s14230_s3 + $0x284] ss:$8 sps:$4 sm:$0xff]  }
 0x2de   : > { %8038 = vst.msk [vmem:[%s12776_s23 + $0x58] sm:$0xf] %vm8015_vm0, %v9222_v38  ;;  %8160 = vst.msk [vmem:[%s12776_s23 + $0x240] sm:$0xf] %vm8015_vm0, %v9344_v6  ;;  %v9223_v59 = vpack.c.bf16 %v5804_v21, %v5804_v21  ;;  %v9345_v35 = vpack.c.bf16 %v6292_v63, %v6292_v63  ;;  %6015 = vmatmul.mubr.bf16.gmra.mrb[24].mxu0 %v10071_v14  ;;  %6503 = vmatmul.mubr.bf16.gmra.mrb[216].mxu1 %v10076_v57 }
 0x2df   : > { %6022 = vmatprep.mubr.bf16.mxu0 %v10079_v45  ;;  %6510 = vmatprep.mubr.bf16.mxu1 %v10080_v19  ;;  %v14445_v19 = vld [vmem:[#allocation54_spill] sm:$0xff] }
 0x2e0   : > { %8039 = vst.msk [vmem:[%s12776_s23 + $0x5c] sm:$0xf] %vm8015_vm0, %v9223_v59  ;;  %8161 = vst.msk [vmem:[%s12776_s23 + $0x244] sm:$0xf] %vm8015_vm0, %v9345_v35  ;;  %v14446_v35 = vld [vmem:[#allocation57_spill] sm:$0xff] }
 0x2e1   : > { %v5808_v40 = vpop.f32.mrb[176].mxu0  ;;  %v6296_v52 = vpop.f32.mrb[112].mxu1 }
 0x2e2   : > { %v5809_v27 = vadd.f32 %v5808_v40, %v14444_v25  ;;  %v6297_v49 = vadd.f32 %v6296_v52, %v12492_v41  ;;  %v5810_v47 = vpop.f32.mrb[177].mxu0  ;;  %v6298_v36 = vpop.f32.mrb[113].mxu1  ;;  %v10086_v41 = vld [vmem:[%s14230_s3 + $0x654] ss:$8 sps:$4 sm:$0xff]  }
 0x2e3   : > { %v5811_v14 = vpop.f32.mrb[178].mxu0  ;;  %v6299_v57 = vpop.f32.mrb[114].mxu1 }
 0x2e4   : > { %v9224_v20 = vpack.c.bf16 %v5809_v27, %v5809_v27  ;;  %v9346_v45 = vpack.c.bf16 %v6297_v49, %v6297_v49  ;;  %v5812_v38 = vadd.f32 %v5811_v14, %v14445_v19  ;;  %v6300_v6 = vadd.f32 %v6299_v57, %v12490_v5  ;;  %v6301_v28 = vpop.f32.mrb[115].mxu1  ;;  %v5813_v21 = vpop.f32.mrb[179].mxu0  ;;  %v10083_v27 = vld [vmem:[%s14230_s3 + $0x280] ss:$8 sps:$4 sm:$0xff]   ;;  %v10088_v49 = vld [vmem:[%s14230_s3 + $0x650] ss:$8 sps:$4 sm:$0xff]  }
 0x2e5   : > { %v14447_v57 = vld [vmem:[#allocation56_spill] sm:$0xff]  ;;  %v14448_v21 = vld [vmem:[#allocation59_spill] sm:$0xff] }
 0x2e6   : > { %8040 = vst.msk [vmem:[%s12776_s23 + $0x60] sm:$0xf] %vm8015_vm0, %v9224_v20  ;;  %8162 = vst.msk [vmem:[%s12776_s23 + $0x248] sm:$0xf] %vm8015_vm0, %v9346_v45  ;;  %v9225_v63 = vpack.c.bf16 %v5812_v38, %v5812_v38  ;;  %v9347_v37 = vpack.c.bf16 %v6300_v6, %v6300_v6  ;;  %6023 = vmatmul.mubr.bf16.gmra.mrb[28].mxu0 %v10077_v43  ;;  %6511 = vmatmul.mubr.bf16.gmra.mrb[220].mxu1 %v10082_v9  ;;  %v10091_v43 = vld [vmem:[%s14230_s3 + $0x294] ss:$8 sps:$4 sm:$0xff]  }
 0x2e7   : > { %6030 = vmatprep.mubr.bf16.mxu0 %v10085_v11  ;;  %6518 = vmatprep.mubr.bf16.mxu1 %v10086_v41 }
 0x2e8   : > { %8041 = vst.msk [vmem:[%s12776_s23 + $0x64] sm:$0xf] %vm8015_vm0, %v9225_v63  ;;  %8163 = vst.msk [vmem:[%s12776_s23 + $0x24c] sm:$0xf] %vm8015_vm0, %v9347_v37 }
 0x2e9   : > { %v5816_v0 = vpop.f32.mrb[180].mxu0  ;;  %v6304_v59 = vpop.f32.mrb[116].mxu1 }
 0x2ea   : > { %v5817_v5 = vadd.f32 %v5816_v0, %v14446_v35  ;;  %v6305_v40 = vadd.f32 %v6304_v59, %v12514_v61  ;;  %v5818_v52 = vpop.f32.mrb[181].mxu0  ;;  %v6306_v25 = vpop.f32.mrb[117].mxu1  ;;  %v10092_v61 = vld [vmem:[%s14230_s3 + $0x664] ss:$8 sps:$4 sm:$0xff]   ;;  %v10089_v59 = vld [vmem:[%s14230_s3 + $0x290] ss:$8 sps:$4 sm:$0xff]  }
 0x2eb   : > { %v5819_v47 = vpop.f32.mrb[182].mxu0  ;;  %v6307_v36 = vpop.f32.mrb[118].mxu1  ;;  %v10094_v35 = vld [vmem:[%s14230_s3 + $0x660] ss:$8 sps:$4 sm:$0xff]   ;;  %v10097_v52 = vld [vmem:[%s14230_s3 + $0x2a4] ss:$8 sps:$4 sm:$0xff]  }
 0x2ec   : > { %v9226_v9 = vpack.c.bf16 %v5817_v5, %v5817_v5  ;;  %v9348_v14 = vpack.c.bf16 %v6305_v40, %v6305_v40  ;;  %v5820_v11 = vadd.f32 %v5819_v47, %v14447_v57  ;;  %v6308_v41 = vadd.f32 %v6307_v36, %v12512_v8  ;;  %v6309_v20 = vpop.f32.mrb[119].mxu1  ;;  %v5821_v45 = vpop.f32.mrb[183].mxu0 }
 0x2ee   : > { %8042 = vst.msk [vmem:[%s12776_s23 + $0x68] sm:$0xf] %vm8015_vm0, %v9226_v9  ;;  %8164 = vst.msk [vmem:[%s12776_s23 + $0x250] sm:$0xf] %vm8015_vm0, %v9348_v14  ;;  %v9227_v19 = vpack.c.bf16 %v5820_v11, %v5820_v11  ;;  %v9349_v38 = vpack.c.bf16 %v6308_v41, %v6308_v41  ;;  %6031 = vmatmul.mubr.bf16.gmra.mrb[32].mxu0 %v10083_v27  ;;  %6519 = vmatmul.mubr.bf16.gmra.mrb[224].mxu1 %v10088_v49  ;;  %v14449_v49 = vld [vmem:[#allocation58_spill] sm:$0xff]  ;;  %v14450_v41 = vld [vmem:[#allocation61_spill] sm:$0xff] }
 0x2ef   : > { %6038 = vmatprep.mubr.bf16.mxu0 %v10091_v43  ;;  %6526 = vmatprep.mubr.bf16.mxu1 %v10092_v61 }
 0x2f0   : > { %8043 = vst.msk [vmem:[%s12776_s23 + $0x6c] sm:$0xf] %vm8015_vm0, %v9227_v19  ;;  %8165 = vst.msk [vmem:[%s12776_s23 + $0x254] sm:$0xf] %vm8015_vm0, %v9349_v38  ;;  %v10095_v38 = vld [vmem:[%s14230_s3 + $0x2a0] ss:$8 sps:$4 sm:$0xff]  }
 0x2f1   : > { %v5824_v6 = vpop.f32.mrb[184].mxu0  ;;  %v6312_v28 = vpop.f32.mrb[120].mxu1 }
 0x2f2   : > { %v5825_v8 = vadd.f32 %v5824_v6, %v14448_v21  ;;  %v6313_v63 = vadd.f32 %v6312_v28, %v12542_v34  ;;  %v5826_v37 = vpop.f32.mrb[185].mxu0  ;;  %v6314_v0 = vpop.f32.mrb[121].mxu1  ;;  %v10098_v34 = vld [vmem:[%s14230_s3 + $0x674] ss:$8 sps:$4 sm:$0xff]   ;;  %v10100_v6 = vld [vmem:[%s14230_s3 + $0x670] ss:$8 sps:$4 sm:$0xff]  }
 0x2f3   : > { %v5827_v5 = vpop.f32.mrb[186].mxu0  ;;  %v6315_v40 = vpop.f32.mrb[122].mxu1  ;;  %v14451_v0 = vld [vmem:[#allocation60_spill] sm:$0xff] }
 0x2f4   : > { %v9228_v25 = vpack.c.bf16 %v5825_v8, %v5825_v8  ;;  %v9350_v27 = vpack.c.bf16 %v6313_v63, %v6313_v63  ;;  %v5828_v47 = vadd.f32 %v5827_v5, %v14449_v49  ;;  %v6316_v36 = vadd.f32 %v6315_v40, %v12540_v16  ;;  %v6317_v43 = vpop.f32.mrb[123].mxu1  ;;  %v5829_v61 = vpop.f32.mrb[187].mxu0  ;;  %v10103_v8 = vld [vmem:[%s14230_s3 + $0x2b4] ss:$8 sps:$4 sm:$0xff]   ;;  %v14452_v49 = vld [vmem:[#allocation63_spill] sm:$0xff] }
 0x2f5   : > { %v10101_v61 = vld [vmem:[%s14230_s3 + $0x2b0] ss:$8 sps:$4 sm:$0xff]  }
 0x2f6   : > { %8044 = vst.msk [vmem:[%s12776_s23 + $0x70] sm:$0xf] %vm8015_vm0, %v9228_v25  ;;  %8166 = vst.msk [vmem:[%s12776_s23 + $0x258] sm:$0xf] %vm8015_vm0, %v9350_v27  ;;  %v9229_v9 = vpack.c.bf16 %v5828_v47, %v5828_v47  ;;  %v9351_v14 = vpack.c.bf16 %v6316_v36, %v6316_v36  ;;  %6039 = vmatmul.mubr.bf16.gmra.mrb[36].mxu0 %v10089_v59  ;;  %6527 = vmatmul.mubr.bf16.gmra.mrb[228].mxu1 %v10094_v35 }
 0x2f7   : > { %6046 = vmatprep.mubr.bf16.mxu0 %v10097_v52  ;;  %6534 = vmatprep.mubr.bf16.mxu1 %v10098_v34 }
 0x2f8   : > { %8045 = vst.msk [vmem:[%s12776_s23 + $0x74] sm:$0xf] %vm8015_vm0, %v9229_v9  ;;  %8167 = vst.msk [vmem:[%s12776_s23 + $0x25c] sm:$0xf] %vm8015_vm0, %v9351_v14  ;;  %v10106_v9 = vld [vmem:[%s14230_s3 + $0x680] ss:$8 sps:$4 sm:$0xff]  }
 0x2f9   : > { %v5832_v57 = vpop.f32.mrb[188].mxu0  ;;  %v6320_v11 = vpop.f32.mrb[124].mxu1 }
 0x2fa   : > { %v5833_v16 = vadd.f32 %v5832_v57, %v14450_v41  ;;  %v6321_v20 = vadd.f32 %v6320_v11, %v12555_v17  ;;  %v5834_v45 = vpop.f32.mrb[189].mxu0  ;;  %v6322_v19 = vpop.f32.mrb[125].mxu1  ;;  %v10104_v17 = vld [vmem:[%s14230_s3 + $0x684] ss:$8 sps:$4 sm:$0xff]  }
 0x2fb   : > { %v5835_v28 = vpop.f32.mrb[190].mxu0  ;;  %v6323_v21 = vpop.f32.mrb[126].mxu1  ;;  %v10109_v11 = vld [vmem:[%s14230_s3 + $0x2c4] ss:$8 sps:$4 sm:$0xff]  }
 0x2fc   : > { %v9230_v63 = vpack.c.bf16 %v5833_v16, %v5833_v16  ;;  %v9352_v37 = vpack.c.bf16 %v6321_v20, %v6321_v20  ;;  %v5836_v59 = vadd.f32 %v5835_v28, %v14451_v0  ;;  %v6324_v35 = vadd.f32 %v6323_v21, %v12553_v58  ;;  %v6325_v5 = vpop.f32.mrb[127].mxu1  ;;  %v5837_v40 = vpop.f32.mrb[191].mxu0  ;;  %v14453_v20 = vld [vmem:[#allocation62_spill] sm:$0xff] }
 0x2fd   : > { %v10112_v5 = vld [vmem:[%s14230_s3 + $0x690] ss:$8 sps:$4 sm:$0xff]  }
 0x2fe   : > { %8046 = vst.msk [vmem:[%s12776_s23 + $0x78] sm:$0xf] %vm8015_vm0, %v9230_v63  ;;  %8168 = vst.msk [vmem:[%s12776_s23 + $0x260] sm:$0xf] %vm8015_vm0, %v9352_v37  ;;  %v9231_v52 = vpack.c.bf16 %v5836_v59, %v5836_v59  ;;  %v9353_v34 = vpack.c.bf16 %v6324_v35, %v6324_v35  ;;  %6047 = vmatmul.mubr.bf16.gmra.mrb[40].mxu0 %v10095_v38  ;;  %6535 = vmatmul.mubr.bf16.gmra.mrb[232].mxu1 %v10100_v6  ;;  %v14454_v63 = vld [vmem:[#allocation65_spill] sm:$0xff] }
 0x2ff   : > { %6054 = vmatprep.mubr.bf16.mxu0 %v10103_v8  ;;  %6542 = vmatprep.mubr.bf16.mxu1 %v10104_v17  ;;  %v10107_v35 = vld [vmem:[%s14230_s3 + $0x2c0] ss:$8 sps:$4 sm:$0xff]  }
 0x300   : > { %8047 = vst.msk [vmem:[%s12776_s23 + $0x7c] sm:$0xf] %vm8015_vm0, %v9231_v52  ;;  %8169 = vst.msk [vmem:[%s12776_s23 + $0x264] sm:$0xf] %vm8015_vm0, %v9353_v34  ;;  %v10115_v34 = vld [vmem:[%s14230_s3 + $0x2d4] ss:$8 sps:$4 sm:$0xff]  }
 0x301   : > { %v5840_v25 = vpop.f32.mrb[192].mxu0  ;;  %v6328_v27 = vpop.f32.mrb[128].mxu1 }
 0x302   : > { %v5841_v58 = vadd.f32 %v5840_v25, %v14452_v49  ;;  %v6329_v47 = vadd.f32 %v6328_v27, %v12580_v4  ;;  %v5842_v36 = vpop.f32.mrb[193].mxu0  ;;  %v6330_v43 = vpop.f32.mrb[129].mxu1  ;;  %v10110_v4 = vld [vmem:[%s14230_s3 + $0x694] ss:$8 sps:$4 sm:$0xff]  }
 0x303   : > { %v5843_v14 = vpop.f32.mrb[194].mxu0  ;;  %v6331_v57 = vpop.f32.mrb[130].mxu1  ;;  %v14455_v49 = vld [vmem:[#allocation64_spill] sm:$0xff] }
 0x304   : > { %v9232_v41 = vpack.c.bf16 %v5841_v58, %v5841_v58  ;;  %v9354_v16 = vpack.c.bf16 %v6329_v47, %v6329_v47  ;;  %v5844_v45 = vadd.f32 %v5843_v14, %v14453_v20  ;;  %v6332_v19 = vadd.f32 %v6331_v57, %v12578_v60  ;;  %v6333_v38 = vpop.f32.mrb[131].mxu1  ;;  %v5845_v6 = vpop.f32.mrb[195].mxu0  ;;  %v10113_v20 = vld [vmem:[%s14230_s3 + $0x2d0] ss:$8 sps:$4 sm:$0xff]  }
 0x305   : > { %v10121_v6 = vld [vmem:[%s14230_s3 + $0x2e4] ss:$8 sps:$4 sm:$0xff]  }
 0x306   : > { %8048 = vst.msk [vmem:[%s12776_s23 + $0x80] sm:$0xf] %vm8015_vm0, %v9232_v41  ;;  %8170 = vst.msk [vmem:[%s12776_s23 + $0x268] sm:$0xf] %vm8015_vm0, %v9354_v16  ;;  %v9233_v28 = vpack.c.bf16 %v5844_v45, %v5844_v45  ;;  %v9355_v21 = vpack.c.bf16 %v6332_v19, %v6332_v19  ;;  %6055 = vmatmul.mubr.bf16.gmra.mrb[44].mxu0 %v10101_v61  ;;  %6543 = vmatmul.mubr.bf16.gmra.mrb[236].mxu1 %v10106_v9  ;;  %v10118_v45 = vld [vmem:[%s14230_s3 + $0x6a0] ss:$8 sps:$4 sm:$0xff]  }
 0x307   : > { %6062 = vmatprep.mubr.bf16.mxu0 %v10109_v11  ;;  %6550 = vmatprep.mubr.bf16.mxu1 %v10110_v4  ;;  %v14456_v11 = vld [vmem:[#allocation67_spill] sm:$0xff] }
 0x308   : > { %8049 = vst.msk [vmem:[%s12776_s23 + $0x84] sm:$0xf] %vm8015_vm0, %v9233_v28  ;;  %8171 = vst.msk [vmem:[%s12776_s23 + $0x26c] sm:$0xf] %vm8015_vm0, %v9355_v21 }
 0x309   : > { %v5848_v8 = vpop.f32.mrb[196].mxu0  ;;  %v6336_v17 = vpop.f32.mrb[132].mxu1 }
 0x30a   : > { %v5849_v60 = vadd.f32 %v5848_v8, %v14454_v63  ;;  %v6337_v37 = vadd.f32 %v6336_v17, %v12602_v15  ;;  %v5850_v0 = vpop.f32.mrb[197].mxu0  ;;  %v6338_v59 = vpop.f32.mrb[133].mxu1  ;;  %v10116_v15 = vld [vmem:[%s14230_s3 + $0x6a4] ss:$8 sps:$4 sm:$0xff]  }
 0x30b   : > { %v5851_v40 = vpop.f32.mrb[198].mxu0  ;;  %v6339_v52 = vpop.f32.mrb[134].mxu1  ;;  %v14457_v8 = vld [vmem:[#allocation66_spill] sm:$0xff] }
 0x30c   : > { %v9234_v25 = vpack.c.bf16 %v5849_v60, %v5849_v60  ;;  %v9356_v27 = vpack.c.bf16 %v6337_v37, %v6337_v37  ;;  %v5852_v58 = vadd.f32 %v5851_v40, %v14455_v49  ;;  %v6340_v47 = vadd.f32 %v6339_v52, %v12600_v13  ;;  %v6341_v36 = vpop.f32.mrb[135].mxu1  ;;  %v5853_v43 = vpop.f32.mrb[199].mxu0  ;;  %v14458_v40 = vld [vmem:[#allocation69_spill] sm:$0xff] }
 0x30e   : > { %8050 = vst.msk [vmem:[%s12776_s23 + $0x88] sm:$0xf] %vm8015_vm0, %v9234_v25  ;;  %8172 = vst.msk [vmem:[%s12776_s23 + $0x270] sm:$0xf] %vm8015_vm0, %v9356_v27  ;;  %v9235_v61 = vpack.c.bf16 %v5852_v58, %v5852_v58  ;;  %v9357_v9 = vpack.c.bf16 %v6340_v47, %v6340_v47  ;;  %6063 = vmatmul.mubr.bf16.gmra.mrb[48].mxu0 %v10107_v35  ;;  %6551 = vmatmul.mubr.bf16.gmra.mrb[240].mxu1 %v10112_v5  ;;  %v10119_v25 = vld [vmem:[%s14230_s3 + $0x2e0] ss:$8 sps:$4 sm:$0xff]  }
 0x30f   : > { %6070 = vmatprep.mubr.bf16.mxu0 %v10115_v34  ;;  %6558 = vmatprep.mubr.bf16.mxu1 %v10116_v15  ;;  %v10124_v27 = vld [vmem:[%s14230_s3 + $0x6b0] ss:$8 sps:$4 sm:$0xff]   ;;  %v10127_v47 = vld [vmem:[%s14230_s3 + $0x2f4] ss:$8 sps:$4 sm:$0xff]  }
 0x310   : > { %8051 = vst.msk [vmem:[%s12776_s23 + $0x8c] sm:$0xf] %vm8015_vm0, %v9235_v61  ;;  %8173 = vst.msk [vmem:[%s12776_s23 + $0x274] sm:$0xf] %vm8015_vm0, %v9357_v9  ;;  %v14459_v61 = vld [vmem:[#allocation68_spill] sm:$0xff] }
 0x311   : > { %v5856_v14 = vpop.f32.mrb[200].mxu0  ;;  %v6344_v57 = vpop.f32.mrb[136].mxu1 }
 0x312   : > { %v5857_v13 = vadd.f32 %v5856_v14, %v14456_v11  ;;  %v6345_v4 = vadd.f32 %v6344_v57, %v12630_v10  ;;  %v5858_v41 = vpop.f32.mrb[201].mxu0  ;;  %v6346_v16 = vpop.f32.mrb[137].mxu1  ;;  %v10122_v10 = vld [vmem:[%s14230_s3 + $0x6b4] ss:$8 sps:$4 sm:$0xff]  }
 0x313   : > { %v5859_v19 = vpop.f32.mrb[202].mxu0  ;;  %v6347_v38 = vpop.f32.mrb[138].mxu1 }
 0x314   : > { %v9236_v28 = vpack.c.bf16 %v5857_v13, %v5857_v13  ;;  %v9358_v21 = vpack.c.bf16 %v6345_v4, %v6345_v4  ;;  %v5860_v17 = vadd.f32 %v5859_v19, %v14457_v8  ;;  %v6348_v63 = vadd.f32 %v6347_v38, %v12628_v44  ;;  %v6349_v60 = vpop.f32.mrb[139].mxu1  ;;  %v5861_v37 = vpop.f32.mrb[203].mxu0  ;;  %v10133_v8 = vld [vmem:[%s14230_s3 + $0x304] ss:$8 sps:$4 sm:$0xff]  }
 0x315   : > { %v14461_v60 = vld [vmem:[#allocation70_spill] sm:$0xff] }
 0x316   : > { %8052 = vst.msk [vmem:[%s12776_s23 + $0x90] sm:$0xf] %vm8015_vm0, %v9236_v28  ;;  %8174 = vst.msk [vmem:[%s12776_s23 + $0x278] sm:$0xf] %vm8015_vm0, %v9358_v21  ;;  %v9237_v0 = vpack.c.bf16 %v5860_v17, %v5860_v17  ;;  %v9359_v59 = vpack.c.bf16 %v6348_v63, %v6348_v63  ;;  %6071 = vmatmul.mubr.bf16.gmra.mrb[52].mxu0 %v10113_v20  ;;  %6559 = vmatmul.mubr.bf16.gmra.mrb[244].mxu1 %v10118_v45  ;;  %v14460_v20 = vld [vmem:[#allocation71_spill] sm:$0xff] }
 0x317   : > { %6078 = vmatprep.mubr.bf16.mxu0 %v10121_v6  ;;  %6566 = vmatprep.mubr.bf16.mxu1 %v10122_v10  ;;  %v10125_v6 = vld [vmem:[%s14230_s3 + $0x2f0] ss:$8 sps:$4 sm:$0xff]   ;;  %v10130_v10 = vld [vmem:[%s14230_s3 + $0x6c0] ss:$8 sps:$4 sm:$0xff]  }
 0x318   : > { %8053 = vst.msk [vmem:[%s12776_s23 + $0x94] sm:$0xf] %vm8015_vm0, %v9237_v0  ;;  %8175 = vst.msk [vmem:[%s12776_s23 + $0x27c] sm:$0xf] %vm8015_vm0, %v9359_v59 }
 0x319   : > { %v5864_v35 = vpop.f32.mrb[204].mxu0  ;;  %v6352_v5 = vpop.f32.mrb[140].mxu1 }
 0x31a   : > { %v5865_v44 = vadd.f32 %v5864_v35, %v14458_v40  ;;  %v6353_v52 = vadd.f32 %v6352_v5, %v12643_v53  ;;  %v5866_v34 = vpop.f32.mrb[205].mxu0  ;;  %v6354_v15 = vpop.f32.mrb[141].mxu1  ;;  %v10128_v53 = vld [vmem:[%s14230_s3 + $0x6c4] ss:$8 sps:$4 sm:$0xff]  }
 0x31b   : > { %v5867_v49 = vpop.f32.mrb[206].mxu0  ;;  %v6355_v58 = vpop.f32.mrb[142].mxu1  ;;  %v14462_v34 = vld [vmem:[#allocation73_spill] sm:$0xff] }
 0x31c   : > { %v9238_v36 = vpack.c.bf16 %v5865_v44, %v5865_v44  ;;  %v9360_v43 = vpack.c.bf16 %v6353_v52, %v6353_v52  ;;  %v5868_v9 = vadd.f32 %v5867_v49, %v14459_v61  ;;  %v6356_v14 = vadd.f32 %v6355_v58, %v12641_v31  ;;  %v6357_v57 = vpop.f32.mrb[143].mxu1  ;;  %v5869_v11 = vpop.f32.mrb[207].mxu0  ;;  %v10131_v49 = vld [vmem:[%s14230_s3 + $0x300] ss:$8 sps:$4 sm:$0xff]   ;;  %v10134_v58 = vld [vmem:[%s14230_s3 + $0x6d0] ss:$8 sps:$4 sm:$0xff]  }
 0x31e   : > { %8054 = vst.msk [vmem:[%s12776_s23 + $0x98] sm:$0xf] %vm8015_vm0, %v9238_v36  ;;  %8176 = vst.msk [vmem:[%s12776_s23 + $0x280] sm:$0xf] %vm8015_vm0, %v9360_v43  ;;  %v9239_v13 = vpack.c.bf16 %v5868_v9, %v5868_v9  ;;  %v9361_v4 = vpack.c.bf16 %v6356_v14, %v6356_v14  ;;  %6079 = vmatmul.mubr.bf16.gmra.mrb[56].mxu0 %v10119_v25  ;;  %6567 = vmatmul.mubr.bf16.gmra.mrb[248].mxu1 %v10124_v27  ;;  %v10139_v36 = vld [vmem:[%s14230_s3 + $0x314] ss:$8 sps:$4 sm:$0xff]  }
 0x31f   : > { %6086 = vmatprep.mubr.bf16.mxu0 %v10127_v47  ;;  %6574 = vmatprep.mubr.bf16.mxu1 %v10128_v53  ;;  %v14463_v9 = vld [vmem:[#allocation72_spill] sm:$0xff] }
 0x320   : > { %8055 = vst.msk [vmem:[%s12776_s23 + $0x9c] sm:$0xf] %vm8015_vm0, %v9239_v13  ;;  %8177 = vst.msk [vmem:[%s12776_s23 + $0x284] sm:$0xf] %vm8015_vm0, %v9361_v4 }
 0x321   : > { %v5872_v41 = vpop.f32.mrb[208].mxu0  ;;  %v6360_v16 = vpop.f32.mrb[144].mxu1 }
 0x322   : > { %v5873_v31 = vadd.f32 %v5872_v41, %v14460_v20  ;;  %v6361_v45 = vadd.f32 %v6360_v16, %v12668_v62  ;;  %v5874_v19 = vpop.f32.mrb[209].mxu0  ;;  %v6362_v38 = vpop.f32.mrb[145].mxu1  ;;  %v10136_v62 = vld [vmem:[%s14230_s3 + $0x6d4] ss:$8 sps:$4 sm:$0xff]  }
 0x323   : > { %v5875_v28 = vpop.f32.mrb[210].mxu0  ;;  %v6363_v21 = vpop.f32.mrb[146].mxu1 }
 0x324   : > { %v9240_v17 = vpack.c.bf16 %v5873_v31, %v5873_v31  ;;  %v9362_v63 = vpack.c.bf16 %v6361_v45, %v6361_v45  ;;  %v5876_v37 = vadd.f32 %v5875_v28, %v14461_v60  ;;  %v6364_v0 = vadd.f32 %v6363_v21, %v12666_v30  ;;  %v6365_v59 = vpop.f32.mrb[147].mxu1  ;;  %v5877_v35 = vpop.f32.mrb[211].mxu0  ;;  %v14464_v31 = vld [vmem:[#allocation75_spill] sm:$0xff] }
 0x326   : > { %8056 = vst.msk [vmem:[%s12776_s23 + $0xa0] sm:$0xf] %vm8015_vm0, %v9240_v17  ;;  %8178 = vst.msk [vmem:[%s12776_s23 + $0x288] sm:$0xf] %vm8015_vm0, %v9362_v63  ;;  %v9241_v5 = vpack.c.bf16 %v5876_v37, %v5876_v37  ;;  %v9363_v40 = vpack.c.bf16 %v6364_v0, %v6364_v0  ;;  %6087 = vmatmul.mubr.bf16.gmra.mrb[60].mxu0 %v10125_v6  ;;  %6575 = vmatmul.mubr.bf16.gmra.mrb[252].mxu1 %v10130_v10  ;;  %v10137_v6 = vld [vmem:[%s14230_s3 + $0x310] ss:$8 sps:$4 sm:$0xff]  }
 0x327   : > { %6094 = vmatprep.mubr.bf16.mxu0 %v10133_v8  ;;  %6582 = vmatprep.mubr.bf16.mxu1 %v10136_v62  ;;  %v10140_v10 = vld [vmem:[%s14230_s3 + $0x6e0] ss:$8 sps:$4 sm:$0xff]   ;;  %v10145_v8 = vld [vmem:[%s14230_s3 + $0x324] ss:$8 sps:$4 sm:$0xff]  }
 0x328   : > { %8057 = vst.msk [vmem:[%s12776_s23 + $0xa4] sm:$0xf] %vm8015_vm0, %v9241_v5  ;;  %8179 = vst.msk [vmem:[%s12776_s23 + $0x28c] sm:$0xf] %vm8015_vm0, %v9363_v40  ;;  %v14465_v63 = vld [vmem:[#allocation74_spill] sm:$0xff] }
 0x329   : > { %v5880_v44 = vpop.f32.mrb[212].mxu0  ;;  %v6368_v52 = vpop.f32.mrb[148].mxu1 }
 0x32a   : > { %v5881_v30 = vadd.f32 %v5880_v44, %v14462_v34  ;;  %v6369_v15 = vadd.f32 %v6368_v52, %v12690_v2  ;;  %v5882_v25 = vpop.f32.mrb[213].mxu0  ;;  %v6370_v27 = vpop.f32.mrb[149].mxu1  ;;  %v10142_v2 = vld [vmem:[%s14230_s3 + $0x6e4] ss:$8 sps:$4 sm:$0xff]   ;;  %v14466_v52 = vld [vmem:[#allocation77_spill] sm:$0xff]  ;;  %v14467_v34 = vld [vmem:[#allocation20_spill] sm:$0xff] }
 0x32b   : > { %v5883_v47 = vpop.f32.mrb[214].mxu0  ;;  %v6371_v53 = vpop.f32.mrb[150].mxu1  ;;  %v10143_v27 = vld [vmem:[%s14230_s3 + $0x320] ss:$8 sps:$4 sm:$0xff]  }
 0x32c   : > { %v9242_v43 = vpack.c.bf16 %v5881_v30, %v5881_v30  ;;  %v9364_v61 = vpack.c.bf16 %v6369_v15, %v6369_v15  ;;  %v5884_v14 = vadd.f32 %v5883_v47, %v14463_v9  ;;  %v6372_v57 = vadd.f32 %v6371_v53, %v12688_v55  ;;  %v6373_v11 = vpop.f32.mrb[151].mxu1  ;;  %v5885_v13 = vpop.f32.mrb[215].mxu0  ;;  %v10151_v53 = vld [vmem:[%s14230_s3 + $0x334] ss:$8 sps:$4 sm:$0xff]  }
 0x32e   : > { %8058 = vst.msk [vmem:[%s12776_s23 + $0xa8] sm:$0xf] %vm8015_vm0, %v9242_v43  ;;  %8180 = vst.msk [vmem:[%s12776_s23 + $0x290] sm:$0xf] %vm8015_vm0, %v9364_v61  ;;  %v9243_v4 = vpack.c.bf16 %v5884_v14, %v5884_v14  ;;  %v9365_v41 = vpack.c.bf16 %v6372_v57, %v6372_v57  ;;  %6095 = vmatmul.mubr.bf16.gmra.mrb[64].mxu0 %v10131_v49  ;;  %6583 = vmatmul.mubr.bf16.gmra.mrb[0].mxu1 %v10134_v58  ;;  %v10146_v49 = vld [vmem:[%s14230_s3 + $0x6f0] ss:$8 sps:$4 sm:$0xff]  }
 0x32f   : > { %6102 = vmatprep.mubr.bf16.mxu0 %v10139_v36  ;;  %6590 = vmatprep.mubr.bf16.mxu1 %v10142_v2  ;;  %v10154_v36 = vld [vmem:[%s14230_s3 + $0x704] ss:$8 sps:$4 sm:$0xff]   ;;  %v14468_v61 = vld [vmem:[#allocation76_spill] sm:$0xff]  ;;  %v14469_v14 = vld [vmem:[#allocation21_spill] sm:$0xff] }
 0x330   : > { %8059 = vst.msk [vmem:[%s12776_s23 + $0xac] sm:$0xf] %vm8015_vm0, %v9243_v4  ;;  %8181 = vst.msk [vmem:[%s12776_s23 + $0x294] sm:$0xf] %vm8015_vm0, %v9365_v41 }
 0x331   : > { %v5888_v16 = vpop.f32.mrb[216].mxu0  ;;  %v6376_v20 = vpop.f32.mrb[152].mxu1 }
 0x332   : > { %v5889_v55 = vadd.f32 %v5888_v16, %v14464_v31  ;;  %v6377_v45 = vadd.f32 %v6376_v20, %v12718_v22  ;;  %v5890_v19 = vpop.f32.mrb[217].mxu0  ;;  %v6378_v38 = vpop.f32.mrb[153].mxu1  ;;  %v10148_v22 = vld [vmem:[%s14230_s3 + $0x6f4] ss:$8 sps:$4 sm:$0xff]   ;;  %v14470_v31 = vld [vmem:[#allocation79_spill] sm:$0xff] }
 0x333   : > { %v5891_v28 = vpop.f32.mrb[218].mxu0  ;;  %v6379_v21 = vpop.f32.mrb[154].mxu1 }
 0x334   : > { %v9244_v62 = vpack.c.bf16 %v5889_v55, %v5889_v55  ;;  %v9366_v17 = vpack.c.bf16 %v6377_v45, %v6377_v45  ;;  %v5892_v60 = vadd.f32 %v5891_v28, %v14465_v63  ;;  %v6380_v37 = vadd.f32 %v6379_v21, %v12716_v24  ;;  %v6381_v0 = vpop.f32.mrb[155].mxu1  ;;  %v5893_v59 = vpop.f32.mrb[219].mxu0  ;;  %v14471_v45 = vld [vmem:[#allocation22_spill] sm:$0xff] }
 0x335   : > { %v10152_v28 = vld [vmem:[%s14230_s3 + $0x700] ss:$8 sps:$4 sm:$0xff]  }
 0x336   : > { %8060 = vst.msk [vmem:[%s12776_s23 + $0xb0] sm:$0xf] %vm8015_vm0, %v9244_v62  ;;  %8182 = vst.msk [vmem:[%s12776_s23 + $0x298] sm:$0xf] %vm8015_vm0, %v9366_v17  ;;  %v9245_v35 = vpack.c.bf16 %v5892_v60, %v5892_v60  ;;  %v9367_v5 = vpack.c.bf16 %v6380_v37, %v6380_v37  ;;  %6103 = vmatmul.mubr.bf16.gmra.mrb[68].mxu0 %v10137_v6  ;;  %6591 = vmatmul.mubr.bf16.gmra.mrb[4].mxu1 %v10140_v10  ;;  %v10149_v10 = vld [vmem:[%s14230_s3 + $0x330] ss:$8 sps:$4 sm:$0xff]  }
 0x337   : > { %6110 = vmatprep.mubr.bf16.mxu0 %v10145_v8  ;;  %6598 = vmatprep.mubr.bf16.mxu1 %v10148_v22  ;;  %v10157_v22 = vld [vmem:[%s14230_s3 + $0x344] ss:$8 sps:$4 sm:$0xff]   ;;  %v10160_v62 = vld [vmem:[%s14230_s3 + $0x714] ss:$8 sps:$4 sm:$0xff]  }
 0x338   : > { %8061 = vst.msk [vmem:[%s12776_s23 + $0xb4] sm:$0xf] %vm8015_vm0, %v9245_v35  ;;  %8183 = vst.msk [vmem:[%s12776_s23 + $0x29c] sm:$0xf] %vm8015_vm0, %v9367_v5  ;;  %v14472_v60 = vld [vmem:[#allocation78_spill] sm:$0xff]  ;;  %v14473_v0 = vld [vmem:[#allocation23_spill] sm:$0xff] }
 0x339   : > { %v5896_v40 = vpop.f32.mrb[220].mxu0  ;;  %v6384_v44 = vpop.f32.mrb[156].mxu1 }
 0x33a   : > { %v5897_v24 = vadd.f32 %v5896_v40, %v14466_v52  ;;  %v6385_v30 = vadd.f32 %v6384_v44, %v14467_v34  ;;  %v5898_v15 = vpop.f32.mrb[221].mxu0  ;;  %v6386_v25 = vpop.f32.mrb[157].mxu1  ;;  %v14474_v34 = vld [vmem:[#allocation81_spill] sm:$0xff] }
 0x33b   : > { %v5899_v58 = vpop.f32.mrb[222].mxu0  ;;  %v6387_v47 = vpop.f32.mrb[158].mxu1 }
 0x33c   : > { %v9246_v2 = vpack.c.bf16 %v5897_v24, %v5897_v24  ;;  %v9368_v43 = vpack.c.bf16 %v6385_v30, %v6385_v30  ;;  %v5900_v9 = vadd.f32 %v5899_v58, %v14468_v61  ;;  %v6388_v57 = vadd.f32 %v6387_v47, %v14469_v14  ;;  %v6389_v11 = vpop.f32.mrb[159].mxu1  ;;  %v5901_v13 = vpop.f32.mrb[223].mxu0  ;;  %v10158_v58 = vld [vmem:[%s14230_s3 + $0x710] ss:$8 sps:$4 sm:$0xff]  }
 0x33d   : > { %v14475_v61 = vld [vmem:[#allocation80_spill] sm:$0xff] }
 0x33e   : > { %8062 = vst.msk [vmem:[%s12776_s23 + $0xb8] sm:$0xf] %vm8015_vm0, %v9246_v2  ;;  %8184 = vst.msk [vmem:[%s12776_s23 + $0x2a0] sm:$0xf] %vm8015_vm0, %v9368_v43  ;;  %v9247_v4 = vpack.c.bf16 %v5900_v9, %v5900_v9  ;;  %v9369_v41 = vpack.c.bf16 %v6388_v57, %v6388_v57  ;;  %6111 = vmatmul.mubr.bf16.gmra.mrb[72].mxu0 %v10143_v27  ;;  %6599 = vmatmul.mubr.bf16.gmra.mrb[8].mxu1 %v10146_v49  ;;  %v10155_v49 = vld [vmem:[%s14230_s3 + $0x340] ss:$8 sps:$4 sm:$0xff]  }
 0x33f   : > { %6118 = vmatprep.mubr.bf16.mxu0 %v10151_v53  ;;  %6606 = vmatprep.mubr.bf16.mxu1 %v10154_v36  ;;  %v10163_v36 = vld [vmem:[%s14230_s3 + $0x354] ss:$8 sps:$4 sm:$0xff]  }
 0x340   : > { %8063 = vst.msk [vmem:[%s12776_s23 + $0xbc] sm:$0xf] %vm8015_vm0, %v9247_v4  ;;  %8185 = vst.msk [vmem:[%s12776_s23 + $0x2a4] sm:$0xf] %vm8015_vm0, %v9369_v41 }
 0x341   : > { %v5904_v16 = vpop.f32.mrb[224].mxu0  ;;  %v6392_v20 = vpop.f32.mrb[160].mxu1 }
 0x342   : > { %v5905_v55 = vadd.f32 %v5904_v16, %v14470_v31  ;;  %v6393_v19 = vadd.f32 %v6392_v20, %v14471_v45  ;;  %v5906_v38 = vpop.f32.mrb[225].mxu0  ;;  %v6394_v6 = vpop.f32.mrb[161].mxu1  ;;  %v14476_v20 = vld [vmem:[#allocation83_spill] sm:$0xff] }
 0x343   : > { %v5907_v21 = vpop.f32.mrb[226].mxu0  ;;  %v6395_v8 = vpop.f32.mrb[162].mxu1  ;;  %v10164_v38 = vld [vmem:[%s14230_s3 + $0x720] ss:$8 sps:$4 sm:$0xff]  }
 0x344   : > { %v9248_v17 = vpack.c.bf16 %v5905_v55, %v5905_v55  ;;  %v9370_v63 = vpack.c.bf16 %v6393_v19, %v6393_v19  ;;  %v5908_v37 = vadd.f32 %v5907_v21, %v14472_v60  ;;  %v6396_v59 = vadd.f32 %v6395_v8, %v14473_v0  ;;  %v6397_v35 = vpop.f32.mrb[163].mxu1  ;;  %v5909_v5 = vpop.f32.mrb[227].mxu0  ;;  %v10161_v19 = vld [vmem:[%s14230_s3 + $0x350] ss:$8 sps:$4 sm:$0xff]  }
 0x345   : > { %v14478_v5 = vld [vmem:[#allocation85_spill] sm:$0xff] }
 0x346   : > { %8064 = vst.msk [vmem:[%s12776_s23 + $0xc0] sm:$0xf] %vm8015_vm0, %v9248_v17  ;;  %8186 = vst.msk [vmem:[%s12776_s23 + $0x2a8] sm:$0xf] %vm8015_vm0, %v9370_v63  ;;  %v9249_v40 = vpack.c.bf16 %v5908_v37, %v5908_v37  ;;  %v9371_v44 = vpack.c.bf16 %v6396_v59, %v6396_v59  ;;  %6119 = vmatmul.mubr.bf16.gmra.mrb[76].mxu0 %v10149_v10  ;;  %6607 = vmatmul.mubr.bf16.gmra.mrb[12].mxu1 %v10152_v28  ;;  %v10169_v28 = vld [vmem:[%s14230_s3 + $0x364] ss:$8 sps:$4 sm:$0xff]  }
 0x347   : > { %6126 = vmatprep.mubr.bf16.mxu0 %v10157_v22  ;;  %6614 = vmatprep.mubr.bf16.mxu1 %v10160_v62  ;;  %v14477_v22 = vld [vmem:[#allocation82_spill] sm:$0xff] }
 0x348   : > { %8065 = vst.msk [vmem:[%s12776_s23 + $0xc4] sm:$0xf] %vm8015_vm0, %v9249_v40  ;;  %8187 = vst.msk [vmem:[%s12776_s23 + $0x2ac] sm:$0xf] %vm8015_vm0, %v9371_v44 }
 0x349   : > { %v5912_v52 = vpop.f32.mrb[228].mxu0  ;;  %v6400_v24 = vpop.f32.mrb[164].mxu1 }
 0x34a   : > { %v5913_v30 = vadd.f32 %v5912_v52, %v14474_v34  ;;  %v6401_v15 = vadd.f32 %v6400_v24, %v12798_v50  ;;  %v5914_v25 = vpop.f32.mrb[229].mxu0  ;;  %v6402_v27 = vpop.f32.mrb[165].mxu1  ;;  %v10166_v50 = vld [vmem:[%s14230_s3 + $0x724] ss:$8 sps:$4 sm:$0xff]   ;;  %v10167_v24 = vld [vmem:[%s14230_s3 + $0x360] ss:$8 sps:$4 sm:$0xff]  }
 0x34b   : > { %v5915_v47 = vpop.f32.mrb[230].mxu0  ;;  %v6403_v53 = vpop.f32.mrb[166].mxu1  ;;  %v10170_v34 = vld [vmem:[%s14230_s3 + $0x730] ss:$8 sps:$4 sm:$0xff]   ;;  %v10175_v25 = vld [vmem:[%s14230_s3 + $0x374] ss:$8 sps:$4 sm:$0xff]  }
 0x34c   : > { %v9250_v2 = vpack.c.bf16 %v5913_v30, %v5913_v30  ;;  %v9372_v43 = vpack.c.bf16 %v6401_v15, %v6401_v15  ;;  %v5916_v9 = vadd.f32 %v5915_v47, %v14475_v61  ;;  %v6404_v14 = vadd.f32 %v6403_v53, %v12796_v51  ;;  %v6405_v57 = vpop.f32.mrb[167].mxu1  ;;  %v5917_v11 = vpop.f32.mrb[231].mxu0 }
 0x34e   : > { %8066 = vst.msk [vmem:[%s12776_s23 + $0xc8] sm:$0xf] %vm8015_vm0, %v9250_v2  ;;  %8188 = vst.msk [vmem:[%s12776_s23 + $0x2b0] sm:$0xf] %vm8015_vm0, %v9372_v43  ;;  %v9251_v13 = vpack.c.bf16 %v5916_v9, %v5916_v9  ;;  %v9373_v4 = vpack.c.bf16 %v6404_v14, %v6404_v14  ;;  %6127 = vmatmul.mubr.bf16.gmra.mrb[80].mxu0 %v10155_v49  ;;  %6615 = vmatmul.mubr.bf16.gmra.mrb[16].mxu1 %v10158_v58  ;;  %v14479_v58 = vld [vmem:[#allocation84_spill] sm:$0xff]  ;;  %v14480_v14 = vld [vmem:[#allocation87_spill] sm:$0xff] }
 0x34f   : > { %6134 = vmatprep.mubr.bf16.mxu0 %v10163_v36  ;;  %6622 = vmatprep.mubr.bf16.mxu1 %v10166_v50 }
 0x350   : > { %8067 = vst.msk [vmem:[%s12776_s23 + $0xcc] sm:$0xf] %vm8015_vm0, %v9251_v13  ;;  %8189 = vst.msk [vmem:[%s12776_s23 + $0x2b4] sm:$0xf] %vm8015_vm0, %v9373_v4  ;;  %v10173_v4 = vld [vmem:[%s14230_s3 + $0x370] ss:$8 sps:$4 sm:$0xff]  }
 0x351   : > { %v5920_v41 = vpop.f32.mrb[232].mxu0  ;;  %v6408_v16 = vpop.f32.mrb[168].mxu1 }
 0x352   : > { %v5921_v51 = vadd.f32 %v5920_v41, %v14476_v20  ;;  %v6409_v31 = vadd.f32 %v6408_v16, %v12838_v3  ;;  %v5922_v55 = vpop.f32.mrb[233].mxu0  ;;  %v6410_v45 = vpop.f32.mrb[169].mxu1  ;;  %v10172_v3 = vld [vmem:[%s14230_s3 + $0x734] ss:$8 sps:$4 sm:$0xff]   ;;  %v10176_v41 = vld [vmem:[%s14230_s3 + $0x740] ss:$8 sps:$4 sm:$0xff]  }
 0x353   : > { %v5923_v6 = vpop.f32.mrb[234].mxu0  ;;  %v6411_v10 = vpop.f32.mrb[170].mxu1  ;;  %v14481_v45 = vld [vmem:[#allocation86_spill] sm:$0xff] }
 0x354   : > { %v9252_v21 = vpack.c.bf16 %v5921_v51, %v5921_v51  ;;  %v9374_v8 = vpack.c.bf16 %v6409_v31, %v6409_v31  ;;  %v5924_v62 = vadd.f32 %v5923_v6, %v14477_v22  ;;  %v6412_v17 = vadd.f32 %v6411_v10, %v12836_v23  ;;  %v6413_v63 = vpop.f32.mrb[171].mxu1  ;;  %v5925_v60 = vpop.f32.mrb[235].mxu0  ;;  %v10181_v51 = vld [vmem:[%s14230_s3 + $0x384] ss:$8 sps:$4 sm:$0xff]   ;;  %v14482_v22 = vld [vmem:[#allocation89_spill] sm:$0xff] }
 0x355   : > { %v10179_v60 = vld [vmem:[%s14230_s3 + $0x380] ss:$8 sps:$4 sm:$0xff]  }
 0x356   : > { %8068 = vst.msk [vmem:[%s12776_s23 + $0xd0] sm:$0xf] %vm8015_vm0, %v9252_v21  ;;  %8190 = vst.msk [vmem:[%s12776_s23 + $0x2b8] sm:$0xf] %vm8015_vm0, %v9374_v8  ;;  %v9253_v37 = vpack.c.bf16 %v5924_v62, %v5924_v62  ;;  %v9375_v0 = vpack.c.bf16 %v6412_v17, %v6412_v17  ;;  %6135 = vmatmul.mubr.bf16.gmra.mrb[84].mxu0 %v10161_v19  ;;  %6623 = vmatmul.mubr.bf16.gmra.mrb[20].mxu1 %v10164_v38 }
 0x357   : > { %6142 = vmatprep.mubr.bf16.mxu0 %v10169_v28  ;;  %6630 = vmatprep.mubr.bf16.mxu1 %v10172_v3 }
 0x358   : > { %8069 = vst.msk [vmem:[%s12776_s23 + $0xd4] sm:$0xf] %vm8015_vm0, %v9253_v37  ;;  %8191 = vst.msk [vmem:[%s12776_s23 + $0x2bc] sm:$0xf] %vm8015_vm0, %v9375_v0  ;;  %v10182_v37 = vld [vmem:[%s14230_s3 + $0x750] ss:$8 sps:$4 sm:$0xff]  }
 0x359   : > { %v5928_v59 = vpop.f32.mrb[236].mxu0  ;;  %v6416_v35 = vpop.f32.mrb[172].mxu1 }
 0x35a   : > { %v5929_v23 = vadd.f32 %v5928_v59, %v14478_v5  ;;  %v6417_v40 = vadd.f32 %v6416_v35, %v12878_v39  ;;  %v5930_v44 = vpop.f32.mrb[237].mxu0  ;;  %v6418_v52 = vpop.f32.mrb[173].mxu1  ;;  %v10178_v39 = vld [vmem:[%s14230_s3 + $0x744] ss:$8 sps:$4 sm:$0xff]   ;;  %v10187_v35 = vld [vmem:[%s14230_s3 + $0x394] ss:$8 sps:$4 sm:$0xff]  }
 0x35b   : > { %v5931_v30 = vpop.f32.mrb[238].mxu0  ;;  %v6419_v15 = vpop.f32.mrb[174].mxu1 }
 0x35c   : > { %v9254_v27 = vpack.c.bf16 %v5929_v23, %v5929_v23  ;;  %v9376_v49 = vpack.c.bf16 %v6417_v40, %v6417_v40  ;;  %v5932_v47 = vadd.f32 %v5931_v30, %v14479_v58  ;;  %v6420_v53 = vadd.f32 %v6419_v15, %v12876_v33  ;;  %v6421_v36 = vpop.f32.mrb[175].mxu1  ;;  %v5933_v50 = vpop.f32.mrb[239].mxu0  ;;  %v14483_v40 = vld [vmem:[#allocation88_spill] sm:$0xff] }
 0x35d   : > { %v10188_v36 = vld [vmem:[%s14230_s3 + $0x760] ss:$8 sps:$4 sm:$0xff]  }
 0x35e   : > { %8070 = vst.msk [vmem:[%s12776_s23 + $0xd8] sm:$0xf] %vm8015_vm0, %v9254_v27  ;;  %8192 = vst.msk [vmem:[%s12776_s23 + $0x2c0] sm:$0xf] %vm8015_vm0, %v9376_v49  ;;  %v9255_v2 = vpack.c.bf16 %v5932_v47, %v5932_v47  ;;  %v9377_v43 = vpack.c.bf16 %v6420_v53, %v6420_v53  ;;  %6143 = vmatmul.mubr.bf16.gmra.mrb[88].mxu0 %v10167_v24  ;;  %6631 = vmatmul.mubr.bf16.gmra.mrb[24].mxu1 %v10170_v34  ;;  %v14484_v27 = vld [vmem:[#allocation91_spill] sm:$0xff] }
 0x35f   : > { %6150 = vmatprep.mubr.bf16.mxu0 %v10175_v25  ;;  %6638 = vmatprep.mubr.bf16.mxu1 %v10178_v39  ;;  %v10185_v53 = vld [vmem:[%s14230_s3 + $0x390] ss:$8 sps:$4 sm:$0xff]  }
 0x360   : > { %8071 = vst.msk [vmem:[%s12776_s23 + $0xdc] sm:$0xf] %vm8015_vm0, %v9255_v2  ;;  %8193 = vst.msk [vmem:[%s12776_s23 + $0x2c4] sm:$0xf] %vm8015_vm0, %v9377_v43  ;;  %v10193_v43 = vld [vmem:[%s14230_s3 + $0x3a4] ss:$8 sps:$4 sm:$0xff]  }
 0x361   : > { %v5936_v61 = vpop.f32.mrb[240].mxu0  ;;  %v6424_v9 = vpop.f32.mrb[176].mxu1 }
 0x362   : > { %v5937_v33 = vadd.f32 %v5936_v61, %v14480_v14  ;;  %v6425_v57 = vadd.f32 %v6424_v9, %v12918_v7  ;;  %v5938_v11 = vpop.f32.mrb[241].mxu0  ;;  %v6426_v13 = vpop.f32.mrb[177].mxu1  ;;  %v10184_v7 = vld [vmem:[%s14230_s3 + $0x754] ss:$8 sps:$4 sm:$0xff]   ;;  %v14485_v14 = vld [vmem:[#allocation90_spill] sm:$0xff] }
 0x363   : > { %v5939_v16 = vpop.f32.mrb[242].mxu0  ;;  %v6427_v20 = vpop.f32.mrb[178].mxu1 }
 0x364   : > { %v9256_v31 = vpack.c.bf16 %v5937_v33, %v5937_v33  ;;  %v9378_v55 = vpack.c.bf16 %v6425_v57, %v6425_v57  ;;  %v5940_v19 = vadd.f32 %v5939_v16, %v14481_v45  ;;  %v6428_v38 = vadd.f32 %v6427_v20, %v12916_v29  ;;  %v6429_v6 = vpop.f32.mrb[179].mxu1  ;;  %v5941_v10 = vpop.f32.mrb[243].mxu0  ;;  %v10191_v45 = vld [vmem:[%s14230_s3 + $0x3a0] ss:$8 sps:$4 sm:$0xff]  }
 0x365   : > { %v10199_v10 = vld [vmem:[%s14230_s3 + $0x3b4] ss:$8 sps:$4 sm:$0xff]  }
 0x366   : > { %8072 = vst.msk [vmem:[%s12776_s23 + $0xe0] sm:$0xf] %vm8015_vm0, %v9256_v31  ;;  %8194 = vst.msk [vmem:[%s12776_s23 + $0x2c8] sm:$0xf] %vm8015_vm0, %v9378_v55  ;;  %v9257_v28 = vpack.c.bf16 %v5940_v19, %v5940_v19  ;;  %v9379_v3 = vpack.c.bf16 %v6428_v38, %v6428_v38  ;;  %6151 = vmatmul.mubr.bf16.gmra.mrb[92].mxu0 %v10173_v4  ;;  %6639 = vmatmul.mubr.bf16.gmra.mrb[28].mxu1 %v10176_v41  ;;  %v10194_v19 = vld [vmem:[%s14230_s3 + $0x770] ss:$8 sps:$4 sm:$0xff]  }
 0x367   : > { %6158 = vmatprep.mubr.bf16.mxu0 %v10181_v51  ;;  %6646 = vmatprep.mubr.bf16.mxu1 %v10184_v7  ;;  %v14486_v51 = vld [vmem:[#allocation93_spill] sm:$0xff] }
 0x368   : > { %8073 = vst.msk [vmem:[%s12776_s23 + $0xe4] sm:$0xf] %vm8015_vm0, %v9257_v28  ;;  %8195 = vst.msk [vmem:[%s12776_s23 + $0x2cc] sm:$0xf] %vm8015_vm0, %v9379_v3 }
 0x369   : > { %v5944_v21 = vpop.f32.mrb[244].mxu0  ;;  %v6432_v8 = vpop.f32.mrb[180].mxu1 }
 0x36a   : > { %v5945_v29 = vadd.f32 %v5944_v21, %v14482_v22  ;;  %v6433_v62 = vadd.f32 %v6432_v8, %v12958_v54  ;;  %v5946_v17 = vpop.f32.mrb[245].mxu0  ;;  %v6434_v63 = vpop.f32.mrb[181].mxu1  ;;  %v10190_v54 = vld [vmem:[%s14230_s3 + $0x764] ss:$8 sps:$4 sm:$0xff]   ;;  %v14487_v21 = vld [vmem:[#allocation92_spill] sm:$0xff] }
 0x36b   : > { %v5947_v0 = vpop.f32.mrb[246].mxu0  ;;  %v6435_v59 = vpop.f32.mrb[182].mxu1 }
 0x36c   : > { %v9258_v5 = vpack.c.bf16 %v5945_v29, %v5945_v29  ;;  %v9380_v23 = vpack.c.bf16 %v6433_v62, %v6433_v62  ;;  %v5948_v44 = vadd.f32 %v5947_v0, %v14483_v40  ;;  %v6436_v52 = vadd.f32 %v6435_v59, %v12956_v12  ;;  %v6437_v24 = vpop.f32.mrb[183].mxu1  ;;  %v5949_v34 = vpop.f32.mrb[247].mxu0  ;;  %v14488_v0 = vld [vmem:[#allocation95_spill] sm:$0xff] }
 0x36e   : > { %8074 = vst.msk [vmem:[%s12776_s23 + $0xe8] sm:$0xf] %vm8015_vm0, %v9258_v5  ;;  %8196 = vst.msk [vmem:[%s12776_s23 + $0x2d0] sm:$0xf] %vm8015_vm0, %v9380_v23  ;;  %v9259_v30 = vpack.c.bf16 %v5948_v44, %v5948_v44  ;;  %v9381_v15 = vpack.c.bf16 %v6436_v52, %v6436_v52  ;;  %6159 = vmatmul.mubr.bf16.gmra.mrb[96].mxu0 %v10179_v60  ;;  %6647 = vmatmul.mubr.bf16.gmra.mrb[32].mxu1 %v10182_v37  ;;  %v10197_v5 = vld [vmem:[%s14230_s3 + $0x3b0] ss:$8 sps:$4 sm:$0xff]  }
 0x36f   : > { %6166 = vmatprep.mubr.bf16.mxu0 %v10187_v35  ;;  %6654 = vmatprep.mubr.bf16.mxu1 %v10190_v54  ;;  %v10200_v23 = vld [vmem:[%s14230_s3 + $0x780] ss:$8 sps:$4 sm:$0xff]   ;;  %v10205_v52 = vld [vmem:[%s14230_s3 + $0x3c4] ss:$8 sps:$4 sm:$0xff]  }
 0x370   : > { %8075 = vst.msk [vmem:[%s12776_s23 + $0xec] sm:$0xf] %vm8015_vm0, %v9259_v30  ;;  %8197 = vst.msk [vmem:[%s12776_s23 + $0x2d4] sm:$0xf] %vm8015_vm0, %v9381_v15  ;;  %v14489_v30 = vld [vmem:[#allocation94_spill] sm:$0xff] }
 0x371   : > { %v5952_v25 = vpop.f32.mrb[248].mxu0  ;;  %v6440_v39 = vpop.f32.mrb[184].mxu1 }
 0x372   : > { %v5953_v12 = vadd.f32 %v5952_v25, %v14484_v27  ;;  %v6441_v49 = vadd.f32 %v6440_v39, %v12998_v46  ;;  %v5954_v58 = vpop.f32.mrb[249].mxu0  ;;  %v6442_v47 = vpop.f32.mrb[185].mxu1  ;;  %v10196_v46 = vld [vmem:[%s14230_s3 + $0x774] ss:$8 sps:$4 sm:$0xff]  }
 0x373   : > { %v5955_v50 = vpop.f32.mrb[250].mxu0  ;;  %v6443_v2 = vpop.f32.mrb[186].mxu1 }
 0x374   : > { %v9260_v61 = vpack.c.bf16 %v5953_v12, %v5953_v12  ;;  %v9382_v9 = vpack.c.bf16 %v6441_v49, %v6441_v49  ;;  %v5956_v33 = vadd.f32 %v5955_v50, %v14485_v14  ;;  %v6444_v57 = vadd.f32 %v6443_v2, %v12996_v18  ;;  %v6445_v11 = vpop.f32.mrb[187].mxu1  ;;  %v5957_v13 = vpop.f32.mrb[251].mxu0  ;;  %v10211_v14 = vld [vmem:[%s14230_s3 + $0x7a4] ss:$8 sps:$4 sm:$0xff]  }
 0x376   : > { %8076 = vst.msk [vmem:[%s12776_s23 + $0xf0] sm:$0xf] %vm8015_vm0, %v9260_v61  ;;  %8198 = vst.msk [vmem:[%s12776_s23 + $0x2d8] sm:$0xf] %vm8015_vm0, %v9382_v9  ;;  %v9261_v4 = vpack.c.bf16 %v5956_v33, %v5956_v33  ;;  %v9383_v41 = vpack.c.bf16 %v6444_v57, %v6444_v57  ;;  %6167 = vmatmul.mubr.bf16.gmra.mrb[100].mxu0 %v10185_v53  ;;  %6655 = vmatmul.mubr.bf16.gmra.mrb[36].mxu1 %v10188_v36  ;;  %v14490_v53 = vld [vmem:[#allocation97_spill] sm:$0xff]  ;;  %v14491_v57 = vld [vmem:[#allocation96_spill] sm:$0xff] }
 0x377   : > { %6174 = vmatprep.mubr.bf16.mxu0 %v10193_v43  ;;  %6662 = vmatprep.mubr.bf16.mxu1 %v10196_v46  ;;  %v10203_v43 = vld [vmem:[%s14230_s3 + $0x3c0] ss:$8 sps:$4 sm:$0xff]   ;;  %v10206_v46 = vld [vmem:[%s14230_s3 + $0x790] ss:$8 sps:$4 sm:$0xff]  }
 0x378   : > { %8077 = vst.msk [vmem:[%s12776_s23 + $0xf4] sm:$0xf] %vm8015_vm0, %v9261_v4  ;;  %8199 = vst.msk [vmem:[%s12776_s23 + $0x2dc] sm:$0xf] %vm8015_vm0, %v9383_v41 }
 0x379   : > { %v5960_v16 = vpop.f32.mrb[252].mxu0  ;;  %v6448_v20 = vpop.f32.mrb[188].mxu1 }
 0x37a   : > { %v5961_v18 = vadd.f32 %v5960_v16, %v14486_v51  ;;  %v6449_v7 = vadd.f32 %v6448_v20, %v13038_v42  ;;  %v5962_v31 = vpop.f32.mrb[253].mxu0  ;;  %v6450_v55 = vpop.f32.mrb[189].mxu1  ;;  %v10202_v42 = vld [vmem:[%s14230_s3 + $0x784] ss:$8 sps:$4 sm:$0xff]  }
 0x37b   : > { %v5963_v38 = vpop.f32.mrb[254].mxu0  ;;  %v6451_v6 = vpop.f32.mrb[190].mxu1  ;;  %v14492_v31 = vld [vmem:[#allocation99_spill] sm:$0xff] }
 0x37c   : > { %v9262_v28 = vpack.c.bf16 %v5961_v18, %v5961_v18  ;;  %v9384_v3 = vpack.c.bf16 %v6449_v7, %v6449_v7  ;;  %v5964_v8 = vadd.f32 %v5963_v38, %v14487_v21  ;;  %v6452_v22 = vadd.f32 %v6451_v6, %v13036_v56  ;;  %v6453_v29 = vpop.f32.mrb[191].mxu1  ;;  %v5965_v62 = vpop.f32.mrb[255].mxu0  ;;  %v10209_v6 = vld [vmem:[%s14230_s3 + $0x7a0] ss:$8 sps:$4 sm:$0xff]  }
 0x37d   : > { %v3756_v51 = vpop.permute.xlu1 %3755  ;;  %v3751_v18 = vpop.permute.xlu0 %3750 }
 0x37e   : > { %8078 = vst.msk [vmem:[%s12776_s23 + $0xf8] sm:$0xf] %vm8015_vm0, %v9262_v28  ;;  %8200 = vst.msk [vmem:[%s12776_s23 + $0x2e0] sm:$0xf] %vm8015_vm0, %v9384_v3  ;;  %v9263_v17 = vpack.c.bf16 %v5964_v8, %v5964_v8  ;;  %v9385_v63 = vpack.c.bf16 %v6452_v22, %v6452_v22  ;;  %6175 = vmatmul.mubr.bf16.gmra.mrb[104].mxu0 %v10191_v45  ;;  %6663 = vmatmul.mubr.bf16.gmra.mrb[40].mxu1 %v10194_v19  ;;  %v10214_v28 = vld [vmem:[%s14230_s3 + $0x7b4] ss:$8 sps:$4 sm:$0xff]  }
 0x37f   : > { %6182 = vmatprep.mubr.bf16.mxu0 %v10199_v10  ;;  %6670 = vmatprep.mubr.bf16.mxu1 %v10202_v42  ;;  %v14493_v8 = vld [vmem:[#allocation98_spill] sm:$0xff] }
 0x380   : > { %8079 = vst.msk [vmem:[%s12776_s23 + $0xfc] sm:$0xf] %vm8015_vm0, %v9263_v17  ;;  %8201 = vst.msk [vmem:[%s12776_s23 + $0x2e4] sm:$0xf] %vm8015_vm0, %v9385_v63 }
 0x381   : > { %v5968_v60 = vpop.f32.mrb[0].mxu0  ;;  %v6456_v37 = vpop.f32.mrb[192].mxu1 }
 0x382   : > { %v5969_v56 = vadd.f32 %v5968_v60, %v14488_v0  ;;  %v6457_v59 = vadd.f32 %v6456_v37, %v13078_v48  ;;  %v5970_v35 = vpop.f32.mrb[1].mxu0  ;;  %v6458_v54 = vpop.f32.mrb[193].mxu1  ;;  %v10208_v48 = vld [vmem:[%s14230_s3 + $0x794] ss:$8 sps:$4 sm:$0xff]  }
 0x383   : > { %v5971_v40 = vpop.f32.mrb[2].mxu0  ;;  %v6459_v44 = vpop.f32.mrb[194].mxu1  ;;  %v14494_v35 = vld [vmem:[#allocation101_spill] sm:$0xff] }
 0x384   : > { %v9264_v24 = vpack.c.bf16 %v5969_v56, %v5969_v56  ;;  %v9386_v34 = vpack.c.bf16 %v6457_v59, %v6457_v59  ;;  %v5972_v15 = vadd.f32 %v5971_v40, %v14489_v30  ;;  %v6460_v25 = vadd.f32 %v6459_v44, %v13076_v1  ;;  %v6461_v39 = vpop.f32.mrb[195].mxu1  ;;  %v5973_v27 = vpop.f32.mrb[3].mxu0  ;;  %v10212_v44 = vld [vmem:[%s14230_s3 + $0x7b0] ss:$8 sps:$4 sm:$0xff]  }
 0x385   : > { %v3766_v37 = vpop.permute.xlu1 %3765  ;;  %v3761_v0 = vpop.permute.xlu0 %3760 }
 0x386   : > { %8080 = vst.msk [vmem:[%s12776_s23 + $0x100] sm:$0xf] %vm8015_vm0, %v9264_v24  ;;  %8202 = vst.msk [vmem:[%s12776_s23 + $0x2e8] sm:$0xf] %vm8015_vm0, %v9386_v34  ;;  %v9265_v12 = vpack.c.bf16 %v5972_v15, %v5972_v15  ;;  %v9387_v49 = vpack.c.bf16 %v6460_v25, %v6460_v25  ;;  %6183 = vmatmul.mubr.bf16.gmra.mrb[108].mxu0 %v10197_v5  ;;  %6671 = vmatmul.mubr.bf16.gmra.mrb[44].mxu1 %v10200_v23  ;;  %v10217_v24 = vld [vmem:[%s14230_s3 + $0x7c4] ss:$8 sps:$4 sm:$0xff]  }
 0x387   : > { %6190 = vmatprep.mubr.bf16.mxu0 %v10205_v52  ;;  %6678 = vmatprep.mubr.bf16.mxu1 %v10208_v48  ;;  %v14495_v15 = vld [vmem:[#allocation100_spill] sm:$0xff] }
 0x388   : > { %8081 = vst.msk [vmem:[%s12776_s23 + $0x104] sm:$0xf] %vm8015_vm0, %v9265_v12  ;;  %8203 = vst.msk [vmem:[%s12776_s23 + $0x2ec] sm:$0xf] %vm8015_vm0, %v9387_v49 }
 0x389   : > { %v5976_v58 = vpop.f32.mrb[4].mxu0  ;;  %v6464_v47 = vpop.f32.mrb[196].mxu1 }
 0x38a   : > { %v5977_v1 = vadd.f32 %v5976_v58, %v14490_v53  ;;  %v6465_v36 = vadd.f32 %v6464_v47, %v13118_v32  ;;  %v5978_v50 = vpop.f32.mrb[5].mxu0  ;;  %v6466_v2 = vpop.f32.mrb[197].mxu1 }
 0x38b   : > { %v5979_v61 = vpop.f32.mrb[6].mxu0  ;;  %v6467_v9 = vpop.f32.mrb[198].mxu1  ;;  %v14496_v50 = vld [vmem:[#allocation103_spill] sm:$0xff] }
 0x38c   : > { %v9266_v33 = vpack.c.bf16 %v5977_v1, %v5977_v1  ;;  %v9388_v32 = vpack.c.bf16 %v6465_v36, %v6465_v36  ;;  %v5980_v11 = vadd.f32 %v5979_v61, %v14491_v57  ;;  %v6468_v13 = vadd.f32 %v6467_v9, %v13116_v26  ;;  %v6469_v4 = vpop.f32.mrb[199].mxu1  ;;  %v5981_v41 = vpop.f32.mrb[7].mxu0  ;;  %v10215_v9 = vld [vmem:[%s14230_s3 + $0x7c0] ss:$8 sps:$4 sm:$0xff]  }
 0x38d   : > { %v3776_v47 = vpop.permute.xlu1 %3775  ;;  %v3771_v53 = vpop.permute.xlu0 %3770 }
 0x38e   : > { %8082 = vst.msk [vmem:[%s12776_s23 + $0x108] sm:$0xf] %vm8015_vm0, %v9266_v33  ;;  %8204 = vst.msk [vmem:[%s12776_s23 + $0x2f0] sm:$0xf] %vm8015_vm0, %v9388_v32  ;;  %v9267_v16 = vpack.c.bf16 %v5980_v11, %v5980_v11  ;;  %v9389_v20 = vpack.c.bf16 %v6468_v13, %v6468_v13  ;;  %6191 = vmatmul.mubr.bf16.gmra.mrb[112].mxu0 %v10203_v43  ;;  %6679 = vmatmul.mubr.bf16.gmra.mrb[48].mxu1 %v10206_v46  ;;  %v10220_v32 = vld [vmem:[%s14230_s3 + $0x7d4] ss:$8 sps:$4 sm:$0xff]  }
 0x38f   : > { %6686 = vmatprep.mubr.bf16.mxu1 %v10211_v14  ;;  %v14497_v13 = vld [vmem:[#allocation102_spill] sm:$0xff] }
 0x390   : > { %8083 = vst.msk [vmem:[%s12776_s23 + $0x10c] sm:$0xf] %vm8015_vm0, %v9267_v16  ;;  %8205 = vst.msk [vmem:[%s12776_s23 + $0x2f4] sm:$0xf] %vm8015_vm0, %v9389_v20 }
 0x391   : > { %v5984_v7 = vpop.f32.mrb[8].mxu0  ;;  %v6472_v26 = vpop.f32.mrb[200].mxu1 }
 0x392   : > { %v5985_v55 = vadd.f32 %v5984_v7, %v14492_v31  ;;  %v6473_v45 = vadd.f32 %v6472_v26, %v3751_v18  ;;  %v5986_v19 = vpop.f32.mrb[9].mxu0  ;;  %v6474_v38 = vpop.f32.mrb[201].mxu1 }
 0x393   : > { %v5987_v10 = vpop.f32.mrb[10].mxu0  ;;  %v6475_v42 = vpop.f32.mrb[202].mxu1 }
 0x394   : > { %v9268_v3 = vpack.c.bf16 %v5985_v55, %v5985_v55  ;;  %v9390_v21 = vpack.c.bf16 %v6473_v45, %v6473_v45  ;;  %v5988_v22 = vadd.f32 %v5987_v10, %v14493_v8  ;;  %v6476_v29 = vadd.f32 %v6475_v42, %v3756_v51  ;;  %v6477_v62 = vpop.f32.mrb[203].mxu1  ;;  %v5989_v17 = vpop.f32.mrb[11].mxu0  ;;  %v14498_v45 = vld [vmem:[#allocation105_spill] sm:$0xff] }
 0x395   : > { %v3786_v7 = vpop.permute.xlu1 %3785  ;;  %v3781_v26 = vpop.permute.xlu0 %3780  ;;  %v10218_v42 = vld [vmem:[%s14230_s3 + $0x7d0] ss:$8 sps:$4 sm:$0xff]  }
 0x396   : > { %8084 = vst.msk [vmem:[%s12776_s23 + $0x110] sm:$0xf] %vm8015_vm0, %v9268_v3  ;;  %8206 = vst.msk [vmem:[%s12776_s23 + $0x2f8] sm:$0xf] %vm8015_vm0, %v9390_v21  ;;  %v9269_v63 = vpack.c.bf16 %v5988_v22, %v5988_v22  ;;  %v9391_v60 = vpack.c.bf16 %v6476_v29, %v6476_v29  ;;  %6687 = vmatmul.mubr.bf16.gmra.mrb[52].mxu1 %v10209_v6  ;;  %v10223_v21 = vld [vmem:[%s14230_s3 + $0x7e4] ss:$8 sps:$4 sm:$0xff]  }
 0x397   : > { %6694 = vmatprep.mubr.bf16.mxu1 %v10214_v28  ;;  %v14499_v29 = vld [vmem:[#allocation104_spill] sm:$0xff] }
 0x398   : > { %8085 = vst.msk [vmem:[%s12776_s23 + $0x114] sm:$0xf] %vm8015_vm0, %v9269_v63  ;;  %8207 = vst.msk [vmem:[%s12776_s23 + $0x2fc] sm:$0xf] %vm8015_vm0, %v9391_v60 }
 0x399   : > { %v5992_v56 = vpop.f32.mrb[12].mxu0  ;;  %v6480_v59 = vpop.f32.mrb[204].mxu1 }
 0x39a   : > { %v5993_v54 = vadd.f32 %v5992_v56, %v14494_v35  ;;  %v6481_v5 = vadd.f32 %v6480_v59, %v3761_v0  ;;  %v5994_v23 = vpop.f32.mrb[13].mxu0  ;;  %v6482_v40 = vpop.f32.mrb[205].mxu1 }
 0x39b   : > { %v5995_v52 = vpop.f32.mrb[14].mxu0  ;;  %v6483_v48 = vpop.f32.mrb[206].mxu1 }
 0x39c   : > { %v9270_v34 = vpack.c.bf16 %v5993_v54, %v5993_v54  ;;  %v9392_v30 = vpack.c.bf16 %v6481_v5, %v6481_v5  ;;  %v5996_v25 = vadd.f32 %v5995_v52, %v14495_v15  ;;  %v6484_v39 = vadd.f32 %v6483_v48, %v3766_v37  ;;  %v6485_v27 = vpop.f32.mrb[207].mxu1  ;;  %v5997_v12 = vpop.f32.mrb[15].mxu0  ;;  %v14500_v5 = vld [vmem:[#allocation107_spill] sm:$0xff] }
 0x39d   : > { %v3796_v56 = vpop.permute.xlu1 %3795  ;;  %v3791_v59 = vpop.permute.xlu0 %3790  ;;  %v10221_v48 = vld [vmem:[%s14230_s3 + $0x7e0] ss:$8 sps:$4 sm:$0xff]  }
 0x39e   : > { %8086 = vst.msk [vmem:[%s12776_s23 + $0x118] sm:$0xf] %vm8015_vm0, %v9270_v34  ;;  %8208 = vst.msk [vmem:[%s12776_s23 + $0x300] sm:$0xf] %vm8015_vm0, %v9392_v30  ;;  %v9271_v49 = vpack.c.bf16 %v5996_v25, %v5996_v25  ;;  %v9393_v58 = vpack.c.bf16 %v6484_v39, %v6484_v39  ;;  %6695 = vmatmul.mubr.bf16.gmra.mrb[56].mxu1 %v10212_v44  ;;  %v10226_v30 = vld [vmem:[%s14230_s3 + $0x7f4] ss:$8 sps:$4 sm:$0xff]  }
 0x39f   : > { %6702 = vmatprep.mubr.bf16.mxu1 %v10217_v24  ;;  %v14501_v39 = vld [vmem:[#allocation106_spill] sm:$0xff] }
 0x3a0   : > { %8087 = vst.msk [vmem:[%s12776_s23 + $0x11c] sm:$0xf] %vm8015_vm0, %v9271_v49  ;;  %8209 = vst.msk [vmem:[%s12776_s23 + $0x304] sm:$0xf] %vm8015_vm0, %v9393_v58 }
 0x3a1   : > { %v6000_v1 = vpop.f32.mrb[16].mxu0  ;;  %v6488_v36 = vpop.f32.mrb[208].mxu1 }
 0x3a2   : > { %v6001_v2 = vadd.f32 %v6000_v1, %v14496_v50  ;;  %v6489_v43 = vadd.f32 %v6488_v36, %v3771_v53  ;;  %v6002_v46 = vpop.f32.mrb[17].mxu0  ;;  %v6490_v61 = vpop.f32.mrb[209].mxu1 }
 0x3a3   : > { %v6003_v14 = vpop.f32.mrb[18].mxu0  ;;  %v6491_v33 = vpop.f32.mrb[210].mxu1 }
 0x3a4   : > { %v9272_v57 = vpack.c.bf16 %v6001_v2, %v6001_v2  ;;  %v9394_v11 = vpack.c.bf16 %v6489_v43, %v6489_v43  ;;  %v6004_v4 = vadd.f32 %v6003_v14, %v14497_v13  ;;  %v6492_v41 = vadd.f32 %v6491_v33, %v3776_v47  ;;  %v6493_v16 = vpop.f32.mrb[211].mxu1  ;;  %v6005_v20 = vpop.f32.mrb[19].mxu0  ;;  %v14502_v43 = vld [vmem:[#allocation109_spill] sm:$0xff]  ;;  %v10229_v13 = vld [vmem:[%s14230_s3 + $0x804] ss:$8 sps:$4 sm:$0xff]  }
 0x3a5   : > { %v3806_v1 = vpop.permute.xlu1 %3805  ;;  %v3801_v36 = vpop.permute.xlu0 %3800  ;;  %v10224_v33 = vld [vmem:[%s14230_s3 + $0x7f0] ss:$8 sps:$4 sm:$0xff]  }
 0x3a6   : > { %8088 = vst.msk [vmem:[%s12776_s23 + $0x120] sm:$0xf] %vm8015_vm0, %v9272_v57  ;;  %8210 = vst.msk [vmem:[%s12776_s23 + $0x308] sm:$0xf] %vm8015_vm0, %v9394_v11  ;;  %v9273_v51 = vpack.c.bf16 %v6004_v4, %v6004_v4  ;;  %v9395_v18 = vpack.c.bf16 %v6492_v41, %v6492_v41  ;;  %6703 = vmatmul.mubr.bf16.gmra.mrb[60].mxu1 %v10215_v9  ;;  %v10275_v4 = vld [vmem:[%s14232_s5] ss:$8 sps:$4 sm:$0xff]  }
 0x3a7   : > { %6710 = vmatprep.mubr.bf16.mxu1 %v10220_v32  ;;  %v10277_v32 = vld [vmem:[%s14232_s5 + $0x4] ss:$8 sps:$4 sm:$0xff]   ;;  %v14503_v20 = vld [vmem:[#allocation108_spill] sm:$0xff] }
 0x3a8   : > { %8089 = vst.msk [vmem:[%s12776_s23 + $0x124] sm:$0xf] %vm8015_vm0, %v9273_v51  ;;  %8211 = vst.msk [vmem:[%s12776_s23 + $0x30c] sm:$0xf] %vm8015_vm0, %v9395_v18  ;;  %8348 = vmatprep.mubr.bf16.mxu0 %v10277_v32 }
 0x3a9   : > { %v6008_v31 = vpop.f32.mrb[20].mxu0  ;;  %v6496_v55 = vpop.f32.mrb[212].mxu1  ;;  %8349 = vmatmul.mubr.bf16.vlgmr.msra.gmra.mrb[116].mxu0 %v10275_v4 }
 0x3aa   : > { %v6009_v19 = vadd.f32 %v6008_v31, %v14498_v45  ;;  %v6497_v38 = vadd.f32 %v6496_v55, %v3781_v26  ;;  %v6010_v6 = vpop.f32.mrb[21].mxu0  ;;  %v6498_v10 = vpop.f32.mrb[213].mxu1 }
 0x3ab   : > { %v6011_v28 = vpop.f32.mrb[22].mxu0  ;;  %v6499_v3 = vpop.f32.mrb[214].mxu1  ;;  %v14504_v10 = vld [vmem:[#allocation111_spill] sm:$0xff] }
 0x3ac   : > { %v9274_v8 = vpack.c.bf16 %v6009_v19, %v6009_v19  ;;  %v9396_v22 = vpack.c.bf16 %v6497_v38, %v6497_v38  ;;  %v6012_v62 = vadd.f32 %v6011_v28, %v14499_v29  ;;  %v6500_v17 = vadd.f32 %v6499_v3, %v3786_v7  ;;  %v6501_v63 = vpop.f32.mrb[215].mxu1  ;;  %v6013_v60 = vpop.f32.mrb[23].mxu0 }
 0x3ad   : > { %v3816_v45 = vpop.permute.xlu1 %3815  ;;  %v3811_v19 = vpop.permute.xlu0 %3810  ;;  %v14505_v60 = vld [vmem:[#allocation110_spill] sm:$0xff] }
 0x3ae   : > { %8090 = vst.msk [vmem:[%s12776_s23 + $0x128] sm:$0xf] %vm8015_vm0, %v9274_v8  ;;  %8212 = vst.msk [vmem:[%s12776_s23 + $0x310] sm:$0xf] %vm8015_vm0, %v9396_v22  ;;  %v9275_v37 = vpack.c.bf16 %v6012_v62, %v6012_v62  ;;  %v9397_v0 = vpack.c.bf16 %v6500_v17, %v6500_v17  ;;  %6711 = vmatmul.mubr.bf16.gmra.mrb[64].mxu1 %v10218_v42  ;;  %v10227_v8 = vld [vmem:[%s14230_s3 + $0x800] ss:$8 sps:$4 sm:$0xff]  }
 0x3af   : > { %6718 = vmatprep.mubr.bf16.mxu1 %v10223_v21  ;;  %v10232_v62 = vld [vmem:[%s14230_s3 + $0x814] ss:$8 sps:$4 sm:$0xff]  }
 0x3b0   : > { %8091 = vst.msk [vmem:[%s12776_s23 + $0x12c] sm:$0xf] %vm8015_vm0, %v9275_v37  ;;  %8213 = vst.msk [vmem:[%s12776_s23 + $0x314] sm:$0xf] %vm8015_vm0, %v9397_v0 }
 0x3b1   : > { %v6016_v35 = vpop.f32.mrb[24].mxu0  ;;  %v6504_v54 = vpop.f32.mrb[216].mxu1 }
 0x3b2   : > { %v6017_v23 = vadd.f32 %v6016_v35, %v14500_v5  ;;  %v6505_v40 = vadd.f32 %v6504_v54, %v3791_v59  ;;  %v6018_v44 = vpop.f32.mrb[25].mxu0  ;;  %v6506_v52 = vpop.f32.mrb[217].mxu1 }
 0x3b3   : > { %v6019_v24 = vpop.f32.mrb[26].mxu0  ;;  %v6507_v34 = vpop.f32.mrb[218].mxu1  ;;  %v14506_v52 = vld [vmem:[#allocation113_spill] sm:$0xff] }
 0x3b4   : > { %v9276_v15 = vpack.c.bf16 %v6017_v23, %v6017_v23  ;;  %v9398_v25 = vpack.c.bf16 %v6505_v40, %v6505_v40  ;;  %v6020_v27 = vadd.f32 %v6019_v24, %v14501_v39  ;;  %v6508_v12 = vadd.f32 %v6507_v34, %v3796_v56  ;;  %v6509_v49 = vpop.f32.mrb[219].mxu1  ;;  %v6021_v58 = vpop.f32.mrb[27].mxu0 }
 0x3b5   : > { %v3826_v5 = vpop.permute.xlu1 %3825  ;;  %v3821_v23 = vpop.permute.xlu0 %3820  ;;  %v14507_v58 = vld [vmem:[#allocation112_spill] sm:$0xff] }
 0x3b6   : > { %8092 = vst.msk [vmem:[%s12776_s23 + $0x130] sm:$0xf] %vm8015_vm0, %v9276_v15  ;;  %8214 = vst.msk [vmem:[%s12776_s23 + $0x318] sm:$0xf] %vm8015_vm0, %v9398_v25  ;;  %v9277_v47 = vpack.c.bf16 %v6020_v27, %v6020_v27  ;;  %v9399_v53 = vpack.c.bf16 %v6508_v12, %v6508_v12  ;;  %6719 = vmatmul.mubr.bf16.gmra.mrb[68].mxu1 %v10221_v48  ;;  %v10230_v15 = vld [vmem:[%s14230_s3 + $0x810] ss:$8 sps:$4 sm:$0xff]  }
 0x3b7   : > { %6726 = vmatprep.mubr.bf16.mxu1 %v10226_v30  ;;  %v10235_v27 = vld [vmem:[%s14230_s3 + $0x824] ss:$8 sps:$4 sm:$0xff]  }
 0x3b8   : > { %8093 = vst.msk [vmem:[%s12776_s23 + $0x134] sm:$0xf] %vm8015_vm0, %v9277_v47  ;;  %8215 = vst.msk [vmem:[%s12776_s23 + $0x31c] sm:$0xf] %vm8015_vm0, %v9399_v53 }
 0x3b9   : > { %v6024_v50 = vpop.f32.mrb[28].mxu0  ;;  %v6512_v2 = vpop.f32.mrb[220].mxu1 }
 0x3ba   : > { %v6025_v46 = vadd.f32 %v6024_v50, %v14502_v43  ;;  %v6513_v61 = vadd.f32 %v6512_v2, %v3801_v36  ;;  %v6026_v9 = vpop.f32.mrb[29].mxu0  ;;  %v6514_v14 = vpop.f32.mrb[221].mxu1 }
 0x3bb   : > { %v6027_v57 = vpop.f32.mrb[30].mxu0  ;;  %v6515_v11 = vpop.f32.mrb[222].mxu1  ;;  %v14508_v14 = vld [vmem:[#allocation115_spill] sm:$0xff] }
 0x3bc   : > { %v9278_v41 = vpack.c.bf16 %v6025_v46, %v6025_v46  ;;  %v9400_v16 = vpack.c.bf16 %v6513_v61, %v6513_v61  ;;  %v6028_v51 = vadd.f32 %v6027_v57, %v14503_v20  ;;  %v6516_v18 = vadd.f32 %v6515_v11, %v3806_v1  ;;  %v6517_v7 = vpop.f32.mrb[223].mxu1  ;;  %v6029_v26 = vpop.f32.mrb[31].mxu0 }
 0x3bd   : > { %v3836_v43 = vpop.permute.xlu1 %3835  ;;  %v3831_v46 = vpop.permute.xlu0 %3830 }
 0x3be   : > { %8094 = vst.msk [vmem:[%s12776_s23 + $0x138] sm:$0xf] %vm8015_vm0, %v9278_v41  ;;  %8216 = vst.msk [vmem:[%s12776_s23 + $0x320] sm:$0xf] %vm8015_vm0, %v9400_v16  ;;  %v9279_v31 = vpack.c.bf16 %v6028_v51, %v6028_v51  ;;  %v9401_v55 = vpack.c.bf16 %v6516_v18, %v6516_v18  ;;  %6727 = vmatmul.mubr.bf16.gmra.mrb[72].mxu1 %v10224_v33  ;;  %v10238_v16 = vld [vmem:[%s14230_s3 + $0x834] ss:$8 sps:$4 sm:$0xff]  }
 0x3bf   : > { %6734 = vmatprep.mubr.bf16.mxu1 %v10229_v13  ;;  %v10233_v13 = vld [vmem:[%s14230_s3 + $0x820] ss:$8 sps:$4 sm:$0xff]  }
 0x3c0   : > { %8095 = vst.msk [vmem:[%s12776_s23 + $0x13c] sm:$0xf] %vm8015_vm0, %v9279_v31  ;;  %8217 = vst.msk [vmem:[%s12776_s23 + $0x324] sm:$0xf] %vm8015_vm0, %v9401_v55  ;;  %v14509_v18 = vld [vmem:[#allocation114_spill] sm:$0xff] }
 0x3c1   : > { %v6032_v38 = vpop.f32.mrb[32].mxu0  ;;  %v6520_v6 = vpop.f32.mrb[224].mxu1 }
 0x3c2   : > { %v6033_v42 = vadd.f32 %v6032_v38, %v14504_v10  ;;  %v6521_v28 = vadd.f32 %v6520_v6, %v3811_v19  ;;  %v6034_v3 = vpop.f32.mrb[33].mxu0  ;;  %v6522_v21 = vpop.f32.mrb[225].mxu1 }
 0x3c3   : > { %v6035_v22 = vpop.f32.mrb[34].mxu0  ;;  %v6523_v29 = vpop.f32.mrb[226].mxu1 }
 0x3c4   : > { %v9280_v17 = vpack.c.bf16 %v6033_v42, %v6033_v42  ;;  %v9402_v63 = vpack.c.bf16 %v6521_v28, %v6521_v28  ;;  %v6036_v37 = vadd.f32 %v6035_v22, %v14505_v60  ;;  %v6524_v0 = vadd.f32 %v6523_v29, %v3816_v45  ;;  %v6525_v56 = vpop.f32.mrb[227].mxu1  ;;  %v6037_v59 = vpop.f32.mrb[35].mxu0  ;;  %v14510_v28 = vld [vmem:[#allocation116_spill] sm:$0xff] }
 0x3c5   : > { %v3846_v38 = vpop.permute.xlu1 %3845  ;;  %v3841_v6 = vpop.permute.xlu0 %3840  ;;  %v10236_v29 = vld [vmem:[%s14230_s3 + $0x830] ss:$8 sps:$4 sm:$0xff]  }
 0x3c6   : > { %8096 = vst.msk [vmem:[%s12776_s23 + $0x140] sm:$0xf] %vm8015_vm0, %v9280_v17  ;;  %8218 = vst.msk [vmem:[%s12776_s23 + $0x328] sm:$0xf] %vm8015_vm0, %v9402_v63  ;;  %v9281_v35 = vpack.c.bf16 %v6036_v37, %v6036_v37  ;;  %v9403_v54 = vpack.c.bf16 %v6524_v0, %v6524_v0  ;;  %6735 = vmatmul.mubr.bf16.gmra.mrb[76].mxu1 %v10227_v8  ;;  %v10241_v63 = vld [vmem:[%s14230_s3 + $0x844] ss:$8 sps:$4 sm:$0xff]  }
 0x3c7   : > { %6742 = vmatprep.mubr.bf16.mxu1 %v10232_v62  ;;  %v14511_v0 = vld [vmem:[#allocation3_spill] sm:$0xff] }
 0x3c8   : > { %8097 = vst.msk [vmem:[%s12776_s23 + $0x144] sm:$0xf] %vm8015_vm0, %v9281_v35  ;;  %8219 = vst.msk [vmem:[%s12776_s23 + $0x32c] sm:$0xf] %vm8015_vm0, %v9403_v54 }
 0x3c9   : > { %v6040_v40 = vpop.f32.mrb[36].mxu0  ;;  %v6528_v44 = vpop.f32.mrb[228].mxu1 }
 0x3ca   : > { %v6041_v48 = vadd.f32 %v6040_v40, %v14506_v52  ;;  %v6529_v24 = vadd.f32 %v6528_v44, %v3821_v23  ;;  %v6042_v34 = vpop.f32.mrb[37].mxu0  ;;  %v6530_v30 = vpop.f32.mrb[229].mxu1 }
 0x3cb   : > { %v6043_v25 = vpop.f32.mrb[38].mxu0  ;;  %v6531_v39 = vpop.f32.mrb[230].mxu1 }
 0x3cc   : > { %v9282_v12 = vpack.c.bf16 %v6041_v48, %v6041_v48  ;;  %v9404_v49 = vpack.c.bf16 %v6529_v24, %v6529_v24  ;;  %v6044_v47 = vadd.f32 %v6043_v25, %v14507_v58  ;;  %v6532_v53 = vadd.f32 %v6531_v39, %v3826_v5  ;;  %v6533_v1 = vpop.f32.mrb[231].mxu1  ;;  %v6045_v36 = vpop.f32.mrb[39].mxu0  ;;  %v14512_v24 = vld [vmem:[#allocation117_spill] sm:$0xff]  ;;  %v10239_v39 = vld [vmem:[%s14230_s3 + $0x840] ss:$8 sps:$4 sm:$0xff]  }
 0x3cd   : > { %v3856_v40 = vpop.permute.xlu1 %3855  ;;  %v3851_v44 = vpop.permute.xlu0 %3850 }
 0x3ce   : > { %8098 = vst.msk [vmem:[%s12776_s23 + $0x148] sm:$0xf] %vm8015_vm0, %v9282_v12  ;;  %8220 = vst.msk [vmem:[%s12776_s23 + $0x330] sm:$0xf] %vm8015_vm0, %v9404_v49  ;;  %v9283_v50 = vpack.c.bf16 %v6044_v47, %v6044_v47  ;;  %v9405_v2 = vpack.c.bf16 %v6532_v53, %v6532_v53  ;;  %6743 = vmatmul.mubr.bf16.gmra.mrb[80].mxu1 %v10230_v15  ;;  %v10244_v49 = vld [vmem:[%s14230_s3 + $0x854] ss:$8 sps:$4 sm:$0xff]  }
 0x3cf   : > { %6750 = vmatprep.mubr.bf16.mxu1 %v10235_v27  ;;  %v14513_v53 = vld [vmem:[#allocation2_spill] sm:$0xff] }
 0x3d0   : > { %8099 = vst.msk [vmem:[%s12776_s23 + $0x14c] sm:$0xf] %vm8015_vm0, %v9283_v50  ;;  %8221 = vst.msk [vmem:[%s12776_s23 + $0x334] sm:$0xf] %vm8015_vm0, %v9405_v2 }
 0x3d1   : > { %v6048_v61 = vpop.f32.mrb[40].mxu0  ;;  %v6536_v9 = vpop.f32.mrb[232].mxu1 }
 0x3d2   : > { %v6049_v33 = vadd.f32 %v6048_v61, %v14508_v14  ;;  %v6537_v32 = vadd.f32 %v6536_v9, %v3831_v46  ;;  %v6050_v57 = vpop.f32.mrb[41].mxu0  ;;  %v6538_v11 = vpop.f32.mrb[233].mxu1 }
 0x3d3   : > { %v6051_v4 = vpop.f32.mrb[42].mxu0  ;;  %v6539_v41 = vpop.f32.mrb[234].mxu1 }
 0x3d4   : > { %v9284_v20 = vpack.c.bf16 %v6049_v33, %v6049_v33  ;;  %v9406_v51 = vpack.c.bf16 %v6537_v32, %v6537_v32  ;;  %v6052_v7 = vadd.f32 %v6051_v4, %v14509_v18  ;;  %v6540_v26 = vadd.f32 %v6539_v41, %v3836_v43  ;;  %v6541_v31 = vpop.f32.mrb[235].mxu1  ;;  %v6053_v55 = vpop.f32.mrb[43].mxu0  ;;  %v14514_v32 = vld [vmem:[#allocation118_spill] sm:$0xff]  ;;  %v10242_v41 = vld [vmem:[%s14230_s3 + $0x850] ss:$8 sps:$4 sm:$0xff]  }
 0x3d5   : > { %v3866_v61 = vpop.permute.xlu1 %3865  ;;  %v3861_v9 = vpop.permute.xlu0 %3860 }
 0x3d6   : > { %8100 = vst.msk [vmem:[%s12776_s23 + $0x150] sm:$0xf] %vm8015_vm0, %v9284_v20  ;;  %8222 = vst.msk [vmem:[%s12776_s23 + $0x338] sm:$0xf] %vm8015_vm0, %v9406_v51  ;;  %v9285_v45 = vpack.c.bf16 %v6052_v7, %v6052_v7  ;;  %v9407_v19 = vpack.c.bf16 %v6540_v26, %v6540_v26  ;;  %6751 = vmatmul.mubr.bf16.gmra.mrb[84].mxu1 %v10233_v13  ;;  %v10247_v51 = vld [vmem:[%s14230_s3 + $0x864] ss:$8 sps:$4 sm:$0xff]  }
 0x3d7   : > { %6758 = vmatprep.mubr.bf16.mxu1 %v10238_v16  ;;  %v14515_v26 = vld [vmem:[#allocation5_spill] sm:$0xff] }
 0x3d8   : > { %8101 = vst.msk [vmem:[%s12776_s23 + $0x154] sm:$0xf] %vm8015_vm0, %v9285_v45  ;;  %8223 = vst.msk [vmem:[%s12776_s23 + $0x33c] sm:$0xf] %vm8015_vm0, %v9407_v19 }
 0x3d9   : > { %v6056_v10 = vpop.f32.mrb[44].mxu0  ;;  %v6544_v42 = vpop.f32.mrb[236].mxu1 }
 0x3da   : > { %v6057_v3 = vadd.f32 %v6056_v10, %v14510_v28  ;;  %v6545_v21 = vadd.f32 %v6544_v42, %v3841_v6  ;;  %v6058_v8 = vpop.f32.mrb[45].mxu0  ;;  %v6546_v22 = vpop.f32.mrb[237].mxu1 }
 0x3db   : > { %v6059_v62 = vpop.f32.mrb[46].mxu0  ;;  %v6547_v17 = vpop.f32.mrb[238].mxu1 }
 0x3dc   : > { %v9286_v60 = vpack.c.bf16 %v6057_v3, %v6057_v3  ;;  %v9408_v37 = vpack.c.bf16 %v6545_v21, %v6545_v21  ;;  %v6060_v56 = vadd.f32 %v6059_v62, %v14511_v0  ;;  %v6548_v59 = vadd.f32 %v6547_v17, %v3846_v38  ;;  %v6549_v35 = vpop.f32.mrb[239].mxu1  ;;  %v6061_v54 = vpop.f32.mrb[47].mxu0  ;;  %v14516_v21 = vld [vmem:[#allocation119_spill] sm:$0xff] }
 0x3dd   : > { %v3876_v10 = vpop.permute.xlu1 %3875  ;;  %v3871_v42 = vpop.permute.xlu0 %3870  ;;  %v10245_v17 = vld [vmem:[%s14230_s3 + $0x860] ss:$8 sps:$4 sm:$0xff]  }
 0x3de   : > { %8102 = vst.msk [vmem:[%s12776_s23 + $0x158] sm:$0xf] %vm8015_vm0, %v9286_v60  ;;  %8224 = vst.msk [vmem:[%s12776_s23 + $0x340] sm:$0xf] %vm8015_vm0, %v9408_v37  ;;  %v9287_v5 = vpack.c.bf16 %v6060_v56, %v6060_v56  ;;  %v9409_v23 = vpack.c.bf16 %v6548_v59, %v6548_v59  ;;  %6759 = vmatmul.mubr.bf16.gmra.mrb[88].mxu1 %v10236_v29  ;;  %v10250_v37 = vld [vmem:[%s14230_s3 + $0x874] ss:$8 sps:$4 sm:$0xff]  }
 0x3df   : > { %6766 = vmatprep.mubr.bf16.mxu1 %v10241_v63  ;;  %v14517_v59 = vld [vmem:[#allocation4_spill] sm:$0xff] }
 0x3e0   : > { %8103 = vst.msk [vmem:[%s12776_s23 + $0x15c] sm:$0xf] %vm8015_vm0, %v9287_v5  ;;  %8225 = vst.msk [vmem:[%s12776_s23 + $0x344] sm:$0xf] %vm8015_vm0, %v9409_v23 }
 0x3e1   : > { %v6064_v52 = vpop.f32.mrb[48].mxu0  ;;  %v6552_v48 = vpop.f32.mrb[240].mxu1 }
 0x3e2   : > { %v6065_v34 = vadd.f32 %v6064_v52, %v14512_v24  ;;  %v6553_v30 = vadd.f32 %v6552_v48, %v3851_v44  ;;  %v6066_v15 = vpop.f32.mrb[49].mxu0  ;;  %v6554_v25 = vpop.f32.mrb[241].mxu1 }
 0x3e3   : > { %v6067_v27 = vpop.f32.mrb[50].mxu0  ;;  %v6555_v12 = vpop.f32.mrb[242].mxu1 }
 0x3e4   : > { %v9288_v58 = vpack.c.bf16 %v6065_v34, %v6065_v34  ;;  %v9410_v47 = vpack.c.bf16 %v6553_v30, %v6553_v30  ;;  %v6068_v1 = vadd.f32 %v6067_v27, %v14513_v53  ;;  %v6556_v36 = vadd.f32 %v6555_v12, %v3856_v40  ;;  %v6557_v50 = vpop.f32.mrb[243].mxu1  ;;  %v6069_v2 = vpop.f32.mrb[51].mxu0  ;;  %v14518_v30 = vld [vmem:[#allocation120_spill] sm:$0xff] }
 0x3e5   : > { %v3886_v52 = vpop.permute.xlu1 %3885  ;;  %v3881_v48 = vpop.permute.xlu0 %3880  ;;  %v10248_v12 = vld [vmem:[%s14230_s3 + $0x870] ss:$8 sps:$4 sm:$0xff]  }
 0x3e6   : > { %8104 = vst.msk [vmem:[%s12776_s23 + $0x160] sm:$0xf] %vm8015_vm0, %v9288_v58  ;;  %8226 = vst.msk [vmem:[%s12776_s23 + $0x348] sm:$0xf] %vm8015_vm0, %v9410_v47  ;;  %v9289_v43 = vpack.c.bf16 %v6068_v1, %v6068_v1  ;;  %v9411_v46 = vpack.c.bf16 %v6556_v36, %v6556_v36  ;;  %6767 = vmatmul.mubr.bf16.gmra.mrb[92].mxu1 %v10239_v39  ;;  %v10253_v47 = vld [vmem:[%s14230_s3 + $0x884] ss:$8 sps:$4 sm:$0xff]  }
 0x3e7   : > { %6774 = vmatprep.mubr.bf16.mxu1 %v10244_v49  ;;  %v14519_v36 = vld [vmem:[#allocation7_spill] sm:$0xff] }
 0x3e8   : > { %8105 = vst.msk [vmem:[%s12776_s23 + $0x164] sm:$0xf] %vm8015_vm0, %v9289_v43  ;;  %8227 = vst.msk [vmem:[%s12776_s23 + $0x34c] sm:$0xf] %vm8015_vm0, %v9411_v46 }
 0x3e9   : > { %v6072_v14 = vpop.f32.mrb[52].mxu0  ;;  %v6560_v33 = vpop.f32.mrb[244].mxu1 }
 0x3ea   : > { %v6073_v57 = vadd.f32 %v6072_v14, %v14514_v32  ;;  %v6561_v11 = vadd.f32 %v6560_v33, %v3861_v9  ;;  %v6074_v13 = vpop.f32.mrb[53].mxu0  ;;  %v6562_v4 = vpop.f32.mrb[245].mxu1 }
 0x3eb   : > { %v6075_v16 = vpop.f32.mrb[54].mxu0  ;;  %v6563_v20 = vpop.f32.mrb[246].mxu1 }
 0x3ec   : > { %v9290_v18 = vpack.c.bf16 %v6073_v57, %v6073_v57  ;;  %v9412_v7 = vpack.c.bf16 %v6561_v11, %v6561_v11  ;;  %v6076_v31 = vadd.f32 %v6075_v16, %v14515_v26  ;;  %v6564_v55 = vadd.f32 %v6563_v20, %v3866_v61  ;;  %v6565_v45 = vpop.f32.mrb[247].mxu1  ;;  %v6077_v19 = vpop.f32.mrb[55].mxu0  ;;  %v14520_v11 = vld [vmem:[#allocation121_spill] sm:$0xff]  ;;  %v10251_v20 = vld [vmem:[%s14230_s3 + $0x880] ss:$8 sps:$4 sm:$0xff]  }
 0x3ed   : > { %v3896_v14 = vpop.permute.xlu1 %3895  ;;  %v3891_v33 = vpop.permute.xlu0 %3890 }
 0x3ee   : > { %8106 = vst.msk [vmem:[%s12776_s23 + $0x168] sm:$0xf] %vm8015_vm0, %v9290_v18  ;;  %8228 = vst.msk [vmem:[%s12776_s23 + $0x350] sm:$0xf] %vm8015_vm0, %v9412_v7  ;;  %v9291_v38 = vpack.c.bf16 %v6076_v31, %v6076_v31  ;;  %v9413_v6 = vpack.c.bf16 %v6564_v55, %v6564_v55  ;;  %6775 = vmatmul.mubr.bf16.gmra.mrb[96].mxu1 %v10242_v41  ;;  %v10256_v7 = vld [vmem:[%s14230_s3 + $0x894] ss:$8 sps:$4 sm:$0xff]  }
 0x3ef   : > { %6782 = vmatprep.mubr.bf16.mxu1 %v10247_v51  ;;  %v14521_v55 = vld [vmem:[#allocation6_spill] sm:$0xff] }
 0x3f0   : > { %8107 = vst.msk [vmem:[%s12776_s23 + $0x16c] sm:$0xf] %vm8015_vm0, %v9291_v38  ;;  %8229 = vst.msk [vmem:[%s12776_s23 + $0x354] sm:$0xf] %vm8015_vm0, %v9413_v6 }
 0x3f1   : > { %v6080_v28 = vpop.f32.mrb[56].mxu0  ;;  %v6568_v3 = vpop.f32.mrb[248].mxu1 }
 0x3f2   : > { %v6081_v8 = vadd.f32 %v6080_v28, %v14516_v21  ;;  %v6569_v22 = vadd.f32 %v6568_v3, %v3871_v42  ;;  %v6082_v29 = vpop.f32.mrb[57].mxu0  ;;  %v6570_v62 = vpop.f32.mrb[249].mxu1 }
 0x3f3   : > { %v6083_v63 = vpop.f32.mrb[58].mxu0  ;;  %v6571_v60 = vpop.f32.mrb[250].mxu1 }
 0x3f4   : > { %v9292_v0 = vpack.c.bf16 %v6081_v8, %v6081_v8  ;;  %v9414_v56 = vpack.c.bf16 %v6569_v22, %v6569_v22  ;;  %v6084_v35 = vadd.f32 %v6083_v63, %v14517_v59  ;;  %v6572_v54 = vadd.f32 %v6571_v60, %v3876_v10  ;;  %v6573_v5 = vpop.f32.mrb[251].mxu1  ;;  %v6085_v23 = vpop.f32.mrb[59].mxu0  ;;  %v14522_v22 = vld [vmem:[#allocation122_spill] sm:$0xff]  ;;  %v10254_v60 = vld [vmem:[%s14230_s3 + $0x890] ss:$8 sps:$4 sm:$0xff]  }
 0x3f5   : > { %v3906_v28 = vpop.permute.xlu1 %3905  ;;  %v3901_v3 = vpop.permute.xlu0 %3900 }
 0x3f6   : > { %8108 = vst.msk [vmem:[%s12776_s23 + $0x170] sm:$0xf] %vm8015_vm0, %v9292_v0  ;;  %8230 = vst.msk [vmem:[%s12776_s23 + $0x358] sm:$0xf] %vm8015_vm0, %v9414_v56  ;;  %v9293_v40 = vpack.c.bf16 %v6084_v35, %v6084_v35  ;;  %v9415_v44 = vpack.c.bf16 %v6572_v54, %v6572_v54  ;;  %6783 = vmatmul.mubr.bf16.gmra.mrb[100].mxu1 %v10245_v17  ;;  %v10259_v56 = vld [vmem:[%s14230_s3 + $0x8a4] ss:$8 sps:$4 sm:$0xff]  }
 0x3f7   : > { %6790 = vmatprep.mubr.bf16.mxu1 %v10250_v37  ;;  %v14523_v54 = vld [vmem:[#allocation9_spill] sm:$0xff] }
 0x3f8   : > { %8109 = vst.msk [vmem:[%s12776_s23 + $0x174] sm:$0xf] %vm8015_vm0, %v9293_v40  ;;  %8231 = vst.msk [vmem:[%s12776_s23 + $0x35c] sm:$0xf] %vm8015_vm0, %v9415_v44 }
 0x3f9   : > { %v6088_v24 = vpop.f32.mrb[60].mxu0  ;;  %v6576_v34 = vpop.f32.mrb[252].mxu1 }
 0x3fa   : > { %v6089_v15 = vadd.f32 %v6088_v24, %v14518_v30  ;;  %v6577_v25 = vadd.f32 %v6576_v34, %v3881_v48  ;;  %v6090_v39 = vpop.f32.mrb[61].mxu0  ;;  %v6578_v27 = vpop.f32.mrb[253].mxu1 }
 0x3fb   : > { %v6091_v49 = vpop.f32.mrb[62].mxu0  ;;  %v6579_v58 = vpop.f32.mrb[254].mxu1 }
 0x3fc   : > { %v9294_v53 = vpack.c.bf16 %v6089_v15, %v6089_v15  ;;  %v9416_v1 = vpack.c.bf16 %v6577_v25, %v6577_v25  ;;  %v6092_v50 = vadd.f32 %v6091_v49, %v14519_v36  ;;  %v6580_v2 = vadd.f32 %v6579_v58, %v3886_v52  ;;  %v6581_v43 = vpop.f32.mrb[255].mxu1  ;;  %v6093_v46 = vpop.f32.mrb[63].mxu0  ;;  %v14524_v25 = vld [vmem:[#allocation123_spill] sm:$0xff] }
 0x3fd   : > { %v3916_v24 = vpop.permute.xlu1 %3915  ;;  %v3911_v34 = vpop.permute.xlu0 %3910  ;;  %v10257_v58 = vld [vmem:[%s14230_s3 + $0x8a0] ss:$8 sps:$4 sm:$0xff]  }
 0x3fe   : > { %8110 = vst.msk [vmem:[%s12776_s23 + $0x178] sm:$0xf] %vm8015_vm0, %v9294_v53  ;;  %8232 = vst.msk [vmem:[%s12776_s23 + $0x360] sm:$0xf] %vm8015_vm0, %v9416_v1  ;;  %v9295_v61 = vpack.c.bf16 %v6092_v50, %v6092_v50  ;;  %v9417_v9 = vpack.c.bf16 %v6580_v2, %v6580_v2  ;;  %6791 = vmatmul.mubr.bf16.gmra.mrb[104].mxu1 %v10248_v12  ;;  %v10262_v1 = vld [vmem:[%s14230_s3 + $0x8b4] ss:$8 sps:$4 sm:$0xff]  }
 0x3ff   : > { %6798 = vmatprep.mubr.bf16.mxu1 %v10253_v47  ;;  %v14525_v2 = vld [vmem:[#allocation8_spill] sm:$0xff] }
 0x400   : > { %8111 = vst.msk [vmem:[%s12776_s23 + $0x17c] sm:$0xf] %vm8015_vm0, %v9295_v61  ;;  %8233 = vst.msk [vmem:[%s12776_s23 + $0x364] sm:$0xf] %vm8015_vm0, %v9417_v9 }
 0x401   : > { %v6096_v32 = vpop.f32.mrb[64].mxu0  ;;  %v6584_v57 = vpop.f32.mrb[0].mxu1 }
 0x402   : > { %v6097_v13 = vadd.f32 %v6096_v32, %v14520_v11  ;;  %v6585_v4 = vadd.f32 %v6584_v57, %v3891_v33  ;;  %v6098_v41 = vpop.f32.mrb[65].mxu0  ;;  %v6586_v16 = vpop.f32.mrb[1].mxu1 }
 0x403   : > { %v6099_v51 = vpop.f32.mrb[66].mxu0  ;;  %v6587_v18 = vpop.f32.mrb[2].mxu1 }
 0x404   : > { %v9296_v26 = vpack.c.bf16 %v6097_v13, %v6097_v13  ;;  %v9418_v31 = vpack.c.bf16 %v6585_v4, %v6585_v4  ;;  %v6100_v45 = vadd.f32 %v6099_v51, %v14521_v55  ;;  %v6588_v19 = vadd.f32 %v6587_v18, %v3896_v14  ;;  %v6589_v38 = vpop.f32.mrb[3].mxu1  ;;  %v6101_v6 = vpop.f32.mrb[67].mxu0  ;;  %v14526_v4 = vld [vmem:[#allocation124_spill] sm:$0xff] }
 0x405   : > { %v3926_v32 = vpop.permute.xlu1 %3925  ;;  %v3921_v57 = vpop.permute.xlu0 %3920  ;;  %v10260_v18 = vld [vmem:[%s14230_s3 + $0x8b0] ss:$8 sps:$4 sm:$0xff]  }
 0x406   : > { %8112 = vst.msk [vmem:[%s12776_s23 + $0x180] sm:$0xf] %vm8015_vm0, %v9296_v26  ;;  %8234 = vst.msk [vmem:[%s12776_s23 + $0x368] sm:$0xf] %vm8015_vm0, %v9418_v31  ;;  %v9297_v10 = vpack.c.bf16 %v6100_v45, %v6100_v45  ;;  %v9419_v42 = vpack.c.bf16 %v6588_v19, %v6588_v19  ;;  %6799 = vmatmul.mubr.bf16.gmra.mrb[108].mxu1 %v10251_v20  ;;  %v10265_v31 = vld [vmem:[%s14230_s3 + $0x8c4] ss:$8 sps:$4 sm:$0xff]  }
 0x407   : > { %6806 = vmatprep.mubr.bf16.mxu1 %v10256_v7  ;;  %v14527_v19 = vld [vmem:[#allocation11_spill] sm:$0xff] }
 0x408   : > { %8113 = vst.msk [vmem:[%s12776_s23 + $0x184] sm:$0xf] %vm8015_vm0, %v9297_v10  ;;  %8235 = vst.msk [vmem:[%s12776_s23 + $0x36c] sm:$0xf] %vm8015_vm0, %v9419_v42 }
 0x409   : > { %v6104_v21 = vpop.f32.mrb[68].mxu0  ;;  %v6592_v8 = vpop.f32.mrb[4].mxu1 }
 0x40a   : > { %v6105_v29 = vadd.f32 %v6104_v21, %v14522_v22  ;;  %v6593_v62 = vadd.f32 %v6592_v8, %v3901_v3  ;;  %v6106_v17 = vpop.f32.mrb[69].mxu0  ;;  %v6594_v63 = vpop.f32.mrb[5].mxu1 }
 0x40b   : > { %v6107_v37 = vpop.f32.mrb[70].mxu0  ;;  %v6595_v0 = vpop.f32.mrb[6].mxu1 }
 0x40c   : > { %v9298_v59 = vpack.c.bf16 %v6105_v29, %v6105_v29  ;;  %v9420_v35 = vpack.c.bf16 %v6593_v62, %v6593_v62  ;;  %v6108_v5 = vadd.f32 %v6107_v37, %v14523_v54  ;;  %v6596_v23 = vadd.f32 %v6595_v0, %v3906_v28  ;;  %v6597_v40 = vpop.f32.mrb[7].mxu1  ;;  %v6109_v44 = vpop.f32.mrb[71].mxu0  ;;  %v14528_v62 = vld [vmem:[#allocation125_spill] sm:$0xff]  ;;  %v10263_v0 = vld [vmem:[%s14230_s3 + $0x8c0] ss:$8 sps:$4 sm:$0xff]  }
 0x40d   : > { %v3936_v21 = vpop.permute.xlu1 %3935  ;;  %v3931_v8 = vpop.permute.xlu0 %3930 }
 0x40e   : > { %8114 = vst.msk [vmem:[%s12776_s23 + $0x188] sm:$0xf] %vm8015_vm0, %v9298_v59  ;;  %8236 = vst.msk [vmem:[%s12776_s23 + $0x370] sm:$0xf] %vm8015_vm0, %v9420_v35  ;;  %v9299_v52 = vpack.c.bf16 %v6108_v5, %v6108_v5  ;;  %v9421_v48 = vpack.c.bf16 %v6596_v23, %v6596_v23  ;;  %6807 = vmatmul.mubr.bf16.gmra.mrb[112].mxu1 %v10254_v60  ;;  %v10268_v35 = vld [vmem:[%s14230_s3 + $0x8d4] ss:$8 sps:$4 sm:$0xff]  }
 0x40f   : > { %6814 = vmatprep.mubr.bf16.mxu1 %v10259_v56  ;;  %v14529_v23 = vld [vmem:[#allocation10_spill] sm:$0xff] }
 0x410   : > { %8115 = vst.msk [vmem:[%s12776_s23 + $0x18c] sm:$0xf] %vm8015_vm0, %v9299_v52  ;;  %8237 = vst.msk [vmem:[%s12776_s23 + $0x374] sm:$0xf] %vm8015_vm0, %v9421_v48 }
 0x411   : > { %v6112_v30 = vpop.f32.mrb[72].mxu0  ;;  %v6600_v15 = vpop.f32.mrb[8].mxu1 }
 0x412   : > { %v6113_v39 = vadd.f32 %v6112_v30, %v14524_v25  ;;  %v6601_v27 = vadd.f32 %v6600_v15, %v3911_v34  ;;  %v6114_v12 = vpop.f32.mrb[73].mxu0  ;;  %v6602_v49 = vpop.f32.mrb[9].mxu1 }
 0x413   : > { %v6115_v47 = vpop.f32.mrb[74].mxu0  ;;  %v6603_v53 = vpop.f32.mrb[10].mxu1 }
 0x414   : > { %v9300_v36 = vpack.c.bf16 %v6113_v39, %v6113_v39  ;;  %v9422_v50 = vpack.c.bf16 %v6601_v27, %v6601_v27  ;;  %v6116_v43 = vadd.f32 %v6115_v47, %v14525_v2  ;;  %v6604_v46 = vadd.f32 %v6603_v53, %v3916_v24  ;;  %v6605_v61 = vpop.f32.mrb[11].mxu1  ;;  %v6117_v9 = vpop.f32.mrb[75].mxu0  ;;  %v14530_v27 = vld [vmem:[#allocation126_spill] sm:$0xff]  ;;  %v10266_v53 = vld [vmem:[%s14230_s3 + $0x8d0] ss:$8 sps:$4 sm:$0xff]  }
 0x415   : > { %v3946_v30 = vpop.permute.xlu1 %3945  ;;  %v3941_v15 = vpop.permute.xlu0 %3940 }
 0x416   : > { %8116 = vst.msk [vmem:[%s12776_s23 + $0x190] sm:$0xf] %vm8015_vm0, %v9300_v36  ;;  %8238 = vst.msk [vmem:[%s12776_s23 + $0x378] sm:$0xf] %vm8015_vm0, %v9422_v50  ;;  %v9301_v14 = vpack.c.bf16 %v6116_v43, %v6116_v43  ;;  %v9423_v33 = vpack.c.bf16 %v6604_v46, %v6604_v46  ;;  %6815 = vmatmul.mubr.bf16.gmra.mrb[116].mxu1 %v10257_v58  ;;  %v10271_v50 = vld [vmem:[%s14230_s3 + $0x8e4] ss:$8 sps:$4 sm:$0xff]  }
 0x417   : > { %6822 = vmatprep.mubr.bf16.mxu1 %v10262_v1  ;;  %v14531_v46 = vld [vmem:[#allocation13_spill] sm:$0xff] }
 0x418   : > { %8117 = vst.msk [vmem:[%s12776_s23 + $0x194] sm:$0xf] %vm8015_vm0, %v9301_v14  ;;  %8239 = vst.msk [vmem:[%s12776_s23 + $0x37c] sm:$0xf] %vm8015_vm0, %v9423_v33 }
 0x419   : > { %v6120_v11 = vpop.f32.mrb[76].mxu0  ;;  %v6608_v13 = vpop.f32.mrb[12].mxu1 }
 0x41a   : > { %v6121_v41 = vadd.f32 %v6120_v11, %v14526_v4  ;;  %v6609_v16 = vadd.f32 %v6608_v13, %v3921_v57  ;;  %v6122_v20 = vpop.f32.mrb[77].mxu0  ;;  %v6610_v51 = vpop.f32.mrb[13].mxu1 }
 0x41b   : > { %v6123_v7 = vpop.f32.mrb[78].mxu0  ;;  %v6611_v26 = vpop.f32.mrb[14].mxu1 }
 0x41c   : > { %v9302_v55 = vpack.c.bf16 %v6121_v41, %v6121_v41  ;;  %v9424_v45 = vpack.c.bf16 %v6609_v16, %v6609_v16  ;;  %v6124_v38 = vadd.f32 %v6123_v7, %v14527_v19  ;;  %v6612_v6 = vadd.f32 %v6611_v26, %v3926_v32  ;;  %v6613_v10 = vpop.f32.mrb[15].mxu1  ;;  %v6125_v42 = vpop.f32.mrb[79].mxu0  ;;  %v14532_v16 = vld [vmem:[#allocation127_spill] sm:$0xff] }
 0x41d   : > { %v3956_v11 = vpop.permute.xlu1 %3955  ;;  %v3951_v13 = vpop.permute.xlu0 %3950  ;;  %v10269_v26 = vld [vmem:[%s14230_s3 + $0x8e0] ss:$8 sps:$4 sm:$0xff]  }
 0x41e   : > { %8118 = vst.msk [vmem:[%s12776_s23 + $0x198] sm:$0xf] %vm8015_vm0, %v9302_v55  ;;  %8240 = vst.msk [vmem:[%s12776_s23 + $0x380] sm:$0xf] %vm8015_vm0, %v9424_v45  ;;  %v9303_v28 = vpack.c.bf16 %v6124_v38, %v6124_v38  ;;  %v9425_v3 = vpack.c.bf16 %v6612_v6, %v6612_v6  ;;  %6823 = vmatmul.mubr.bf16.gmra.mrb[120].mxu1 %v10260_v18  ;;  %v10274_v45 = vld [vmem:[%s14230_s3 + $0x8f4] ss:$8 sps:$4 sm:$0xff]  }
 0x41f   : > { %6830 = vmatprep.mubr.bf16.mxu1 %v10265_v31  ;;  %v14533_v6 = vld [vmem:[#allocation12_spill] sm:$0xff] }
 0x420   : > { %8119 = vst.msk [vmem:[%s12776_s23 + $0x19c] sm:$0xf] %vm8015_vm0, %v9303_v28  ;;  %8241 = vst.msk [vmem:[%s12776_s23 + $0x384] sm:$0xf] %vm8015_vm0, %v9425_v3 }
 0x421   : > { %v6128_v22 = vpop.f32.mrb[80].mxu0  ;;  %v6616_v29 = vpop.f32.mrb[16].mxu1 }
 0x422   : > { %v6129_v17 = vadd.f32 %v6128_v22, %v14528_v62  ;;  %v6617_v63 = vadd.f32 %v6616_v29, %v3931_v8  ;;  %v6130_v60 = vpop.f32.mrb[81].mxu0  ;;  %v6618_v37 = vpop.f32.mrb[17].mxu1 }
 0x423   : > { %v6131_v56 = vpop.f32.mrb[82].mxu0  ;;  %v6619_v59 = vpop.f32.mrb[18].mxu1 }
 0x424   : > { %v9304_v54 = vpack.c.bf16 %v6129_v17, %v6129_v17  ;;  %v9426_v5 = vpack.c.bf16 %v6617_v63, %v6617_v63  ;;  %v6132_v40 = vadd.f32 %v6131_v56, %v14529_v23  ;;  %v6620_v44 = vadd.f32 %v6619_v59, %v3936_v21  ;;  %v6621_v52 = vpop.f32.mrb[19].mxu1  ;;  %v6133_v48 = vpop.f32.mrb[83].mxu0  ;;  %v14534_v63 = vld [vmem:[#allocation128_spill] sm:$0xff] }
 0x425   : > { %v3966_v22 = vpop.permute.xlu1 %3965  ;;  %v3961_v29 = vpop.permute.xlu0 %3960  ;;  %v10272_v59 = vld [vmem:[%s14230_s3 + $0x8f0] ss:$8 sps:$4 sm:$0xff]  }
 0x426   : > { %8120 = vst.msk [vmem:[%s12776_s23 + $0x1a0] sm:$0xf] %vm8015_vm0, %v9304_v54  ;;  %8242 = vst.msk [vmem:[%s12776_s23 + $0x388] sm:$0xf] %vm8015_vm0, %v9426_v5  ;;  %v9305_v24 = vpack.c.bf16 %v6132_v40, %v6132_v40  ;;  %v9427_v34 = vpack.c.bf16 %v6620_v44, %v6620_v44  ;;  %6831 = vmatmul.mubr.bf16.gmra.mrb[124].mxu1 %v10263_v0  ;;  %v14535_v40 = vld [vmem:[#allocation15_spill] sm:$0xff] }
 0x427   : > { %6838 = vmatprep.mubr.bf16.mxu1 %v10268_v35 }
 0x428   : > { %8121 = vst.msk [vmem:[%s12776_s23 + $0x1a4] sm:$0xf] %vm8015_vm0, %v9305_v24  ;;  %8243 = vst.msk [vmem:[%s12776_s23 + $0x38c] sm:$0xf] %vm8015_vm0, %v9427_v34 }
 0x429   : > { %v6136_v25 = vpop.f32.mrb[84].mxu0  ;;  %v6624_v39 = vpop.f32.mrb[20].mxu1 }
 0x42a   : > { %v6137_v12 = vadd.f32 %v6136_v25, %v14530_v27  ;;  %v6625_v49 = vadd.f32 %v6624_v39, %v3941_v15  ;;  %v6138_v58 = vpop.f32.mrb[85].mxu0  ;;  %v6626_v47 = vpop.f32.mrb[21].mxu1 }
 0x42b   : > { %v6139_v1 = vpop.f32.mrb[86].mxu0  ;;  %v6627_v36 = vpop.f32.mrb[22].mxu1 }
 0x42c   : > { %v9306_v2 = vpack.c.bf16 %v6137_v12, %v6137_v12  ;;  %v9428_v43 = vpack.c.bf16 %v6625_v49, %v6625_v49  ;;  %v6140_v61 = vadd.f32 %v6139_v1, %v14531_v46  ;;  %v6628_v9 = vadd.f32 %v6627_v36, %v3946_v30  ;;  %v6629_v14 = vpop.f32.mrb[23].mxu1  ;;  %v6141_v33 = vpop.f32.mrb[87].mxu0  ;;  %v14536_v12 = vld [vmem:[#allocation129_spill] sm:$0xff] }
 0x42d   : > { %v3976_v15 = vpop.permute.xlu1 %3975  ;;  %v3971_v25 = vpop.permute.xlu0 %3970 }
 0x42e   : > { %8122 = vst.msk [vmem:[%s12776_s23 + $0x1a8] sm:$0xf] %vm8015_vm0, %v9306_v2  ;;  %8244 = vst.msk [vmem:[%s12776_s23 + $0x390] sm:$0xf] %vm8015_vm0, %v9428_v43  ;;  %v9307_v32 = vpack.c.bf16 %v6140_v61, %v6140_v61  ;;  %v9429_v57 = vpack.c.bf16 %v6628_v9, %v6628_v9  ;;  %6839 = vmatmul.mubr.bf16.gmra.mrb[128].mxu1 %v10266_v53  ;;  %v14537_v43 = vld [vmem:[#allocation14_spill] sm:$0xff] }
 0x42f   : > { %6846 = vmatprep.mubr.bf16.mxu1 %v10271_v50 }
 0x430   : > { %8123 = vst.msk [vmem:[%s12776_s23 + $0x1ac] sm:$0xf] %vm8015_vm0, %v9307_v32  ;;  %8245 = vst.msk [vmem:[%s12776_s23 + $0x394] sm:$0xf] %vm8015_vm0, %v9429_v57 }
 0x431   : > { %v6144_v4 = vpop.f32.mrb[88].mxu0  ;;  %v6632_v41 = vpop.f32.mrb[24].mxu1 }
 0x432   : > { %v6145_v20 = vadd.f32 %v6144_v4, %v14532_v16  ;;  %v6633_v51 = vadd.f32 %v6632_v41, %v3951_v13  ;;  %v6146_v18 = vpop.f32.mrb[89].mxu0  ;;  %v6634_v7 = vpop.f32.mrb[25].mxu1  ;;  %v14538_v41 = vld [vmem:[#allocation130_spill] sm:$0xff] }
 0x433   : > { %v6147_v31 = vpop.f32.mrb[90].mxu0  ;;  %v6635_v55 = vpop.f32.mrb[26].mxu1 }
 0x434   : > { %v9308_v19 = vpack.c.bf16 %v6145_v20, %v6145_v20  ;;  %v9430_v38 = vpack.c.bf16 %v6633_v51, %v6633_v51  ;;  %v6148_v10 = vadd.f32 %v6147_v31, %v14533_v6  ;;  %v6636_v42 = vadd.f32 %v6635_v55, %v3956_v11  ;;  %v6637_v28 = vpop.f32.mrb[27].mxu1  ;;  %v6149_v3 = vpop.f32.mrb[91].mxu0 }
 0x435   : > { %v3986_v57 = vpop.permute.xlu1 %3985  ;;  %v3981_v11 = vpop.permute.xlu0 %3980 }
 0x436   : > { %8124 = vst.msk [vmem:[%s12776_s23 + $0x1b0] sm:$0xf] %vm8015_vm0, %v9308_v19  ;;  %8246 = vst.msk [vmem:[%s12776_s23 + $0x398] sm:$0xf] %vm8015_vm0, %v9430_v38  ;;  %v9309_v21 = vpack.c.bf16 %v6148_v10, %v6148_v10  ;;  %v9431_v8 = vpack.c.bf16 %v6636_v42, %v6636_v42  ;;  %6847 = vmatmul.mubr.bf16.gmra.mrb[132].mxu1 %v10269_v26 }
 0x437   : > { %6854 = vmatprep.mubr.bf16.mxu1 %v10274_v45  ;;  %v14539_v45 = vld [vmem:[#allocation17_spill] sm:$0xff] }
 0x438   : > { %8125 = vst.msk [vmem:[%s12776_s23 + $0x1b4] sm:$0xf] %vm8015_vm0, %v9309_v21  ;;  %8247 = vst.msk [vmem:[%s12776_s23 + $0x39c] sm:$0xf] %vm8015_vm0, %v9431_v8 }
 0x439   : > { %v6152_v62 = vpop.f32.mrb[92].mxu0  ;;  %v6640_v17 = vpop.f32.mrb[28].mxu1 }
 0x43a   : > { %v6153_v60 = vadd.f32 %v6152_v62, %v14534_v63  ;;  %v6641_v37 = vadd.f32 %v6640_v17, %v3961_v29  ;;  %v6154_v0 = vpop.f32.mrb[93].mxu0  ;;  %v6642_v56 = vpop.f32.mrb[29].mxu1  ;;  %v14540_v29 = vld [vmem:[#allocation131_spill] sm:$0xff] }
 0x43b   : > { %v6155_v35 = vpop.f32.mrb[94].mxu0  ;;  %v6643_v54 = vpop.f32.mrb[30].mxu1 }
 0x43c   : > { %v9310_v5 = vpack.c.bf16 %v6153_v60, %v6153_v60  ;;  %v9432_v23 = vpack.c.bf16 %v6641_v37, %v6641_v37  ;;  %v6156_v44 = vadd.f32 %v6155_v35, %v14535_v40  ;;  %v6644_v52 = vadd.f32 %v6643_v54, %v3966_v22  ;;  %v6645_v48 = vpop.f32.mrb[31].mxu1  ;;  %v6157_v24 = vpop.f32.mrb[95].mxu0  ;;  %v14541_v35 = vld [vmem:[#allocation16_spill] sm:$0xff] }
 0x43d   : > { %v3996_v3 = vpop.permute.xlu1 %3995  ;;  %v3991_v21 = vpop.permute.xlu0 %3990 }
 0x43e   : > { %8126 = vst.msk [vmem:[%s12776_s23 + $0x1b8] sm:$0xf] %vm8015_vm0, %v9310_v5  ;;  %8248 = vst.msk [vmem:[%s12776_s23 + $0x3a0] sm:$0xf] %vm8015_vm0, %v9432_v23  ;;  %v9311_v34 = vpack.c.bf16 %v6156_v44, %v6156_v44  ;;  %v9433_v30 = vpack.c.bf16 %v6644_v52, %v6644_v52  ;;  %6855 = vmatmul.mubr.bf16.gmra.mrb[136].mxu1 %v10272_v59 }
 0x440   : > { %8127 = vst.msk [vmem:[%s12776_s23 + $0x1bc] sm:$0xf] %vm8015_vm0, %v9311_v34  ;;  %8249 = vst.msk [vmem:[%s12776_s23 + $0x3a4] sm:$0xf] %vm8015_vm0, %v9433_v30 }
 0x441   : > { %v6160_v39 = vpop.f32.mrb[96].mxu0  ;;  %v6648_v27 = vpop.f32.mrb[32].mxu1 }
 0x442   : > { %v6161_v49 = vadd.f32 %v6160_v39, %v14536_v12  ;;  %v6649_v58 = vadd.f32 %v6648_v27, %v3971_v25  ;;  %v6162_v47 = vpop.f32.mrb[97].mxu0  ;;  %v6650_v53 = vpop.f32.mrb[33].mxu1 }
 0x443   : > { %v6163_v1 = vpop.f32.mrb[98].mxu0  ;;  %v6651_v36 = vpop.f32.mrb[34].mxu1 }
 0x444   : > { %v9312_v50 = vpack.c.bf16 %v6161_v49, %v6161_v49  ;;  %v9434_v2 = vpack.c.bf16 %v6649_v58, %v6649_v58  ;;  %v6164_v46 = vadd.f32 %v6163_v1, %v14537_v43  ;;  %v6652_v61 = vadd.f32 %v6651_v36, %v3976_v15  ;;  %v6653_v9 = vpop.f32.mrb[35].mxu1  ;;  %v6165_v14 = vpop.f32.mrb[99].mxu0  ;;  %v14542_v15 = vld [vmem:[#allocation132_spill] sm:$0xff]  ;;  %v14543_v1 = vld [vmem:[#allocation19_spill] sm:$0xff] }
 0x445   : > { %v4006_v48 = vpop.permute.xlu1 %4005  ;;  %v4001_v24 = vpop.permute.xlu0 %4000 }
 0x446   : > { %8128 = vst.msk [vmem:[%s12776_s23 + $0x1c0] sm:$0xf] %vm8015_vm0, %v9312_v50  ;;  %8250 = vst.msk [vmem:[%s12776_s23 + $0x3a8] sm:$0xf] %vm8015_vm0, %v9434_v2  ;;  %v9313_v33 = vpack.c.bf16 %v6164_v46, %v6164_v46  ;;  %v9435_v32 = vpack.c.bf16 %v6652_v61, %v6652_v61 }
 0x448   : > { %8129 = vst.msk [vmem:[%s12776_s23 + $0x1c4] sm:$0xf] %vm8015_vm0, %v9313_v33  ;;  %8251 = vst.msk [vmem:[%s12776_s23 + $0x3ac] sm:$0xf] %vm8015_vm0, %v9435_v32 }
 0x449   : > { %v6168_v13 = vpop.f32.mrb[100].mxu0  ;;  %v6656_v4 = vpop.f32.mrb[36].mxu1 }
 0x44a   : > { %v6169_v16 = vadd.f32 %v6168_v13, %v14538_v41  ;;  %v6657_v20 = vadd.f32 %v6656_v4, %v3981_v11  ;;  %v6170_v51 = vpop.f32.mrb[101].mxu0  ;;  %v6658_v18 = vpop.f32.mrb[37].mxu1 }
 0x44b   : > { %v6171_v7 = vpop.f32.mrb[102].mxu0  ;;  %v6659_v26 = vpop.f32.mrb[38].mxu1 }
 0x44c   : > { %v9314_v31 = vpack.c.bf16 %v6169_v16, %v6169_v16  ;;  %v9436_v55 = vpack.c.bf16 %v6657_v20, %v6657_v20  ;;  %v6172_v19 = vadd.f32 %v6171_v7, %v14539_v45  ;;  %v6660_v38 = vadd.f32 %v6659_v26, %v3986_v57  ;;  %v6661_v6 = vpop.f32.mrb[39].mxu1  ;;  %v6173_v10 = vpop.f32.mrb[103].mxu0  ;;  %v14544_v57 = vld [vmem:[#allocation133_spill] sm:$0xff]  ;;  %v14545_v7 = vld [vmem:[#allocation18_spill] sm:$0xff] }
 0x44d   : > { %v4016_v9 = vpop.permute.xlu1 %4015  ;;  %v4011_v14 = vpop.permute.xlu0 %4010 }
 0x44e   : > { %8130 = vst.msk [vmem:[%s12776_s23 + $0x1c8] sm:$0xf] %vm8015_vm0, %v9314_v31  ;;  %8252 = vst.msk [vmem:[%s12776_s23 + $0x3b0] sm:$0xf] %vm8015_vm0, %v9436_v55  ;;  %v9315_v42 = vpack.c.bf16 %v6172_v19, %v6172_v19  ;;  %v9437_v28 = vpack.c.bf16 %v6660_v38, %v6660_v38 }
 0x450   : > { %8131 = vst.msk [vmem:[%s12776_s23 + $0x1cc] sm:$0xf] %vm8015_vm0, %v9315_v42  ;;  %8253 = vst.msk [vmem:[%s12776_s23 + $0x3b4] sm:$0xf] %vm8015_vm0, %v9437_v28 }
 0x451   : > { %v6176_v8 = vpop.f32.mrb[104].mxu0  ;;  %v6664_v22 = vpop.f32.mrb[40].mxu1 }
 0x452   : > { %v6177_v62 = vadd.f32 %v6176_v8, %v14540_v29  ;;  %v6665_v17 = vadd.f32 %v6664_v22, %v3991_v21  ;;  %v6178_v63 = vpop.f32.mrb[105].mxu0  ;;  %v6666_v60 = vpop.f32.mrb[41].mxu1 }
 0x453   : > { %v6179_v37 = vpop.f32.mrb[106].mxu0  ;;  %v6667_v0 = vpop.f32.mrb[42].mxu1 }
 0x454   : > { %v9316_v56 = vpack.c.bf16 %v6177_v62, %v6177_v62  ;;  %v9438_v59 = vpack.c.bf16 %v6665_v17, %v6665_v17  ;;  %v6180_v54 = vadd.f32 %v6179_v37, %v14541_v35  ;;  %v6668_v5 = vadd.f32 %v6667_v0, %v3996_v3  ;;  %v6669_v23 = vpop.f32.mrb[43].mxu1  ;;  %v6181_v40 = vpop.f32.mrb[107].mxu0 }
 0x455   : > { %v4021_v6 = vpop.permute.xlu0 %4020  ;;  %v4026_v3 = vpop.permute.xlu1 %4025 }
 0x456   : > { %8132 = vst.msk [vmem:[%s12776_s23 + $0x1d0] sm:$0xf] %vm8015_vm0, %v9316_v56  ;;  %8254 = vst.msk [vmem:[%s12776_s23 + $0x3b8] sm:$0xf] %vm8015_vm0, %v9438_v59  ;;  %v9317_v44 = vpack.c.bf16 %v6180_v54, %v6180_v54  ;;  %v9439_v52 = vpack.c.bf16 %v6668_v5, %v6668_v5 }
 0x458   : > { %8133 = vst.msk [vmem:[%s12776_s23 + $0x1d4] sm:$0xf] %vm8015_vm0, %v9317_v44  ;;  %8255 = vst.msk [vmem:[%s12776_s23 + $0x3bc] sm:$0xf] %vm8015_vm0, %v9439_v52 }
 0x459   : > { %v6184_v34 = vpop.f32.mrb[108].mxu0  ;;  %v6672_v30 = vpop.f32.mrb[44].mxu1 }
 0x45a   : > { %v6185_v25 = vadd.f32 %v6184_v34, %v14542_v15  ;;  %v6673_v39 = vadd.f32 %v6672_v30, %v4001_v24  ;;  %v6186_v27 = vpop.f32.mrb[109].mxu0  ;;  %v6674_v12 = vpop.f32.mrb[45].mxu1 }
 0x45b   : > { %v6187_v49 = vpop.f32.mrb[110].mxu0  ;;  %v6675_v58 = vpop.f32.mrb[46].mxu1 }
 0x45c   : > { %v9318_v47 = vpack.c.bf16 %v6185_v25, %v6185_v25  ;;  %v9440_v53 = vpack.c.bf16 %v6673_v39, %v6673_v39  ;;  %v6188_v36 = vadd.f32 %v6187_v49, %v14543_v1  ;;  %v6676_v50 = vadd.f32 %v6675_v58, %v4006_v48  ;;  %v6677_v2 = vpop.f32.mrb[47].mxu1  ;;  %v6189_v43 = vpop.f32.mrb[111].mxu0 }
 0x45d   : > { %v4031_v17 = vpop.permute.xlu0 %4030  ;;  %v4036_v0 = vpop.permute.xlu1 %4035 }
 0x45e   : > { %8134 = vst.msk [vmem:[%s12776_s23 + $0x1d8] sm:$0xf] %vm8015_vm0, %v9318_v47  ;;  %8256 = vst.msk [vmem:[%s12776_s23 + $0x3c0] sm:$0xf] %vm8015_vm0, %v9440_v53  ;;  %v9319_v46 = vpack.c.bf16 %v6188_v36, %v6188_v36  ;;  %v9441_v61 = vpack.c.bf16 %v6676_v50, %v6676_v50 }
 0x460   : > { %8135 = vst.msk [vmem:[%s12776_s23 + $0x1dc] sm:$0xf] %vm8015_vm0, %v9319_v46  ;;  %8257 = vst.msk [vmem:[%s12776_s23 + $0x3c4] sm:$0xf] %vm8015_vm0, %v9441_v61 }
 0x461   : > { %v6192_v33 = vpop.f32.mrb[112].mxu0  ;;  %v6680_v32 = vpop.f32.mrb[48].mxu1 }
 0x462   : > { %v6193_v11 = vadd.f32 %v6192_v33, %v14544_v57  ;;  %v6681_v13 = vadd.f32 %v6680_v32, %v4011_v14  ;;  %v6194_v4 = vpop.f32.mrb[113].mxu0  ;;  %v6682_v41 = vpop.f32.mrb[49].mxu1 }
 0x463   : > { %v6195_v16 = vpop.f32.mrb[114].mxu0  ;;  %v6683_v20 = vpop.f32.mrb[50].mxu1 }
 0x464   : > { %v9320_v51 = vpack.c.bf16 %v6193_v11, %v6193_v11  ;;  %v9442_v18 = vpack.c.bf16 %v6681_v13, %v6681_v13  ;;  %v6196_v26 = vadd.f32 %v6195_v16, %v14545_v7  ;;  %v6684_v31 = vadd.f32 %v6683_v20, %v4016_v9  ;;  %v6685_v55 = vpop.f32.mrb[51].mxu1  ;;  %v6197_v45 = vpop.f32.mrb[115].mxu0 }
 0x465   : > { %v4041_v23 = vpop.permute.xlu0 %4040  ;;  %v4046_v48 = vpop.permute.xlu1 %4045 }
 0x466   : > { %8136 = vst.msk [vmem:[%s12776_s23 + $0x1e0] sm:$0xf] %vm8015_vm0, %v9320_v51  ;;  %8258 = vst.msk [vmem:[%s12776_s23 + $0x3c8] sm:$0xf] %vm8015_vm0, %v9442_v18  ;;  %v9321_v19 = vpack.c.bf16 %v6196_v26, %v6196_v26  ;;  %v9443_v38 = vpack.c.bf16 %v6684_v31, %v6684_v31 }
 0x468   : > { %8137 = vst.msk [vmem:[%s12776_s23 + $0x1e4] sm:$0xf] %vm8015_vm0, %v9321_v19  ;;  %8259 = vst.msk [vmem:[%s12776_s23 + $0x3cc] sm:$0xf] %vm8015_vm0, %v9443_v38 }
 0x469   : > { %v6688_v10 = vpop.f32.mrb[52].mxu1  ;;  %v4051_v39 = vpop.permute.xlu0 %4050 }
 0x46a   : > { %v6689_v42 = vadd.f32 %v6688_v10, %v4021_v6  ;;  %v6690_v28 = vpop.f32.mrb[53].mxu1  ;;  %v4056_v12 = vpop.permute.xlu1 %4055 }
 0x46b   : > { %v6691_v21 = vpop.f32.mrb[54].mxu1 }
 0x46c   : > { %v9444_v8 = vpack.c.bf16 %v6689_v42, %v6689_v42  ;;  %v6692_v22 = vadd.f32 %v6691_v21, %v4026_v3  ;;  %v6693_v29 = vpop.f32.mrb[55].mxu1 }
 0x46d   : > { %v4061_v43 = vpop.permute.xlu0 %4060 }
 0x46e   : > { %8260 = vst.msk [vmem:[%s12776_s23 + $0x3d0] sm:$0xf] %vm8015_vm0, %v9444_v8  ;;  %v9445_v62 = vpack.c.bf16 %v6692_v22, %v6692_v22  ;;  %v4066_v2 = vpop.permute.xlu1 %4065 }
 0x470   : > { %8261 = vst.msk [vmem:[%s12776_s23 + $0x3d4] sm:$0xf] %vm8015_vm0, %v9445_v62 }
 0x471   : > { %v6696_v63 = vpop.f32.mrb[56].mxu1  ;;  %v4071_v4 = vpop.permute.xlu0 %4070 }
 0x472   : > { %v6697_v60 = vadd.f32 %v6696_v63, %v4031_v17  ;;  %v6698_v37 = vpop.f32.mrb[57].mxu1  ;;  %v4076_v13 = vpop.permute.xlu1 %4075 }
 0x473   : > { %v6699_v56 = vpop.f32.mrb[58].mxu1 }
 0x474   : > { %v9446_v59 = vpack.c.bf16 %v6697_v60, %v6697_v60  ;;  %v6700_v35 = vadd.f32 %v6699_v56, %v4036_v0  ;;  %v6701_v54 = vpop.f32.mrb[59].mxu1 }
 0x475   : > { %v4081_v42 = vpop.permute.xlu0 %4080 }
 0x476   : > { %8262 = vst.msk [vmem:[%s12776_s23 + $0x3d8] sm:$0xf] %vm8015_vm0, %v9446_v59  ;;  %v9447_v5 = vpack.c.bf16 %v6700_v35, %v6700_v35  ;;  %v4086_v8 = vpop.permute.xlu1 %4085 }
 0x478   : > { %8263 = vst.msk [vmem:[%s12776_s23 + $0x3dc] sm:$0xf] %vm8015_vm0, %v9447_v5 }
 0x479   : > { %v6704_v40 = vpop.f32.mrb[60].mxu1  ;;  %v4091_v60 = vpop.permute.xlu0 %4090 }
 0x47a   : > { %v6705_v44 = vadd.f32 %v6704_v40, %v4041_v23  ;;  %v6706_v52 = vpop.f32.mrb[61].mxu1  ;;  %v4096_v59 = vpop.permute.xlu1 %4095 }
 0x47b   : > { %v6707_v24 = vpop.f32.mrb[62].mxu1 }
 0x47c   : > { %v9448_v34 = vpack.c.bf16 %v6705_v44, %v6705_v44  ;;  %v6708_v30 = vadd.f32 %v6707_v24, %v4046_v48  ;;  %v6709_v15 = vpop.f32.mrb[63].mxu1  ;;  %v9544_v41 = vpop.f32.mrb[116].mxu0 }
 0x47d   : > { %v9545_v20 = vpop.f32.mrb[117].mxu0  ;;  %v4101_v44 = vpop.permute.xlu0 %4100 }
 0x47e   : > { %8264 = vst.msk [vmem:[%s12776_s23 + $0x3e0] sm:$0xf] %vm8015_vm0, %v9448_v34  ;;  %v9449_v25 = vpack.c.bf16 %v6708_v30, %v6708_v30  ;;  %v9547_v7 = vpop.f32.mrb[118].mxu0  ;;  %v9546_v38 = vadd.f32 %v9545_v20, %v9544_v41  ;;  %v4106_v34 = vpop.permute.xlu1 %4105 }
 0x47f   : > { %v9548_v31 = vpop.f32.mrb[119].mxu0 }
 0x480   : > { %8265 = vst.msk [vmem:[%s12776_s23 + $0x3e4] sm:$0xf] %vm8015_vm0, %v9449_v25  ;;  %v9549_v6 = vadd.f32 %v9548_v31, %v9547_v7 }
 0x481   : > { %v6712_v27 = vpop.f32.mrb[64].mxu1  ;;  %8358 = vst.msk [vmem:[%s330_s17] sm:$0xff] %vm8357_vm1, %v9546_v38 }
 0x482   : > { %v6713_v49 = vadd.f32 %v6712_v27, %v4051_v39  ;;  %v6714_v58 = vpop.f32.mrb[65].mxu1  ;;  %8359 = vst.msk [vmem:[%s330_s17 + $0x8] sm:$0xff] %vm8357_vm1, %v9549_v6 }
 0x483   : > { %v6715_v47 = vpop.f32.mrb[66].mxu1 }
 0x484   : > { %v9450_v53 = vpack.c.bf16 %v6713_v49, %v6713_v49  ;;  %v6716_v1 = vadd.f32 %v6715_v47, %v4056_v12  ;;  %v6717_v36 = vpop.f32.mrb[67].mxu1  ;;  %v4111_v12 = vpop.permute.xlu0 %4110 }
 0x486   : > { %8266 = vst.msk [vmem:[%s12776_s23 + $0x3e8] sm:$0xf] %vm8015_vm0, %v9450_v53  ;;  %v9451_v50 = vpack.c.bf16 %v6716_v1, %v6716_v1  ;;  %v4116_v53 = vpop.permute.xlu1 %4115 }
 0x488   : > { %8267 = vst.msk [vmem:[%s12776_s23 + $0x3ec] sm:$0xf] %vm8015_vm0, %v9451_v50 }
 0x489   : > { %v6720_v46 = vpop.f32.mrb[68].mxu1 }
 0x48a   : > { %v6721_v61 = vadd.f32 %v6720_v46, %v4061_v43  ;;  %v6722_v9 = vpop.f32.mrb[69].mxu1  ;;  %v4121_v46 = vpop.permute.xlu0 %4120 }
 0x48b   : > { %v6723_v14 = vpop.f32.mrb[70].mxu1 }
 0x48c   : > { %v9452_v33 = vpack.c.bf16 %v6721_v61, %v6721_v61  ;;  %v6724_v32 = vadd.f32 %v6723_v14, %v4066_v2  ;;  %v6725_v57 = vpop.f32.mrb[71].mxu1 }
 0x48e   : > { %8268 = vst.msk [vmem:[%s12776_s23 + $0x3f0] sm:$0xf] %vm8015_vm0, %v9452_v33  ;;  %v9453_v11 = vpack.c.bf16 %v6724_v32, %v6724_v32  ;;  %v4126_v33 = vpop.permute.xlu1 %4125  ;;  %v4131_v41 = vpop.permute.xlu0 %4130 }
 0x490   : > { %8269 = vst.msk [vmem:[%s12776_s23 + $0x3f4] sm:$0xf] %vm8015_vm0, %v9453_v11 }
 0x491   : > { %v6728_v16 = vpop.f32.mrb[72].mxu1 }
 0x492   : > { %v6729_v51 = vadd.f32 %v6728_v16, %v4071_v4  ;;  %v6730_v18 = vpop.f32.mrb[73].mxu1 }
 0x493   : > { %v6731_v26 = vpop.f32.mrb[74].mxu1  ;;  %v4136_v18 = vpop.permute.xlu1 %4135 }
 0x494   : > { %v9454_v55 = vpack.c.bf16 %v6729_v51, %v6729_v51  ;;  %v6732_v45 = vadd.f32 %v6731_v26, %v4076_v13  ;;  %v6733_v19 = vpop.f32.mrb[75].mxu1 }
 0x495   : > { %v4141_v19 = vpop.permute.xlu0 %4140 }
 0x496   : > { %8270 = vst.msk [vmem:[%s12776_s23 + $0x3f8] sm:$0xf] %vm8015_vm0, %v9454_v55  ;;  %v9455_v10 = vpack.c.bf16 %v6732_v45, %v6732_v45 }
 0x498   : > { %8271 = vst.msk [vmem:[%s12776_s23 + $0x3fc] sm:$0xf] %vm8015_vm0, %v9455_v10 }
 0x499   : > { %v6736_v28 = vpop.f32.mrb[76].mxu1 }
 0x49a   : > { %v6737_v3 = vadd.f32 %v6736_v28, %v4081_v42  ;;  %v6738_v21 = vpop.f32.mrb[77].mxu1  ;;  %v4146_v42 = vpop.permute.xlu1 %4145 }
 0x49b   : > { %v6739_v22 = vpop.f32.mrb[78].mxu1 }
 0x49c   : > { %v9456_v29 = vpack.c.bf16 %v6737_v3, %v6737_v3  ;;  %v6740_v62 = vadd.f32 %v6739_v22, %v4086_v8  ;;  %v6741_v17 = vpop.f32.mrb[79].mxu1 }
 0x49e   : > { %8272 = vst.msk [vmem:[%s12776_s23 + $0x400] sm:$0xf] %vm8015_vm0, %v9456_v29  ;;  %v9457_v63 = vpack.c.bf16 %v6740_v62, %v6740_v62  ;;  %v4151_v29 = vpop.permute.xlu0 %4150 }
 0x4a0   : > { %8273 = vst.msk [vmem:[%s12776_s23 + $0x404] sm:$0xf] %vm8015_vm0, %v9457_v63 }
 0x4a1   : > { %v6744_v37 = vpop.f32.mrb[80].mxu1 }
 0x4a2   : > { %v6745_v0 = vadd.f32 %v6744_v37, %v4091_v60  ;;  %v6746_v56 = vpop.f32.mrb[81].mxu1  ;;  %v4156_v60 = vpop.permute.xlu1 %4155 }
 0x4a3   : > { %v6747_v35 = vpop.f32.mrb[82].mxu1 }
 0x4a4   : > { %v9458_v54 = vpack.c.bf16 %v6745_v0, %v6745_v0  ;;  %v6748_v5 = vadd.f32 %v6747_v35, %v4096_v59  ;;  %v6749_v23 = vpop.f32.mrb[83].mxu1 }
 0x4a6   : > { %8274 = vst.msk [vmem:[%s12776_s23 + $0x408] sm:$0xf] %vm8015_vm0, %v9458_v54  ;;  %v9459_v40 = vpack.c.bf16 %v6748_v5, %v6748_v5  ;;  %v4161_v54 = vpop.permute.xlu0 %4160 }
 0x4a8   : > { %8275 = vst.msk [vmem:[%s12776_s23 + $0x40c] sm:$0xf] %vm8015_vm0, %v9459_v40 }
 0x4a9   : > { %v6752_v52 = vpop.f32.mrb[84].mxu1 }
 0x4aa   : > { %v6753_v48 = vadd.f32 %v6752_v52, %v4101_v44  ;;  %v6754_v24 = vpop.f32.mrb[85].mxu1  ;;  %v4166_v44 = vpop.permute.xlu1 %4165 }
 0x4ab   : > { %v6755_v30 = vpop.f32.mrb[86].mxu1 }
 0x4ac   : > { %v9460_v15 = vpack.c.bf16 %v6753_v48, %v6753_v48  ;;  %v6756_v25 = vadd.f32 %v6755_v30, %v4106_v34  ;;  %v6757_v39 = vpop.f32.mrb[87].mxu1 }
 0x4ae   : > { %8276 = vst.msk [vmem:[%s12776_s23 + $0x410] sm:$0xf] %vm8015_vm0, %v9460_v15  ;;  %v9461_v27 = vpack.c.bf16 %v6756_v25, %v6756_v25  ;;  %v4171_v15 = vpop.permute.xlu0 %4170 }
 0x4b0   : > { %8277 = vst.msk [vmem:[%s12776_s23 + $0x414] sm:$0xf] %vm8015_vm0, %v9461_v27 }
 0x4b1   : > { %v6760_v49 = vpop.f32.mrb[88].mxu1 }
 0x4b2   : > { %v6761_v58 = vadd.f32 %v6760_v49, %v4111_v12  ;;  %v6762_v47 = vpop.f32.mrb[89].mxu1  ;;  %v4176_v12 = vpop.permute.xlu1 %4175 }
 0x4b3   : > { %v6763_v1 = vpop.f32.mrb[90].mxu1 }
 0x4b4   : > { %v9462_v36 = vpack.c.bf16 %v6761_v58, %v6761_v58  ;;  %v6764_v50 = vadd.f32 %v6763_v1, %v4116_v53  ;;  %v6765_v2 = vpop.f32.mrb[91].mxu1 }
 0x4b6   : > { %8278 = vst.msk [vmem:[%s12776_s23 + $0x418] sm:$0xf] %vm8015_vm0, %v9462_v36  ;;  %v9463_v43 = vpack.c.bf16 %v6764_v50, %v6764_v50  ;;  %v4181_v36 = vpop.permute.xlu0 %4180 }
 0x4b8   : > { %8279 = vst.msk [vmem:[%s12776_s23 + $0x41c] sm:$0xf] %vm8015_vm0, %v9463_v43 }
 0x4b9   : > { %v6768_v61 = vpop.f32.mrb[92].mxu1 }
 0x4ba   : > { %v6769_v9 = vadd.f32 %v6768_v61, %v4121_v46  ;;  %v6770_v14 = vpop.f32.mrb[93].mxu1  ;;  %v4186_v46 = vpop.permute.xlu1 %4185 }
 0x4bb   : > { %v6771_v32 = vpop.f32.mrb[94].mxu1 }
 0x4bc   : > { %v9464_v57 = vpack.c.bf16 %v6769_v9, %v6769_v9  ;;  %v6772_v11 = vadd.f32 %v6771_v32, %v4126_v33  ;;  %v6773_v13 = vpop.f32.mrb[95].mxu1 }
 0x4be   : > { %8280 = vst.msk [vmem:[%s12776_s23 + $0x420] sm:$0xf] %vm8015_vm0, %v9464_v57  ;;  %v9465_v4 = vpack.c.bf16 %v6772_v11, %v6772_v11  ;;  %v4191_v57 = vpop.permute.xlu0 %4190 }
 0x4c0   : > { %8281 = vst.msk [vmem:[%s12776_s23 + $0x424] sm:$0xf] %vm8015_vm0, %v9465_v4 }
 0x4c1   : > { %v6776_v16 = vpop.f32.mrb[96].mxu1 }
 0x4c2   : > { %v6777_v20 = vadd.f32 %v6776_v16, %v4131_v41  ;;  %v6778_v51 = vpop.f32.mrb[97].mxu1  ;;  %v4196_v41 = vpop.permute.xlu1 %4195 }
 0x4c3   : > { %v6779_v7 = vpop.f32.mrb[98].mxu1 }
 0x4c4   : > { %v9466_v26 = vpack.c.bf16 %v6777_v20, %v6777_v20  ;;  %v6780_v31 = vadd.f32 %v6779_v7, %v4136_v18  ;;  %v6781_v55 = vpop.f32.mrb[99].mxu1 }
 0x4c6   : > { %8282 = vst.msk [vmem:[%s12776_s23 + $0x428] sm:$0xf] %vm8015_vm0, %v9466_v26  ;;  %v9467_v45 = vpack.c.bf16 %v6780_v31, %v6780_v31  ;;  %v4201_v26 = vpop.permute.xlu0 %4200 }
 0x4c8   : > { %8283 = vst.msk [vmem:[%s12776_s23 + $0x42c] sm:$0xf] %vm8015_vm0, %v9467_v45 }
 0x4c9   : > { %v6784_v38 = vpop.f32.mrb[100].mxu1 }
 0x4ca   : > { %v6785_v6 = vadd.f32 %v6784_v38, %v4141_v19  ;;  %v6786_v10 = vpop.f32.mrb[101].mxu1  ;;  %v4206_v19 = vpop.permute.xlu1 %4205 }
 0x4cb   : > { %v6787_v28 = vpop.f32.mrb[102].mxu1 }
 0x4cc   : > { %v9468_v3 = vpack.c.bf16 %v6785_v6, %v6785_v6  ;;  %v6788_v21 = vadd.f32 %v6787_v28, %v4146_v42  ;;  %v6789_v8 = vpop.f32.mrb[103].mxu1 }
 0x4ce   : > { %8284 = vst.msk [vmem:[%s12776_s23 + $0x430] sm:$0xf] %vm8015_vm0, %v9468_v3  ;;  %v9469_v22 = vpack.c.bf16 %v6788_v21, %v6788_v21  ;;  %v4211_v3 = vpop.permute.xlu0 %4210 }
 0x4d0   : > { %8285 = vst.msk [vmem:[%s12776_s23 + $0x434] sm:$0xf] %vm8015_vm0, %v9469_v22 }
 0x4d1   : > { %v6792_v62 = vpop.f32.mrb[104].mxu1 }
 0x4d2   : > { %v6793_v17 = vadd.f32 %v6792_v62, %v4151_v29  ;;  %v6794_v63 = vpop.f32.mrb[105].mxu1  ;;  %v4216_v29 = vpop.permute.xlu1 %4215 }
 0x4d3   : > { %v6795_v37 = vpop.f32.mrb[106].mxu1 }
 0x4d4   : > { %v9470_v0 = vpack.c.bf16 %v6793_v17, %v6793_v17  ;;  %v6796_v56 = vadd.f32 %v6795_v37, %v4156_v60  ;;  %v6797_v59 = vpop.f32.mrb[107].mxu1 }
 0x4d6   : > { %8286 = vst.msk [vmem:[%s12776_s23 + $0x438] sm:$0xf] %vm8015_vm0, %v9470_v0  ;;  %v9471_v35 = vpack.c.bf16 %v6796_v56, %v6796_v56  ;;  %v4221_v0 = vpop.permute.xlu0 %4220 }
 0x4d8   : > { %8287 = vst.msk [vmem:[%s12776_s23 + $0x43c] sm:$0xf] %vm8015_vm0, %v9471_v35 }
 0x4d9   : > { %v6800_v5 = vpop.f32.mrb[108].mxu1 }
 0x4da   : > { %v6801_v23 = vadd.f32 %v6800_v5, %v4161_v54  ;;  %v6802_v40 = vpop.f32.mrb[109].mxu1  ;;  %v4226_v54 = vpop.permute.xlu1 %4225 }
 0x4db   : > { %v6803_v52 = vpop.f32.mrb[110].mxu1 }
 0x4dc   : > { %v9472_v48 = vpack.c.bf16 %v6801_v23, %v6801_v23  ;;  %v6804_v24 = vadd.f32 %v6803_v52, %v4166_v44  ;;  %v6805_v34 = vpop.f32.mrb[111].mxu1 }
 0x4de   : > { %8288 = vst.msk [vmem:[%s12776_s23 + $0x440] sm:$0xf] %vm8015_vm0, %v9472_v48  ;;  %v9473_v30 = vpack.c.bf16 %v6804_v24, %v6804_v24  ;;  %v4231_v48 = vpop.permute.xlu0 %4230 }
 0x4e0   : > { %8289 = vst.msk [vmem:[%s12776_s23 + $0x444] sm:$0xf] %vm8015_vm0, %v9473_v30 }
 0x4e1   : > { %v6808_v25 = vpop.f32.mrb[112].mxu1 }
 0x4e2   : > { %v6809_v39 = vadd.f32 %v6808_v25, %v4171_v15  ;;  %v6810_v27 = vpop.f32.mrb[113].mxu1  ;;  %v4236_v15 = vpop.permute.xlu1 %4235 }
 0x4e3   : > { %v6811_v49 = vpop.f32.mrb[114].mxu1 }
 0x4e4   : > { %v9474_v58 = vpack.c.bf16 %v6809_v39, %v6809_v39  ;;  %v6812_v47 = vadd.f32 %v6811_v49, %v4176_v12  ;;  %v6813_v53 = vpop.f32.mrb[115].mxu1 }
 0x4e6   : > { %8290 = vst.msk [vmem:[%s12776_s23 + $0x448] sm:$0xf] %vm8015_vm0, %v9474_v58  ;;  %v9475_v1 = vpack.c.bf16 %v6812_v47, %v6812_v47 }
 0x4e8   : > { %8291 = vst.msk [vmem:[%s12776_s23 + $0x44c] sm:$0xf] %vm8015_vm0, %v9475_v1 }
 0x4e9   : > { %v6816_v50 = vpop.f32.mrb[116].mxu1 }
 0x4ea   : > { %v6817_v2 = vadd.f32 %v6816_v50, %v4181_v36  ;;  %v6818_v43 = vpop.f32.mrb[117].mxu1 }
 0x4eb   : > { %v6819_v61 = vpop.f32.mrb[118].mxu1 }
 0x4ec   : > { %v9476_v9 = vpack.c.bf16 %v6817_v2, %v6817_v2  ;;  %v6820_v14 = vadd.f32 %v6819_v61, %v4186_v46  ;;  %v6821_v33 = vpop.f32.mrb[119].mxu1 }
 0x4ee   : > { %8292 = vst.msk [vmem:[%s12776_s23 + $0x450] sm:$0xf] %vm8015_vm0, %v9476_v9  ;;  %v9477_v32 = vpack.c.bf16 %v6820_v14, %v6820_v14 }
 0x4f0   : > { %8293 = vst.msk [vmem:[%s12776_s23 + $0x454] sm:$0xf] %vm8015_vm0, %v9477_v32 }
 0x4f1   : > { %v6824_v11 = vpop.f32.mrb[120].mxu1 }
 0x4f2   : > { %v6825_v13 = vadd.f32 %v6824_v11, %v4191_v57  ;;  %v6826_v4 = vpop.f32.mrb[121].mxu1 }
 0x4f3   : > { %v6827_v16 = vpop.f32.mrb[122].mxu1 }
 0x4f4   : > { %v9478_v20 = vpack.c.bf16 %v6825_v13, %v6825_v13  ;;  %v6828_v51 = vadd.f32 %v6827_v16, %v4196_v41  ;;  %v6829_v18 = vpop.f32.mrb[123].mxu1 }
 0x4f6   : > { %8294 = vst.msk [vmem:[%s12776_s23 + $0x458] sm:$0xf] %vm8015_vm0, %v9478_v20  ;;  %v9479_v7 = vpack.c.bf16 %v6828_v51, %v6828_v51 }
 0x4f8   : > { %8295 = vst.msk [vmem:[%s12776_s23 + $0x45c] sm:$0xf] %vm8015_vm0, %v9479_v7 }
 0x4f9   : > { %v6832_v31 = vpop.f32.mrb[124].mxu1 }
 0x4fa   : > { %v6833_v55 = vadd.f32 %v6832_v31, %v4201_v26  ;;  %v6834_v45 = vpop.f32.mrb[125].mxu1 }
 0x4fb   : > { %v6835_v38 = vpop.f32.mrb[126].mxu1 }
 0x4fc   : > { %v9480_v6 = vpack.c.bf16 %v6833_v55, %v6833_v55  ;;  %v6836_v10 = vadd.f32 %v6835_v38, %v4206_v19  ;;  %v6837_v42 = vpop.f32.mrb[127].mxu1 }
 0x4fe   : > { %8296 = vst.msk [vmem:[%s12776_s23 + $0x460] sm:$0xf] %vm8015_vm0, %v9480_v6  ;;  %v9481_v28 = vpack.c.bf16 %v6836_v10, %v6836_v10 }
 0x500   : > { %8297 = vst.msk [vmem:[%s12776_s23 + $0x464] sm:$0xf] %vm8015_vm0, %v9481_v28 }
 0x501   : > { %v6840_v21 = vpop.f32.mrb[128].mxu1 }
 0x502   : > { %v6841_v8 = vadd.f32 %v6840_v21, %v4211_v3  ;;  %v6842_v22 = vpop.f32.mrb[129].mxu1 }
 0x503   : > { %v6843_v62 = vpop.f32.mrb[130].mxu1 }
 0x504   : > { %v9482_v17 = vpack.c.bf16 %v6841_v8, %v6841_v8  ;;  %v6844_v63 = vadd.f32 %v6843_v62, %v4216_v29  ;;  %v6845_v60 = vpop.f32.mrb[131].mxu1 }
 0x506   : > { %8298 = vst.msk [vmem:[%s12776_s23 + $0x468] sm:$0xf] %vm8015_vm0, %v9482_v17  ;;  %v9483_v37 = vpack.c.bf16 %v6844_v63, %v6844_v63 }
 0x508   : > { %8299 = vst.msk [vmem:[%s12776_s23 + $0x46c] sm:$0xf] %vm8015_vm0, %v9483_v37 }
 0x509   : > { %v6848_v56 = vpop.f32.mrb[132].mxu1 }
 0x50a   : > { %v6849_v59 = vadd.f32 %v6848_v56, %v4221_v0  ;;  %v6850_v35 = vpop.f32.mrb[133].mxu1 }
 0x50b   : > { %v6851_v5 = vpop.f32.mrb[134].mxu1 }
 0x50c   : > { %v9484_v23 = vpack.c.bf16 %v6849_v59, %v6849_v59  ;;  %v6852_v40 = vadd.f32 %v6851_v5, %v4226_v54  ;;  %v6853_v44 = vpop.f32.mrb[135].mxu1 }
 0x50e   : > { %8300 = vst.msk [vmem:[%s12776_s23 + $0x470] sm:$0xf] %vm8015_vm0, %v9484_v23  ;;  %v9485_v52 = vpack.c.bf16 %v6852_v40, %v6852_v40 }
 0x510   : > { %8301 = vst.msk [vmem:[%s12776_s23 + $0x474] sm:$0xf] %vm8015_vm0, %v9485_v52 }
 0x511   : > { %v6856_v24 = vpop.f32.mrb[136].mxu1 }
 0x512   : > { %v6857_v34 = vadd.f32 %v6856_v24, %v4231_v48  ;;  %v6858_v30 = vpop.f32.mrb[137].mxu1 }
 0x513   : > { %v6859_v25 = vpop.f32.mrb[138].mxu1 }
 0x514   : > { %v9486_v39 = vpack.c.bf16 %v6857_v34, %v6857_v34  ;;  %v6860_v27 = vadd.f32 %v6859_v25, %v4236_v15  ;;  %v6861_v12 = vpop.f32.mrb[139].mxu1 }
 0x516   : > { %8302 = vst.msk [vmem:[%s12776_s23 + $0x478] sm:$0xf] %vm8015_vm0, %v9486_v39  ;;  %v9487_v49 = vpack.c.bf16 %v6860_v27, %v6860_v27 }
 0x518   : > { %8303 = vst.msk [vmem:[%s12776_s23 + $0x47c] sm:$0xf] %vm8015_vm0, %v9487_v49 }
 0x519 PF: > { %s18_s26 = sadd.s32 1, %s10300_s26   ;;  %s14546_s24 = smov %s10296_s25 }
 0x51a   : > { %p15_p5 = scmp.ge.s32.totalorder %s18_s26, 4   ;;  %s14547_s25 = smov %s14549_s27 }
 0x51c   :  { %17 = sbr.rel (!%p15_p5) target bundleno = 2 (0x2), region = 86 }

</bundles_post_ra>
